<compile_context>
chip_gen: v5e
topology: v5e:2x2
jax: 0.10.0
libtpu: 0.0.40
codegen_flags: <defaults>
</compile_context>

<pallas_src>
import math

import jax
import jax.numpy as jnp
from jax.experimental import pallas as pl
from jax.experimental.pallas import tpu as pltpu


# -----------------------------------------------------------------------------
# Data consistency (image domain, as in the reference).
# `noise_lvl` is a *static Python scalar*; `if noise_lvl:` intentionally mirrors
# the reference's truthiness (None / 0.0 -> hard data-consistency branch).
# -----------------------------------------------------------------------------
def _data_consistency(k, k0, m, noise_lvl):
    if noise_lvl:
        v = noise_lvl
        return (1.0 - m) * k + m * (k + v * k0) / (1.0 + v)
    return (1.0 - m) * k + m * k0


# -----------------------------------------------------------------------------
# Fused per-stage kernel: [DC_in] -> RDN -> "+x" residual -> [DC_out]
# Feature slabs live in bf16 VMEM scratch laid out as (rows, EXT+Lp+EXT); the
# EXT-lane margins stay zero so 3x3 tap slices never read garbage.  The 1-pixel
# zero ring inside the Lp region is preserved by multiplying every conv output
# by `imask` (required invariant for the flattened im2col to be correct).
# -----------------------------------------------------------------------------
def _make_stage_kernel(*, D, C, G0, G, C0, Wp, Lp, EXT, n_convs,
                       noise_lvl, apply_dc_in, apply_dc_out):
    need_raw = apply_dc_in or apply_dc_out

    def kernel(*refs):
        refs = list(refs)
        x_ref = refs.pop(0)
        raw_ref = mask_ref = None
        if need_raw:
            raw_ref = refs.pop(0)
            mask_ref = refs.pop(0)
        imask_ref = refs.pop(0)
        wrefs = refs[:2 * n_convs]
        refs = refs[2 * n_convs:]
        rs_ref = refs.pop(0)
        nxt_ref = refs.pop(0) if apply_dc_out else None
        local_ref, sfe1_ref, rdb_ref = refs

        # ---- zero the halo margins of the tap-sliced slabs (every step: scratch
        #      is stale at entry; with a megacore-sharded batch axis a pid==0
        #      guard would not run on every core). rdb_ref is only read by 1x1
        #      convs (center only), so its margins never need zeroing. --------
        for ref in (local_ref, sfe1_ref):
            z = jnp.zeros((ref.shape[0], EXT), jnp.bfloat16)
            ref[:, 0:EXT] = z
            ref[:, EXT + Lp:EXT + Lp + EXT] = z

        imask = imask_ref[...]                    # (1, Lp) f32: 1 interior, 0 ring
        imask_cache = {}

        def imask_for(cout):                      # one broadcast per distinct width
            if cout not in imask_cache:
                imask_cache[cout] = jnp.broadcast_to(imask, (cout, Lp))
            return imask_cache[cout]

        def write_slab(dst_ref, r0, val_f32):     # activations stored as bf16
            rows = val_f32.shape[0]
            dst_ref[r0:r0 + rows, EXT:EXT + Lp] = val_f32.astype(jnp.bfloat16)

        widx = [0]

        def conv(src_ref, cin, *, k3, relu=False):
            """'SAME' conv reading rows [0:cin] of a margin-layout bf16 slab."""
            i = widx[0]
            widx[0] += 1
            w_ref, b_ref = wrefs[2 * i], wrefs[2 * i + 1]
            if k3:
                offs = [(kh - 1) * Wp + (kw - 1)
                        for kh in range(3) for kw in range(3)]
                src = src_ref[0:cin, :]                      # (cin, Le) bf16, 1 load
                if w_ref.ndim == 3:
                    # Per-tap accumulating MXU dots; no materialized im2col.
                    cout = w_ref.shape[1]
                    acc = None
                    for t, o in enumerate(offs):
                        tap = src[:, EXT + o:EXT + o + Lp]   # (cin, Lp) bf16
                        d = jnp.dot(w_ref[t], tap,
                                    preferred_element_type=jnp.float32)
                        acc = d if acc is None else acc + d
                else:
                    # Tiny-Cin conv (e.g. the first SFE conv): stack the few
                    # tap rows and do one dot (K = 9*cin).
                    cout = w_ref.shape[0]
                    taps = [src[:, EXT + o:EXT + o + Lp].astype(jnp.float32)
                            for o in offs]
                    rhs = jnp.concatenate(taps, axis=0).astype(jnp.bfloat16)
                    acc = jnp.dot(w_ref[...], rhs,
                                  preferred_element_type=jnp.float32)
            else:                                            # 1x1 conv: center only
                cout = w_ref.shape[0]
                rhs = src_ref[0:cin, EXT:EXT + Lp]           # aligned (cin, Lp)
                acc = jnp.dot(w_ref[...], rhs,
                              preferred_element_type=jnp.float32)
            acc = acc + b_ref[...]
            if relu:
                acc = jnp.maximum(acc, 0.0)
            return acc * imask_for(cout)     # keep zero ring / dead lanes exact

        # ---- stage input (+ leading data consistency) ------------------------
        x_in = x_ref[0].astype(jnp.float32)                  # (C0, Lp)
        if apply_dc_in:
            x_in = _data_consistency(x_in, raw_ref[0].astype(jnp.float32),
                                     mask_ref[0].astype(jnp.float32), noise_lvl)

        # ---- RDN backbone (all intermediates live in VMEM scratch) -----------
        write_slab(local_ref, 0, x_in)
        sfe1 = conv(local_ref, C0, k3=True)                  # (G0, Lp)
        write_slab(sfe1_ref, 0, sfe1)
        sfe2 = conv(sfe1_ref, G0, k3=True)
        write_slab(local_ref, 0, sfe2)                       # block_in of RDB 0
        for d in range(D):
            for j in range(C):
                cin = G0 + j * G
                out = conv(local_ref, cin, k3=True, relu=True)   # (G, Lp)
                write_slab(local_ref, cin, out)                  # in-place growth
            lff = conv(local_ref, G0 + C * G, k3=False)          # 1x1 LFF
            block_in = local_ref[0:G0, EXT:EXT + Lp].astype(jnp.float32)
            feat = lff + block_in                                # local residual
            write_slab(rdb_ref, d * G0, feat)                    # in-place "concat"
            if d + 1 < D:
                write_slab(local_ref, 0, feat)                   # next block_in
        gff = conv(rdb_ref, D * G0, k3=False)                    # 1x1 GFF
        write_slab(local_ref, 0, gff)
        gff = conv(local_ref, G0, k3=True)                       # 3x3 GFF
        feat = gff + sfe1_ref[0:G0, EXT:EXT + Lp].astype(jnp.float32)
        write_slab(local_ref, 0, feat)
        out = conv(local_ref, G0, k3=True)                       # -> (C0, Lp)

        # ---- "+x" residual refinement + trailing data consistency ------------
        y = out + x_in
        rs_ref[0] = y.astype(rs_ref.dtype)
        if apply_dc_out:
            nxt = _data_consistency(y, raw_ref[0].astype(jnp.float32),
                                    mask_ref[0].astype(jnp.float32), noise_lvl)
            nxt_ref[0] = nxt.astype(nxt_ref.dtype)

    return kernel


# -----------------------------------------------------------------------------
# pallas_call wrapper for one refinement stage
# -----------------------------------------------------------------------------
def stage_forward(convs, x_p, raw_p, mask_p, imask, *, D, C, G0, G, Wp, Lp, EXT,
                  noise_lvl, apply_dc_in, apply_dc_out):
    N, C0, _ = x_p.shape
    n_convs = len(convs)
    flat = [a for pair in convs for a in pair]
    need_raw = apply_dc_in or apply_dc_out

    act_spec = pl.BlockSpec((1, C0, Lp), lambda n: (n, 0, 0))
    imask_spec = pl.BlockSpec((1, Lp), lambda n: (0, 0))

    def const_spec(a):                       # weights / biases stay resident
        return pl.BlockSpec(a.shape, lambda n, _nd=a.ndim: (0,) * _nd)

    inputs = [x_p] + ([raw_p, mask_p] if need_raw else []) + [imask] + flat
    in_specs = ([act_spec] + ([act_spec, act_spec] if need_raw else [])
                + [imask_spec] + [const_spec(a) for a in flat])

    sds = jax.ShapeDtypeStruct((N, C0, Lp), jnp.float32)
    if apply_dc_out:
        out_shape = (sds, sds)
        out_specs = (act_spec, act_spec)
    else:                                    # discarded DC output is not computed
        out_shape = sds
        out_specs = act_spec

    Le = EXT + Lp + EXT
    scratch_shapes = [
        pltpu.VMEM((G0 + C * G, Le), jnp.bfloat16),   # dense-block local buffer
        pltpu.VMEM((G0, Le), jnp.bfloat16),           # sfe1 (global residual)
        pltpu.VMEM((D * G0, Le), jnp.bfloat16),       # RDB outputs ("concat")
    ]

    kernel = _make_stage_kernel(D=D, C=C, G0=G0, G=G, C0=C0, Wp=Wp, Lp=Lp,
                                EXT=EXT, n_convs=n_convs, noise_lvl=noise_lvl,
                                apply_dc_in=apply_dc_in,
                                apply_dc_out=apply_dc_out)
    return pl.pallas_call(
        kernel,
        out_shape=out_shape,
        grid=(N,),
        in_specs=in_specs,
        out_specs=out_specs,
        scratch_shapes=scratch_shapes,
        compiler_params=pltpu.CompilerParams(
            dimension_semantics=("parallel",),
            vmem_limit_bytes=64 * 1024 * 1024),
    )(*inputs)


# -----------------------------------------------------------------------------
# Parameter construction (deterministic, synthetic)
# -----------------------------------------------------------------------------
def _init_conv(key, k, cin, cout):
    kw_, kb = jax.random.split(key)
    w = jax.random.normal(kw_, (k, k, cin, cout), jnp.float32)
    w = w * (1.0 / math.sqrt(k * k * cin))
    b = 0.1 * jax.random.normal(kb, (cout, 1), jnp.float32)
    if k == 3 and cin >= 16:
        # Per-tap layout (9, Cout, Cin) for the accumulating-dot path.
        wf = jnp.transpose(w, (0, 1, 3, 2)).reshape(k * k, cout, cin)
    else:
        # Packed (Cout, K*K*Cin) in (kh, kw, cin) order for the single-dot path.
        wf = jnp.transpose(w, (3, 0, 1, 2)).reshape(cout, k * k * cin)
    return (wf.astype(jnp.bfloat16), b)


def init_rdn_params(key, num_channels, G0, D, C, G):
    n_convs = 2 + D * (C + 1) + 3
    ki = iter(jax.random.split(key, n_convs))
    convs = [_init_conv(next(ki), 3, num_channels, G0),      # SFE1
             _init_conv(next(ki), 3, G0, G0)]                # SFE2
    for _ in range(D):
        cin = G0
        for _ in range(C):
            convs.append(_init_conv(next(ki), 3, cin, G))
            cin += G
        convs.append(_init_conv(next(ki), 1, cin, G0))       # 1x1 LFF
    convs.append(_init_conv(next(ki), 1, D * G0, G0))        # 1x1 GFF
    convs.append(_init_conv(next(ki), 3, G0, G0))            # 3x3 GFF
    convs.append(_init_conv(next(ki), 3, G0, num_channels))  # output conv
    return convs


# -----------------------------------------------------------------------------
# Full module forward (NCHW, like the PyTorch reference)
# -----------------------------------------------------------------------------
def rdn_habs_m2_dcs_forward(rdn_params_list, lr, mask, *, G0, D, C, G,
                            dc=True, noise_lvl=None):
    """lr, mask: (N, num_channels, H, W).  Returns list of (N, C0, H, W)."""
    N, C0, H, W = lr.shape
    Hp, Wp = H + 2, W + 2
    L = Hp * Wp
    Lp = ((L + 127) // 128) * 128                 # lane-dense slab width
    EXT = ((Wp + 1 + 127) // 128) * 128           # halo margin (>= Wp+1, aligned)

    def pad_flat(a):   # (N,C0,H,W) -> (N,C0,Lp): zero ring + zero dead lanes
        a = jnp.pad(a, ((0, 0), (0, 0), (1, 1), (1, 1))).reshape(N, C0, L)
        return jnp.pad(a, ((0, 0), (0, 0), (0, Lp - L)))

    x_p = pad_flat(lr)
    raw_p = x_p                                   # data.LR_raw = data.LR.clone()
    mask_p = pad_flat(mask)
    imask = jnp.pad(jnp.pad(jnp.ones((H, W), jnp.float32),
                            ((1, 1), (1, 1))).reshape(1, L),
                    ((0, 0), (0, Lp - L)))

    rs = []
    n = len(rdn_params_list)
    for i, convs in enumerate(rdn_params_list):
        apply_dc_in = (i == 0)
        apply_dc_out = bool(dc) and (i != n - 1)
        res = stage_forward(convs, x_p, raw_p, mask_p, imask,
                            D=D, C=C, G0=G0, G=G, Wp=Wp, Lp=Lp, EXT=EXT,
                            noise_lvl=noise_lvl, apply_dc_in=apply_dc_in,
                            apply_dc_out=apply_dc_out)
        if apply_dc_out:
            y_p, x_p = res
        else:
            y_p = res
            x_p = y_p
        rs.append(y_p[:, :, :L].reshape(N, C0, Hp, Wp)[:, :, 1:H + 1, 1:W + 1])
    return rs


# -----------------------------------------------------------------------------
# Pure-JAX reference (for correctness check in the demo)
# -----------------------------------------------------------------------------
def _unpack_w(wf, k):
    w = wf.astype(jnp.float32)
    if w.ndim == 3:                                  # (k*k, cout, cin)
        cout, cin = w.shape[1], w.shape[2]
        return w.reshape(k, k, cout, cin).transpose(0, 1, 3, 2)      # HWIO
    cout = w.shape[0]
    cin = w.shape[1] // (k * k)
    return w.reshape(cout, k, k, cin).transpose(1, 2, 3, 0)          # HWIO


def _conv_ref(x, wb, k, relu=False):
    wf, b = wb
    y = jax.lax.conv_general_dilated(
        x, _unpack_w(wf, k), (1, 1), 'SAME',
        dimension_numbers=('NCHW', 'HWIO', 'NCHW'),
        precision=jax.lax.Precision.HIGHEST)
    y = y + b.astype(jnp.float32).reshape(1, -1, 1, 1)
    return jnp.maximum(y, 0.0) if relu else y


def _rdn_ref(convs, x, D, C):
    it = iter(convs)
    sfe1 = _conv_ref(x, next(it), 3)
    sfe2 = _conv_ref(sfe1, next(it), 3)
    feat = sfe2
    outs = []
    for _ in range(D):
        block_in = feat
        local = block_in
        for _ in range(C):
            o = _conv_ref(local, next(it), 3, relu=True)
            local = jnp.concatenate([local, o], axis=1)
        feat = _conv_ref(local, next(it), 1) + block_in
        outs.append(feat)
    g = _conv_ref(jnp.concatenate(outs, axis=1), next(it), 1)
    g = _conv_ref(g, next(it), 3)
    return _conv_ref(g + sfe1, next(it), 3)


def forward_ref(params_list, lr, mask, *, D, C, dc=True, noise_lvl=None):
    raw = lr
    x = _data_consistency(lr, raw, mask, noise_lvl)
    rs = []
    n = len(params_list)
    for i, convs in enumerate(params_list):
        x = _rdn_ref(convs, x, D, C) + x
        rs.append(x)
        if dc and i != n - 1:
            x = _data_consistency(x, raw, mask, noise_lvl)
    return rs


# -----------------------------------------------------------------------------
# Demo
# -----------------------------------------------------------------------------
if __name__ == "__main__":
    # Module defaults scaled down for a quick run.
    Clayers = 2
    num_channels = 1
    G0, D, C, G = 16, 2, 2, 16        # num_features, num_blocks, num_layers, growth
    N, H, W = 2, 16, 16

    key = jax.random.PRNGKey(0)
    k_lr, k_mask, k_params = jax.random.split(key, 3)
    lr = jax.random.normal(k_lr, (N, num_channels, H, W), jnp.float32)
    mask = (jax.random.uniform(k_mask, (N, num_channels, H, W)) > 0.5
            ).astype(jnp.float32)

    pkeys = jax.random.split(k_params, Clayers)
    params_list = [init_rdn_params(pkeys[i], num_channels, G0, D, C, G)
                   for i in range(Clayers)]

    rs = rdn_habs_m2_dcs_forward(params_list, lr, mask, G0=G0, D=D, C=C, G=G)
    rs = [jax.block_until_ready(r) for r in rs]

    # Correctness check against a pure-JAX f32 reference (kernel uses bf16
    # matmul operands and bf16 activation storage -> ~1e-2 relative error).
    rs_ref = forward_ref(params_list, lr, mask, D=D, C=C)
    assert len(rs) == Clayers
    for got, want in zip(rs, rs_ref):
        assert got.shape == (N, num_channels, H, W)
        assert bool(jnp.all(jnp.isfinite(got)))
        rel = float(jnp.linalg.norm(got - want) /
                    (jnp.linalg.norm(want) + 1e-8))
        assert rel < 3e-2, f"relative L2 error too large: {rel}"
    print("KERNEL_OK")
</pallas_src>

<mosaic_0001>
module attributes {stable_mosaic.version = 11 : i64} {
  func.func @kernel(%arg0: i32, %arg1: memref<1x1x384xf32, #tpu.memory_space<vmem>>, %arg2: memref<1x1x384xf32, #tpu.memory_space<vmem>>, %arg3: memref<1x1x384xf32, #tpu.memory_space<vmem>>, %arg4: memref<1x384xf32, #tpu.memory_space<vmem>>, %arg5: memref<16x9xbf16, #tpu.memory_space<vmem>>, %arg6: memref<16x1xf32, #tpu.memory_space<vmem>>, %arg7: memref<9x16x16xbf16, #tpu.memory_space<vmem>>, %arg8: memref<16x1xf32, #tpu.memory_space<vmem>>, %arg9: memref<9x16x16xbf16, #tpu.memory_space<vmem>>, %arg10: memref<16x1xf32, #tpu.memory_space<vmem>>, %arg11: memref<9x16x32xbf16, #tpu.memory_space<vmem>>, %arg12: memref<16x1xf32, #tpu.memory_space<vmem>>, %arg13: memref<16x48xbf16, #tpu.memory_space<vmem>>, %arg14: memref<16x1xf32, #tpu.memory_space<vmem>>, %arg15: memref<9x16x16xbf16, #tpu.memory_space<vmem>>, %arg16: memref<16x1xf32, #tpu.memory_space<vmem>>, %arg17: memref<9x16x32xbf16, #tpu.memory_space<vmem>>, %arg18: memref<16x1xf32, #tpu.memory_space<vmem>>, %arg19: memref<16x48xbf16, #tpu.memory_space<vmem>>, %arg20: memref<16x1xf32, #tpu.memory_space<vmem>>, %arg21: memref<16x32xbf16, #tpu.memory_space<vmem>>, %arg22: memref<16x1xf32, #tpu.memory_space<vmem>>, %arg23: memref<9x16x16xbf16, #tpu.memory_space<vmem>>, %arg24: memref<16x1xf32, #tpu.memory_space<vmem>>, %arg25: memref<9x1x16xbf16, #tpu.memory_space<vmem>>, %arg26: memref<1x1xf32, #tpu.memory_space<vmem>>, %arg27: memref<1x1x384xf32, #tpu.memory_space<vmem>>, %arg28: memref<1x1x384xf32, #tpu.memory_space<vmem>>, %arg29: memref<48x640xbf16, #tpu.memory_space<vmem>>, %arg30: memref<16x640xbf16, #tpu.memory_space<vmem>>, %arg31: memref<32x640xbf16, #tpu.memory_space<vmem>>) attributes {dimension_semantics = [#tpu.dimension_semantics<parallel>], iteration_bounds = array<i64: 2>, scalar_prefetch = 0 : i64, scratch_operands = 3 : i64, tpu.core_type = #tpu.core_type<tc>, window_params = [{transform_indices = @transform_0, window_bounds = array<i64: 1, 1, 384>}, {transform_indices = @transform_1, window_bounds = array<i64: 1, 1, 384>}, {transform_indices = @transform_2, window_bounds = array<i64: 1, 1, 384>}, {pipeline_mode = #tpu.pipeline_mode<synchronous>, transform_indices = @transform_3, window_bounds = array<i64: 1, 384>}, {pipeline_mode = #tpu.pipeline_mode<synchronous>, transform_indices = @transform_4, window_bounds = array<i64: 16, 9>}, {pipeline_mode = #tpu.pipeline_mode<synchronous>, transform_indices = @transform_5, window_bounds = array<i64: 16, 1>}, {pipeline_mode = #tpu.pipeline_mode<synchronous>, transform_indices = @transform_6, window_bounds = array<i64: 9, 16, 16>}, {pipeline_mode = #tpu.pipeline_mode<synchronous>, transform_indices = @transform_7, window_bounds = array<i64: 16, 1>}, {pipeline_mode = #tpu.pipeline_mode<synchronous>, transform_indices = @transform_8, window_bounds = array<i64: 9, 16, 16>}, {pipeline_mode = #tpu.pipeline_mode<synchronous>, transform_indices = @transform_9, window_bounds = array<i64: 16, 1>}, {pipeline_mode = #tpu.pipeline_mode<synchronous>, transform_indices = @transform_10, window_bounds = array<i64: 9, 16, 32>}, {pipeline_mode = #tpu.pipeline_mode<synchronous>, transform_indices = @transform_11, window_bounds = array<i64: 16, 1>}, {pipeline_mode = #tpu.pipeline_mode<synchronous>, transform_indices = @transform_12, window_bounds = array<i64: 16, 48>}, {pipeline_mode = #tpu.pipeline_mode<synchronous>, transform_indices = @transform_13, window_bounds = array<i64: 16, 1>}, {pipeline_mode = #tpu.pipeline_mode<synchronous>, transform_indices = @transform_14, window_bounds = array<i64: 9, 16, 16>}, {pipeline_mode = #tpu.pipeline_mode<synchronous>, transform_indices = @transform_15, window_bounds = array<i64: 16, 1>}, {pipeline_mode = #tpu.pipeline_mode<synchronous>, transform_indices = @transform_16, window_bounds = array<i64: 9, 16, 32>}, {pipeline_mode = #tpu.pipeline_mode<synchronous>, transform_indices = @transform_17, window_bounds = array<i64: 16, 1>}, {pipeline_mode = #tpu.pipeline_mode<synchronous>, transform_indices = @transform_18, window_bounds = array<i64: 16, 48>}, {pipeline_mode = #tpu.pipeline_mode<synchronous>, transform_indices = @transform_19, window_bounds = array<i64: 16, 1>}, {pipeline_mode = #tpu.pipeline_mode<synchronous>, transform_indices = @transform_20, window_bounds = array<i64: 16, 32>}, {pipeline_mode = #tpu.pipeline_mode<synchronous>, transform_indices = @transform_21, window_bounds = array<i64: 16, 1>}, {pipeline_mode = #tpu.pipeline_mode<synchronous>, transform_indices = @transform_22, window_bounds = array<i64: 9, 16, 16>}, {pipeline_mode = #tpu.pipeline_mode<synchronous>, transform_indices = @transform_23, window_bounds = array<i64: 16, 1>}, {pipeline_mode = #tpu.pipeline_mode<synchronous>, transform_indices = @transform_24, window_bounds = array<i64: 9, 1, 16>}, {pipeline_mode = #tpu.pipeline_mode<synchronous>, transform_indices = @transform_25, window_bounds = array<i64: 1, 1>}, {transform_indices = @transform_26, window_bounds = array<i64: 1, 1, 384>}, {transform_indices = @transform_27, window_bounds = array<i64: 1, 1, 384>}]} {
    %cst = arith.constant 0.000000e+00 : bf16
    %0 = vector.broadcast %cst : bf16 to vector<48x128xbf16>
    %c0 = arith.constant 0 : index
    %c0_0 = arith.constant 0 : index
    %1 = vector.load %arg29[%c0, %c0_0] : memref<48x640xbf16, #tpu.memory_space<vmem>>, vector<48x128xbf16>
    tpu.vector_store %arg29[%c0, %c0_0], %0 {strides = array<i32>} : memref<48x640xbf16, #tpu.memory_space<vmem>>, vector<48x128xbf16>,
    %c0_1 = arith.constant 0 : index
    %c512 = arith.constant 512 : index
    %2 = vector.load %arg29[%c0_1, %c512] : memref<48x640xbf16, #tpu.memory_space<vmem>>, vector<48x128xbf16>
    tpu.vector_store %arg29[%c0_1, %c512], %0 {strides = array<i32>} : memref<48x640xbf16, #tpu.memory_space<vmem>>, vector<48x128xbf16>,
    %cst_2 = arith.constant 0.000000e+00 : bf16
    %3 = vector.broadcast %cst_2 : bf16 to vector<16x128xbf16>
    %c0_3 = arith.constant 0 : index
    %c0_4 = arith.constant 0 : index
    %4 = vector.load %arg30[%c0_3, %c0_4] : memref<16x640xbf16, #tpu.memory_space<vmem>>, vector<16x128xbf16>
    tpu.vector_store %arg30[%c0_3, %c0_4], %3 {strides = array<i32>} : memref<16x640xbf16, #tpu.memory_space<vmem>>, vector<16x128xbf16>,
    %c0_5 = arith.constant 0 : index
    %c512_6 = arith.constant 512 : index
    %5 = vector.load %arg30[%c0_5, %c512_6] : memref<16x640xbf16, #tpu.memory_space<vmem>>, vector<16x128xbf16>
    tpu.vector_store %arg30[%c0_5, %c512_6], %3 {strides = array<i32>} : memref<16x640xbf16, #tpu.memory_space<vmem>>, vector<16x128xbf16>,
    %c0_7 = arith.constant 0 : index
    %c0_8 = arith.constant 0 : index
    %6 = vector.load %arg4[%c0_7, %c0_8] : memref<1x384xf32, #tpu.memory_space<vmem>>, vector<1x384xf32>
    %c0_9 = arith.constant 0 : index
    %c0_10 = arith.constant 0 : index
    %c0_11 = arith.constant 0 : index
    %7 = vector.load %arg1[%c0_9, %c0_10, %c0_11] : memref<1x1x384xf32, #tpu.memory_space<vmem>>, vector<1x1x384xf32>
    %8 = vector.shape_cast %7 : vector<1x1x384xf32> to vector<1x384xf32>
    %c0_12 = arith.constant 0 : index
    %c0_13 = arith.constant 0 : index
    %c0_14 = arith.constant 0 : index
    %9 = vector.load %arg2[%c0_12, %c0_13, %c0_14] : memref<1x1x384xf32, #tpu.memory_space<vmem>>, vector<1x1x384xf32>
    %10 = vector.shape_cast %9 : vector<1x1x384xf32> to vector<1x384xf32>
    %c0_15 = arith.constant 0 : index
    %c0_16 = arith.constant 0 : index
    %c0_17 = arith.constant 0 : index
    %11 = vector.load %arg3[%c0_15, %c0_16, %c0_17] : memref<1x1x384xf32, #tpu.memory_space<vmem>>, vector<1x1x384xf32>
    %12 = vector.shape_cast %11 : vector<1x1x384xf32> to vector<1x384xf32>
    %cst_18 = arith.constant 1.000000e+00 : f32
    %13 = vector.broadcast %cst_18 : f32 to vector<1x384xf32>
    %14 = arith.subf %13, %12 : vector<1x384xf32>
    %15 = arith.mulf %14, %8 : vector<1x384xf32>
    %16 = arith.mulf %12, %10 : vector<1x384xf32>
    %17 = arith.addf %15, %16 : vector<1x384xf32>
    %18 = arith.truncf %17 : vector<1x384xf32> to vector<1x384xbf16>
    %c0_19 = arith.constant 0 : index
    %c128 = arith.constant 128 : index
    %19 = vector.load %arg29[%c0_19, %c128] : memref<48x640xbf16, #tpu.memory_space<vmem>>, vector<1x384xbf16>
    tpu.vector_store %arg29[%c0_19, %c128], %18 {strides = array<i32>} : memref<48x640xbf16, #tpu.memory_space<vmem>>, vector<1x384xbf16>,
    %c0_20 = arith.constant 0 : index
    %c0_21 = arith.constant 0 : index
    %20 = vector.load %arg29[%c0_20, %c0_21] : memref<48x640xbf16, #tpu.memory_space<vmem>>, vector<1x640xbf16>
    %21 = vector.extract_strided_slice %20 {offsets = [0, 109], sizes = [1, 384], strides = [1, 1]} : vector<1x640xbf16> to vector<1x384xbf16>
    %22 = arith.extf %21 : vector<1x384xbf16> to vector<1x384xf32>
    %23 = vector.extract_strided_slice %20 {offsets = [0, 110], sizes = [1, 384], strides = [1, 1]} : vector<1x640xbf16> to vector<1x384xbf16>
    %24 = arith.extf %23 : vector<1x384xbf16> to vector<1x384xf32>
    %25 = vector.extract_strided_slice %20 {offsets = [0, 111], sizes = [1, 384], strides = [1, 1]} : vector<1x640xbf16> to vector<1x384xbf16>
    %26 = arith.extf %25 : vector<1x384xbf16> to vector<1x384xf32>
    %27 = vector.extract_strided_slice %20 {offsets = [0, 127], sizes = [1, 384], strides = [1, 1]} : vector<1x640xbf16> to vector<1x384xbf16>
    %28 = arith.extf %27 : vector<1x384xbf16> to vector<1x384xf32>
    %29 = vector.extract_strided_slice %20 {offsets = [0, 128], sizes = [1, 384], strides = [1, 1]} : vector<1x640xbf16> to vector<1x384xbf16>
    %30 = arith.extf %29 : vector<1x384xbf16> to vector<1x384xf32>
    %31 = vector.extract_strided_slice %20 {offsets = [0, 129], sizes = [1, 384], strides = [1, 1]} : vector<1x640xbf16> to vector<1x384xbf16>
    %32 = arith.extf %31 : vector<1x384xbf16> to vector<1x384xf32>
    %33 = vector.extract_strided_slice %20 {offsets = [0, 145], sizes = [1, 384], strides = [1, 1]} : vector<1x640xbf16> to vector<1x384xbf16>
    %34 = arith.extf %33 : vector<1x384xbf16> to vector<1x384xf32>
    %35 = vector.extract_strided_slice %20 {offsets = [0, 146], sizes = [1, 384], strides = [1, 1]} : vector<1x640xbf16> to vector<1x384xbf16>
    %36 = arith.extf %35 : vector<1x384xbf16> to vector<1x384xf32>
    %37 = vector.extract_strided_slice %20 {offsets = [0, 147], sizes = [1, 384], strides = [1, 1]} : vector<1x640xbf16> to vector<1x384xbf16>
    %38 = arith.extf %37 : vector<1x384xbf16> to vector<1x384xf32>
    %39 = tpu.concatenate %22, %24, %26, %28, %30, %32, %34, %36, %38 in 0 : vector<1x384xf32>, vector<1x384xf32>, vector<1x384xf32>, vector<1x384xf32>, vector<1x384xf32>, vector<1x384xf32>, vector<1x384xf32>, vector<1x384xf32>, vector<1x384xf32> -> vector<9x384xf32>
    %40 = arith.truncf %39 : vector<9x384xf32> to vector<9x384xbf16>
    %c0_22 = arith.constant 0 : index
    %c0_23 = arith.constant 0 : index
    %41 = vector.load %arg5[%c0_22, %c0_23] : memref<16x9xbf16, #tpu.memory_space<vmem>>, vector<16x9xbf16>
    %cst_24 = arith.constant dense<0.000000e+00> : vector<16x384xf32>
    %42 = tpu.matmul %41, %40, %cst_24 {dimension_numbers = #tpu.dot_dimension_numbers<[1], [0], [0], [1], [0, 0, 1, 1], [], []>} : vector<16x9xbf16>, vector<9x384xbf16>, vector<16x384xf32> -> vector<16x384xf32>
    %c0_25 = arith.constant 0 : index
    %c0_26 = arith.constant 0 : index
    %43 = vector.load %arg6[%c0_25, %c0_26] : memref<16x1xf32, #tpu.memory_space<vmem>>, vector<16x1xf32>
    %44 = vector.broadcast %43 : vector<16x1xf32> to vector<16x384xf32>
    %45 = arith.addf %42, %44 : vector<16x384xf32>
    %46 = vector.shape_cast %6 : vector<1x384xf32> to vector<1x384xf32>
    %47 = vector.broadcast %46 : vector<1x384xf32> to vector<16x384xf32>
    %48 = arith.mulf %45, %47 : vector<16x384xf32>
    %49 = arith.truncf %48 : vector<16x384xf32> to vector<16x384xbf16>
    %c0_27 = arith.constant 0 : index
    %c128_28 = arith.constant 128 : index
    %50 = vector.load %arg30[%c0_27, %c128_28] : memref<16x640xbf16, #tpu.memory_space<vmem>>, vector<16x384xbf16>
    tpu.vector_store %arg30[%c0_27, %c128_28], %49 {strides = array<i32>} : memref<16x640xbf16, #tpu.memory_space<vmem>>, vector<16x384xbf16>,
    %c0_29 = arith.constant 0 : index
    %c0_30 = arith.constant 0 : index
    %51 = vector.load %arg30[%c0_29, %c0_30] : memref<16x640xbf16, #tpu.memory_space<vmem>>, vector<16x640xbf16>
    %52 = vector.extract_strided_slice %51 {offsets = [0, 109], sizes = [16, 384], strides = [1, 1]} : vector<16x640xbf16> to vector<16x384xbf16>
    %c0_31 = arith.constant 0 : index
    %c0_32 = arith.constant 0 : index
    %c0_33 = arith.constant 0 : index
    %53 = vector.load %arg7[%c0_31, %c0_32, %c0_33] : memref<9x16x16xbf16, #tpu.memory_space<vmem>>, vector<1x16x16xbf16>
    %54 = vector.shape_cast %53 : vector<1x16x16xbf16> to vector<16x16xbf16>
    %cst_34 = arith.constant dense<0.000000e+00> : vector<16x384xf32>
    %55 = tpu.matmul %54, %52, %cst_34 {dimension_numbers = #tpu.dot_dimension_numbers<[1], [0], [0], [1], [0, 0, 1, 1], [], []>} : vector<16x16xbf16>, vector<16x384xbf16>, vector<16x384xf32> -> vector<16x384xf32>
    %56 = vector.extract_strided_slice %51 {offsets = [0, 110], sizes = [16, 384], strides = [1, 1]} : vector<16x640xbf16> to vector<16x384xbf16>
    %c1 = arith.constant 1 : index
    %c0_35 = arith.constant 0 : index
    %c0_36 = arith.constant 0 : index
    %57 = vector.load %arg7[%c1, %c0_35, %c0_36] : memref<9x16x16xbf16, #tpu.memory_space<vmem>>, vector<1x16x16xbf16>
    %58 = vector.shape_cast %57 : vector<1x16x16xbf16> to vector<16x16xbf16>
    %cst_37 = arith.constant dense<0.000000e+00> : vector<16x384xf32>
    %59 = tpu.matmul %58, %56, %cst_37 {dimension_numbers = #tpu.dot_dimension_numbers<[1], [0], [0], [1], [0, 0, 1, 1], [], []>} : vector<16x16xbf16>, vector<16x384xbf16>, vector<16x384xf32> -> vector<16x384xf32>
    %60 = arith.addf %55, %59 : vector<16x384xf32>
    %61 = vector.extract_strided_slice %51 {offsets = [0, 111], sizes = [16, 384], strides = [1, 1]} : vector<16x640xbf16> to vector<16x384xbf16>
    %c2 = arith.constant 2 : index
    %c0_38 = arith.constant 0 : index
    %c0_39 = arith.constant 0 : index
    %62 = vector.load %arg7[%c2, %c0_38, %c0_39] : memref<9x16x16xbf16, #tpu.memory_space<vmem>>, vector<1x16x16xbf16>
    %63 = vector.shape_cast %62 : vector<1x16x16xbf16> to vector<16x16xbf16>
    %cst_40 = arith.constant dense<0.000000e+00> : vector<16x384xf32>
    %64 = tpu.matmul %63, %61, %cst_40 {dimension_numbers = #tpu.dot_dimension_numbers<[1], [0], [0], [1], [0, 0, 1, 1], [], []>} : vector<16x16xbf16>, vector<16x384xbf16>, vector<16x384xf32> -> vector<16x384xf32>
    %65 = arith.addf %60, %64 : vector<16x384xf32>
    %66 = vector.extract_strided_slice %51 {offsets = [0, 127], sizes = [16, 384], strides = [1, 1]} : vector<16x640xbf16> to vector<16x384xbf16>
    %c3 = arith.constant 3 : index
    %c0_41 = arith.constant 0 : index
    %c0_42 = arith.constant 0 : index
    %67 = vector.load %arg7[%c3, %c0_41, %c0_42] : memref<9x16x16xbf16, #tpu.memory_space<vmem>>, vector<1x16x16xbf16>
    %68 = vector.shape_cast %67 : vector<1x16x16xbf16> to vector<16x16xbf16>
    %cst_43 = arith.constant dense<0.000000e+00> : vector<16x384xf32>
    %69 = tpu.matmul %68, %66, %cst_43 {dimension_numbers = #tpu.dot_dimension_numbers<[1], [0], [0], [1], [0, 0, 1, 1], [], []>} : vector<16x16xbf16>, vector<16x384xbf16>, vector<16x384xf32> -> vector<16x384xf32>
    %70 = arith.addf %65, %69 : vector<16x384xf32>
    %71 = vector.extract_strided_slice %51 {offsets = [0, 128], sizes = [16, 384], strides = [1, 1]} : vector<16x640xbf16> to vector<16x384xbf16>
    %c4 = arith.constant 4 : index
    %c0_44 = arith.constant 0 : index
    %c0_45 = arith.constant 0 : index
    %72 = vector.load %arg7[%c4, %c0_44, %c0_45] : memref<9x16x16xbf16, #tpu.memory_space<vmem>>, vector<1x16x16xbf16>
    %73 = vector.shape_cast %72 : vector<1x16x16xbf16> to vector<16x16xbf16>
    %cst_46 = arith.constant dense<0.000000e+00> : vector<16x384xf32>
    %74 = tpu.matmul %73, %71, %cst_46 {dimension_numbers = #tpu.dot_dimension_numbers<[1], [0], [0], [1], [0, 0, 1, 1], [], []>} : vector<16x16xbf16>, vector<16x384xbf16>, vector<16x384xf32> -> vector<16x384xf32>
    %75 = arith.addf %70, %74 : vector<16x384xf32>
    %76 = vector.extract_strided_slice %51 {offsets = [0, 129], sizes = [16, 384], strides = [1, 1]} : vector<16x640xbf16> to vector<16x384xbf16>
    %c5 = arith.constant 5 : index
    %c0_47 = arith.constant 0 : index
    %c0_48 = arith.constant 0 : index
    %77 = vector.load %arg7[%c5, %c0_47, %c0_48] : memref<9x16x16xbf16, #tpu.memory_space<vmem>>, vector<1x16x16xbf16>
    %78 = vector.shape_cast %77 : vector<1x16x16xbf16> to vector<16x16xbf16>
    %cst_49 = arith.constant dense<0.000000e+00> : vector<16x384xf32>
    %79 = tpu.matmul %78, %76, %cst_49 {dimension_numbers = #tpu.dot_dimension_numbers<[1], [0], [0], [1], [0, 0, 1, 1], [], []>} : vector<16x16xbf16>, vector<16x384xbf16>, vector<16x384xf32> -> vector<16x384xf32>
    %80 = arith.addf %75, %79 : vector<16x384xf32>
    %81 = vector.extract_strided_slice %51 {offsets = [0, 145], sizes = [16, 384], strides = [1, 1]} : vector<16x640xbf16> to vector<16x384xbf16>
    %c6 = arith.constant 6 : index
    %c0_50 = arith.constant 0 : index
    %c0_51 = arith.constant 0 : index
    %82 = vector.load %arg7[%c6, %c0_50, %c0_51] : memref<9x16x16xbf16, #tpu.memory_space<vmem>>, vector<1x16x16xbf16>
    %83 = vector.shape_cast %82 : vector<1x16x16xbf16> to vector<16x16xbf16>
    %cst_52 = arith.constant dense<0.000000e+00> : vector<16x384xf32>
    %84 = tpu.matmul %83, %81, %cst_52 {dimension_numbers = #tpu.dot_dimension_numbers<[1], [0], [0], [1], [0, 0, 1, 1], [], []>} : vector<16x16xbf16>, vector<16x384xbf16>, vector<16x384xf32> -> vector<16x384xf32>
    %85 = arith.addf %80, %84 : vector<16x384xf32>
    %86 = vector.extract_strided_slice %51 {offsets = [0, 146], sizes = [16, 384], strides = [1, 1]} : vector<16x640xbf16> to vector<16x384xbf16>
    %c7 = arith.constant 7 : index
    %c0_53 = arith.constant 0 : index
    %c0_54 = arith.constant 0 : index
    %87 = vector.load %arg7[%c7, %c0_53, %c0_54] : memref<9x16x16xbf16, #tpu.memory_space<vmem>>, vector<1x16x16xbf16>
    %88 = vector.shape_cast %87 : vector<1x16x16xbf16> to vector<16x16xbf16>
    %cst_55 = arith.constant dense<0.000000e+00> : vector<16x384xf32>
    %89 = tpu.matmul %88, %86, %cst_55 {dimension_numbers = #tpu.dot_dimension_numbers<[1], [0], [0], [1], [0, 0, 1, 1], [], []>} : vector<16x16xbf16>, vector<16x384xbf16>, vector<16x384xf32> -> vector<16x384xf32>
    %90 = arith.addf %85, %89 : vector<16x384xf32>
    %91 = vector.extract_strided_slice %51 {offsets = [0, 147], sizes = [16, 384], strides = [1, 1]} : vector<16x640xbf16> to vector<16x384xbf16>
    %c8 = arith.constant 8 : index
    %c0_56 = arith.constant 0 : index
    %c0_57 = arith.constant 0 : index
    %92 = vector.load %arg7[%c8, %c0_56, %c0_57] : memref<9x16x16xbf16, #tpu.memory_space<vmem>>, vector<1x16x16xbf16>
    %93 = vector.shape_cast %92 : vector<1x16x16xbf16> to vector<16x16xbf16>
    %cst_58 = arith.constant dense<0.000000e+00> : vector<16x384xf32>
    %94 = tpu.matmul %93, %91, %cst_58 {dimension_numbers = #tpu.dot_dimension_numbers<[1], [0], [0], [1], [0, 0, 1, 1], [], []>} : vector<16x16xbf16>, vector<16x384xbf16>, vector<16x384xf32> -> vector<16x384xf32>
    %95 = arith.addf %90, %94 : vector<16x384xf32>
    %c0_59 = arith.constant 0 : index
    %c0_60 = arith.constant 0 : index
    %96 = vector.load %arg8[%c0_59, %c0_60] : memref<16x1xf32, #tpu.memory_space<vmem>>, vector<16x1xf32>
    %97 = vector.broadcast %96 : vector<16x1xf32> to vector<16x384xf32>
    %98 = arith.addf %95, %97 : vector<16x384xf32>
    %99 = arith.mulf %98, %47 : vector<16x384xf32>
    %100 = arith.truncf %99 : vector<16x384xf32> to vector<16x384xbf16>
    %c0_61 = arith.constant 0 : index
    %c128_62 = arith.constant 128 : index
    %101 = vector.load %arg29[%c0_61, %c128_62] : memref<48x640xbf16, #tpu.memory_space<vmem>>, vector<16x384xbf16>
    tpu.vector_store %arg29[%c0_61, %c128_62], %100 {strides = array<i32>} : memref<48x640xbf16, #tpu.memory_space<vmem>>, vector<16x384xbf16>,
    %c0_63 = arith.constant 0 : index
    %c0_64 = arith.constant 0 : index
    %102 = vector.load %arg29[%c0_63, %c0_64] : memref<48x640xbf16, #tpu.memory_space<vmem>>, vector<16x640xbf16>
    %103 = vector.extract_strided_slice %102 {offsets = [0, 109], sizes = [16, 384], strides = [1, 1]} : vector<16x640xbf16> to vector<16x384xbf16>
    %c0_65 = arith.constant 0 : index
    %c0_66 = arith.constant 0 : index
    %c0_67 = arith.constant 0 : index
    %104 = vector.load %arg9[%c0_65, %c0_66, %c0_67] : memref<9x16x16xbf16, #tpu.memory_space<vmem>>, vector<1x16x16xbf16>
    %105 = vector.shape_cast %104 : vector<1x16x16xbf16> to vector<16x16xbf16>
    %cst_68 = arith.constant dense<0.000000e+00> : vector<16x384xf32>
    %106 = tpu.matmul %105, %103, %cst_68 {dimension_numbers = #tpu.dot_dimension_numbers<[1], [0], [0], [1], [0, 0, 1, 1], [], []>} : vector<16x16xbf16>, vector<16x384xbf16>, vector<16x384xf32> -> vector<16x384xf32>
    %107 = vector.extract_strided_slice %102 {offsets = [0, 110], sizes = [16, 384], strides = [1, 1]} : vector<16x640xbf16> to vector<16x384xbf16>
    %c1_69 = arith.constant 1 : index
    %c0_70 = arith.constant 0 : index
    %c0_71 = arith.constant 0 : index
    %108 = vector.load %arg9[%c1_69, %c0_70, %c0_71] : memref<9x16x16xbf16, #tpu.memory_space<vmem>>, vector<1x16x16xbf16>
    %109 = vector.shape_cast %108 : vector<1x16x16xbf16> to vector<16x16xbf16>
    %cst_72 = arith.constant dense<0.000000e+00> : vector<16x384xf32>
    %110 = tpu.matmul %109, %107, %cst_72 {dimension_numbers = #tpu.dot_dimension_numbers<[1], [0], [0], [1], [0, 0, 1, 1], [], []>} : vector<16x16xbf16>, vector<16x384xbf16>, vector<16x384xf32> -> vector<16x384xf32>
    %111 = arith.addf %106, %110 : vector<16x384xf32>
    %112 = vector.extract_strided_slice %102 {offsets = [0, 111], sizes = [16, 384], strides = [1, 1]} : vector<16x640xbf16> to vector<16x384xbf16>
    %c2_73 = arith.constant 2 : index
    %c0_74 = arith.constant 0 : index
    %c0_75 = arith.constant 0 : index
    %113 = vector.load %arg9[%c2_73, %c0_74, %c0_75] : memref<9x16x16xbf16, #tpu.memory_space<vmem>>, vector<1x16x16xbf16>
    %114 = vector.shape_cast %113 : vector<1x16x16xbf16> to vector<16x16xbf16>
    %cst_76 = arith.constant dense<0.000000e+00> : vector<16x384xf32>
    %115 = tpu.matmul %114, %112, %cst_76 {dimension_numbers = #tpu.dot_dimension_numbers<[1], [0], [0], [1], [0, 0, 1, 1], [], []>} : vector<16x16xbf16>, vector<16x384xbf16>, vector<16x384xf32> -> vector<16x384xf32>
    %116 = arith.addf %111, %115 : vector<16x384xf32>
    %117 = vector.extract_strided_slice %102 {offsets = [0, 127], sizes = [16, 384], strides = [1, 1]} : vector<16x640xbf16> to vector<16x384xbf16>
    %c3_77 = arith.constant 3 : index
    %c0_78 = arith.constant 0 : index
    %c0_79 = arith.constant 0 : index
    %118 = vector.load %arg9[%c3_77, %c0_78, %c0_79] : memref<9x16x16xbf16, #tpu.memory_space<vmem>>, vector<1x16x16xbf16>
    %119 = vector.shape_cast %118 : vector<1x16x16xbf16> to vector<16x16xbf16>
    %cst_80 = arith.constant dense<0.000000e+00> : vector<16x384xf32>
    %120 = tpu.matmul %119, %117, %cst_80 {dimension_numbers = #tpu.dot_dimension_numbers<[1], [0], [0], [1], [0, 0, 1, 1], [], []>} : vector<16x16xbf16>, vector<16x384xbf16>, vector<16x384xf32> -> vector<16x384xf32>
    %121 = arith.addf %116, %120 : vector<16x384xf32>
    %122 = vector.extract_strided_slice %102 {offsets = [0, 128], sizes = [16, 384], strides = [1, 1]} : vector<16x640xbf16> to vector<16x384xbf16>
    %c4_81 = arith.constant 4 : index
    %c0_82 = arith.constant 0 : index
    %c0_83 = arith.constant 0 : index
    %123 = vector.load %arg9[%c4_81, %c0_82, %c0_83] : memref<9x16x16xbf16, #tpu.memory_space<vmem>>, vector<1x16x16xbf16>
    %124 = vector.shape_cast %123 : vector<1x16x16xbf16> to vector<16x16xbf16>
    %cst_84 = arith.constant dense<0.000000e+00> : vector<16x384xf32>
    %125 = tpu.matmul %124, %122, %cst_84 {dimension_numbers = #tpu.dot_dimension_numbers<[1], [0], [0], [1], [0, 0, 1, 1], [], []>} : vector<16x16xbf16>, vector<16x384xbf16>, vector<16x384xf32> -> vector<16x384xf32>
    %126 = arith.addf %121, %125 : vector<16x384xf32>
    %127 = vector.extract_strided_slice %102 {offsets = [0, 129], sizes = [16, 384], strides = [1, 1]} : vector<16x640xbf16> to vector<16x384xbf16>
    %c5_85 = arith.constant 5 : index
    %c0_86 = arith.constant 0 : index
    %c0_87 = arith.constant 0 : index
    %128 = vector.load %arg9[%c5_85, %c0_86, %c0_87] : memref<9x16x16xbf16, #tpu.memory_space<vmem>>, vector<1x16x16xbf16>
    %129 = vector.shape_cast %128 : vector<1x16x16xbf16> to vector<16x16xbf16>
    %cst_88 = arith.constant dense<0.000000e+00> : vector<16x384xf32>
    %130 = tpu.matmul %129, %127, %cst_88 {dimension_numbers = #tpu.dot_dimension_numbers<[1], [0], [0], [1], [0, 0, 1, 1], [], []>} : vector<16x16xbf16>, vector<16x384xbf16>, vector<16x384xf32> -> vector<16x384xf32>
    %131 = arith.addf %126, %130 : vector<16x384xf32>
    %132 = vector.extract_strided_slice %102 {offsets = [0, 145], sizes = [16, 384], strides = [1, 1]} : vector<16x640xbf16> to vector<16x384xbf16>
    %c6_89 = arith.constant 6 : index
    %c0_90 = arith.constant 0 : index
    %c0_91 = arith.constant 0 : index
    %133 = vector.load %arg9[%c6_89, %c0_90, %c0_91] : memref<9x16x16xbf16, #tpu.memory_space<vmem>>, vector<1x16x16xbf16>
    %134 = vector.shape_cast %133 : vector<1x16x16xbf16> to vector<16x16xbf16>
    %cst_92 = arith.constant dense<0.000000e+00> : vector<16x384xf32>
    %135 = tpu.matmul %134, %132, %cst_92 {dimension_numbers = #tpu.dot_dimension_numbers<[1], [0], [0], [1], [0, 0, 1, 1], [], []>} : vector<16x16xbf16>, vector<16x384xbf16>, vector<16x384xf32> -> vector<16x384xf32>
    %136 = arith.addf %131, %135 : vector<16x384xf32>
    %137 = vector.extract_strided_slice %102 {offsets = [0, 146], sizes = [16, 384], strides = [1, 1]} : vector<16x640xbf16> to vector<16x384xbf16>
    %c7_93 = arith.constant 7 : index
    %c0_94 = arith.constant 0 : index
    %c0_95 = arith.constant 0 : index
    %138 = vector.load %arg9[%c7_93, %c0_94, %c0_95] : memref<9x16x16xbf16, #tpu.memory_space<vmem>>, vector<1x16x16xbf16>
    %139 = vector.shape_cast %138 : vector<1x16x16xbf16> to vector<16x16xbf16>
    %cst_96 = arith.constant dense<0.000000e+00> : vector<16x384xf32>
    %140 = tpu.matmul %139, %137, %cst_96 {dimension_numbers = #tpu.dot_dimension_numbers<[1], [0], [0], [1], [0, 0, 1, 1], [], []>} : vector<16x16xbf16>, vector<16x384xbf16>, vector<16x384xf32> -> vector<16x384xf32>
    %141 = arith.addf %136, %140 : vector<16x384xf32>
    %142 = vector.extract_strided_slice %102 {offsets = [0, 147], sizes = [16, 384], strides = [1, 1]} : vector<16x640xbf16> to vector<16x384xbf16>
    %c8_97 = arith.constant 8 : index
    %c0_98 = arith.constant 0 : index
    %c0_99 = arith.constant 0 : index
    %143 = vector.load %arg9[%c8_97, %c0_98, %c0_99] : memref<9x16x16xbf16, #tpu.memory_space<vmem>>, vector<1x16x16xbf16>
    %144 = vector.shape_cast %143 : vector<1x16x16xbf16> to vector<16x16xbf16>
    %cst_100 = arith.constant dense<0.000000e+00> : vector<16x384xf32>
    %145 = tpu.matmul %144, %142, %cst_100 {dimension_numbers = #tpu.dot_dimension_numbers<[1], [0], [0], [1], [0, 0, 1, 1], [], []>} : vector<16x16xbf16>, vector<16x384xbf16>, vector<16x384xf32> -> vector<16x384xf32>
    %146 = arith.addf %141, %145 : vector<16x384xf32>
    %c0_101 = arith.constant 0 : index
    %c0_102 = arith.constant 0 : index
    %147 = vector.load %arg10[%c0_101, %c0_102] : memref<16x1xf32, #tpu.memory_space<vmem>>, vector<16x1xf32>
    %148 = vector.broadcast %147 : vector<16x1xf32> to vector<16x384xf32>
    %149 = arith.addf %146, %148 : vector<16x384xf32>
    %cst_103 = arith.constant 0.000000e+00 : f32
    %150 = vector.broadcast %cst_103 : f32 to vector<16x384xf32>
    %151 = arith.maximumf %149, %150 : vector<16x384xf32>
    %152 = arith.mulf %151, %47 : vector<16x384xf32>
    %153 = arith.truncf %152 : vector<16x384xf32> to vector<16x384xbf16>
    %c16 = arith.constant 16 : index
    %c128_104 = arith.constant 128 : index
    %154 = vector.load %arg29[%c16, %c128_104] : memref<48x640xbf16, #tpu.memory_space<vmem>>, vector<16x384xbf16>
    tpu.vector_store %arg29[%c16, %c128_104], %153 {strides = array<i32>} : memref<48x640xbf16, #tpu.memory_space<vmem>>, vector<16x384xbf16>,
    %c0_105 = arith.constant 0 : index
    %c0_106 = arith.constant 0 : index
    %155 = vector.load %arg29[%c0_105, %c0_106] : memref<48x640xbf16, #tpu.memory_space<vmem>>, vector<32x640xbf16>
    %156 = vector.extract_strided_slice %155 {offsets = [0, 109], sizes = [32, 384], strides = [1, 1]} : vector<32x640xbf16> to vector<32x384xbf16>
    %c0_107 = arith.constant 0 : index
    %c0_108 = arith.constant 0 : index
    %c0_109 = arith.constant 0 : index
    %157 = vector.load %arg11[%c0_107, %c0_108, %c0_109] : memref<9x16x32xbf16, #tpu.memory_space<vmem>>, vector<1x16x32xbf16>
    %158 = vector.shape_cast %157 : vector<1x16x32xbf16> to vector<16x32xbf16>
    %cst_110 = arith.constant dense<0.000000e+00> : vector<16x384xf32>
    %159 = tpu.matmul %158, %156, %cst_110 {dimension_numbers = #tpu.dot_dimension_numbers<[1], [0], [0], [1], [0, 0, 1, 1], [], []>} : vector<16x32xbf16>, vector<32x384xbf16>, vector<16x384xf32> -> vector<16x384xf32>
    %160 = vector.extract_strided_slice %155 {offsets = [0, 110], sizes = [32, 384], strides = [1, 1]} : vector<32x640xbf16> to vector<32x384xbf16>
    %c1_111 = arith.constant 1 : index
    %c0_112 = arith.constant 0 : index
    %c0_113 = arith.constant 0 : index
    %161 = vector.load %arg11[%c1_111, %c0_112, %c0_113] : memref<9x16x32xbf16, #tpu.memory_space<vmem>>, vector<1x16x32xbf16>
    %162 = vector.shape_cast %161 : vector<1x16x32xbf16> to vector<16x32xbf16>
    %cst_114 = arith.constant dense<0.000000e+00> : vector<16x384xf32>
    %163 = tpu.matmul %162, %160, %cst_114 {dimension_numbers = #tpu.dot_dimension_numbers<[1], [0], [0], [1], [0, 0, 1, 1], [], []>} : vector<16x32xbf16>, vector<32x384xbf16>, vector<16x384xf32> -> vector<16x384xf32>
    %164 = arith.addf %159, %163 : vector<16x384xf32>
    %165 = vector.extract_strided_slice %155 {offsets = [0, 111], sizes = [32, 384], strides = [1, 1]} : vector<32x640xbf16> to vector<32x384xbf16>
    %c2_115 = arith.constant 2 : index
    %c0_116 = arith.constant 0 : index
    %c0_117 = arith.constant 0 : index
    %166 = vector.load %arg11[%c2_115, %c0_116, %c0_117] : memref<9x16x32xbf16, #tpu.memory_space<vmem>>, vector<1x16x32xbf16>
    %167 = vector.shape_cast %166 : vector<1x16x32xbf16> to vector<16x32xbf16>
    %cst_118 = arith.constant dense<0.000000e+00> : vector<16x384xf32>
    %168 = tpu.matmul %167, %165, %cst_118 {dimension_numbers = #tpu.dot_dimension_numbers<[1], [0], [0], [1], [0, 0, 1, 1], [], []>} : vector<16x32xbf16>, vector<32x384xbf16>, vector<16x384xf32> -> vector<16x384xf32>
    %169 = arith.addf %164, %168 : vector<16x384xf32>
    %170 = vector.extract_strided_slice %155 {offsets = [0, 127], sizes = [32, 384], strides = [1, 1]} : vector<32x640xbf16> to vector<32x384xbf16>
    %c3_119 = arith.constant 3 : index
    %c0_120 = arith.constant 0 : index
    %c0_121 = arith.constant 0 : index
    %171 = vector.load %arg11[%c3_119, %c0_120, %c0_121] : memref<9x16x32xbf16, #tpu.memory_space<vmem>>, vector<1x16x32xbf16>
    %172 = vector.shape_cast %171 : vector<1x16x32xbf16> to vector<16x32xbf16>
    %cst_122 = arith.constant dense<0.000000e+00> : vector<16x384xf32>
    %173 = tpu.matmul %172, %170, %cst_122 {dimension_numbers = #tpu.dot_dimension_numbers<[1], [0], [0], [1], [0, 0, 1, 1], [], []>} : vector<16x32xbf16>, vector<32x384xbf16>, vector<16x384xf32> -> vector<16x384xf32>
    %174 = arith.addf %169, %173 : vector<16x384xf32>
    %175 = vector.extract_strided_slice %155 {offsets = [0, 128], sizes = [32, 384], strides = [1, 1]} : vector<32x640xbf16> to vector<32x384xbf16>
    %c4_123 = arith.constant 4 : index
    %c0_124 = arith.constant 0 : index
    %c0_125 = arith.constant 0 : index
    %176 = vector.load %arg11[%c4_123, %c0_124, %c0_125] : memref<9x16x32xbf16, #tpu.memory_space<vmem>>, vector<1x16x32xbf16>
    %177 = vector.shape_cast %176 : vector<1x16x32xbf16> to vector<16x32xbf16>
    %cst_126 = arith.constant dense<0.000000e+00> : vector<16x384xf32>
    %178 = tpu.matmul %177, %175, %cst_126 {dimension_numbers = #tpu.dot_dimension_numbers<[1], [0], [0], [1], [0, 0, 1, 1], [], []>} : vector<16x32xbf16>, vector<32x384xbf16>, vector<16x384xf32> -> vector<16x384xf32>
    %179 = arith.addf %174, %178 : vector<16x384xf32>
    %180 = vector.extract_strided_slice %155 {offsets = [0, 129], sizes = [32, 384], strides = [1, 1]} : vector<32x640xbf16> to vector<32x384xbf16>
    %c5_127 = arith.constant 5 : index
    %c0_128 = arith.constant 0 : index
    %c0_129 = arith.constant 0 : index
    %181 = vector.load %arg11[%c5_127, %c0_128, %c0_129] : memref<9x16x32xbf16, #tpu.memory_space<vmem>>, vector<1x16x32xbf16>
    %182 = vector.shape_cast %181 : vector<1x16x32xbf16> to vector<16x32xbf16>
    %cst_130 = arith.constant dense<0.000000e+00> : vector<16x384xf32>
    %183 = tpu.matmul %182, %180, %cst_130 {dimension_numbers = #tpu.dot_dimension_numbers<[1], [0], [0], [1], [0, 0, 1, 1], [], []>} : vector<16x32xbf16>, vector<32x384xbf16>, vector<16x384xf32> -> vector<16x384xf32>
    %184 = arith.addf %179, %183 : vector<16x384xf32>
    %185 = vector.extract_strided_slice %155 {offsets = [0, 145], sizes = [32, 384], strides = [1, 1]} : vector<32x640xbf16> to vector<32x384xbf16>
    %c6_131 = arith.constant 6 : index
    %c0_132 = arith.constant 0 : index
    %c0_133 = arith.constant 0 : index
    %186 = vector.load %arg11[%c6_131, %c0_132, %c0_133] : memref<9x16x32xbf16, #tpu.memory_space<vmem>>, vector<1x16x32xbf16>
    %187 = vector.shape_cast %186 : vector<1x16x32xbf16> to vector<16x32xbf16>
    %cst_134 = arith.constant dense<0.000000e+00> : vector<16x384xf32>
    %188 = tpu.matmul %187, %185, %cst_134 {dimension_numbers = #tpu.dot_dimension_numbers<[1], [0], [0], [1], [0, 0, 1, 1], [], []>} : vector<16x32xbf16>, vector<32x384xbf16>, vector<16x384xf32> -> vector<16x384xf32>
    %189 = arith.addf %184, %188 : vector<16x384xf32>
    %190 = vector.extract_strided_slice %155 {offsets = [0, 146], sizes = [32, 384], strides = [1, 1]} : vector<32x640xbf16> to vector<32x384xbf16>
    %c7_135 = arith.constant 7 : index
    %c0_136 = arith.constant 0 : index
    %c0_137 = arith.constant 0 : index
    %191 = vector.load %arg11[%c7_135, %c0_136, %c0_137] : memref<9x16x32xbf16, #tpu.memory_space<vmem>>, vector<1x16x32xbf16>
    %192 = vector.shape_cast %191 : vector<1x16x32xbf16> to vector<16x32xbf16>
    %cst_138 = arith.constant dense<0.000000e+00> : vector<16x384xf32>
    %193 = tpu.matmul %192, %190, %cst_138 {dimension_numbers = #tpu.dot_dimension_numbers<[1], [0], [0], [1], [0, 0, 1, 1], [], []>} : vector<16x32xbf16>, vector<32x384xbf16>, vector<16x384xf32> -> vector<16x384xf32>
    %194 = arith.addf %189, %193 : vector<16x384xf32>
    %195 = vector.extract_strided_slice %155 {offsets = [0, 147], sizes = [32, 384], strides = [1, 1]} : vector<32x640xbf16> to vector<32x384xbf16>
    %c8_139 = arith.constant 8 : index
    %c0_140 = arith.constant 0 : index
    %c0_141 = arith.constant 0 : index
    %196 = vector.load %arg11[%c8_139, %c0_140, %c0_141] : memref<9x16x32xbf16, #tpu.memory_space<vmem>>, vector<1x16x32xbf16>
    %197 = vector.shape_cast %196 : vector<1x16x32xbf16> to vector<16x32xbf16>
    %cst_142 = arith.constant dense<0.000000e+00> : vector<16x384xf32>
    %198 = tpu.matmul %197, %195, %cst_142 {dimension_numbers = #tpu.dot_dimension_numbers<[1], [0], [0], [1], [0, 0, 1, 1], [], []>} : vector<16x32xbf16>, vector<32x384xbf16>, vector<16x384xf32> -> vector<16x384xf32>
    %199 = arith.addf %194, %198 : vector<16x384xf32>
    %c0_143 = arith.constant 0 : index
    %c0_144 = arith.constant 0 : index
    %200 = vector.load %arg12[%c0_143, %c0_144] : memref<16x1xf32, #tpu.memory_space<vmem>>, vector<16x1xf32>
    %201 = vector.broadcast %200 : vector<16x1xf32> to vector<16x384xf32>
    %202 = arith.addf %199, %201 : vector<16x384xf32>
    %cst_145 = arith.constant 0.000000e+00 : f32
    %203 = vector.broadcast %cst_145 : f32 to vector<16x384xf32>
    %204 = arith.maximumf %202, %203 : vector<16x384xf32>
    %205 = arith.mulf %204, %47 : vector<16x384xf32>
    %206 = arith.truncf %205 : vector<16x384xf32> to vector<16x384xbf16>
    %c32 = arith.constant 32 : index
    %c128_146 = arith.constant 128 : index
    %207 = vector.load %arg29[%c32, %c128_146] : memref<48x640xbf16, #tpu.memory_space<vmem>>, vector<16x384xbf16>
    tpu.vector_store %arg29[%c32, %c128_146], %206 {strides = array<i32>} : memref<48x640xbf16, #tpu.memory_space<vmem>>, vector<16x384xbf16>,
    %c0_147 = arith.constant 0 : index
    %c128_148 = arith.constant 128 : index
    %208 = vector.load %arg29[%c0_147, %c128_148] : memref<48x640xbf16, #tpu.memory_space<vmem>>, vector<48x384xbf16>
    %c0_149 = arith.constant 0 : index
    %c0_150 = arith.constant 0 : index
    %209 = vector.load %arg13[%c0_149, %c0_150] : memref<16x48xbf16, #tpu.memory_space<vmem>>, vector<16x48xbf16>
    %cst_151 = arith.constant dense<0.000000e+00> : vector<16x384xf32>
    %210 = tpu.matmul %209, %208, %cst_151 {dimension_numbers = #tpu.dot_dimension_numbers<[1], [0], [0], [1], [0, 0, 1, 1], [], []>} : vector<16x48xbf16>, vector<48x384xbf16>, vector<16x384xf32> -> vector<16x384xf32>
    %c0_152 = arith.constant 0 : index
    %c0_153 = arith.constant 0 : index
    %211 = vector.load %arg14[%c0_152, %c0_153] : memref<16x1xf32, #tpu.memory_space<vmem>>, vector<16x1xf32>
    %212 = vector.broadcast %211 : vector<16x1xf32> to vector<16x384xf32>
    %213 = arith.addf %210, %212 : vector<16x384xf32>
    %214 = arith.mulf %213, %47 : vector<16x384xf32>
    %c0_154 = arith.constant 0 : index
    %c128_155 = arith.constant 128 : index
    %215 = vector.load %arg29[%c0_154, %c128_155] : memref<48x640xbf16, #tpu.memory_space<vmem>>, vector<16x384xbf16>
    %216 = arith.extf %215 : vector<16x384xbf16> to vector<16x384xf32>
    %217 = arith.addf %214, %216 : vector<16x384xf32>
    %218 = arith.truncf %217 : vector<16x384xf32> to vector<16x384xbf16>
    %c0_156 = arith.constant 0 : index
    %c128_157 = arith.constant 128 : index
    %219 = vector.load %arg31[%c0_156, %c128_157] : memref<32x640xbf16, #tpu.memory_space<vmem>>, vector<16x384xbf16>
    tpu.vector_store %arg31[%c0_156, %c128_157], %218 {strides = array<i32>} : memref<32x640xbf16, #tpu.memory_space<vmem>>, vector<16x384xbf16>,
    %220 = arith.truncf %217 : vector<16x384xf32> to vector<16x384xbf16>
    %c0_158 = arith.constant 0 : index
    %c128_159 = arith.constant 128 : index
    %221 = vector.load %arg29[%c0_158, %c128_159] : memref<48x640xbf16, #tpu.memory_space<vmem>>, vector<16x384xbf16>
    tpu.vector_store %arg29[%c0_158, %c128_159], %220 {strides = array<i32>} : memref<48x640xbf16, #tpu.memory_space<vmem>>, vector<16x384xbf16>,
    %c0_160 = arith.constant 0 : index
    %c0_161 = arith.constant 0 : index
    %222 = vector.load %arg29[%c0_160, %c0_161] : memref<48x640xbf16, #tpu.memory_space<vmem>>, vector<16x640xbf16>
    %223 = vector.extract_strided_slice %222 {offsets = [0, 109], sizes = [16, 384], strides = [1, 1]} : vector<16x640xbf16> to vector<16x384xbf16>
    %c0_162 = arith.constant 0 : index
    %c0_163 = arith.constant 0 : index
    %c0_164 = arith.constant 0 : index
    %224 = vector.load %arg15[%c0_162, %c0_163, %c0_164] : memref<9x16x16xbf16, #tpu.memory_space<vmem>>, vector<1x16x16xbf16>
    %225 = vector.shape_cast %224 : vector<1x16x16xbf16> to vector<16x16xbf16>
    %cst_165 = arith.constant dense<0.000000e+00> : vector<16x384xf32>
    %226 = tpu.matmul %225, %223, %cst_165 {dimension_numbers = #tpu.dot_dimension_numbers<[1], [0], [0], [1], [0, 0, 1, 1], [], []>} : vector<16x16xbf16>, vector<16x384xbf16>, vector<16x384xf32> -> vector<16x384xf32>
    %227 = vector.extract_strided_slice %222 {offsets = [0, 110], sizes = [16, 384], strides = [1, 1]} : vector<16x640xbf16> to vector<16x384xbf16>
    %c1_166 = arith.constant 1 : index
    %c0_167 = arith.constant 0 : index
    %c0_168 = arith.constant 0 : index
    %228 = vector.load %arg15[%c1_166, %c0_167, %c0_168] : memref<9x16x16xbf16, #tpu.memory_space<vmem>>, vector<1x16x16xbf16>
    %229 = vector.shape_cast %228 : vector<1x16x16xbf16> to vector<16x16xbf16>
    %cst_169 = arith.constant dense<0.000000e+00> : vector<16x384xf32>
    %230 = tpu.matmul %229, %227, %cst_169 {dimension_numbers = #tpu.dot_dimension_numbers<[1], [0], [0], [1], [0, 0, 1, 1], [], []>} : vector<16x16xbf16>, vector<16x384xbf16>, vector<16x384xf32> -> vector<16x384xf32>
    %231 = arith.addf %226, %230 : vector<16x384xf32>
    %232 = vector.extract_strided_slice %222 {offsets = [0, 111], sizes = [16, 384], strides = [1, 1]} : vector<16x640xbf16> to vector<16x384xbf16>
    %c2_170 = arith.constant 2 : index
    %c0_171 = arith.constant 0 : index
    %c0_172 = arith.constant 0 : index
    %233 = vector.load %arg15[%c2_170, %c0_171, %c0_172] : memref<9x16x16xbf16, #tpu.memory_space<vmem>>, vector<1x16x16xbf16>
    %234 = vector.shape_cast %233 : vector<1x16x16xbf16> to vector<16x16xbf16>
    %cst_173 = arith.constant dense<0.000000e+00> : vector<16x384xf32>
    %235 = tpu.matmul %234, %232, %cst_173 {dimension_numbers = #tpu.dot_dimension_numbers<[1], [0], [0], [1], [0, 0, 1, 1], [], []>} : vector<16x16xbf16>, vector<16x384xbf16>, vector<16x384xf32> -> vector<16x384xf32>
    %236 = arith.addf %231, %235 : vector<16x384xf32>
    %237 = vector.extract_strided_slice %222 {offsets = [0, 127], sizes = [16, 384], strides = [1, 1]} : vector<16x640xbf16> to vector<16x384xbf16>
    %c3_174 = arith.constant 3 : index
    %c0_175 = arith.constant 0 : index
    %c0_176 = arith.constant 0 : index
    %238 = vector.load %arg15[%c3_174, %c0_175, %c0_176] : memref<9x16x16xbf16, #tpu.memory_space<vmem>>, vector<1x16x16xbf16>
    %239 = vector.shape_cast %238 : vector<1x16x16xbf16> to vector<16x16xbf16>
    %cst_177 = arith.constant dense<0.000000e+00> : vector<16x384xf32>
    %240 = tpu.matmul %239, %237, %cst_177 {dimension_numbers = #tpu.dot_dimension_numbers<[1], [0], [0], [1], [0, 0, 1, 1], [], []>} : vector<16x16xbf16>, vector<16x384xbf16>, vector<16x384xf32> -> vector<16x384xf32>
    %241 = arith.addf %236, %240 : vector<16x384xf32>
    %242 = vector.extract_strided_slice %222 {offsets = [0, 128], sizes = [16, 384], strides = [1, 1]} : vector<16x640xbf16> to vector<16x384xbf16>
    %c4_178 = arith.constant 4 : index
    %c0_179 = arith.constant 0 : index
    %c0_180 = arith.constant 0 : index
    %243 = vector.load %arg15[%c4_178, %c0_179, %c0_180] : memref<9x16x16xbf16, #tpu.memory_space<vmem>>, vector<1x16x16xbf16>
    %244 = vector.shape_cast %243 : vector<1x16x16xbf16> to vector<16x16xbf16>
    %cst_181 = arith.constant dense<0.000000e+00> : vector<16x384xf32>
    %245 = tpu.matmul %244, %242, %cst_181 {dimension_numbers = #tpu.dot_dimension_numbers<[1], [0], [0], [1], [0, 0, 1, 1], [], []>} : vector<16x16xbf16>, vector<16x384xbf16>, vector<16x384xf32> -> vector<16x384xf32>
    %246 = arith.addf %241, %245 : vector<16x384xf32>
    %247 = vector.extract_strided_slice %222 {offsets = [0, 129], sizes = [16, 384], strides = [1, 1]} : vector<16x640xbf16> to vector<16x384xbf16>
    %c5_182 = arith.constant 5 : index
    %c0_183 = arith.constant 0 : index
    %c0_184 = arith.constant 0 : index
    %248 = vector.load %arg15[%c5_182, %c0_183, %c0_184] : memref<9x16x16xbf16, #tpu.memory_space<vmem>>, vector<1x16x16xbf16>
    %249 = vector.shape_cast %248 : vector<1x16x16xbf16> to vector<16x16xbf16>
    %cst_185 = arith.constant dense<0.000000e+00> : vector<16x384xf32>
    %250 = tpu.matmul %249, %247, %cst_185 {dimension_numbers = #tpu.dot_dimension_numbers<[1], [0], [0], [1], [0, 0, 1, 1], [], []>} : vector<16x16xbf16>, vector<16x384xbf16>, vector<16x384xf32> -> vector<16x384xf32>
    %251 = arith.addf %246, %250 : vector<16x384xf32>
    %252 = vector.extract_strided_slice %222 {offsets = [0, 145], sizes = [16, 384], strides = [1, 1]} : vector<16x640xbf16> to vector<16x384xbf16>
    %c6_186 = arith.constant 6 : index
    %c0_187 = arith.constant 0 : index
    %c0_188 = arith.constant 0 : index
    %253 = vector.load %arg15[%c6_186, %c0_187, %c0_188] : memref<9x16x16xbf16, #tpu.memory_space<vmem>>, vector<1x16x16xbf16>
    %254 = vector.shape_cast %253 : vector<1x16x16xbf16> to vector<16x16xbf16>
    %cst_189 = arith.constant dense<0.000000e+00> : vector<16x384xf32>
    %255 = tpu.matmul %254, %252, %cst_189 {dimension_numbers = #tpu.dot_dimension_numbers<[1], [0], [0], [1], [0, 0, 1, 1], [], []>} : vector<16x16xbf16>, vector<16x384xbf16>, vector<16x384xf32> -> vector<16x384xf32>
    %256 = arith.addf %251, %255 : vector<16x384xf32>
    %257 = vector.extract_strided_slice %222 {offsets = [0, 146], sizes = [16, 384], strides = [1, 1]} : vector<16x640xbf16> to vector<16x384xbf16>
    %c7_190 = arith.constant 7 : index
    %c0_191 = arith.constant 0 : index
    %c0_192 = arith.constant 0 : index
    %258 = vector.load %arg15[%c7_190, %c0_191, %c0_192] : memref<9x16x16xbf16, #tpu.memory_space<vmem>>, vector<1x16x16xbf16>
    %259 = vector.shape_cast %258 : vector<1x16x16xbf16> to vector<16x16xbf16>
    %cst_193 = arith.constant dense<0.000000e+00> : vector<16x384xf32>
    %260 = tpu.matmul %259, %257, %cst_193 {dimension_numbers = #tpu.dot_dimension_numbers<[1], [0], [0], [1], [0, 0, 1, 1], [], []>} : vector<16x16xbf16>, vector<16x384xbf16>, vector<16x384xf32> -> vector<16x384xf32>
    %261 = arith.addf %256, %260 : vector<16x384xf32>
    %262 = vector.extract_strided_slice %222 {offsets = [0, 147], sizes = [16, 384], strides = [1, 1]} : vector<16x640xbf16> to vector<16x384xbf16>
    %c8_194 = arith.constant 8 : index
    %c0_195 = arith.constant 0 : index
    %c0_196 = arith.constant 0 : index
    %263 = vector.load %arg15[%c8_194, %c0_195, %c0_196] : memref<9x16x16xbf16, #tpu.memory_space<vmem>>, vector<1x16x16xbf16>
    %264 = vector.shape_cast %263 : vector<1x16x16xbf16> to vector<16x16xbf16>
    %cst_197 = arith.constant dense<0.000000e+00> : vector<16x384xf32>
    %265 = tpu.matmul %264, %262, %cst_197 {dimension_numbers = #tpu.dot_dimension_numbers<[1], [0], [0], [1], [0, 0, 1, 1], [], []>} : vector<16x16xbf16>, vector<16x384xbf16>, vector<16x384xf32> -> vector<16x384xf32>
    %266 = arith.addf %261, %265 : vector<16x384xf32>
    %c0_198 = arith.constant 0 : index
    %c0_199 = arith.constant 0 : index
    %267 = vector.load %arg16[%c0_198, %c0_199] : memref<16x1xf32, #tpu.memory_space<vmem>>, vector<16x1xf32>
    %268 = vector.broadcast %267 : vector<16x1xf32> to vector<16x384xf32>
    %269 = arith.addf %266, %268 : vector<16x384xf32>
    %cst_200 = arith.constant 0.000000e+00 : f32
    %270 = vector.broadcast %cst_200 : f32 to vector<16x384xf32>
    %271 = arith.maximumf %269, %270 : vector<16x384xf32>
    %272 = arith.mulf %271, %47 : vector<16x384xf32>
    %273 = arith.truncf %272 : vector<16x384xf32> to vector<16x384xbf16>
    %c16_201 = arith.constant 16 : index
    %c128_202 = arith.constant 128 : index
    %274 = vector.load %arg29[%c16_201, %c128_202] : memref<48x640xbf16, #tpu.memory_space<vmem>>, vector<16x384xbf16>
    tpu.vector_store %arg29[%c16_201, %c128_202], %273 {strides = array<i32>} : memref<48x640xbf16, #tpu.memory_space<vmem>>, vector<16x384xbf16>,
    %c0_203 = arith.constant 0 : index
    %c0_204 = arith.constant 0 : index
    %275 = vector.load %arg29[%c0_203, %c0_204] : memref<48x640xbf16, #tpu.memory_space<vmem>>, vector<32x640xbf16>
    %276 = vector.extract_strided_slice %275 {offsets = [0, 109], sizes = [32, 384], strides = [1, 1]} : vector<32x640xbf16> to vector<32x384xbf16>
    %c0_205 = arith.constant 0 : index
    %c0_206 = arith.constant 0 : index
    %c0_207 = arith.constant 0 : index
    %277 = vector.load %arg17[%c0_205, %c0_206, %c0_207] : memref<9x16x32xbf16, #tpu.memory_space<vmem>>, vector<1x16x32xbf16>
    %278 = vector.shape_cast %277 : vector<1x16x32xbf16> to vector<16x32xbf16>
    %cst_208 = arith.constant dense<0.000000e+00> : vector<16x384xf32>
    %279 = tpu.matmul %278, %276, %cst_208 {dimension_numbers = #tpu.dot_dimension_numbers<[1], [0], [0], [1], [0, 0, 1, 1], [], []>} : vector<16x32xbf16>, vector<32x384xbf16>, vector<16x384xf32> -> vector<16x384xf32>
    %280 = vector.extract_strided_slice %275 {offsets = [0, 110], sizes = [32, 384], strides = [1, 1]} : vector<32x640xbf16> to vector<32x384xbf16>
    %c1_209 = arith.constant 1 : index
    %c0_210 = arith.constant 0 : index
    %c0_211 = arith.constant 0 : index
    %281 = vector.load %arg17[%c1_209, %c0_210, %c0_211] : memref<9x16x32xbf16, #tpu.memory_space<vmem>>, vector<1x16x32xbf16>
    %282 = vector.shape_cast %281 : vector<1x16x32xbf16> to vector<16x32xbf16>
    %cst_212 = arith.constant dense<0.000000e+00> : vector<16x384xf32>
    %283 = tpu.matmul %282, %280, %cst_212 {dimension_numbers = #tpu.dot_dimension_numbers<[1], [0], [0], [1], [0, 0, 1, 1], [], []>} : vector<16x32xbf16>, vector<32x384xbf16>, vector<16x384xf32> -> vector<16x384xf32>
    %284 = arith.addf %279, %283 : vector<16x384xf32>
    %285 = vector.extract_strided_slice %275 {offsets = [0, 111], sizes = [32, 384], strides = [1, 1]} : vector<32x640xbf16> to vector<32x384xbf16>
    %c2_213 = arith.constant 2 : index
    %c0_214 = arith.constant 0 : index
    %c0_215 = arith.constant 0 : index
    %286 = vector.load %arg17[%c2_213, %c0_214, %c0_215] : memref<9x16x32xbf16, #tpu.memory_space<vmem>>, vector<1x16x32xbf16>
    %287 = vector.shape_cast %286 : vector<1x16x32xbf16> to vector<16x32xbf16>
    %cst_216 = arith.constant dense<0.000000e+00> : vector<16x384xf32>
    %288 = tpu.matmul %287, %285, %cst_216 {dimension_numbers = #tpu.dot_dimension_numbers<[1], [0], [0], [1], [0, 0, 1, 1], [], []>} : vector<16x32xbf16>, vector<32x384xbf16>, vector<16x384xf32> -> vector<16x384xf32>
    %289 = arith.addf %284, %288 : vector<16x384xf32>
    %290 = vector.extract_strided_slice %275 {offsets = [0, 127], sizes = [32, 384], strides = [1, 1]} : vector<32x640xbf16> to vector<32x384xbf16>
    %c3_217 = arith.constant 3 : index
    %c0_218 = arith.constant 0 : index
    %c0_219 = arith.constant 0 : index
    %291 = vector.load %arg17[%c3_217, %c0_218, %c0_219] : memref<9x16x32xbf16, #tpu.memory_space<vmem>>, vector<1x16x32xbf16>
    %292 = vector.shape_cast %291 : vector<1x16x32xbf16> to vector<16x32xbf16>
    %cst_220 = arith.constant dense<0.000000e+00> : vector<16x384xf32>
    %293 = tpu.matmul %292, %290, %cst_220 {dimension_numbers = #tpu.dot_dimension_numbers<[1], [0], [0], [1], [0, 0, 1, 1], [], []>} : vector<16x32xbf16>, vector<32x384xbf16>, vector<16x384xf32> -> vector<16x384xf32>
    %294 = arith.addf %289, %293 : vector<16x384xf32>
    %295 = vector.extract_strided_slice %275 {offsets = [0, 128], sizes = [32, 384], strides = [1, 1]} : vector<32x640xbf16> to vector<32x384xbf16>
    %c4_221 = arith.constant 4 : index
    %c0_222 = arith.constant 0 : index
    %c0_223 = arith.constant 0 : index
    %296 = vector.load %arg17[%c4_221, %c0_222, %c0_223] : memref<9x16x32xbf16, #tpu.memory_space<vmem>>, vector<1x16x32xbf16>
    %297 = vector.shape_cast %296 : vector<1x16x32xbf16> to vector<16x32xbf16>
    %cst_224 = arith.constant dense<0.000000e+00> : vector<16x384xf32>
    %298 = tpu.matmul %297, %295, %cst_224 {dimension_numbers = #tpu.dot_dimension_numbers<[1], [0], [0], [1], [0, 0, 1, 1], [], []>} : vector<16x32xbf16>, vector<32x384xbf16>, vector<16x384xf32> -> vector<16x384xf32>
    %299 = arith.addf %294, %298 : vector<16x384xf32>
    %300 = vector.extract_strided_slice %275 {offsets = [0, 129], sizes = [32, 384], strides = [1, 1]} : vector<32x640xbf16> to vector<32x384xbf16>
    %c5_225 = arith.constant 5 : index
    %c0_226 = arith.constant 0 : index
    %c0_227 = arith.constant 0 : index
    %301 = vector.load %arg17[%c5_225, %c0_226, %c0_227] : memref<9x16x32xbf16, #tpu.memory_space<vmem>>, vector<1x16x32xbf16>
    %302 = vector.shape_cast %301 : vector<1x16x32xbf16> to vector<16x32xbf16>
    %cst_228 = arith.constant dense<0.000000e+00> : vector<16x384xf32>
    %303 = tpu.matmul %302, %300, %cst_228 {dimension_numbers = #tpu.dot_dimension_numbers<[1], [0], [0], [1], [0, 0, 1, 1], [], []>} : vector<16x32xbf16>, vector<32x384xbf16>, vector<16x384xf32> -> vector<16x384xf32>
    %304 = arith.addf %299, %303 : vector<16x384xf32>
    %305 = vector.extract_strided_slice %275 {offsets = [0, 145], sizes = [32, 384], strides = [1, 1]} : vector<32x640xbf16> to vector<32x384xbf16>
    %c6_229 = arith.constant 6 : index
    %c0_230 = arith.constant 0 : index
    %c0_231 = arith.constant 0 : index
    %306 = vector.load %arg17[%c6_229, %c0_230, %c0_231] : memref<9x16x32xbf16, #tpu.memory_space<vmem>>, vector<1x16x32xbf16>
    %307 = vector.shape_cast %306 : vector<1x16x32xbf16> to vector<16x32xbf16>
    %cst_232 = arith.constant dense<0.000000e+00> : vector<16x384xf32>
    %308 = tpu.matmul %307, %305, %cst_232 {dimension_numbers = #tpu.dot_dimension_numbers<[1], [0], [0], [1], [0, 0, 1, 1], [], []>} : vector<16x32xbf16>, vector<32x384xbf16>, vector<16x384xf32> -> vector<16x384xf32>
    %309 = arith.addf %304, %308 : vector<16x384xf32>
    %310 = vector.extract_strided_slice %275 {offsets = [0, 146], sizes = [32, 384], strides = [1, 1]} : vector<32x640xbf16> to vector<32x384xbf16>
    %c7_233 = arith.constant 7 : index
    %c0_234 = arith.constant 0 : index
    %c0_235 = arith.constant 0 : index
    %311 = vector.load %arg17[%c7_233, %c0_234, %c0_235] : memref<9x16x32xbf16, #tpu.memory_space<vmem>>, vector<1x16x32xbf16>
    %312 = vector.shape_cast %311 : vector<1x16x32xbf16> to vector<16x32xbf16>
    %cst_236 = arith.constant dense<0.000000e+00> : vector<16x384xf32>
    %313 = tpu.matmul %312, %310, %cst_236 {dimension_numbers = #tpu.dot_dimension_numbers<[1], [0], [0], [1], [0, 0, 1, 1], [], []>} : vector<16x32xbf16>, vector<32x384xbf16>, vector<16x384xf32> -> vector<16x384xf32>
    %314 = arith.addf %309, %313 : vector<16x384xf32>
    %315 = vector.extract_strided_slice %275 {offsets = [0, 147], sizes = [32, 384], strides = [1, 1]} : vector<32x640xbf16> to vector<32x384xbf16>
    %c8_237 = arith.constant 8 : index
    %c0_238 = arith.constant 0 : index
    %c0_239 = arith.constant 0 : index
    %316 = vector.load %arg17[%c8_237, %c0_238, %c0_239] : memref<9x16x32xbf16, #tpu.memory_space<vmem>>, vector<1x16x32xbf16>
    %317 = vector.shape_cast %316 : vector<1x16x32xbf16> to vector<16x32xbf16>
    %cst_240 = arith.constant dense<0.000000e+00> : vector<16x384xf32>
    %318 = tpu.matmul %317, %315, %cst_240 {dimension_numbers = #tpu.dot_dimension_numbers<[1], [0], [0], [1], [0, 0, 1, 1], [], []>} : vector<16x32xbf16>, vector<32x384xbf16>, vector<16x384xf32> -> vector<16x384xf32>
    %319 = arith.addf %314, %318 : vector<16x384xf32>
    %c0_241 = arith.constant 0 : index
    %c0_242 = arith.constant 0 : index
    %320 = vector.load %arg18[%c0_241, %c0_242] : memref<16x1xf32, #tpu.memory_space<vmem>>, vector<16x1xf32>
    %321 = vector.broadcast %320 : vector<16x1xf32> to vector<16x384xf32>
    %322 = arith.addf %319, %321 : vector<16x384xf32>
    %cst_243 = arith.constant 0.000000e+00 : f32
    %323 = vector.broadcast %cst_243 : f32 to vector<16x384xf32>
    %324 = arith.maximumf %322, %323 : vector<16x384xf32>
    %325 = arith.mulf %324, %47 : vector<16x384xf32>
    %326 = arith.truncf %325 : vector<16x384xf32> to vector<16x384xbf16>
    %c32_244 = arith.constant 32 : index
    %c128_245 = arith.constant 128 : index
    %327 = vector.load %arg29[%c32_244, %c128_245] : memref<48x640xbf16, #tpu.memory_space<vmem>>, vector<16x384xbf16>
    tpu.vector_store %arg29[%c32_244, %c128_245], %326 {strides = array<i32>} : memref<48x640xbf16, #tpu.memory_space<vmem>>, vector<16x384xbf16>,
    %c0_246 = arith.constant 0 : index
    %c128_247 = arith.constant 128 : index
    %328 = vector.load %arg29[%c0_246, %c128_247] : memref<48x640xbf16, #tpu.memory_space<vmem>>, vector<48x384xbf16>
    %c0_248 = arith.constant 0 : index
    %c0_249 = arith.constant 0 : index
    %329 = vector.load %arg19[%c0_248, %c0_249] : memref<16x48xbf16, #tpu.memory_space<vmem>>, vector<16x48xbf16>
    %cst_250 = arith.constant dense<0.000000e+00> : vector<16x384xf32>
    %330 = tpu.matmul %329, %328, %cst_250 {dimension_numbers = #tpu.dot_dimension_numbers<[1], [0], [0], [1], [0, 0, 1, 1], [], []>} : vector<16x48xbf16>, vector<48x384xbf16>, vector<16x384xf32> -> vector<16x384xf32>
    %c0_251 = arith.constant 0 : index
    %c0_252 = arith.constant 0 : index
    %331 = vector.load %arg20[%c0_251, %c0_252] : memref<16x1xf32, #tpu.memory_space<vmem>>, vector<16x1xf32>
    %332 = vector.broadcast %331 : vector<16x1xf32> to vector<16x384xf32>
    %333 = arith.addf %330, %332 : vector<16x384xf32>
    %334 = arith.mulf %333, %47 : vector<16x384xf32>
    %c0_253 = arith.constant 0 : index
    %c128_254 = arith.constant 128 : index
    %335 = vector.load %arg29[%c0_253, %c128_254] : memref<48x640xbf16, #tpu.memory_space<vmem>>, vector<16x384xbf16>
    %336 = arith.extf %335 : vector<16x384xbf16> to vector<16x384xf32>
    %337 = arith.addf %334, %336 : vector<16x384xf32>
    %338 = arith.truncf %337 : vector<16x384xf32> to vector<16x384xbf16>
    %c16_255 = arith.constant 16 : index
    %c128_256 = arith.constant 128 : index
    %339 = vector.load %arg31[%c16_255, %c128_256] : memref<32x640xbf16, #tpu.memory_space<vmem>>, vector<16x384xbf16>
    tpu.vector_store %arg31[%c16_255, %c128_256], %338 {strides = array<i32>} : memref<32x640xbf16, #tpu.memory_space<vmem>>, vector<16x384xbf16>,
    %c0_257 = arith.constant 0 : index
    %c128_258 = arith.constant 128 : index
    %340 = vector.load %arg31[%c0_257, %c128_258] : memref<32x640xbf16, #tpu.memory_space<vmem>>, vector<32x384xbf16>
    %c0_259 = arith.constant 0 : index
    %c0_260 = arith.constant 0 : index
    %341 = vector.load %arg21[%c0_259, %c0_260] : memref<16x32xbf16, #tpu.memory_space<vmem>>, vector<16x32xbf16>
    %cst_261 = arith.constant dense<0.000000e+00> : vector<16x384xf32>
    %342 = tpu.matmul %341, %340, %cst_261 {dimension_numbers = #tpu.dot_dimension_numbers<[1], [0], [0], [1], [0, 0, 1, 1], [], []>} : vector<16x32xbf16>, vector<32x384xbf16>, vector<16x384xf32> -> vector<16x384xf32>
    %c0_262 = arith.constant 0 : index
    %c0_263 = arith.constant 0 : index
    %343 = vector.load %arg22[%c0_262, %c0_263] : memref<16x1xf32, #tpu.memory_space<vmem>>, vector<16x1xf32>
    %344 = vector.broadcast %343 : vector<16x1xf32> to vector<16x384xf32>
    %345 = arith.addf %342, %344 : vector<16x384xf32>
    %346 = arith.mulf %345, %47 : vector<16x384xf32>
    %347 = arith.truncf %346 : vector<16x384xf32> to vector<16x384xbf16>
    %c0_264 = arith.constant 0 : index
    %c128_265 = arith.constant 128 : index
    %348 = vector.load %arg29[%c0_264, %c128_265] : memref<48x640xbf16, #tpu.memory_space<vmem>>, vector<16x384xbf16>
    tpu.vector_store %arg29[%c0_264, %c128_265], %347 {strides = array<i32>} : memref<48x640xbf16, #tpu.memory_space<vmem>>, vector<16x384xbf16>,
    %c0_266 = arith.constant 0 : index
    %c0_267 = arith.constant 0 : index
    %349 = vector.load %arg29[%c0_266, %c0_267] : memref<48x640xbf16, #tpu.memory_space<vmem>>, vector<16x640xbf16>
    %350 = vector.extract_strided_slice %349 {offsets = [0, 109], sizes = [16, 384], strides = [1, 1]} : vector<16x640xbf16> to vector<16x384xbf16>
    %c0_268 = arith.constant 0 : index
    %c0_269 = arith.constant 0 : index
    %c0_270 = arith.constant 0 : index
    %351 = vector.load %arg23[%c0_268, %c0_269, %c0_270] : memref<9x16x16xbf16, #tpu.memory_space<vmem>>, vector<1x16x16xbf16>
    %352 = vector.shape_cast %351 : vector<1x16x16xbf16> to vector<16x16xbf16>
    %cst_271 = arith.constant dense<0.000000e+00> : vector<16x384xf32>
    %353 = tpu.matmul %352, %350, %cst_271 {dimension_numbers = #tpu.dot_dimension_numbers<[1], [0], [0], [1], [0, 0, 1, 1], [], []>} : vector<16x16xbf16>, vector<16x384xbf16>, vector<16x384xf32> -> vector<16x384xf32>
    %354 = vector.extract_strided_slice %349 {offsets = [0, 110], sizes = [16, 384], strides = [1, 1]} : vector<16x640xbf16> to vector<16x384xbf16>
    %c1_272 = arith.constant 1 : index
    %c0_273 = arith.constant 0 : index
    %c0_274 = arith.constant 0 : index
    %355 = vector.load %arg23[%c1_272, %c0_273, %c0_274] : memref<9x16x16xbf16, #tpu.memory_space<vmem>>, vector<1x16x16xbf16>
    %356 = vector.shape_cast %355 : vector<1x16x16xbf16> to vector<16x16xbf16>
    %cst_275 = arith.constant dense<0.000000e+00> : vector<16x384xf32>
    %357 = tpu.matmul %356, %354, %cst_275 {dimension_numbers = #tpu.dot_dimension_numbers<[1], [0], [0], [1], [0, 0, 1, 1], [], []>} : vector<16x16xbf16>, vector<16x384xbf16>, vector<16x384xf32> -> vector<16x384xf32>
    %358 = arith.addf %353, %357 : vector<16x384xf32>
    %359 = vector.extract_strided_slice %349 {offsets = [0, 111], sizes = [16, 384], strides = [1, 1]} : vector<16x640xbf16> to vector<16x384xbf16>
    %c2_276 = arith.constant 2 : index
    %c0_277 = arith.constant 0 : index
    %c0_278 = arith.constant 0 : index
    %360 = vector.load %arg23[%c2_276, %c0_277, %c0_278] : memref<9x16x16xbf16, #tpu.memory_space<vmem>>, vector<1x16x16xbf16>
    %361 = vector.shape_cast %360 : vector<1x16x16xbf16> to vector<16x16xbf16>
    %cst_279 = arith.constant dense<0.000000e+00> : vector<16x384xf32>
    %362 = tpu.matmul %361, %359, %cst_279 {dimension_numbers = #tpu.dot_dimension_numbers<[1], [0], [0], [1], [0, 0, 1, 1], [], []>} : vector<16x16xbf16>, vector<16x384xbf16>, vector<16x384xf32> -> vector<16x384xf32>
    %363 = arith.addf %358, %362 : vector<16x384xf32>
    %364 = vector.extract_strided_slice %349 {offsets = [0, 127], sizes = [16, 384], strides = [1, 1]} : vector<16x640xbf16> to vector<16x384xbf16>
    %c3_280 = arith.constant 3 : index
    %c0_281 = arith.constant 0 : index
    %c0_282 = arith.constant 0 : index
    %365 = vector.load %arg23[%c3_280, %c0_281, %c0_282] : memref<9x16x16xbf16, #tpu.memory_space<vmem>>, vector<1x16x16xbf16>
    %366 = vector.shape_cast %365 : vector<1x16x16xbf16> to vector<16x16xbf16>
    %cst_283 = arith.constant dense<0.000000e+00> : vector<16x384xf32>
    %367 = tpu.matmul %366, %364, %cst_283 {dimension_numbers = #tpu.dot_dimension_numbers<[1], [0], [0], [1], [0, 0, 1, 1], [], []>} : vector<16x16xbf16>, vector<16x384xbf16>, vector<16x384xf32> -> vector<16x384xf32>
    %368 = arith.addf %363, %367 : vector<16x384xf32>
    %369 = vector.extract_strided_slice %349 {offsets = [0, 128], sizes = [16, 384], strides = [1, 1]} : vector<16x640xbf16> to vector<16x384xbf16>
    %c4_284 = arith.constant 4 : index
    %c0_285 = arith.constant 0 : index
    %c0_286 = arith.constant 0 : index
    %370 = vector.load %arg23[%c4_284, %c0_285, %c0_286] : memref<9x16x16xbf16, #tpu.memory_space<vmem>>, vector<1x16x16xbf16>
    %371 = vector.shape_cast %370 : vector<1x16x16xbf16> to vector<16x16xbf16>
    %cst_287 = arith.constant dense<0.000000e+00> : vector<16x384xf32>
    %372 = tpu.matmul %371, %369, %cst_287 {dimension_numbers = #tpu.dot_dimension_numbers<[1], [0], [0], [1], [0, 0, 1, 1], [], []>} : vector<16x16xbf16>, vector<16x384xbf16>, vector<16x384xf32> -> vector<16x384xf32>
    %373 = arith.addf %368, %372 : vector<16x384xf32>
    %374 = vector.extract_strided_slice %349 {offsets = [0, 129], sizes = [16, 384], strides = [1, 1]} : vector<16x640xbf16> to vector<16x384xbf16>
    %c5_288 = arith.constant 5 : index
    %c0_289 = arith.constant 0 : index
    %c0_290 = arith.constant 0 : index
    %375 = vector.load %arg23[%c5_288, %c0_289, %c0_290] : memref<9x16x16xbf16, #tpu.memory_space<vmem>>, vector<1x16x16xbf16>
    %376 = vector.shape_cast %375 : vector<1x16x16xbf16> to vector<16x16xbf16>
    %cst_291 = arith.constant dense<0.000000e+00> : vector<16x384xf32>
    %377 = tpu.matmul %376, %374, %cst_291 {dimension_numbers = #tpu.dot_dimension_numbers<[1], [0], [0], [1], [0, 0, 1, 1], [], []>} : vector<16x16xbf16>, vector<16x384xbf16>, vector<16x384xf32> -> vector<16x384xf32>
    %378 = arith.addf %373, %377 : vector<16x384xf32>
    %379 = vector.extract_strided_slice %349 {offsets = [0, 145], sizes = [16, 384], strides = [1, 1]} : vector<16x640xbf16> to vector<16x384xbf16>
    %c6_292 = arith.constant 6 : index
    %c0_293 = arith.constant 0 : index
    %c0_294 = arith.constant 0 : index
    %380 = vector.load %arg23[%c6_292, %c0_293, %c0_294] : memref<9x16x16xbf16, #tpu.memory_space<vmem>>, vector<1x16x16xbf16>
    %381 = vector.shape_cast %380 : vector<1x16x16xbf16> to vector<16x16xbf16>
    %cst_295 = arith.constant dense<0.000000e+00> : vector<16x384xf32>
    %382 = tpu.matmul %381, %379, %cst_295 {dimension_numbers = #tpu.dot_dimension_numbers<[1], [0], [0], [1], [0, 0, 1, 1], [], []>} : vector<16x16xbf16>, vector<16x384xbf16>, vector<16x384xf32> -> vector<16x384xf32>
    %383 = arith.addf %378, %382 : vector<16x384xf32>
    %384 = vector.extract_strided_slice %349 {offsets = [0, 146], sizes = [16, 384], strides = [1, 1]} : vector<16x640xbf16> to vector<16x384xbf16>
    %c7_296 = arith.constant 7 : index
    %c0_297 = arith.constant 0 : index
    %c0_298 = arith.constant 0 : index
    %385 = vector.load %arg23[%c7_296, %c0_297, %c0_298] : memref<9x16x16xbf16, #tpu.memory_space<vmem>>, vector<1x16x16xbf16>
    %386 = vector.shape_cast %385 : vector<1x16x16xbf16> to vector<16x16xbf16>
    %cst_299 = arith.constant dense<0.000000e+00> : vector<16x384xf32>
    %387 = tpu.matmul %386, %384, %cst_299 {dimension_numbers = #tpu.dot_dimension_numbers<[1], [0], [0], [1], [0, 0, 1, 1], [], []>} : vector<16x16xbf16>, vector<16x384xbf16>, vector<16x384xf32> -> vector<16x384xf32>
    %388 = arith.addf %383, %387 : vector<16x384xf32>
    %389 = vector.extract_strided_slice %349 {offsets = [0, 147], sizes = [16, 384], strides = [1, 1]} : vector<16x640xbf16> to vector<16x384xbf16>
    %c8_300 = arith.constant 8 : index
    %c0_301 = arith.constant 0 : index
    %c0_302 = arith.constant 0 : index
    %390 = vector.load %arg23[%c8_300, %c0_301, %c0_302] : memref<9x16x16xbf16, #tpu.memory_space<vmem>>, vector<1x16x16xbf16>
    %391 = vector.shape_cast %390 : vector<1x16x16xbf16> to vector<16x16xbf16>
    %cst_303 = arith.constant dense<0.000000e+00> : vector<16x384xf32>
    %392 = tpu.matmul %391, %389, %cst_303 {dimension_numbers = #tpu.dot_dimension_numbers<[1], [0], [0], [1], [0, 0, 1, 1], [], []>} : vector<16x16xbf16>, vector<16x384xbf16>, vector<16x384xf32> -> vector<16x384xf32>
    %393 = arith.addf %388, %392 : vector<16x384xf32>
    %c0_304 = arith.constant 0 : index
    %c0_305 = arith.constant 0 : index
    %394 = vector.load %arg24[%c0_304, %c0_305] : memref<16x1xf32, #tpu.memory_space<vmem>>, vector<16x1xf32>
    %395 = vector.broadcast %394 : vector<16x1xf32> to vector<16x384xf32>
    %396 = arith.addf %393, %395 : vector<16x384xf32>
    %397 = arith.mulf %396, %47 : vector<16x384xf32>
    %c0_306 = arith.constant 0 : index
    %c128_307 = arith.constant 128 : index
    %398 = vector.load %arg30[%c0_306, %c128_307] : memref<16x640xbf16, #tpu.memory_space<vmem>>, vector<16x384xbf16>
    %399 = arith.extf %398 : vector<16x384xbf16> to vector<16x384xf32>
    %400 = arith.addf %397, %399 : vector<16x384xf32>
    %401 = arith.truncf %400 : vector<16x384xf32> to vector<16x384xbf16>
    %c0_308 = arith.constant 0 : index
    %c128_309 = arith.constant 128 : index
    %402 = vector.load %arg29[%c0_308, %c128_309] : memref<48x640xbf16, #tpu.memory_space<vmem>>, vector<16x384xbf16>
    tpu.vector_store %arg29[%c0_308, %c128_309], %401 {strides = array<i32>} : memref<48x640xbf16, #tpu.memory_space<vmem>>, vector<16x384xbf16>,
    %c0_310 = arith.constant 0 : index
    %c0_311 = arith.constant 0 : index
    %403 = vector.load %arg29[%c0_310, %c0_311] : memref<48x640xbf16, #tpu.memory_space<vmem>>, vector<16x640xbf16>
    %404 = vector.extract_strided_slice %403 {offsets = [0, 109], sizes = [16, 384], strides = [1, 1]} : vector<16x640xbf16> to vector<16x384xbf16>
    %c0_312 = arith.constant 0 : index
    %c0_313 = arith.constant 0 : index
    %c0_314 = arith.constant 0 : index
    %405 = vector.load %arg25[%c0_312, %c0_313, %c0_314] : memref<9x1x16xbf16, #tpu.memory_space<vmem>>, vector<1x1x16xbf16>
    %406 = vector.shape_cast %405 : vector<1x1x16xbf16> to vector<1x16xbf16>
    %cst_315 = arith.constant dense<0.000000e+00> : vector<1x384xf32>
    %407 = tpu.matmul %406, %404, %cst_315 {dimension_numbers = #tpu.dot_dimension_numbers<[1], [0], [0], [1], [0, 0, 1, 1], [], []>} : vector<1x16xbf16>, vector<16x384xbf16>, vector<1x384xf32> -> vector<1x384xf32>
    %408 = vector.extract_strided_slice %403 {offsets = [0, 110], sizes = [16, 384], strides = [1, 1]} : vector<16x640xbf16> to vector<16x384xbf16>
    %c1_316 = arith.constant 1 : index
    %c0_317 = arith.constant 0 : index
    %c0_318 = arith.constant 0 : index
    %409 = vector.load %arg25[%c1_316, %c0_317, %c0_318] : memref<9x1x16xbf16, #tpu.memory_space<vmem>>, vector<1x1x16xbf16>
    %410 = vector.shape_cast %409 : vector<1x1x16xbf16> to vector<1x16xbf16>
    %cst_319 = arith.constant dense<0.000000e+00> : vector<1x384xf32>
    %411 = tpu.matmul %410, %408, %cst_319 {dimension_numbers = #tpu.dot_dimension_numbers<[1], [0], [0], [1], [0, 0, 1, 1], [], []>} : vector<1x16xbf16>, vector<16x384xbf16>, vector<1x384xf32> -> vector<1x384xf32>
    %412 = arith.addf %407, %411 : vector<1x384xf32>
    %413 = vector.extract_strided_slice %403 {offsets = [0, 111], sizes = [16, 384], strides = [1, 1]} : vector<16x640xbf16> to vector<16x384xbf16>
    %c2_320 = arith.constant 2 : index
    %c0_321 = arith.constant 0 : index
    %c0_322 = arith.constant 0 : index
    %414 = vector.load %arg25[%c2_320, %c0_321, %c0_322] : memref<9x1x16xbf16, #tpu.memory_space<vmem>>, vector<1x1x16xbf16>
    %415 = vector.shape_cast %414 : vector<1x1x16xbf16> to vector<1x16xbf16>
    %cst_323 = arith.constant dense<0.000000e+00> : vector<1x384xf32>
    %416 = tpu.matmul %415, %413, %cst_323 {dimension_numbers = #tpu.dot_dimension_numbers<[1], [0], [0], [1], [0, 0, 1, 1], [], []>} : vector<1x16xbf16>, vector<16x384xbf16>, vector<1x384xf32> -> vector<1x384xf32>
    %417 = arith.addf %412, %416 : vector<1x384xf32>
    %418 = vector.extract_strided_slice %403 {offsets = [0, 127], sizes = [16, 384], strides = [1, 1]} : vector<16x640xbf16> to vector<16x384xbf16>
    %c3_324 = arith.constant 3 : index
    %c0_325 = arith.constant 0 : index
    %c0_326 = arith.constant 0 : index
    %419 = vector.load %arg25[%c3_324, %c0_325, %c0_326] : memref<9x1x16xbf16, #tpu.memory_space<vmem>>, vector<1x1x16xbf16>
    %420 = vector.shape_cast %419 : vector<1x1x16xbf16> to vector<1x16xbf16>
    %cst_327 = arith.constant dense<0.000000e+00> : vector<1x384xf32>
    %421 = tpu.matmul %420, %418, %cst_327 {dimension_numbers = #tpu.dot_dimension_numbers<[1], [0], [0], [1], [0, 0, 1, 1], [], []>} : vector<1x16xbf16>, vector<16x384xbf16>, vector<1x384xf32> -> vector<1x384xf32>
    %422 = arith.addf %417, %421 : vector<1x384xf32>
    %423 = vector.extract_strided_slice %403 {offsets = [0, 128], sizes = [16, 384], strides = [1, 1]} : vector<16x640xbf16> to vector<16x384xbf16>
    %c4_328 = arith.constant 4 : index
    %c0_329 = arith.constant 0 : index
    %c0_330 = arith.constant 0 : index
    %424 = vector.load %arg25[%c4_328, %c0_329, %c0_330] : memref<9x1x16xbf16, #tpu.memory_space<vmem>>, vector<1x1x16xbf16>
    %425 = vector.shape_cast %424 : vector<1x1x16xbf16> to vector<1x16xbf16>
    %cst_331 = arith.constant dense<0.000000e+00> : vector<1x384xf32>
    %426 = tpu.matmul %425, %423, %cst_331 {dimension_numbers = #tpu.dot_dimension_numbers<[1], [0], [0], [1], [0, 0, 1, 1], [], []>} : vector<1x16xbf16>, vector<16x384xbf16>, vector<1x384xf32> -> vector<1x384xf32>
    %427 = arith.addf %422, %426 : vector<1x384xf32>
    %428 = vector.extract_strided_slice %403 {offsets = [0, 129], sizes = [16, 384], strides = [1, 1]} : vector<16x640xbf16> to vector<16x384xbf16>
    %c5_332 = arith.constant 5 : index
    %c0_333 = arith.constant 0 : index
    %c0_334 = arith.constant 0 : index
    %429 = vector.load %arg25[%c5_332, %c0_333, %c0_334] : memref<9x1x16xbf16, #tpu.memory_space<vmem>>, vector<1x1x16xbf16>
    %430 = vector.shape_cast %429 : vector<1x1x16xbf16> to vector<1x16xbf16>
    %cst_335 = arith.constant dense<0.000000e+00> : vector<1x384xf32>
    %431 = tpu.matmul %430, %428, %cst_335 {dimension_numbers = #tpu.dot_dimension_numbers<[1], [0], [0], [1], [0, 0, 1, 1], [], []>} : vector<1x16xbf16>, vector<16x384xbf16>, vector<1x384xf32> -> vector<1x384xf32>
    %432 = arith.addf %427, %431 : vector<1x384xf32>
    %433 = vector.extract_strided_slice %403 {offsets = [0, 145], sizes = [16, 384], strides = [1, 1]} : vector<16x640xbf16> to vector<16x384xbf16>
    %c6_336 = arith.constant 6 : index
    %c0_337 = arith.constant 0 : index
    %c0_338 = arith.constant 0 : index
    %434 = vector.load %arg25[%c6_336, %c0_337, %c0_338] : memref<9x1x16xbf16, #tpu.memory_space<vmem>>, vector<1x1x16xbf16>
    %435 = vector.shape_cast %434 : vector<1x1x16xbf16> to vector<1x16xbf16>
    %cst_339 = arith.constant dense<0.000000e+00> : vector<1x384xf32>
    %436 = tpu.matmul %435, %433, %cst_339 {dimension_numbers = #tpu.dot_dimension_numbers<[1], [0], [0], [1], [0, 0, 1, 1], [], []>} : vector<1x16xbf16>, vector<16x384xbf16>, vector<1x384xf32> -> vector<1x384xf32>
    %437 = arith.addf %432, %436 : vector<1x384xf32>
    %438 = vector.extract_strided_slice %403 {offsets = [0, 146], sizes = [16, 384], strides = [1, 1]} : vector<16x640xbf16> to vector<16x384xbf16>
    %c7_340 = arith.constant 7 : index
    %c0_341 = arith.constant 0 : index
    %c0_342 = arith.constant 0 : index
    %439 = vector.load %arg25[%c7_340, %c0_341, %c0_342] : memref<9x1x16xbf16, #tpu.memory_space<vmem>>, vector<1x1x16xbf16>
    %440 = vector.shape_cast %439 : vector<1x1x16xbf16> to vector<1x16xbf16>
    %cst_343 = arith.constant dense<0.000000e+00> : vector<1x384xf32>
    %441 = tpu.matmul %440, %438, %cst_343 {dimension_numbers = #tpu.dot_dimension_numbers<[1], [0], [0], [1], [0, 0, 1, 1], [], []>} : vector<1x16xbf16>, vector<16x384xbf16>, vector<1x384xf32> -> vector<1x384xf32>
    %442 = arith.addf %437, %441 : vector<1x384xf32>
    %443 = vector.extract_strided_slice %403 {offsets = [0, 147], sizes = [16, 384], strides = [1, 1]} : vector<16x640xbf16> to vector<16x384xbf16>
    %c8_344 = arith.constant 8 : index
    %c0_345 = arith.constant 0 : index
    %c0_346 = arith.constant 0 : index
    %444 = vector.load %arg25[%c8_344, %c0_345, %c0_346] : memref<9x1x16xbf16, #tpu.memory_space<vmem>>, vector<1x1x16xbf16>
    %445 = vector.shape_cast %444 : vector<1x1x16xbf16> to vector<1x16xbf16>
    %cst_347 = arith.constant dense<0.000000e+00> : vector<1x384xf32>
    %446 = tpu.matmul %445, %443, %cst_347 {dimension_numbers = #tpu.dot_dimension_numbers<[1], [0], [0], [1], [0, 0, 1, 1], [], []>} : vector<1x16xbf16>, vector<16x384xbf16>, vector<1x384xf32> -> vector<1x384xf32>
    %447 = arith.addf %442, %446 : vector<1x384xf32>
    %c0_348 = arith.constant 0 : index
    %c0_349 = arith.constant 0 : index
    %448 = vector.load %arg26[%c0_348, %c0_349] : memref<1x1xf32, #tpu.memory_space<vmem>>, vector<1x1xf32>
    %449 = vector.broadcast %448 : vector<1x1xf32> to vector<1x384xf32>
    %450 = arith.addf %447, %449 : vector<1x384xf32>
    %451 = arith.mulf %450, %6 : vector<1x384xf32>
    %452 = arith.addf %451, %17 : vector<1x384xf32>
    %c0_350 = arith.constant 0 : index
    %c0_351 = arith.constant 0 : index
    %c0_352 = arith.constant 0 : index
    %453 = vector.load %arg27[%c0_350, %c0_351, %c0_352] : memref<1x1x384xf32, #tpu.memory_space<vmem>>, vector<1x1x384xf32>
    %454 = vector.shape_cast %453 : vector<1x1x384xf32> to vector<1x384xf32>
    %455 = vector.shape_cast %452 : vector<1x384xf32> to vector<1x1x384xf32>
    tpu.vector_store %arg27[%c0_350, %c0_351, %c0_352], %455 {strides = array<i32>} : memref<1x1x384xf32, #tpu.memory_space<vmem>>, vector<1x1x384xf32>,
    %c0_353 = arith.constant 0 : index
    %c0_354 = arith.constant 0 : index
    %c0_355 = arith.constant 0 : index
    %456 = vector.load %arg2[%c0_353, %c0_354, %c0_355] : memref<1x1x384xf32, #tpu.memory_space<vmem>>, vector<1x1x384xf32>
    %457 = vector.shape_cast %456 : vector<1x1x384xf32> to vector<1x384xf32>
    %c0_356 = arith.constant 0 : index
    %c0_357 = arith.constant 0 : index
    %c0_358 = arith.constant 0 : index
    %458 = vector.load %arg3[%c0_356, %c0_357, %c0_358] : memref<1x1x384xf32, #tpu.memory_space<vmem>>, vector<1x1x384xf32>
    %459 = vector.shape_cast %458 : vector<1x1x384xf32> to vector<1x384xf32>
    %cst_359 = arith.constant 1.000000e+00 : f32
    %460 = vector.broadcast %cst_359 : f32 to vector<1x384xf32>
    %461 = arith.subf %460, %459 : vector<1x384xf32>
    %462 = arith.mulf %461, %452 : vector<1x384xf32>
    %463 = arith.mulf %459, %457 : vector<1x384xf32>
    %464 = arith.addf %462, %463 : vector<1x384xf32>
    %c0_360 = arith.constant 0 : index
    %c0_361 = arith.constant 0 : index
    %c0_362 = arith.constant 0 : index
    %465 = vector.load %arg28[%c0_360, %c0_361, %c0_362] : memref<1x1x384xf32, #tpu.memory_space<vmem>>, vector<1x1x384xf32>
    %466 = vector.shape_cast %465 : vector<1x1x384xf32> to vector<1x384xf32>
    %467 = vector.shape_cast %464 : vector<1x384xf32> to vector<1x1x384xf32>
    tpu.vector_store %arg28[%c0_360, %c0_361, %c0_362], %467 {strides = array<i32>} : memref<1x1x384xf32, #tpu.memory_space<vmem>>, vector<1x1x384xf32>,
    return
  }
  func.func @transform_0(%arg0: i32) -> (i32, i32, i32) {
    %c0_i32 = arith.constant 0 : i32
    %c0_i32_0 = arith.constant 0 : i32
    %c0_i32_1 = arith.constant 0 : i32
    return %arg0, %c0_i32, %c0_i32_0 : i32, i32, i32
  }
  func.func @transform_1(%arg0: i32) -> (i32, i32, i32) {
    %c0_i32 = arith.constant 0 : i32
    %c0_i32_0 = arith.constant 0 : i32
    %c0_i32_1 = arith.constant 0 : i32
    return %arg0, %c0_i32, %c0_i32_0 : i32, i32, i32
  }
  func.func @transform_2(%arg0: i32) -> (i32, i32, i32) {
    %c0_i32 = arith.constant 0 : i32
    %c0_i32_0 = arith.constant 0 : i32
    %c0_i32_1 = arith.constant 0 : i32
    return %arg0, %c0_i32, %c0_i32_0 : i32, i32, i32
  }
  func.func @transform_3(%arg0: i32) -> (i32, i32) {
    %c0_i32 = arith.constant 0 : i32
    %c0_i32_0 = arith.constant 0 : i32
    %c0_i32_1 = arith.constant 0 : i32
    return %c0_i32, %c0_i32_0 : i32, i32
  }
  func.func @transform_4(%arg0: i32) -> (i32, i32) {
    %c0_i32 = arith.constant 0 : i32
    %c0_i32_0 = arith.constant 0 : i32
    %c0_i32_1 = arith.constant 0 : i32
    return %c0_i32, %c0_i32_0 : i32, i32
  }
  func.func @transform_5(%arg0: i32) -> (i32, i32) {
    %c0_i32 = arith.constant 0 : i32
    %c0_i32_0 = arith.constant 0 : i32
    %c0_i32_1 = arith.constant 0 : i32
    return %c0_i32, %c0_i32_0 : i32, i32
  }
  func.func @transform_6(%arg0: i32) -> (i32, i32, i32) {
    %c0_i32 = arith.constant 0 : i32
    %c0_i32_0 = arith.constant 0 : i32
    %c0_i32_1 = arith.constant 0 : i32
    %c0_i32_2 = arith.constant 0 : i32
    return %c0_i32, %c0_i32_0, %c0_i32_1 : i32, i32, i32
  }
  func.func @transform_7(%arg0: i32) -> (i32, i32) {
    %c0_i32 = arith.constant 0 : i32
    %c0_i32_0 = arith.constant 0 : i32
    %c0_i32_1 = arith.constant 0 : i32
    return %c0_i32, %c0_i32_0 : i32, i32
  }
  func.func @transform_8(%arg0: i32) -> (i32, i32, i32) {
    %c0_i32 = arith.constant 0 : i32
    %c0_i32_0 = arith.constant 0 : i32
    %c0_i32_1 = arith.constant 0 : i32
    %c0_i32_2 = arith.constant 0 : i32
    return %c0_i32, %c0_i32_0, %c0_i32_1 : i32, i32, i32
  }
  func.func @transform_9(%arg0: i32) -> (i32, i32) {
    %c0_i32 = arith.constant 0 : i32
    %c0_i32_0 = arith.constant 0 : i32
    %c0_i32_1 = arith.constant 0 : i32
    return %c0_i32, %c0_i32_0 : i32, i32
  }
  func.func @transform_10(%arg0: i32) -> (i32, i32, i32) {
    %c0_i32 = arith.constant 0 : i32
    %c0_i32_0 = arith.constant 0 : i32
    %c0_i32_1 = arith.constant 0 : i32
    %c0_i32_2 = arith.constant 0 : i32
    return %c0_i32, %c0_i32_0, %c0_i32_1 : i32, i32, i32
  }
  func.func @transform_11(%arg0: i32) -> (i32, i32) {
    %c0_i32 = arith.constant 0 : i32
    %c0_i32_0 = arith.constant 0 : i32
    %c0_i32_1 = arith.constant 0 : i32
    return %c0_i32, %c0_i32_0 : i32, i32
  }
  func.func @transform_12(%arg0: i32) -> (i32, i32) {
    %c0_i32 = arith.constant 0 : i32
    %c0_i32_0 = arith.constant 0 : i32
    %c0_i32_1 = arith.constant 0 : i32
    return %c0_i32, %c0_i32_0 : i32, i32
  }
  func.func @transform_13(%arg0: i32) -> (i32, i32) {
    %c0_i32 = arith.constant 0 : i32
    %c0_i32_0 = arith.constant 0 : i32
    %c0_i32_1 = arith.constant 0 : i32
    return %c0_i32, %c0_i32_0 : i32, i32
  }
  func.func @transform_14(%arg0: i32) -> (i32, i32, i32) {
    %c0_i32 = arith.constant 0 : i32
    %c0_i32_0 = arith.constant 0 : i32
    %c0_i32_1 = arith.constant 0 : i32
    %c0_i32_2 = arith.constant 0 : i32
    return %c0_i32, %c0_i32_0, %c0_i32_1 : i32, i32, i32
  }
  func.func @transform_15(%arg0: i32) -> (i32, i32) {
    %c0_i32 = arith.constant 0 : i32
    %c0_i32_0 = arith.constant 0 : i32
    %c0_i32_1 = arith.constant 0 : i32
    return %c0_i32, %c0_i32_0 : i32, i32
  }
  func.func @transform_16(%arg0: i32) -> (i32, i32, i32) {
    %c0_i32 = arith.constant 0 : i32
    %c0_i32_0 = arith.constant 0 : i32
    %c0_i32_1 = arith.constant 0 : i32
    %c0_i32_2 = arith.constant 0 : i32
    return %c0_i32, %c0_i32_0, %c0_i32_1 : i32, i32, i32
  }
  func.func @transform_17(%arg0: i32) -> (i32, i32) {
    %c0_i32 = arith.constant 0 : i32
    %c0_i32_0 = arith.constant 0 : i32
    %c0_i32_1 = arith.constant 0 : i32
    return %c0_i32, %c0_i32_0 : i32, i32
  }
  func.func @transform_18(%arg0: i32) -> (i32, i32) {
    %c0_i32 = arith.constant 0 : i32
    %c0_i32_0 = arith.constant 0 : i32
    %c0_i32_1 = arith.constant 0 : i32
    return %c0_i32, %c0_i32_0 : i32, i32
  }
  func.func @transform_19(%arg0: i32) -> (i32, i32) {
    %c0_i32 = arith.constant 0 : i32
    %c0_i32_0 = arith.constant 0 : i32
    %c0_i32_1 = arith.constant 0 : i32
    return %c0_i32, %c0_i32_0 : i32, i32
  }
  func.func @transform_20(%arg0: i32) -> (i32, i32) {
    %c0_i32 = arith.constant 0 : i32
    %c0_i32_0 = arith.constant 0 : i32
    %c0_i32_1 = arith.constant 0 : i32
    return %c0_i32, %c0_i32_0 : i32, i32
  }
  func.func @transform_21(%arg0: i32) -> (i32, i32) {
    %c0_i32 = arith.constant 0 : i32
    %c0_i32_0 = arith.constant 0 : i32
    %c0_i32_1 = arith.constant 0 : i32
    return %c0_i32, %c0_i32_0 : i32, i32
  }
  func.func @transform_22(%arg0: i32) -> (i32, i32, i32) {
    %c0_i32 = arith.constant 0 : i32
    %c0_i32_0 = arith.constant 0 : i32
    %c0_i32_1 = arith.constant 0 : i32
    %c0_i32_2 = arith.constant 0 : i32
    return %c0_i32, %c0_i32_0, %c0_i32_1 : i32, i32, i32
  }
  func.func @transform_23(%arg0: i32) -> (i32, i32) {
    %c0_i32 = arith.constant 0 : i32
    %c0_i32_0 = arith.constant 0 : i32
    %c0_i32_1 = arith.constant 0 : i32
    return %c0_i32, %c0_i32_0 : i32, i32
  }
  func.func @transform_24(%arg0: i32) -> (i32, i32, i32) {
    %c0_i32 = arith.constant 0 : i32
    %c0_i32_0 = arith.constant 0 : i32
    %c0_i32_1 = arith.constant 0 : i32
    %c0_i32_2 = arith.constant 0 : i32
    return %c0_i32, %c0_i32_0, %c0_i32_1 : i32, i32, i32
  }
  func.func @transform_25(%arg0: i32) -> (i32, i32) {
    %c0_i32 = arith.constant 0 : i32
    %c0_i32_0 = arith.constant 0 : i32
    %c0_i32_1 = arith.constant 0 : i32
    return %c0_i32, %c0_i32_0 : i32, i32
  }
  func.func @transform_26(%arg0: i32) -> (i32, i32, i32) {
    %c0_i32 = arith.constant 0 : i32
    %c0_i32_0 = arith.constant 0 : i32
    %c0_i32_1 = arith.constant 0 : i32
    return %arg0, %c0_i32, %c0_i32_0 : i32, i32, i32
  }
  func.func @transform_27(%arg0: i32) -> (i32, i32, i32) {
    %c0_i32 = arith.constant 0 : i32
    %c0_i32_0 = arith.constant 0 : i32
    %c0_i32_1 = arith.constant 0 : i32
    return %arg0, %c0_i32, %c0_i32_0 : i32, i32, i32
  }
}

</mosaic_0001>

<bundles_post_ra>
// kernel: tpu_custom_call.1
= control target key start
LH: loop header
LB: loop body
LE: loop exit
PB: predicated region body
PF: predicated region fallthrough
CT: control target
= control target key end

     0   :  { %s10334_s0 = inlined_call_operand.vmem [shape: f32[2,1,384], index: 0, kind: input, shape index: {}]   ;;  %s10335_s1 = inlined_call_operand.vmem [shape: f32[2,1,384], index: 1, kind: input, shape index: {}]   ;;  %s10336_s2 = inlined_call_operand.vmem [shape: f32[2,1,384], index: 2, kind: input, shape index: {}]   ;;  %s10337_s3 = inlined_call_operand.vmem [shape: f32[1,384], index: 3, kind: input, shape index: {}]   ;;  %s10338_s4 = inlined_call_operand.vmem [shape: bf16[16,9], index: 4, kind: input, shape index: {}]   ;;  %s10339_s5 = inlined_call_operand.vmem [shape: f32[16,1], index: 5, kind: input, shape index: {}]   ;;  %s10340_s6 = inlined_call_operand.hbm [shape: bf16[9,16,16], index: 6, kind: input, shape index: {}]   ;;  %s10341_s7 = inlined_call_operand.vmem [shape: f32[16,1], index: 7, kind: input, shape index: {}]   ;;  %s10342_s8 = inlined_call_operand.hbm [shape: bf16[9,16,16], index: 8, kind: input, shape index: {}]   ;;  %s10343_s9 = inlined_call_operand.vmem [shape: f32[16,1], index: 9, kind: input, shape index: {}]   ;;  %s10344_s10 = inlined_call_operand.hbm [shape: bf16[9,16,32], index: 10, kind: input, shape index: {}]   ;;  %s10345_s11 = inlined_call_operand.vmem [shape: f32[16,1], index: 11, kind: input, shape index: {}]   ;;  %s10346_s12 = inlined_call_operand.vmem [shape: bf16[16,48], index: 12, kind: input, shape index: {}]   ;;  %s10347_s13 = inlined_call_operand.vmem [shape: f32[16,1], index: 13, kind: input, shape index: {}]   ;;  %s10348_s14 = inlined_call_operand.hbm [shape: bf16[9,16,16], index: 14, kind: input, shape index: {}]   ;;  %s10349_s15 = inlined_call_operand.vmem [shape: f32[16,1], index: 15, kind: input, shape index: {}]   ;;  %s10350_s16 = inlined_call_operand.hbm [shape: bf16[9,16,32], index: 16, kind: input, shape index: {}]   ;;  %s10351_s17 = inlined_call_operand.vmem [shape: f32[16,1], index: 17, kind: input, shape index: {}]   ;;  %s10352_s18 = inlined_call_operand.vmem [shape: bf16[16,48], index: 18, kind: input, shape index: {}]   ;;  %s10353_s19 = inlined_call_operand.vmem [shape: f32[16,1], index: 19, kind: input, shape index: {}]   ;;  %s10354_s20 = inlined_call_operand.vmem [shape: bf16[16,32], index: 20, kind: input, shape index: {}]   ;;  %s10355_s21 = inlined_call_operand.vmem [shape: f32[16,1], index: 21, kind: input, shape index: {}]   ;;  %s10356_s22 = inlined_call_operand.hbm [shape: bf16[9,16,16], index: 22, kind: input, shape index: {}]   ;;  %s10357_s23 = inlined_call_operand.vmem [shape: f32[16,1], index: 23, kind: input, shape index: {}]   ;;  %s10358_s24 = inlined_call_operand.vmem [shape: bf16[9,1,16], index: 24, kind: input, shape index: {}]   ;;  %s10359_s25 = inlined_call_operand.<no memory space> [shape: f32[1,1], index: 25, kind: input, shape index: {}]   ;;  %s10360_s26 = inlined_call_operand.hbm [shape: f32[2,1,384], index: 26, kind: output, shape index: {0}]   ;;  %s10361_s27 = inlined_call_operand.hbm [shape: f32[2,1,384], index: 27, kind: output, shape index: {1}]  }
   0x1   :  { %10381 = sst [smem:[#allocation34_spill]] %s10334_s0  ;;  %v33_v0 = vstv %s10359_s25 }
   0x2   :  { %10382 = sst [smem:[#allocation35_spill]] %s10335_s1  ;;  %34 = vst [vmem:[#allocation5] sm:$0x1] %v33_v0 }
   0x3   :  { %10383 = sst [smem:[#allocation36_spill]] %s10336_s2 }
   0x4   :  { %10384 = sst [smem:[#allocation37_spill]] %s10337_s3 }
   0x5   :  { %10385 = sst [smem:[#allocation38_spill]] %s10338_s4 }
   0x6   :  { %10386 = sst [smem:[#allocation39_spill]] %s10339_s5 }
   0x7   :  { %10387 = sst [smem:[#allocation40_spill]] %s10340_s6 }
   0x8   :  { %10388 = sst [smem:[#allocation41_spill]] %s10341_s7 }
   0x9   :  { %10389 = sst [smem:[#allocation42_spill]] %s10342_s8 }
   0xa   :  { %10390 = sst [smem:[#allocation43_spill]] %s10343_s9 }
   0xb   :  { %10391 = sst [smem:[#allocation44_spill]] %s10344_s10 }
   0xc   :  { %10392 = sst [smem:[#allocation45_spill]] %s10345_s11 }
   0xd   :  { %10393 = sst [smem:[#allocation46_spill]] %s10346_s12 }
   0xe   :  { %10394 = sst [smem:[#allocation47_spill]] %s10347_s13 }
   0xf   :  { %10395 = sst [smem:[#allocation48_spill]] %s10348_s14 }
  0x10   :  { %10396 = sst [smem:[#allocation49_spill]] %s10360_s26 }
  0x11   :  { %10397 = sst [smem:[#allocation50_spill]] %s10361_s27 }
  0x12   :  { %35 = vsyncpa [#allocation7], 0 }
  0x13   :  { %36 = vsyncpa [#allocation10], 0 }
  0x14   :  { %37 = vsyncpa [#allocation13], 0 }
  0x15   :  { %38 = vsyncpa [#allocation16], 0 }
  0x16   :  { %39 = vsyncpa [#allocation8], 0 }
  0x17   :  { %41 = vsyncpa [#allocation8 + $0x1], 0 }
  0x18   :  { %42 = vsyncpa [#allocation19], 0 }
  0x19   :  { %44 = vsyncpa [#allocation19 + $0x1], 0  ;;  %s8622_s8 = smov 0   ;;  %s8624_s30 = smov 0  }
  0x1a   :  { %s8626_s9 = smov 0   ;;  %s8628_s5 = smov 0  }
  0x1b LB: > { %10398 = sst [smem:[#allocation26_spill]] %s8446_s8  ;;  %s8643_s25 = sadd.s32 4294967295, %s8458_s5   ;;  %s8458_s5 = sphi %s8628_s5, %s10436_s5   ;;  %s8454_s9 = sphi %s8626_s9, %s10439_s9   ;;  %s8450_s30 = sphi %s8624_s30, %s10438_s30   ;;  %s8446_s8 = sphi %s8622_s8, %s10437_s8  }
  0x1c   : > { %10399 = sst [smem:[#allocation27_spill]] %s8450_s30  ;;  %s7116_s28 = sadd.s32 4294967294, %s8458_s5  }
  0x1d   : > { %10400 = sst [smem:[#allocation28_spill]] %s8454_s9  ;;  %s8647_s0 = sadd.s32 1, %s8458_s5  }
  0x1e   : > { %10401 = sst [smem:[#allocation29_spill]] %s8458_s5  ;;  %s618_s10 = sadd.s32 1, %s8454_s9 }
  0x1f   : > { %10402 = sst [smem:[#allocation30_spill]] %s8647_s0  ;;  %s615_s29 = ssub.s32 %s8458_s5, %s8647_s0 }
  0x20   : > { %p628_p0 = scmp.ne.s32.totalorder %s8454_s9, %s8450_s30  ;;  %p616_p1 = scmp.eq.s32.totalorder %s615_s29, 0 }
  0x21   : > { %p629_p2 = scmp.eq.s32.totalorder %s8643_s25, 1  ;;  %p634_p3 = scmp.ne.s32.totalorder %s8450_s30, %s8446_s8 }
  0x22   : > { %p635_p4 = scmp.eq.s32.totalorder %s7116_s28, 1  ;;  %p7117_p7 = scmp.ge.s32.totalorder %s8458_s5, 1 }
  0x23   : > { %s8658_s1 = scalar_select %p616_p1, %s8454_s9, %s618_s10  }
  0x24   : > { %p8660_p5 = por %p629_p2, %p628_p0  ;;  %p8664_p6 = por %p635_p4, %p634_p3 }
  0x25   : > { %10403 = sst [smem:[#allocation31_spill]] %s8658_s1  ;;  %p668_p8 = scmp.lt.s32.totalorder %s8458_s5, 3 }
  0x26   : > { %s10404_s6 = scalar_select %p8660_p5, 1, 0 }
  0x27   : > { %s10406_s11 = scalar_select %p8664_p6, 1, 0 }
  0x28   : > { %10405 = sst [smem:[#allocation32_spill]] %s10404_s6  ;;  %p8036_p9 = scmp.eq.s32.totalorder %s8643_s25, 0 }
  0x29   : > { %10407 = sst [smem:[#allocation33_spill]] %s10406_s11  ;;  %p8671_p10 = pnand %p7117_p7, %p668_p8 }
  0x2a   : > { %s10409_s4 = sld [smem:[#allocation42_spill]]  ;;  %s8460_s0 = smov [#allocation9]  }
  0x2b   : > { %p8010_p11 = pneg %p8671_p10  ;;  %s10410_s14 = sld [smem:[#allocation48_spill]] }
  0x2c   : > { %s707_s11 = sshll.u32 %s8460_s0, 4  ;;  %s8461_s3 = smov 64   ;;  %s708_s11 = int_to_ptr.vmem [resolvable:$true] %s707_s11 }
  0x2d   : > { %p8685_p12 = pnand %p8036_p9, %p8010_p11  ;;  %s8462_s7 = smov 4  }
  0x2e   : > { %s10412_s8 = sld [smem:[#allocation40_spill]]  ;;  %s8464_s30 = smov [#allocation6]  }
  0x2f   : > { %s10413_s27 = sld [smem:[#allocation44_spill]]  ;;  %s791_s6 = sshll.u32 %s10356_s22, 4  ;;  %s792_s6 = int_to_ptr.hbm [resolvable:$true] %s791_s6 }
  0x30   : > { %s705_s28 = sshll.u32 %s10409_s4, 4  ;;  %s8463_s4 = smov [#allocation12]   ;;  %s706_s28 = int_to_ptr.hbm [resolvable:$true] %s705_s28 }
  0x31   : > { %s745_s1 = sshll.u32 %s10410_s14, 4  ;;  %s747_s10 = sshll.u32 %s8463_s4, 4  ;;  %s746_s1 = int_to_ptr.hbm [resolvable:$true] %s745_s1  ;;  %s748_s10 = int_to_ptr.vmem [resolvable:$true] %s747_s10 }
  0x32   : > { %8016 = dma.hbm_to_vmem [thread:$0]  (!%p8685_p12), %s706_s28, 1152, %s708_s11, [#allocation10], %s8461_s3, %s8461_s3, %s8462_s7  }
  0x33   : > { %8022 = dma.hbm_to_vmem [thread:$0]  (!%p8685_p12), %s746_s1, 1152, %s748_s10, [#allocation13], %s8461_s3, %s8461_s3, %s8462_s7  }
  0x34   : > { %s688_s5 = sshll.u32 %s10412_s8, 4  ;;  %s690_s11 = sshll.u32 %s8464_s30, 4  ;;  %s689_s5 = int_to_ptr.hbm [resolvable:$true] %s688_s5  ;;  %s691_s11 = int_to_ptr.vmem [resolvable:$true] %s690_s11 }
  0x35   : > { %s722_s26 = sshll.u32 %s10413_s27, 4  ;;  %s8465_s14 = smov [#allocation11]   ;;  %s723_s26 = int_to_ptr.hbm [resolvable:$true] %s722_s26 }
  0x36   : > { %8013 = dma.hbm_to_vmem [thread:$0]  (!%p8685_p12), %s689_s5, 1152, %s691_s11, [#allocation7], %s8461_s3, %s8461_s3, %s8462_s7  }
  0x37   : > { %s724_s8 = sshll.u32 %s8465_s14, 4  ;;  %s762_s1 = sshll.u32 %s10350_s16, 4  ;;  %s725_s8 = int_to_ptr.vmem [resolvable:$true] %s724_s8  ;;  %s763_s1 = int_to_ptr.hbm [resolvable:$true] %s762_s1 }
  0x38   : > { %8019 = dma.hbm_to_vmem [thread:$0]  (!%p8685_p12), %s723_s26, 1152, %s725_s8, [#allocation10], %s8461_s3, %s8461_s3, %s8462_s7  }
  0x39   : > { %s8466_s10 = smov [#allocation14]   ;;  %s8467_s29 = smov [#allocation15]  }
  0x3a   : > { %s764_s5 = sshll.u32 %s8466_s10, 4  ;;  %s793_s0 = sshll.u32 %s8467_s29, 4  ;;  %s765_s5 = int_to_ptr.vmem [resolvable:$true] %s764_s5  ;;  %s794_s0 = int_to_ptr.vmem [resolvable:$true] %s793_s0 }
  0x3b   : > { %8025 = dma.hbm_to_vmem [thread:$0]  (!%p8685_p12), %s763_s1, 1152, %s765_s5, [#allocation13], %s8461_s3, %s8461_s3, %s8462_s7  }
  0x3c   : > { %8028 = dma.hbm_to_vmem [thread:$0]  (!%p8685_p12), %s792_s6, 1152, %s794_s0, [#allocation16], %s8461_s3, %s8461_s3, %s8462_s7  }
  0x3d   : > { %839 = sbr.rel (%p8671_p10) target bundleno = 3778 (0xec2), region = 124 }
  0x42   : > { %8421 = dma.done.wait (%p8036_p9), [#allocation7], 1152  }
  0x43   : > { %8423 = vsyncadd (%p8036_p9), [#allocation7], 4294966144 }
  0x44   : > { %8425 = dma.done.wait (%p8036_p9), [#allocation10], 2304  }
  0x45   : > { %8427 = vsyncadd (%p8036_p9), [#allocation10], 4294964992 }
  0x46   : > { %8429 = dma.done.wait (%p8036_p9), [#allocation13], 2304  }
  0x47   : > { %8431 = vsyncadd (%p8036_p9), [#allocation13], 4294964992 }
  0x48   : > { %8433 = dma.done.wait (%p8036_p9), [#allocation16], 1152  }
  0x49   : > { %8435 = vsyncadd (%p8036_p9), [#allocation16], 4294966144  ;;  %v8468_v1 = vmov 0   ;;  %p949_p13 = scmp.lt.s32.totalorder %s8643_s25, 1  ;;  %s10414_s7 = sld [smem:[#allocation34_spill]]  ;;  %vm995_vm0 = vcmask 1040384  }
  0x4a   : > { %968 = vst [vmem:[#allocation2 + $0x10] sm:$0xf] %v8468_v1  ;;  %8165 = vset.pattern.permute.xlu0 %v8468_v1  ;;  %8166 = vset.pattern.permute.xlu1 %v8468_v1  ;;  %s10415_s28 = sld [smem:[#allocation35_spill]]  ;;  %s8469_s10 = smov 111   ;;  %vm996_vm1 = vsmask.f32 256 }
  0x4b   : > { %8167 = vset.pattern.permute.xlu2 %v8468_v1  ;;  %s950_s26 = scalar_select %p949_p13, %s8643_s25, 1  ;;  %962 = vst [vmem:[#allocation2] sm:$0xf] %v8468_v1  ;;  %vm998_vm2 = vcmask 1044484   ;;  %vm999_vm3 = vsmask.f32 4352  ;;  %vm997_vm4 = vmand %vm995_vm0, %vm996_vm1 }
  0x4c   : > { %963 = vst [vmem:[#allocation2 + $0x14] sm:$0xf] %v8468_v1  ;;  %s10416_s30 = sld [smem:[#allocation36_spill]]  ;;  %s8470_s5 = smov 127   ;;  %vm1000_vm5 = vmand %vm998_vm2, %vm999_vm3  ;;  %v1002_v13 = vld [vmem:[#allocation2 + $0x4] sm:$0x11] }
  0x4d   : > { %s7979_s9 = smul.u32 3, %s950_s26  ;;  %964 = vst [vmem:[#allocation2 + $0x28] sm:$0xf] %v8468_v1  ;;  %s8471_s29 = smov 110   ;;  %vm1001_vm6 = vmor %vm1000_vm5, %vm997_vm4  ;;  %v1005_v14 = vld [vmem:[#allocation2 + $0xc] sm:$0x1] }
  0x4e   : > { %965 = vst [vmem:[#allocation2 + $0x3c] sm:$0xf] %v8468_v1  ;;  %s8472_s0 = smov 109   ;;  %s8473_s26 = smov 126   ;;  %vm1019_vm7 = vcmask 1043456   ;;  %vm1070_vm8 = vcmask 900096  }
  0x4f   : > { %s952_s11 = scalar_lea.vmem %s10414_s7, %s7979_s9  ;;  %969 = vst [vmem:[#allocation2 + $0x24] sm:$0xf] %v8468_v1  ;;  %vm1053_vm9 = vcmask 908288   ;;  %vm1036_vm10 = vcmask 1039360   ;;  %vm1087_vm11 = vcmask 891904   ;;  %vm1131_vm12 = vcmask 1031168  }
  0x50   : > { %s8757_s4 = scalar_lea.vmem %s10415_s28, %s7979_s9  ;;  %v979_v3 = vld [vmem:[%s952_s11] sm:$0x7]  ;;  %970 = vst [vmem:[#allocation2 + $0x38] sm:$0xf] %v8468_v1  ;;  %vm1252_vm13 = vcmask 1041408   ;;  %vm1257_vm14 = vcmask 1042432  }
  0x51   : > { %v1010_v2 = vld [vmem:[#allocation2 + $0x10] sm:$0x1]  ;;  %v980_v4 = vld [vmem:[%s8757_s4] sm:$0x7]  ;;  %971 = vst [vmem:[#allocation2 + $0x4c] sm:$0xf] %v8468_v1 }
  0x52   : > { %s8762_s6 = scalar_lea.vmem %s10416_s30, %s7979_s9  ;;  %1048 = vrot.lane.b32.xlu1 %v1010_v2, %s8469_s10  ;;  %1031 = vrot.lane.b32.xlu0 %v1010_v2, %s8470_s5  ;;  %974 = vst [vmem:[#allocation3] sm:$0xf] %v8468_v1  ;;  %vm1267_vm15 = vcmask 1044480   ;;  %vm1272_vm1 = vcmask 1045504   ;;  %vm1277_vm2 = vcmask 1046528   ;;  %s8474_s9 = smov 19  }
  0x53   : > { %v981_v5 = vld [vmem:[%s8762_s6] sm:$0x7]  ;;  %1065 = vrot.lane.b32.xlu2 %v1010_v2, %s8471_s29  ;;  %975 = vst [vmem:[#allocation3 + $0x14] sm:$0xf] %v8468_v1  ;;  %s10417_s7 = sld [smem:[#allocation39_spill]]  ;;  %vm1317_vm3 = vcmask 154624  }
  0x54   : > { %v982_v6 = vsub.f32 1.0, %v981_v5  ;;  %v984_v7 = vmul.f32 %v981_v5, %v980_v4  ;;  %976 = vst [vmem:[#allocation3 + $0x10] sm:$0xf] %v8468_v1  ;;  %s10418_s1 = sld [smem:[#allocation38_spill]]  ;;  %s8476_s27 = smov 18   ;;  %vm1439_vm5 = vcmask 146432  }
  0x55   : > { %977 = vst [vmem:[#allocation3 + $0x24] sm:$0xf] %v8468_v1  ;;  %s10419_s2 = sld [smem:[#allocation37_spill]]  ;;  %s8477_s3 = smov 17  }
  0x56   : > { %v983_v8 = vmul.f32 %v982_v6, %v979_v3  ;;  %s8478_s11 = smov 1   ;;  %s10420_s28 = sld [smem:[#allocation41_spill]] }
  0x57   : > { %s10421_s14 = sld [smem:[#allocation43_spill]]  ;;  %s7980_s8 = smul.u32 3, %s8643_s25 }
  0x58   : > { %v8770_v9 = vadd.f32 %v984_v7, %v983_v8  ;;  %s10423_s13 = sld [smem:[#allocation47_spill]] }
  0x59   : > { %s10424_s12 = sld [smem:[#allocation46_spill]] }
  0x5a   : > { %v10377_v10 = vperm.slane %v8770_v9, 0  ;;  %v10378_v11 = vperm.slane %v8770_v9, 1  ;;  %v8775_v12 = vperm.slane %v8770_v9, 2 }
  0x5c   : > { %v993_v15 = vpack.c.bf16 %v10378_v11, %v10377_v10  ;;  %v994_v16 = vpack.c.bf16 %v8775_v12, %v8775_v12 }
  0x5e   : > { %v1003_v17 = vsel %vm1001_vm6, %v993_v15, %v1002_v13  ;;  %v1006_v18 = vsel %vm997_vm4, %v994_v16, %v1005_v14  ;;  %vm1321_vm4 = vcmask 72704   ;;  %vm1446_vm6 = vcmask 130048  }
  0x5f   : > { %1004 = vst [vmem:[#allocation2 + $0x4] sm:$0x11] %v1003_v17 }
  0x60   : > { %1007 = vst [vmem:[#allocation2 + $0xc] sm:$0x1] %v1006_v18 }
  0x66   : > { %v1008_v19 = vld [vmem:[#allocation2] sm:$0x11] }
  0x67   : > { %1044 = vrot.lane.b32.xlu1 %v1008_v19, %s8469_s10  ;;  %1027 = vrot.lane.b32.xlu0 %v1008_v19, %s8470_s5  ;;  %v1009_v20 = vld [vmem:[#allocation2 + $0x8] sm:$0x11]  ;;  %v8792_v21 = vunpack.c.l.bf16 %v1008_v19  ;;  %v8794_v22 = vunpack.c.h.bf16 %v1008_v19  ;;  %v1017_v34 = vrot.slane %v1008_v19, 4 }
  0x68   : > { %1061 = vrot.lane.b32.xlu2 %v1008_v19, %s8471_s29  ;;  %v8799_v26 = vunpack.c.l.bf16 %v1009_v20  ;;  %v8801_v27 = vunpack.c.h.bf16 %v1009_v20  ;;  %v1018_v35 = vrot.slane %v1009_v20, 4 }
  0x69   : > { %v1099_v23 = vrot.slane %v8792_v21, 7  ;;  %v1100_v24 = vrot.slane %v8794_v22, 7  ;;  %v1139_v39 = vrot.slane %v8792_v21, 5  ;;  %v1140_v40 = vrot.slane %v8794_v22, 5 }
  0x6a   : > { %v1101_v28 = vrot.slane %v8799_v26, 7  ;;  %v1102_v29 = vrot.slane %v8801_v27, 7  ;;  %v1121_v30 = vrot.slane %v8799_v26, 6  ;;  %v1122_v31 = vrot.slane %v8801_v27, 6 }
  0x6b   : > { %v8100_v25 = vpack.i.bf16 %v1100_v24, %v1099_v23  ;;  %v1020_v36 = vsel %vm1019_vm7, %v1017_v34, %v1018_v35  ;;  %v1119_v41 = vrot.slane %v8792_v21, 6  ;;  %v1120_v42 = vrot.slane %v8794_v22, 6 }
  0x6c   : > { %v8105_v32 = vpack.i.bf16 %v1102_v29, %v1101_v28  ;;  %v8115_v33 = vpack.i.bf16 %v1122_v31, %v1121_v30  ;;  %v1023_v37 = vunpack.c.l.bf16 %v1020_v36  ;;  %v1024_v38 = vunpack.c.h.bf16 %v1020_v36 }
  0x6d   : > { %v8120_v45 = vpack.i.bf16 %v1140_v40, %v1139_v39  ;;  %v8110_v46 = vpack.i.bf16 %v1120_v42, %v1119_v41  ;;  %v1141_v48 = vrot.slane %v8799_v26, 5  ;;  %v1142_v49 = vrot.slane %v8801_v27, 5 }
  0x6e   : > { %v1162_v43 = vrot.slane %v1023_v37, 4  ;;  %v1163_v44 = vrot.slane %v1024_v38, 4  ;;  %v1025_v60 = vunpack.c.l.bf16 %v1018_v35 }
  0x6f   : > { %1046 = vrot.lane.b32.xlu1 %v1009_v20, %s8469_s10  ;;  %1029 = vrot.lane.b32.xlu0 %v1009_v20, %s8470_s5  ;;  %v8125_v50 = vpack.i.bf16 %v1142_v49, %v1141_v48 }
  0x70   : > { %1063 = vrot.lane.b32.xlu2 %v1009_v20, %s8471_s29  ;;  %v8130_v47 = vpack.i.bf16 %v1163_v44, %v1162_v43  ;;  %v1164_v4 = vrot.slane %v1025_v60, 4 }
  0x77   : > { %1080 = vrot.lane.b32.xlu1 %v1009_v20, %s8472_s0  ;;  %1078 = vrot.lane.b32.xlu0 %v1008_v19, %s8472_s0 }
  0x78   : > { %1082 = vrot.lane.b32.xlu2 %v1010_v2, %s8472_s0 }
  0x7f   : > { %8101 = vrot.lane.b32.xlu0 %v8100_v25, %s8470_s5  ;;  %8106 = vrot.lane.b32.xlu1 %v8105_v32, %s8470_s5 }
  0x80   : > { %8111 = vrot.lane.b32.xlu2 %v8110_v46, %s8473_s26 }
  0x87   : > { %8116 = vrot.lane.b32.xlu0 %v8115_v33, %s8473_s26  ;;  %8121 = vrot.lane.b32.xlu1 %v8120_v45, %s8471_s29 }
  0x88   : > { %8126 = vrot.lane.b32.xlu2 %v8125_v50, %s8471_s29 }
  0x8f   : > { %8131 = vrot.lane.b32.xlu0 %v8130_v47, %s8472_s0 }
  0xad   : > { %v1066_v51 = vpop.permute.xlu2 %1065 }
  0xc2   : > { %v1062_v54 = vpop.permute.xlu2 %1061 }
  0xc3   : > { %v1067_v58 = vrot.slane %v1062_v54, 4 }
  0xc4   : > { %v1049_v52 = vpop.permute.xlu1 %1048  ;;  %v1032_v53 = vpop.permute.xlu0 %1031 }
  0xca   : > { %v1064_v57 = vpop.permute.xlu2 %1063 }
  0xcb   : > { %v1068_v59 = vrot.slane %v1064_v57, 4 }
  0xcd   : > { %v1069_v61 = vsel %vm1019_vm7, %v1067_v58, %v1068_v59  ;;  %v1072_v5 = vsel %vm1070_vm8, %v1068_v59, %v1066_v51 }
  0xce   : > { %v1071_v6 = vsel %vm1070_vm8, %v1069_v61, %v1064_v57  ;;  %v1077_v36 = vunpack.c.l.bf16 %v1072_v5 }
  0xcf   : > { %v1075_v31 = vunpack.c.l.bf16 %v1071_v6  ;;  %v1076_v32 = vunpack.c.h.bf16 %v1071_v6 }
  0xd0   : > { %v1219_v44 = vrot.slane %v1077_v36, 1 }
  0xd1   : > { %v1217_v43 = vrot.slane %v1075_v31, 1  ;;  %v1218_v46 = vrot.slane %v1076_v32, 1 }
  0xd9   : > { %v1045_v55 = vpop.permute.xlu1 %1044  ;;  %v1028_v56 = vpop.permute.xlu0 %1027 }
  0xda   : > { %v1050_v0 = vrot.slane %v1045_v55, 4  ;;  %v1033_v1 = vrot.slane %v1028_v56, 4 }
  0xe1   : > { %v1047_v62 = vpop.permute.xlu1 %1046  ;;  %v1030_v63 = vpop.permute.xlu0 %1029 }
  0xe2   : > { %v1051_v2 = vrot.slane %v1047_v62, 4  ;;  %v1034_v3 = vrot.slane %v1030_v63, 4 }
  0xe4   : > { %v1052_v7 = vsel %vm1019_vm7, %v1050_v0, %v1051_v2  ;;  %v1035_v8 = vsel %vm1019_vm7, %v1033_v1, %v1034_v3  ;;  %v1038_v13 = vsel %vm1036_vm10, %v1034_v3, %v1032_v53  ;;  %v1055_v17 = vsel %vm1053_vm9, %v1051_v2, %v1049_v52  ;;  %v1083_v53 = vpop.permute.xlu2 %1082 }
  0xe5   : > { %v1054_v14 = vsel %vm1053_vm9, %v1052_v7, %v1047_v62  ;;  %v1037_v15 = vsel %vm1036_vm10, %v1035_v8, %v1030_v63  ;;  %v1043_v16 = vunpack.c.l.bf16 %v1038_v13  ;;  %v1060_v35 = vunpack.c.l.bf16 %v1055_v17 }
  0xe6   : > { %v1058_v18 = vunpack.c.l.bf16 %v1054_v14  ;;  %v1059_v19 = vunpack.c.h.bf16 %v1054_v14  ;;  %v1041_v20 = vunpack.c.l.bf16 %v1037_v15  ;;  %v1042_v23 = vunpack.c.h.bf16 %v1037_v15 }
  0xe7   : > { %v1183_v24 = vrot.slane %v1043_v16, 3  ;;  %v1201_v47 = vrot.slane %v1060_v35, 2  ;;  %v8155_v52 = vpack.i.bf16 %v1219_v44, %v1218_v46 }
  0xe8   : > { %v1199_v25 = vrot.slane %v1058_v18, 2  ;;  %v1200_v28 = vrot.slane %v1059_v19, 2  ;;  %v1181_v29 = vrot.slane %v1041_v20, 3  ;;  %v1182_v30 = vrot.slane %v1042_v23, 3 }
  0xe9   : > { %v1081_v33 = vpop.permute.xlu1 %1080  ;;  %v1079_v34 = vpop.permute.xlu0 %1078  ;;  %v8150_v51 = vpack.i.bf16 %v1217_v43, %v1201_v47 }
  0xea   : > { %v1085_v37 = vrot.slane %v1081_v33, 4  ;;  %v1084_v38 = vrot.slane %v1079_v34, 4  ;;  %v8135_v39 = vpack.i.bf16 %v1181_v29, %v1164_v4  ;;  %v8140_v40 = vpack.i.bf16 %v1183_v24, %v1182_v30 }
  0xeb   : > { %v8145_v41 = vpack.i.bf16 %v1200_v28, %v1199_v25 }
  0xec   : > { %v1086_v42 = vsel %vm1019_vm7, %v1084_v38, %v1085_v37  ;;  %8136 = vrot.lane.b32.xlu1 %v8135_v39, %s8472_s0  ;;  %8141 = vrot.lane.b32.xlu2 %v8140_v40, %s8472_s0  ;;  %v1089_v54 = vsel %vm1087_vm11, %v1085_v37, %v1083_v53  ;;  %v8112_v57 = vpop.permute.xlu2 %8111 }
  0xed   : > { %8146 = vrot.lane.b32.xlu0 %v8145_v41, %s8472_s0  ;;  %v1088_v45 = vsel %vm1087_vm11, %v1086_v42, %v1081_v33  ;;  %v1094_v55 = vunpack.c.l.bf16 %v1089_v54  ;;  %v8114_v1 = vunpack.i.h.bf16 %v8112_v57  ;;  %v8113_v4 = vunpack.i.l.bf16 %v8112_v57 }
  0xee   : > { %v1092_v48 = vunpack.c.l.bf16 %v1088_v45  ;;  %v1093_v49 = vunpack.c.h.bf16 %v1088_v45 }
  0xef   : > { %v1132_v20 = vsel %vm1131_vm12, %v8113_v4, %v8114_v1 }
  0xf0   : > { %v8160_v50 = vpack.i.bf16 %v1093_v49, %v1092_v48 }
  0xf1   : > { %v8102_v56 = vpop.permute.xlu0 %8101  ;;  %v8107_v58 = vpop.permute.xlu1 %8106 }
  0xf2   : > { %v8104_v61 = vunpack.i.h.bf16 %v8102_v56  ;;  %v8108_v62 = vunpack.i.l.bf16 %v8107_v58  ;;  %v8103_v63 = vunpack.i.l.bf16 %v8102_v56  ;;  %v8109_v0 = vunpack.i.h.bf16 %v8107_v58 }
  0xf4   : > { %8151 = vrot.lane.b32.xlu1 %v8150_v51, %s8472_s0  ;;  %8156 = vrot.lane.b32.xlu2 %v8155_v52, %s8472_s0  ;;  %v8127_v60 = vpop.permute.xlu2 %8126  ;;  %v1113_v5 = vsel %vm1036_vm10, %v8104_v61, %v8108_v62  ;;  %v1112_v7 = vsel %vm1036_vm10, %v8103_v63, %v8104_v61  ;;  %v1114_v14 = vsel %vm1036_vm10, %v8108_v62, %v8109_v0 }
  0xf5   : > { %8161 = vrot.lane.b32.xlu0 %v8160_v50, %s8472_s0  ;;  %v8128_v13 = vunpack.i.l.bf16 %v8127_v60  ;;  %v1249_v16 = vsel %vm995_vm0, %v8794_v22, %v1113_v5  ;;  %v8129_v23 = vunpack.i.h.bf16 %v8127_v60  ;;  %v1248_v24 = vsel %vm995_vm0, %v8792_v21, %v1112_v7 }
  0xf6   : > { %v1251_v25 = vsel %vm995_vm0, %v8801_v27, %v8109_v0  ;;  %v1250_v28 = vsel %vm995_vm0, %v8799_v26, %v1114_v14  ;;  %v1253_v34 = vsel %vm1252_vm13, %v1248_v24, %v1132_v20 }
  0xf7   : > { %v1154_v27 = vsel %vm1070_vm8, %v8128_v13, %v8129_v23 }
  0xf9   : > { %v8117_v59 = vpop.permute.xlu0 %8116  ;;  %v8122_v3 = vpop.permute.xlu1 %8121 }
  0xfa   : > { %v8118_v2 = vunpack.i.l.bf16 %v8117_v59  ;;  %v8119_v8 = vunpack.i.h.bf16 %v8117_v59  ;;  %v8124_v15 = vunpack.i.h.bf16 %v8122_v3  ;;  %v8123_v19 = vunpack.i.l.bf16 %v8122_v3 }
  0xfc   : > { %1239 = vrot.lane.b32.xlu1 %v1094_v55, %s8472_s0  ;;  %v1133_v18 = vsel %vm1131_vm12, %v8114_v1, %v8118_v2  ;;  %v1134_v22 = vsel %vm1131_vm12, %v8118_v2, %v8119_v8  ;;  %v1153_v30 = vsel %vm1070_vm8, %v8124_v15, %v8128_v13  ;;  %v1152_v33 = vsel %vm1070_vm8, %v8123_v19, %v8124_v15 }
  0xfd   : > { %v1254_v29 = vsel %vm1252_vm13, %v1249_v16, %v1133_v18  ;;  %v1256_v26 = vsel %vm1252_vm13, %v1251_v25, %v8119_v8  ;;  %v1255_v37 = vsel %vm1252_vm13, %v1250_v28, %v1134_v22  ;;  %v1258_v41 = vsel %vm1257_vm14, %v1253_v34, %v1152_v33 }
  0xfe   : > { %v1259_v38 = vsel %vm1257_vm14, %v1254_v29, %v1153_v30  ;;  %v1261_v50 = vsel %vm1257_vm14, %v1256_v26, %v8129_v23  ;;  %v1260_v52 = vsel %vm1257_vm14, %v1255_v37, %v1154_v27  ;;  %v1288_v30 = vld [vmem:[%s10417_s7] sm:$0xff]  ;;  %v8475_v33 = vmov 65535  }
  0xff   : > { %v1325_v34 = vsel %vm1019_vm7, 4294967295, %v8475_v33  ;;  %v7851_v26 = vld [vmem:[%s10418_s1] sm:$0xff]  ;;  %vm1646_vm12 = vcmask 7168   ;;  %vm2875_vm14 = vcmask 261120  }
 0x101   : > { %v8132_v6 = vpop.permute.xlu0 %8131 }
 0x102   : > { %v8134_v31 = vunpack.i.h.bf16 %v8132_v6  ;;  %v8133_v32 = vunpack.i.l.bf16 %v8132_v6 }
 0x104   : > { %v1172_v40 = vsel %vm1087_vm11, %v8133_v32, %v8134_v31  ;;  %v1263_v48 = vsel %vm1019_vm7, %v1258_v41, %v8133_v32 }
 0x105   : > { %v1264_v49 = vsel %vm1019_vm7, %v1259_v38, %v1172_v40 }
 0x146   : > { %v8842_v17 = vpop.permute.xlu2 %8141 }
 0x147   : > { %v8143_v39 = vunpack.i.l.bf16 %v8842_v17  ;;  %v8144_v43 = vunpack.i.h.bf16 %v8842_v17 }
 0x149   : > { %v1191_v54 = vsel %vm1087_vm11, %v8143_v39, %v8144_v43 }
 0x14e   : > { %v8157_v47 = vpop.permute.xlu2 %8156 }
 0x14f   : > { %v8159_v58 = vunpack.i.h.bf16 %v8157_v47  ;;  %v8158_v59 = vunpack.i.l.bf16 %v8157_v47 }
 0x151   : > { %v1227_v23 = vsel %vm1087_vm11, %v8158_v59, %v8159_v58 }
 0x15e   : > { %v8137_v21 = vpop.permute.xlu1 %8136 }
 0x15f   : > { %v8139_v35 = vunpack.i.h.bf16 %v8137_v21  ;;  %v8147_v36 = vpop.permute.xlu0 %8146  ;;  %v8138_v42 = vunpack.i.l.bf16 %v8137_v21  ;;  %v1326_v21 = vsel %vm1267_vm15, %v1325_v34, 0  ;;  %v7858_v34 = vld [vmem:[#allocation6 + $0x8] sm:$0xff] }
 0x160   : > { %v8149_v44 = vunpack.i.h.bf16 %v8147_v36  ;;  %v8148_v45 = vunpack.i.l.bf16 %v8147_v36 }
 0x161   : > { %v1190_v46 = vsel %vm1087_vm11, %v8139_v35, %v8143_v39  ;;  %v1173_v51 = vsel %vm1087_vm11, %v8134_v31, %v8138_v42  ;;  %v1268_v53 = vsel %vm1267_vm15, %v1263_v48, %v8139_v35  ;;  %v1266_v7 = vsel %vm1019_vm7, %v1261_v50, %v8138_v42  ;;  %v1289_v31 = vld [vmem:[%s10417_s7 + $0x8] sm:$0xff] }
 0x162   : > { %v1208_v55 = vsel %vm1087_vm11, %v8148_v45, %v8149_v44  ;;  %v1269_v57 = vsel %vm1267_vm15, %v1264_v49, %v1190_v46  ;;  %v1265_v63 = vsel %vm1019_vm7, %v1260_v52, %v1173_v51  ;;  %v1273_v2 = vsel %vm1272_vm1, %v1268_v53, %v8148_v45  ;;  %v978_v46 = vld [vmem:[%s10419_s2] sm:$0x7]  ;;  %s10422_s2 = sld [smem:[#allocation45_spill]] }
 0x163   : > { %v1274_v6 = vsel %vm1272_vm1, %v1269_v57, %v1208_v55  ;;  %v1270_v16 = vsel %vm1267_vm15, %v1265_v63, %v1191_v54  ;;  %v1271_v18 = vsel %vm1267_vm15, %v1266_v7, %v8144_v43  ;;  %v7145_v43 = vld [vmem:[#allocation3] sm:$0xf]  ;;  %v8914_v49 = vperm.slane %v978_v46, 0 }
 0x164   : > { %v8916_v51 = vperm.slane %v978_v46, 1  ;;  %vm1572_vm7 = vcmask 138240   ;;  %vm3713_vm15 = vcmask 392192  }
 0x166   : > { %v8152_v56 = vpop.permute.xlu1 %8151 }
 0x167   : > { %v8154_v60 = vunpack.i.h.bf16 %v8152_v56  ;;  %v8153_v61 = vunpack.i.l.bf16 %v8152_v56  ;;  %v8162_v62 = vpop.permute.xlu0 %8161 }
 0x168   : > { %v8164_v0 = vunpack.i.h.bf16 %v8162_v62  ;;  %v8163_v1 = vunpack.i.l.bf16 %v8162_v62 }
 0x169   : > { %v1209_v3 = vsel %vm1087_vm11, %v8149_v44, %v8153_v61  ;;  %v1278_v4 = vsel %vm1277_vm2, %v1273_v2, %v8154_v60  ;;  %v1226_v5 = vsel %vm1087_vm11, %v8154_v60, %v8158_v59  ;;  %v1276_v20 = vsel %vm1272_vm1, %v1271_v18, %v8153_v61  ;;  %v7854_v44 = vld [vmem:[#allocation3 + $0x10] sm:$0xf0] }
 0x16a   : > { %v1282_v8 = vpack.c.bf16 %v8163_v1, %v1278_v4  ;;  %v1241_v13 = vsel %vm1087_vm11, %v8163_v1, %v8164_v0  ;;  %v1279_v14 = vsel %vm1277_vm2, %v1274_v6, %v1226_v5  ;;  %v1275_v17 = vsel %vm1272_vm1, %v1270_v16, %v1209_v3 }
 0x16b   : > { %v1283_v15 = vpack.c.bf16 %v1241_v13, %v1279_v14  ;;  %v1280_v25 = vsel %vm1277_vm2, %v1275_v17, %v1227_v23  ;;  %v1281_v22 = vsel %vm1277_vm2, %v1276_v20, %v8159_v58  ;;  %v7146_v45 = vor.u32 %v7854_v44, %v7145_v43 }
 0x16c   : > { %1309 = vrot.lane.b32.xlu2 %v1282_v8, %s8474_s9  ;;  %v8920_v59 = vperm.slane %v978_v46, 2  ;;  %v7857_v46 = vld [vmem:[#allocation6] sm:$0xff] }
 0x16d   : > { %1311 = vrot.lane.b32.xlu0 %v1283_v15, %s8474_s9 }
 0x16e   : > { %v1240_v19 = vpop.permute.xlu1 %1239 }
 0x16f   : > { %v1242_v24 = vsel %vm1087_vm11, %v8164_v0, %v1240_v19  ;;  %v1285_v29 = vpack.c.bf16 %v1240_v19, %v1281_v22 }
 0x170   : > { %v1284_v28 = vpack.c.bf16 %v1242_v24, %v1280_v25  ;;  %v7196_v25 = vld [vmem:[#allocation3 + $0x10] sm:$0xf] }
 0x172   : > { %1313 = vrot.lane.b32.xlu1 %v1284_v28, %s8474_s9  ;;  %v7856_v28 = vld [vmem:[#allocation3 + $0x20] sm:$0xf0] }
 0x173   : > { %v7197_v22 = vor.u32 %v7856_v28, %v7196_v25 }
 0x174   : > { %1315 = vrot.lane.b32.xlu2 %v1285_v29, %s8474_s9  ;;  %v2064_v29 = vld [vmem:[%s10420_s28 + $0x8] sm:$0xff] }
 0x175   : > { %1292 = vperm.xlu0 %8165, %v1288_v30  }
 0x17a   : > { %1297 = vperm.xlu1 %8166, %v1289_v31  }
 0x17c   : > { %1431 = vrot.lane.b32.xlu2 %v7146_v45, %s8476_s27 }
 0x1c6   : > { %v1310_v32 = vpop.permute.xlu2 %1309 }
 0x1ce   : > { %v1316_v37 = vpop.permute.xlu2 %1315 }
 0x1d6   : > { %v1432_v30 = vpop.permute.xlu2 %1431 }
 0x1df   : > { %v1312_v35 = vpop.permute.xlu0 %1311 }
 0x1e0   : > { %v1318_v36 = vsel %vm1317_vm3, %v1310_v32, %v1312_v35 }
 0x1e1   : > { %v1328_v27 = vand.u32 %v1326_v21, %v1318_v36 }
 0x1e3   : > { %1343 = vmatpush.bf16.msra.mxu0 %v1328_v27 }
 0x1e4   : > { %v1314_v38 = vpop.permute.xlu1 %1313 }
 0x1e5   : > { %v1319_v39 = vsel %vm1317_vm3, %v1312_v35, %v1314_v38  ;;  %v1320_v40 = vsel %vm1317_vm3, %v1314_v38, %v1316_v37 }
 0x1e6   : > { %7136 = vmatmul.msk.bf16.vlgmr.msra.gmra.mxu0 %vm1321_vm4, %v7851_v26  ;;  %v1331_v41 = vand.u32 %v1326_v21, %v1319_v39  ;;  %v1334_v42 = vand.u32 %v1326_v21, %v1320_v40 }
 0x1e7   : > { %v1293_v47 = vpop.permute.xlu0 %1292 }
 0x1e8   : > { %1357 = vmatpush.bf16.msra.mxu1 %v1331_v41  ;;  %1371 = vmatpush.bf16.msra.mxu2 %v1334_v42 }
 0x1eb   : > { %7137 = vmatmul.msk.bf16.vlgmr.msra.gmra.mxu1 %vm1321_vm4, %v7851_v26  ;;  %7138 = vmatmul.msk.bf16.vlgmr.msra.gmra.mxu2 %vm1321_vm4, %v7851_v26 }
 0x1ec   : > { %v1298_v56 = vpop.permute.xlu1 %1297 }
 0x263   : > { %v1345_v48 = vpop.f32.mrf.mxu0 }
 0x264   : > { %v1346_v50 = vadd.f32 %v1345_v48, %v1293_v47 }
 0x266   : > { %v1385_v54 = vmul.f32 %v8914_v49, %v1346_v50 }
 0x268   : > { %v1359_v52 = vpop.f32.mrf.mxu1 }
 0x269   : > { %v1360_v53 = vadd.f32 %v1359_v52, %v1293_v47 }
 0x26b   : > { %v1386_v55 = vmul.f32 %v8916_v51, %v1360_v53  ;;  %v1347_v57 = vpop.f32.mrf.mxu0 }
 0x26c   : > { %v1348_v61 = vadd.f32 %v1347_v57, %v1298_v56 }
 0x26d   : > { %v1391_v58 = vpack.c.bf16 %v1386_v55, %v1385_v54  ;;  %v7859_v54 = vld [vmem:[#allocation6 + $0x10] sm:$0xff] }
 0x26e   : > { %v1373_v60 = vpop.f32.mrf.mxu2  ;;  %v1388_v2 = vmul.f32 %v8914_v49, %v1348_v61 }
 0x26f   : > { %1395 = vst [vmem:[#allocation3 + $0x4] sm:$0xff] %v1391_v58  ;;  %v1374_v62 = vadd.f32 %v1373_v60, %v1293_v47 }
 0x270   : > { %v1361_v63 = vpop.f32.mrf.mxu1 }
 0x271   : > { %v1387_v0 = vmul.f32 %v8920_v59, %v1374_v62  ;;  %v1362_v1 = vadd.f32 %v1361_v63, %v1298_v56  ;;  %v7860_v62 = vld [vmem:[#allocation6 + $0x18] sm:$0xff] }
 0x273   : > { %v1392_v3 = vpack.c.bf16 %v1387_v0, %v1387_v0  ;;  %v1389_v4 = vmul.f32 %v8916_v51, %v1362_v1 }
 0x275   : > { %1396 = vst [vmem:[#allocation3 + $0xc] sm:$0xf] %v1392_v3  ;;  %v1393_v5 = vpack.c.bf16 %v1389_v4, %v1388_v2 }
 0x276   : > { %v1375_v6 = vpop.f32.mrf.mxu2  ;;  %v7153_v14 = vld [vmem:[#allocation3 + $0x8] sm:$0xf]  ;;  %v7852_v17 = vld [vmem:[#allocation3 + $0x4] sm:$0xf] }
 0x277   : > { %1397 = vst [vmem:[#allocation3 + $0x18] sm:$0xff] %v1393_v5  ;;  %v1376_v7 = vadd.f32 %v1375_v6, %v1298_v56 }
 0x279   : > { %v1390_v8 = vmul.f32 %v8920_v59, %v1376_v7 }
 0x27b   : > { %v1394_v13 = vpack.c.bf16 %v1390_v8, %v1390_v8  ;;  %v7861_v8 = vld [vmem:[#allocation6 + $0x20] sm:$0xff] }
 0x27c   : > { %v7853_v23 = vld [vmem:[#allocation3 + $0xc] sm:$0xf] }
 0x27d   : > { %1398 = vst [vmem:[#allocation3 + $0x20] sm:$0xf] %v1394_v13 }
 0x27e   : > { %v7147_v15 = vld [vmem:[#allocation3 + $0x14] sm:$0xf0]  ;;  %v7855_v16 = vld [vmem:[#allocation3 + $0x18] sm:$0xf0] }
 0x27f   : > { %v8926_v18 = vor.u32 %v7855_v16, %v7153_v14  ;;  %v8928_v19 = vor.u32 %v7852_v17, %v7147_v15 }
 0x281   : > { %1435 = vrot.lane.b32.xlu2 %v8926_v18, %s8476_s27  ;;  %1499 = vrot.lane.b32.xlu0 %v8928_v19, %s8474_s9 }
 0x282   : > { %1433 = vrot.lane.b32.xlu1 %v8928_v19, %s8476_s27 }
 0x284   : > { %v7155_v20 = vld [vmem:[#allocation3 + $0x1c] sm:$0xf0] }
 0x285   : > { %v8936_v24 = vor.u32 %v7853_v23, %v7155_v20 }
 0x289   : > { %1503 = vrot.lane.b32.xlu0 %v8936_v24, %s8474_s9  ;;  %1437 = vrot.lane.b32.xlu2 %v8936_v24, %s8476_s27 }
 0x28a   : > { %1501 = vrot.lane.b32.xlu1 %v8926_v18, %s8474_s9 }
 0x291   : > { %1570 = vrot.lane.b32.xlu0 %v8936_v24, %s8477_s3  ;;  %1568 = vrot.lane.b32.xlu2 %v8926_v18, %s8477_s3 }
 0x292   : > { %1497 = vrot.lane.b32.xlu1 %v7146_v45, %s8474_s9 }
 0x299   : > { %1638 = vrot.lane.b32.xlu0 %v7146_v45, %s8478_s11  ;;  %1566 = vrot.lane.b32.xlu2 %v8928_v19, %s8477_s3 }
 0x29a   : > { %1564 = vrot.lane.b32.xlu1 %v7146_v45, %s8477_s3 }
 0x2a1   : > { %1644 = vrot.lane.b32.xlu0 %v8936_v24, %s8478_s11  ;;  %1642 = vrot.lane.b32.xlu2 %v8926_v18, %s8478_s11 }
 0x2a2   : > { %1640 = vrot.lane.b32.xlu1 %v8928_v19, %s8478_s11 }
 0x2a9   : > { %1785 = vrot.lane.b32.xlu0 %v7197_v22, %s8470_s5  ;;  %1783 = vrot.lane.b32.xlu2 %v8936_v24, %s8470_s5 }
 0x2aa   : > { %1781 = vrot.lane.b32.xlu1 %v8926_v18, %s8470_s5 }
 0x2b1   : > { %1858 = vrot.lane.b32.xlu0 %v7197_v22, %s8469_s10  ;;  %1856 = vrot.lane.b32.xlu2 %v8936_v24, %s8469_s10 }
 0x2b2   : > { %1779 = vrot.lane.b32.xlu1 %v8928_v19, %s8470_s5 }
 0x2b9   : > { %1925 = vrot.lane.b32.xlu0 %v8928_v19, %s8471_s29  ;;  %1854 = vrot.lane.b32.xlu2 %v8926_v18, %s8469_s10 }
 0x2ba   : > { %1852 = vrot.lane.b32.xlu1 %v8928_v19, %s8469_s10 }
 0x2c1   : > { %2000 = vrot.lane.b32.xlu0 %v8926_v18, %s8472_s0  ;;  %1998 = vrot.lane.b32.xlu2 %v8928_v19, %s8472_s0 }
 0x2c2   : > { %1927 = vrot.lane.b32.xlu1 %v8926_v18, %s8471_s29 }
 0x2c9   : > { %1931 = vrot.lane.b32.xlu0 %v7197_v22, %s8471_s29  ;;  %2002 = vrot.lane.b32.xlu2 %v8936_v24, %s8472_s0 }
 0x2ca   : > { %1929 = vrot.lane.b32.xlu1 %v8936_v24, %s8471_s29 }
 0x2d1   : > { %2072 = vperm.xlu0 %8165, %v2064_v29  }
 0x2d2   : > { %2004 = vrot.lane.b32.xlu1 %v7197_v22, %s8472_s0 }
 0x2db   : > { %v1436_v31 = vpop.permute.xlu2 %1435 }
 0x2e3   : > { %v1438_v32 = vpop.permute.xlu2 %1437 }
 0x2e4   : > { %v1442_v33 = vsel %vm1439_vm5, %v1436_v31, %v1438_v32 }
 0x2e5   : > { %1485 = vmatpush.bf16.msrb.mxu1 %v1442_v33  ;;  %v7863_v33 = vld [vmem:[#allocation6 + $0x30] sm:$0xff] }
 0x2e8   : > { %7161 = vmatmul.msk.bf16.vlgmr.msrb.gmra.mxu1 %vm1446_vm6, %v7858_v34 }
 0x2eb   : > { %v1569_v21 = vpop.permute.xlu2 %1568 }
 0x2f3   : > { %v1500_v35 = vpop.permute.xlu0 %1499  ;;  %v1567_v39 = vpop.permute.xlu2 %1566 }
 0x2f4   : > { %v1434_v36 = vpop.permute.xlu1 %1433  ;;  %v1574_v47 = vsel %vm1572_vm7, %v1567_v39, %v1569_v21 }
 0x2f5   : > { %v1440_v27 = vsel %vm1439_vm5, %v1432_v30, %v1434_v36  ;;  %v1441_v26 = vsel %vm1439_vm5, %v1434_v36, %v1436_v31  ;;  %v7865_v36 = vld [vmem:[#allocation6 + $0x40] sm:$0xff] }
 0x2f6   : > { %1457 = vmatpush.bf16.msra.mxu3 %v1440_v27  ;;  %1471 = vmatpush.bf16.msrb.mxu0 %v1441_v26  ;;  %v2063_v27 = vld [vmem:[%s10420_s28] sm:$0xff] }
 0x2f7   : > { %2067 = vperm.xlu2 %8167, %v2063_v27  }
 0x2f9   : > { %7159 = vmatmul.msk.bf16.vlgmr.msra.gmra.mxu3 %vm1446_vm6, %v7858_v34  ;;  %7160 = vmatmul.msk.bf16.vlgmr.msrb.gmra.mxu0 %vm1446_vm6, %v7858_v34 }
 0x2fb   : > { %v1504_v37 = vpop.permute.xlu0 %1503  ;;  %v1643_v48 = vpop.permute.xlu2 %1642 }
 0x2fc   : > { %v1502_v38 = vpop.permute.xlu1 %1501 }
 0x2fd   : > { %v1507_v40 = vsel %vm1317_vm3, %v1502_v38, %v1504_v37  ;;  %v1506_v41 = vsel %vm1317_vm3, %v1500_v35, %v1502_v38 }
 0x2fe   : > { %1535 = vmatpush.bf16.msrb.mxu3 %v1506_v41  ;;  %1549 = vmatpush.bf16.msra.mxu0 %v1507_v40 }
 0x303   : > { %v1571_v42 = vpop.permute.xlu0 %1570  ;;  %v1784_v55 = vpop.permute.xlu2 %1783 }
 0x304   : > { %v1498_v43 = vpop.permute.xlu1 %1497  ;;  %v1575_v44 = vsel %vm1572_vm7, %v1569_v21, %v1571_v42 }
 0x305   : > { %v1505_v45 = vsel %vm1317_vm3, %v1498_v43, %v1500_v35  ;;  %1617 = vmatpush.bf16.msra.mxu3 %v1575_v44  ;;  %v7864_v35 = vld [vmem:[#allocation6 + $0x38] sm:$0xff] }
 0x306   : > { %1521 = vmatpush.bf16.msrb.mxu2 %v1505_v45 }
 0x309   : > { %7166 = vmatmul.msk.bf16.vlgmr.msrb.gmra.mxu2 %vm1446_vm6, %v7857_v46  ;;  %7167 = vmatmul.msk.bf16.vlgmr.msrb.gmra.mxu3 %vm1446_vm6, %v7857_v46 }
 0x30a   : > { %1603 = vmatpush.bf16.msra.mxu2 %v1574_v47  ;;  %7168 = vmatmul.msk.bf16.vlgmr.msra.gmra.mxu0 %vm1446_vm6, %v7857_v46 }
 0x30b   : > { %1725 = vmatpush.bf16.msrb.mxu3 %v8928_v19  ;;  %v1639_v50 = vpop.permute.xlu0 %1638  ;;  %v1857_v63 = vpop.permute.xlu2 %1856 }
 0x30c   : > { %v1565_v52 = vpop.permute.xlu1 %1564 }
 0x30d   : > { %v1573_v53 = vsel %vm1572_vm7, %v1565_v52, %v1567_v39 }
 0x30e   : > { %1589 = vmatpush.bf16.msra.mxu1 %v1573_v53 }
 0x311   : > { %7173 = vmatmul.msk.bf16.vlgmr.msra.gmra.mxu1 %vm1446_vm6, %v7859_v54 }
 0x313   : > { %v1645_v56 = vpop.permute.xlu0 %1644  ;;  %v1855_v6 = vpop.permute.xlu2 %1854 }
 0x314   : > { %v1641_v57 = vpop.permute.xlu1 %1640  ;;  %v1649_v58 = vsel %vm1646_vm12, %v1643_v48, %v1645_v56  ;;  %v1861_v13 = vsel %vm1053_vm9, %v1855_v6, %v1857_v63 }
 0x315   : > { %v1647_v60 = vsel %vm1646_vm12, %v1639_v50, %v1641_v57  ;;  %v1648_v61 = vsel %vm1646_vm12, %v1641_v57, %v1643_v48  ;;  %1691 = vmatpush.bf16.msrb.mxu2 %v1649_v58 }
 0x316   : > { %1663 = vmatpush.bf16.msrb.mxu0 %v1647_v60  ;;  %1677 = vmatpush.bf16.msrb.mxu1 %v1648_v61 }
 0x319   : > { %7174 = vmatmul.msk.bf16.vlgmr.msra.gmra.mxu2 %vm1446_vm6, %v7859_v54  ;;  %7175 = vmatmul.msk.bf16.vlgmr.msra.gmra.mxu3 %vm1446_vm6, %v7859_v54 }
 0x31a   : > { %1739 = vmatpush.bf16.msra.mxu0 %v8926_v18  ;;  %1753 = vmatpush.bf16.msra.mxu1 %v8936_v24  ;;  %v7862_v24 = vld [vmem:[#allocation6 + $0x28] sm:$0xff] }
 0x31b   : > { %7180 = vmatmul.msk.bf16.vlgmr.msrb.gmra.mxu0 %vm1446_vm6, %v7860_v62  ;;  %v1786_v0 = vpop.permute.xlu0 %1785  ;;  %v1999_v18 = vpop.permute.xlu2 %1998 }
 0x31c   : > { %v1782_v1 = vpop.permute.xlu1 %1781  ;;  %v1789_v2 = vsel %vm1036_vm10, %v1784_v55, %v1786_v0 }
 0x31d   : > { %v1788_v3 = vsel %vm1036_vm10, %v1782_v1, %v1784_v55 }
 0x31e   : > { %1831 = vmatpush.bf16.msrb.mxu0 %v1789_v2  ;;  %1817 = vmatpush.bf16.msra.mxu3 %v1788_v3 }
 0x321   : > { %7181 = vmatmul.msk.bf16.vlgmr.msrb.gmra.mxu1 %vm1446_vm6, %v7860_v62 }
 0x323   : > { %v1859_v4 = vpop.permute.xlu0 %1858  ;;  %v2003_v25 = vpop.permute.xlu2 %2002 }
 0x324   : > { %v1780_v5 = vpop.permute.xlu1 %1779  ;;  %v1862_v14 = vsel %vm1053_vm9, %v1857_v63, %v1859_v4 }
 0x325   : > { %v1787_v7 = vsel %vm1036_vm10, %v1780_v5, %v1782_v1 }
 0x326   : > { %1803 = vmatpush.bf16.msra.mxu2 %v1787_v7 }
 0x329   : > { %7182 = vmatmul.msk.bf16.vlgmr.msrb.gmra.mxu2 %vm1446_vm6, %v7860_v62  ;;  %7187 = vmatmul.msk.bf16.vlgmr.msrb.gmra.mxu3 %vm1446_vm6, %v7861_v8 }
 0x32a   : > { %1890 = vmatpush.bf16.msrb.mxu2 %v1861_v13  ;;  %1904 = vmatpush.bf16.msrb.mxu3 %v1862_v14 }
 0x32b   : > { %7188 = vmatmul.msk.bf16.vlgmr.msra.gmra.mxu0 %vm1446_vm6, %v7861_v8  ;;  %v1926_v15 = vpop.permute.xlu0 %1925 }
 0x32c   : > { %v1853_v16 = vpop.permute.xlu1 %1852 }
 0x32d   : > { %v1860_v17 = vsel %vm1053_vm9, %v1853_v16, %v1855_v6 }
 0x32e   : > { %1876 = vmatpush.bf16.msrb.mxu1 %v1860_v17  ;;  %v7228_v17 = vld [vmem:[#allocation2] sm:$0xf] }
 0x331   : > { %7189 = vmatmul.msk.bf16.vlgmr.msra.gmra.mxu1 %vm1446_vm6, %v7861_v8 }
 0x333   : > { %v2001_v19 = vpop.permute.xlu0 %2000 }
 0x334   : > { %v1928_v20 = vpop.permute.xlu1 %1927  ;;  %v2006_v28 = vsel %vm1087_vm11, %v1999_v18, %v2001_v19  ;;  %v2007_v22 = vsel %vm1087_vm11, %v2001_v19, %v2003_v25  ;;  %v7868_v18 = vld [vmem:[#allocation2 + $0x10] sm:$0xf0] }
 0x335   : > { %v1933_v23 = vsel %vm1070_vm8, %v1926_v15, %v1928_v20 }
 0x336   : > { %1949 = vmatpush.bf16.msra.mxu0 %v1933_v23 }
 0x339   : > { %7198 = vmatmul.msk.bf16.vlgmr.msra.gmra.mxu2 %vm1446_vm6, %v7862_v24  ;;  %7199 = vmatmul.msk.bf16.vlgmr.msra.gmra.mxu3 %vm1446_vm6, %v7862_v24 }
 0x33a   : > { %2022 = vmatpush.bf16.msra.mxu3 %v2006_v28 }
 0x33b   : > { %7200 = vmatmul.msk.bf16.vlgmr.msrb.gmra.mxu0 %vm1446_vm6, %v7862_v24  ;;  %v1932_v29 = vpop.permute.xlu0 %1931 }
 0x33c   : > { %2036 = vmatpush.bf16.msrb.mxu0 %v2007_v22  ;;  %v1930_v30 = vpop.permute.xlu1 %1929 }
 0x33d   : > { %v1935_v31 = vsel %vm1070_vm8, %v1930_v30, %v1932_v29  ;;  %v1934_v32 = vsel %vm1070_vm8, %v1928_v20, %v1930_v30  ;;  %v9047_v20 = vor.u32 %v7868_v18, %v7228_v17 }
 0x33e   : > { %1963 = vmatpush.bf16.msra.mxu1 %v1934_v32  ;;  %1977 = vmatpush.bf16.msra.mxu2 %v1935_v31 }
 0x33f   : > { %2127 = vrot.lane.b32.xlu1 %v9047_v20, %s8476_s27 }
 0x341   : > { %7205 = vmatmul.msk.bf16.vlgmr.msrb.gmra.mxu1 %vm1446_vm6, %v7863_v33 }
 0x344   : > { %v2005_v34 = vpop.permute.xlu1 %2004 }
 0x345   : > { %v2008_v21 = vsel %vm1087_vm11, %v2003_v25, %v2005_v34 }
 0x346   : > { %2050 = vmatpush.bf16.msrb.mxu1 %v2008_v21 }
 0x349   : > { %7206 = vmatmul.msk.bf16.vlgmr.msrb.gmra.mxu2 %vm1446_vm6, %v7863_v33  ;;  %7207 = vmatmul.msk.bf16.vlgmr.msrb.gmra.mxu3 %vm1446_vm6, %v7863_v33 }
 0x34b   : > { %7212 = vmatmul.msk.bf16.vlgmr.msra.gmra.mxu0 %vm1446_vm6, %v7864_v35 }
 0x351   : > { %7213 = vmatmul.msk.bf16.vlgmr.msra.gmra.mxu1 %vm1446_vm6, %v7864_v35 }
 0x359   : > { %7214 = vmatmul.msk.bf16.vlgmr.msra.gmra.mxu2 %vm1446_vm6, %v7864_v35  ;;  %7219 = vmatmul.msk.bf16.vlgmr.msra.gmra.mxu3 %vm1446_vm6, %v7865_v36 }
 0x35b   : > { %7220 = vmatmul.msk.bf16.vlgmr.msrb.gmra.mxu0 %vm1446_vm6, %v7865_v36 }
 0x361   : > { %7221 = vmatmul.msk.bf16.vlgmr.msrb.gmra.mxu1 %vm1446_vm6, %v7865_v36 }
 0x365   : > { %v1487_v38 = vpop.f32.mrf.mxu1 }
 0x36d   : > { %v1489_v41 = vpop.f32.mrf.mxu1 }
 0x376   : > { %v1473_v26 = vpop.f32.mrf.mxu0 }
 0x37c   : > { %v1459_v37 = vpop.f32.mrf.mxu3 }
 0x37e   : > { %v1475_v39 = vpop.f32.mrf.mxu0 }
 0x384   : > { %v1461_v40 = vpop.f32.mrf.mxu3 }
 0x387   : > { %v1551_v42 = vpop.f32.mrf.mxu0 }
 0x388   : > { %v1552_v43 = vadd.f32 %v1551_v42, %v1487_v38 }
 0x38c   : > { %v1523_v44 = vpop.f32.mrf.mxu2  ;;  %v1537_v45 = vpop.f32.mrf.mxu3 }
 0x38d   : > { %v1524_v46 = vadd.f32 %v1523_v44, %v1459_v37  ;;  %v1538_v47 = vadd.f32 %v1537_v45, %v1473_v26 }
 0x38e   : > { %v1591_v48 = vpop.f32.mrf.mxu1 }
 0x38f   : > { %v1553_v50 = vpop.f32.mrf.mxu0  ;;  %v1624_v52 = vadd.f32 %v1591_v48, %v1524_v46 }
 0x394   : > { %v1525_v53 = vpop.f32.mrf.mxu2  ;;  %v1539_v54 = vpop.f32.mrf.mxu3 }
 0x395   : > { %v1540_v33 = vadd.f32 %v1539_v54, %v1475_v39  ;;  %v1526_v37 = vadd.f32 %v1525_v53, %v1461_v40 }
 0x396   : > { %v1593_v55 = vpop.f32.mrf.mxu1 }
 0x398   : > { %v1665_v56 = vpop.f32.mrf.mxu0 }
 0x399   : > { %v1698_v35 = vadd.f32 %v1665_v56, %v1624_v52 }
 0x39c   : > { %v1605_v57 = vpop.f32.mrf.mxu2  ;;  %v1619_v58 = vpop.f32.mrf.mxu3 }
 0x39d   : > { %v1625_v22 = vadd.f32 %v1605_v57, %v1538_v47  ;;  %v1626_v36 = vadd.f32 %v1619_v58, %v1552_v43  ;;  %v1554_v47 = vadd.f32 %v1553_v50, %v1489_v41  ;;  %v1627_v57 = vadd.f32 %v1593_v55, %v1526_v37 }
 0x39e   : > { %v1679_v60 = vpop.f32.mrf.mxu1 }
 0x39f   : > { %v1699_v31 = vadd.f32 %v1679_v60, %v1625_v22 }
 0x3a0   : > { %v1667_v61 = vpop.f32.mrf.mxu0 }
 0x3a4   : > { %v1607_v62 = vpop.f32.mrf.mxu2  ;;  %v1621_v63 = vpop.f32.mrf.mxu3 }
 0x3a5   : > { %v1628_v27 = vadd.f32 %v1607_v62, %v1540_v33  ;;  %v1629_v52 = vadd.f32 %v1621_v63, %v1554_v47 }
 0x3a6   : > { %v1681_v0 = vpop.f32.mrf.mxu1 }
 0x3a7   : > { %v1702_v48 = vadd.f32 %v1681_v0, %v1628_v27 }
 0x3a8   : > { %v1741_v1 = vpop.f32.mrf.mxu0 }
 0x3a9   : > { %v1761_v34 = vadd.f32 %v1741_v1, %v1699_v31  ;;  %v1701_v1 = vadd.f32 %v1667_v61, %v1627_v57 }
 0x3ac   : > { %v1693_v2 = vpop.f32.mrf.mxu2  ;;  %v1727_v3 = vpop.f32.mrf.mxu3 }
 0x3ad   : > { %v1700_v38 = vadd.f32 %v1693_v2, %v1626_v36  ;;  %v1760_v42 = vadd.f32 %v1727_v3, %v1698_v35  ;;  %v2068_v2 = vpop.permute.xlu2 %2067 }
 0x3ae   : > { %v1755_v4 = vpop.f32.mrf.mxu1 }
 0x3af   : > { %v1762_v22 = vadd.f32 %v1755_v4, %v1700_v38 }
 0x3b0   : > { %v1743_v5 = vpop.f32.mrf.mxu0 }
 0x3b1   : > { %v1764_v60 = vadd.f32 %v1743_v5, %v1702_v48 }
 0x3b4   : > { %v1695_v6 = vpop.f32.mrf.mxu2  ;;  %v1729_v7 = vpop.f32.mrf.mxu3 }
 0x3b5   : > { %v1703_v53 = vadd.f32 %v1695_v6, %v1629_v52  ;;  %v1763_v62 = vadd.f32 %v1729_v7, %v1701_v1 }
 0x3b6   : > { %v1757_v8 = vpop.f32.mrf.mxu1 }
 0x3b8   : > { %v1833_v13 = vpop.f32.mrf.mxu0 }
 0x3b9   : > { %v1840_v43 = vadd.f32 %v1833_v13, %v1762_v22 }
 0x3bc   : > { %v1805_v14 = vpop.f32.mrf.mxu2  ;;  %v1819_v15 = vpop.f32.mrf.mxu3 }
 0x3bd   : > { %v1839_v26 = vadd.f32 %v1819_v15, %v1761_v34  ;;  %v1838_v17 = vadd.f32 %v1805_v14, %v1760_v42 }
 0x3be   : > { %v1878_v16 = vpop.f32.mrf.mxu1 }
 0x3bf   : > { %v1911_v56 = vadd.f32 %v1878_v16, %v1838_v17 }
 0x3c0   : > { %v1835_v19 = vpop.f32.mrf.mxu0 }
 0x3c4   : > { %v1807_v23 = vpop.f32.mrf.mxu2  ;;  %v1821_v24 = vpop.f32.mrf.mxu3 }
 0x3c5   : > { %v1842_v58 = vadd.f32 %v1821_v24, %v1764_v60  ;;  %v1841_v14 = vadd.f32 %v1807_v23, %v1763_v62  ;;  %v2073_v23 = vpop.permute.xlu0 %2072  ;;  %v7327_v62 = vld [vmem:[#allocation2 + $0x28] sm:$0xf] }
 0x3c6   : > { %v1880_v25 = vpop.f32.mrf.mxu1 }
 0x3c8   : > { %v1951_v28 = vpop.f32.mrf.mxu0 }
 0x3c9   : > { %v1984_v3 = vadd.f32 %v1951_v28, %v1911_v56  ;;  %v7279_v56 = vld [vmem:[#allocation2 + $0x10] sm:$0xf] }
 0x3cc   : > { %v1892_v29 = vpop.f32.mrf.mxu2  ;;  %v1906_v30 = vpop.f32.mrf.mxu3 }
 0x3cd   : > { %v1912_v44 = vadd.f32 %v1892_v29, %v1839_v26  ;;  %v1913_v15 = vadd.f32 %v1906_v30, %v1840_v43  ;;  %v1765_v29 = vadd.f32 %v1757_v8, %v1703_v53  ;;  %v2756_v53 = vld [vmem:[%s10421_s14 + $0x8] sm:$0xff] }
 0x3ce   : > { %v1965_v32 = vpop.f32.mrf.mxu1 }
 0x3cf   : > { %v1985_v39 = vadd.f32 %v1965_v32, %v1912_v44  ;;  %v1843_v24 = vadd.f32 %v1835_v19, %v1765_v29  ;;  %v1914_v32 = vadd.f32 %v1880_v25, %v1841_v14 }
 0x3d0   : > { %v1953_v21 = vpop.f32.mrf.mxu0 }
 0x3d1   : > { %v1987_v33 = vadd.f32 %v1953_v21, %v1914_v32 }
 0x3d4   : > { %v1894_v45 = vpop.f32.mrf.mxu2  ;;  %v1908_v46 = vpop.f32.mrf.mxu3 }
 0x3d5   : > { %v1915_v0 = vadd.f32 %v1894_v45, %v1842_v58  ;;  %v1916_v34 = vadd.f32 %v1908_v46, %v1843_v24  ;;  %v7870_v58 = vld [vmem:[#allocation2 + $0x20] sm:$0xf0] }
 0x3d6   : > { %v1967_v18 = vpop.f32.mrf.mxu1 }
 0x3d7   : > { %v1988_v61 = vadd.f32 %v1967_v18, %v1915_v0 }
 0x3d8   : > { %v2038_v54 = vpop.f32.mrf.mxu0 }
 0x3d9   : > { %v2058_v40 = vadd.f32 %v2038_v54, %v1985_v39 }
 0x3db   : > { %v2076_v55 = vadd.f32 %v2068_v2, %v2058_v40  ;;  %v7280_v40 = vor.u32 %v7870_v58, %v7279_v56 }
 0x3dc   : > { %v1979_v41 = vpop.f32.mrf.mxu2  ;;  %v2024_v50 = vpop.f32.mrf.mxu3 }
 0x3dd   : > { %v1986_v5 = vadd.f32 %v1979_v41, %v1913_v15  ;;  %v2057_v4 = vadd.f32 %v2024_v50, %v1984_v3  ;;  %v2082_v6 = vmul.f32 %v2076_v55, %v8916_v51  ;;  %v7311_v3 = vld [vmem:[#allocation2] sm:$0xf]  ;;  %v7882_v15 = vld [vmem:[#allocation2 + $0x10] sm:$0xf0]  ;;  %v2128_v41 = vpop.permute.xlu1 %2127 }
 0x3de   : > { %v2052_v31 = vpop.f32.mrf.mxu1  ;;  %v7312_v14 = vor.u32 %v7882_v15, %v7311_v3 }
 0x3df   : > { %v2075_v63 = vadd.f32 %v2068_v2, %v2057_v4  ;;  %v2059_v16 = vadd.f32 %v2052_v31, %v1986_v5  ;;  %v7872_v5 = vld [vmem:[#allocation9 + $0x8] sm:$0xff] }
 0x3e0   : > { %v2040_v13 = vpop.f32.mrf.mxu0 }
 0x3e1   : > { %v2081_v7 = vmul.f32 %v2075_v63, %v8914_v49  ;;  %v2061_v28 = vadd.f32 %v2040_v13, %v1988_v61  ;;  %v2077_v30 = vadd.f32 %v2068_v2, %v2059_v16  ;;  %v7887_v2 = vld [vmem:[#allocation2 + $0x38] sm:$0xf0] }
 0x3e2   : > { %v7328_v0 = vor.u32 %v7887_v2, %v7327_v62  ;;  %v7876_v2 = vld [vmem:[#allocation9 + $0x28] sm:$0xff] }
 0x3e3   : > { %v2087_v35 = vpack.c.bf16 %v2082_v6, %v2081_v7  ;;  %v2083_v36 = vmul.f32 %v2077_v30, %v8920_v59  ;;  %v2079_v26 = vadd.f32 %v2073_v23, %v2061_v28 }
 0x3e4   : > { %v1981_v8 = vpop.f32.mrf.mxu2  ;;  %v2026_v27 = vpop.f32.mrf.mxu3 }
 0x3e5   : > { %2091 = vst [vmem:[#allocation2 + $0x4] sm:$0xff] %v2087_v35  ;;  %v2088_v37 = vpack.c.bf16 %v2083_v36, %v2083_v36  ;;  %v1989_v38 = vadd.f32 %v1981_v8, %v1916_v34  ;;  %v2060_v19 = vadd.f32 %v2026_v27, %v1987_v33  ;;  %v2085_v45 = vmul.f32 %v2079_v26, %v8916_v51  ;;  %v7871_v34 = vld [vmem:[#allocation9] sm:$0xff] }
 0x3e6   : > { %v2054_v25 = vpop.f32.mrf.mxu1 }
 0x3e7   : > { %2092 = vst [vmem:[#allocation2 + $0xc] sm:$0xf] %v2088_v37  ;;  %v2078_v42 = vadd.f32 %v2073_v23, %v2060_v19  ;;  %v2062_v44 = vadd.f32 %v2054_v25, %v1989_v38 }
 0x3e9   : > { %v2084_v48 = vmul.f32 %v2078_v42, %v8914_v49  ;;  %v2080_v21 = vadd.f32 %v2073_v23, %v2062_v44  ;;  %v7873_v44 = vld [vmem:[#allocation9 + $0x10] sm:$0xff] }
 0x3eb   : > { %v2089_v46 = vpack.c.bf16 %v2085_v45, %v2084_v48  ;;  %v2086_v17 = vmul.f32 %v2080_v21, %v8920_v59 }
 0x3ec   : > { %v7236_v57 = vld [vmem:[#allocation2 + $0x8] sm:$0xf]  ;;  %v7866_v60 = vld [vmem:[#allocation2 + $0x4] sm:$0xf] }
 0x3ed   : > { %2093 = vst [vmem:[#allocation2 + $0x18] sm:$0xff] %v2089_v46  ;;  %v2090_v47 = vpack.c.bf16 %v2086_v17, %v2086_v17  ;;  %v7319_v31 = vld [vmem:[#allocation2 + $0x8] sm:$0xf]  ;;  %v7880_v24 = vld [vmem:[#allocation2 + $0x4] sm:$0xf] }
 0x3ee   : > { %v7867_v52 = vld [vmem:[#allocation2 + $0xc] sm:$0xf] }
 0x3ef   : > { %2094 = vst [vmem:[#allocation2 + $0x20] sm:$0xf] %v2090_v47  ;;  %v7881_v6 = vld [vmem:[#allocation2 + $0xc] sm:$0xf] }
 0x3f4   : > { %v7869_v18 = vld [vmem:[#allocation2 + $0x18] sm:$0xf0]  ;;  %v7230_v22 = vld [vmem:[#allocation2 + $0x14] sm:$0xf0] }
 0x3f5   : > { %v9057_v39 = vor.u32 %v7869_v18, %v7236_v57  ;;  %v9059_v54 = vor.u32 %v7866_v60, %v7230_v22  ;;  %v7883_v29 = vld [vmem:[#allocation2 + $0x18] sm:$0xf0]  ;;  %v7313_v13 = vld [vmem:[#allocation2 + $0x14] sm:$0xf0] }
 0x3f6   : > { %v7238_v1 = vld [vmem:[#allocation2 + $0x1c] sm:$0xf0]  ;;  %v9135_v61 = vor.u32 %v7883_v29, %v7319_v31  ;;  %v9141_v32 = vor.u32 %v7880_v24, %v7313_v13 }
 0x3f7   : > { %2131 = vrot.lane.b32.xlu0 %v9057_v39, %s8476_s27  ;;  %2193 = vrot.lane.b32.xlu1 %v9059_v54, %s8474_s9  ;;  %v9067_v43 = vor.u32 %v7867_v52, %v7238_v1  ;;  %v7321_v16 = vld [vmem:[#allocation2 + $0x1c] sm:$0xf0] }
 0x3f8   : > { %2129 = vrot.lane.b32.xlu2 %v9059_v54, %s8476_s27  ;;  %v9143_v7 = vor.u32 %v7881_v6, %v7321_v16  ;;  %v7875_v1 = vld [vmem:[#allocation9 + $0x20] sm:$0xff] }
 0x3ff   : > { %2197 = vrot.lane.b32.xlu0 %v9067_v43, %s8474_s9  ;;  %2133 = vrot.lane.b32.xlu1 %v9067_v43, %s8476_s27 }
 0x400   : > { %2195 = vrot.lane.b32.xlu2 %v9057_v39, %s8474_s9 }
 0x407   : > { %2264 = vrot.lane.b32.xlu0 %v9067_v43, %s8477_s3  ;;  %2331 = vrot.lane.b32.xlu1 %v9047_v20, %s8478_s11 }
 0x408   : > { %2262 = vrot.lane.b32.xlu2 %v9057_v39, %s8477_s3 }
 0x40f   : > { %2191 = vrot.lane.b32.xlu0 %v9047_v20, %s8474_s9  ;;  %2258 = vrot.lane.b32.xlu1 %v9047_v20, %s8477_s3  ;;  %v2755_v20 = vld [vmem:[%s10421_s14] sm:$0xff] }
 0x410   : > { %2333 = vrot.lane.b32.xlu2 %v9059_v54, %s8478_s11 }
 0x417   : > { %2335 = vrot.lane.b32.xlu0 %v9057_v39, %s8478_s11  ;;  %2473 = vrot.lane.b32.xlu1 %v9057_v39, %s8470_s5 }
 0x418   : > { %2260 = vrot.lane.b32.xlu2 %v9059_v54, %s8477_s3 }
 0x41f   : > { %2477 = vrot.lane.b32.xlu0 %v7280_v40, %s8470_s5  ;;  %2337 = vrot.lane.b32.xlu1 %v9067_v43, %s8478_s11 }
 0x420   : > { %2475 = vrot.lane.b32.xlu2 %v9067_v43, %s8470_s5 }
 0x427   : > { %2550 = vrot.lane.b32.xlu0 %v7280_v40, %s8469_s10  ;;  %2617 = vrot.lane.b32.xlu1 %v9059_v54, %s8471_s29 }
 0x428   : > { %2548 = vrot.lane.b32.xlu2 %v9067_v43, %s8469_s10 }
 0x42f   : > { %2471 = vrot.lane.b32.xlu0 %v9059_v54, %s8470_s5  ;;  %2544 = vrot.lane.b32.xlu1 %v9059_v54, %s8469_s10 }
 0x430   : > { %2619 = vrot.lane.b32.xlu2 %v9057_v39, %s8471_s29 }
 0x437   : > { %2690 = vrot.lane.b32.xlu0 %v9059_v54, %s8472_s0  ;;  %2692 = vrot.lane.b32.xlu1 %v9057_v39, %s8472_s0 }
 0x438   : > { %2546 = vrot.lane.b32.xlu2 %v9057_v39, %s8469_s10 }
 0x43f   : > { %2621 = vrot.lane.b32.xlu0 %v9067_v43, %s8471_s29  ;;  %2623 = vrot.lane.b32.xlu1 %v7280_v40, %s8471_s29 }
 0x440   : > { %2694 = vrot.lane.b32.xlu2 %v9067_v43, %s8472_s0 }
 0x447   : > { %2759 = vperm.xlu0 %8165, %v2755_v20   ;;  %2764 = vperm.xlu1 %8166, %v2756_v53  }
 0x448   : > { %2696 = vrot.lane.b32.xlu2 %v7280_v40, %s8472_s0 }
 0x44f   : > { %2855 = vrot.lane.b32.xlu0 %v7328_v0, %s8476_s27  ;;  %2847 = vrot.lane.b32.xlu1 %v7312_v14, %s8476_s27 }
 0x450   : > { %2934 = vrot.lane.b32.xlu2 %v7328_v0, %s8474_s9 }
 0x452   : > { %v2130_v50 = vpop.permute.xlu2 %2129 }
 0x453   : > { %v2135_v55 = vsel %vm1439_vm5, %v2128_v41, %v2130_v50 }
 0x454   : > { %2151 = vmatpush.bf16.msrb.mxu2 %v2135_v55 }
 0x457   : > { %3102 = vrot.lane.b32.xlu0 %v7328_v0, %s8478_s11  ;;  %3015 = vrot.lane.b32.xlu1 %v7328_v0, %s8477_s3 }
 0x458   : > { %3094 = vrot.lane.b32.xlu2 %v7312_v14, %s8478_s11  ;;  %7242 = vmatmul.msk.bf16.vlgmr.msrb.gmra.mxu2 %vm1446_vm6, %v7872_v5 }
 0x45a   : > { %v2196_v4 = vpop.permute.xlu2 %2195 }
 0x45f   : > { %3007 = vrot.lane.b32.xlu0 %v7312_v14, %s8477_s3  ;;  %2926 = vrot.lane.b32.xlu1 %v7312_v14, %s8474_s9 }
 0x460   : > { %2851 = vrot.lane.b32.xlu2 %v9135_v61, %s8476_s27 }
 0x462   : > { %v2263_v63 = vpop.permute.xlu2 %2262 }
 0x467   : > { %2930 = vrot.lane.b32.xlu0 %v9135_v61, %s8474_s9  ;;  %2849 = vrot.lane.b32.xlu1 %v9141_v32, %s8476_s27 }
 0x468   : > { %2853 = vrot.lane.b32.xlu2 %v9143_v7, %s8476_s27 }
 0x469   : > { %v2132_v28 = vpop.permute.xlu0 %2131  ;;  %v2194_v30 = vpop.permute.xlu1 %2193 }
 0x46a   : > { %v2136_v23 = vsel %vm1439_vm5, %v2130_v50, %v2132_v28  ;;  %v2200_v33 = vsel %vm1317_vm3, %v2194_v30, %v2196_v4  ;;  %v2334_v35 = vpop.permute.xlu2 %2333 }
 0x46b   : > { %2165 = vmatpush.bf16.msrb.mxu3 %v2136_v23  ;;  %2229 = vmatpush.bf16.msra.mxu2 %v2200_v33  ;;  %v7878_v33 = vld [vmem:[#allocation9 + $0x38] sm:$0xff] }
 0x46e   : > { %7243 = vmatmul.msk.bf16.vlgmr.msrb.gmra.mxu3 %vm1446_vm6, %v7872_v5  ;;  %7250 = vmatmul.msk.bf16.vlgmr.msra.gmra.mxu2 %vm1446_vm6, %v7871_v34 }
 0x46f   : > { %2928 = vrot.lane.b32.xlu0 %v9141_v32, %s8474_s9  ;;  %2932 = vrot.lane.b32.xlu1 %v9143_v7, %s8474_s9 }
 0x471   : > { %v2198_v36 = vpop.permute.xlu0 %2197  ;;  %v2134_v8 = vpop.permute.xlu1 %2133 }
 0x472   : > { %v2201_v27 = vsel %vm1317_vm3, %v2196_v4, %v2198_v36  ;;  %v2137_v26 = vsel %vm1439_vm5, %v2132_v28, %v2134_v8  ;;  %v2261_v37 = vpop.permute.xlu2 %2260 }
 0x473   : > { %2179 = vmatpush.bf16.msra.mxu0 %v2137_v26  ;;  %2243 = vmatpush.bf16.msra.mxu3 %v2201_v27  ;;  %v2267_v47 = vsel %vm1572_vm7, %v2261_v37, %v2263_v63 }
 0x476   : > { %7244 = vmatmul.msk.bf16.vlgmr.msra.gmra.mxu0 %vm1446_vm6, %v7872_v5 }
 0x477   : > { %3096 = vrot.lane.b32.xlu0 %v9141_v32, %s8478_s11  ;;  %3009 = vrot.lane.b32.xlu1 %v9141_v32, %s8477_s3 }
 0x479   : > { %v2265_v38 = vpop.permute.xlu0 %2264  ;;  %v2332_v19 = vpop.permute.xlu1 %2331 }
 0x47a   : > { %v2268_v25 = vsel %vm1572_vm7, %v2263_v63, %v2265_v38  ;;  %v2339_v42 = vsel %vm1646_vm12, %v2332_v19, %v2334_v35  ;;  %v2476_v45 = vpop.permute.xlu2 %2475  ;;  %v7877_v63 = vld [vmem:[#allocation9 + $0x30] sm:$0xff] }
 0x47b   : > { %2310 = vmatpush.bf16.msrb.mxu2 %v2268_v25  ;;  %2355 = vmatpush.bf16.msrb.mxu3 %v2339_v42 }
 0x47e   : > { %7251 = vmatmul.msk.bf16.vlgmr.msra.gmra.mxu3 %vm1446_vm6, %v7871_v34  ;;  %7258 = vmatmul.msk.bf16.vlgmr.msrb.gmra.mxu2 %vm1446_vm6, %v7873_v44 }
 0x47f   : > { %2417 = vmatpush.bf16.msra.mxu2 %v9059_v54  ;;  %2431 = vmatpush.bf16.msra.mxu3 %v9057_v39  ;;  %v7874_v54 = vld [vmem:[#allocation9 + $0x18] sm:$0xff] }
 0x481   : > { %v2192_v48 = vpop.permute.xlu0 %2191  ;;  %v2259_v21 = vpop.permute.xlu1 %2258 }
 0x482   : > { %v2199_v46 = vsel %vm1317_vm3, %v2192_v48, %v2194_v30  ;;  %v2266_v17 = vsel %vm1572_vm7, %v2259_v21, %v2261_v37  ;;  %v2549_v60 = vpop.permute.xlu2 %2548 }
 0x483   : > { %2215 = vmatpush.bf16.msra.mxu1 %v2199_v46  ;;  %2282 = vmatpush.bf16.msrb.mxu0 %v2266_v17 }
 0x486   : > { %7249 = vmatmul.msk.bf16.vlgmr.msra.gmra.mxu1 %vm1446_vm6, %v7871_v34  ;;  %7256 = vmatmul.msk.bf16.vlgmr.msrb.gmra.mxu0 %vm1446_vm6, %v7873_v44  ;;  %v7879_v34 = vld [vmem:[#allocation9 + $0x40] sm:$0xff] }
 0x487   : > { %2296 = vmatpush.bf16.msrb.mxu1 %v2267_v47 }
 0x489   : > { %v2336_v57 = vpop.permute.xlu0 %2335  ;;  %v2474_v18 = vpop.permute.xlu1 %2473 }
 0x48a   : > { %v2340_v22 = vsel %vm1646_vm12, %v2334_v35, %v2336_v57  ;;  %v2480_v39 = vsel %vm1036_vm10, %v2474_v18, %v2476_v45  ;;  %v2620_v20 = vpop.permute.xlu2 %2619 }
 0x48b   : > { %2369 = vmatpush.bf16.msra.mxu0 %v2340_v22  ;;  %2509 = vmatpush.bf16.msrb.mxu2 %v2480_v39 }
 0x48e   : > { %7263 = vmatmul.msk.bf16.vlgmr.msrb.gmra.mxu3 %vm1446_vm6, %v7874_v54  ;;  %7270 = vmatmul.msk.bf16.vlgmr.msra.gmra.mxu2 %vm1446_vm6, %v7875_v1 }
 0x48f   : > { %2445 = vmatpush.bf16.msrb.mxu0 %v9067_v43 }
 0x491   : > { %v2478_v52 = vpop.permute.xlu0 %2477  ;;  %v2338_v56 = vpop.permute.xlu1 %2337 }
 0x492   : > { %v2481_v58 = vsel %vm1036_vm10, %v2476_v45, %v2478_v52  ;;  %v2341_v40 = vsel %vm1646_vm12, %v2336_v57, %v2338_v56  ;;  %v2547_v3 = vpop.permute.xlu2 %2546 }
 0x493   : > { %2383 = vmatpush.bf16.msra.mxu1 %v2341_v40  ;;  %2523 = vmatpush.bf16.msrb.mxu3 %v2481_v58  ;;  %v2553_v55 = vsel %vm1053_vm9, %v2547_v3, %v2549_v60 }
 0x496   : > { %7257 = vmatmul.msk.bf16.vlgmr.msrb.gmra.mxu1 %vm1446_vm6, %v7873_v44  ;;  %7264 = vmatmul.msk.bf16.vlgmr.msra.gmra.mxu0 %vm1446_vm6, %v7874_v54 }
 0x499   : > { %v2551_v53 = vpop.permute.xlu0 %2550  ;;  %v2618_v62 = vpop.permute.xlu1 %2617 }
 0x49a   : > { %v2554_v43 = vsel %vm1053_vm9, %v2549_v60, %v2551_v53  ;;  %v2625_v15 = vsel %vm1070_vm8, %v2618_v62, %v2620_v20  ;;  %v2695_v5 = vpop.permute.xlu2 %2694 }
 0x49b   : > { %2596 = vmatpush.bf16.msra.mxu2 %v2554_v43 }
 0x49e   : > { %7271 = vmatmul.msk.bf16.vlgmr.msra.gmra.mxu3 %vm1446_vm6, %v7875_v1  ;;  %7282 = vmatmul.msk.bf16.vlgmr.msrb.gmra.mxu2 %vm1446_vm6, %v7876_v2 }
 0x49f   : > { %2641 = vmatpush.bf16.msra.mxu3 %v2625_v15 }
 0x4a1   : > { %v2472_v0 = vpop.permute.xlu0 %2471  ;;  %v2545_v14 = vpop.permute.xlu1 %2544 }
 0x4a2   : > { %v2479_v41 = vsel %vm1036_vm10, %v2472_v0, %v2474_v18  ;;  %v2552_v50 = vsel %vm1053_vm9, %v2545_v14, %v2547_v3  ;;  %v2697_v6 = vpop.permute.xlu2 %2696 }
 0x4a3   : > { %2495 = vmatpush.bf16.msrb.mxu1 %v2479_v41  ;;  %2568 = vmatpush.bf16.msra.mxu0 %v2552_v50  ;;  %v2700_v30 = vsel %vm1087_vm11, %v2695_v5, %v2697_v6 }
 0x4a6   : > { %7265 = vmatmul.msk.bf16.vlgmr.msra.gmra.mxu1 %vm1446_vm6, %v7874_v54  ;;  %7272 = vmatmul.msk.bf16.vlgmr.msrb.gmra.mxu0 %vm1446_vm6, %v7875_v1 }
 0x4a7   : > { %2582 = vmatpush.bf16.msra.mxu1 %v2553_v55 }
 0x4a9   : > { %v2691_v4 = vpop.permute.xlu0 %2690  ;;  %v2693_v29 = vpop.permute.xlu1 %2692 }
 0x4aa   : > { %v2698_v31 = vsel %vm1087_vm11, %v2691_v4, %v2693_v29  ;;  %v2699_v13 = vsel %vm1087_vm11, %v2693_v29, %v2695_v5 }
 0x4ab   : > { %2714 = vmatpush.bf16.msrb.mxu2 %v2698_v31 }
 0x4ae   : > { %7283 = vmatmul.msk.bf16.vlgmr.msrb.gmra.mxu3 %vm1446_vm6, %v7876_v2  ;;  %7290 = vmatmul.msk.bf16.vlgmr.msra.gmra.mxu2 %vm1446_vm6, %v7877_v63 }
 0x4af   : > { %2728 = vmatpush.bf16.msrb.mxu3 %v2699_v13 }
 0x4b1   : > { %v2622_v16 = vpop.permute.xlu0 %2621  ;;  %v2624_v28 = vpop.permute.xlu1 %2623 }
 0x4b2   : > { %v2626_v24 = vsel %vm1070_vm8, %v2620_v20, %v2622_v16  ;;  %v2627_v23 = vsel %vm1070_vm8, %v2622_v16, %v2624_v28 }
 0x4b3   : > { %2655 = vmatpush.bf16.msrb.mxu0 %v2626_v24 }
 0x4b6   : > { %7281 = vmatmul.msk.bf16.vlgmr.msrb.gmra.mxu1 %vm1446_vm6, %v7876_v2  ;;  %7288 = vmatmul.msk.bf16.vlgmr.msra.gmra.mxu0 %vm1446_vm6, %v7877_v63 }
 0x4b7   : > { %2669 = vmatpush.bf16.msrb.mxu1 %v2627_v23  ;;  %2742 = vmatpush.bf16.msra.mxu0 %v2700_v30 }
 0x4be   : > { %7295 = vmatmul.msk.bf16.vlgmr.msra.gmra.mxu3 %vm1446_vm6, %v7878_v33  ;;  %7302 = vmatmul.msk.bf16.vlgmr.msrb.gmra.mxu2 %vm1446_vm6, %v7879_v34 }
 0x4c6   : > { %7289 = vmatmul.msk.bf16.vlgmr.msra.gmra.mxu1 %vm1446_vm6, %v7877_v63  ;;  %7296 = vmatmul.msk.bf16.vlgmr.msrb.gmra.mxu0 %vm1446_vm6, %v7878_v33 }
 0x4ce   : > { %7303 = vmatmul.msk.bf16.vlgmr.msrb.gmra.mxu3 %vm1446_vm6, %v7879_v34 }
 0x4d6   : > { %7297 = vmatmul.msk.bf16.vlgmr.msrb.gmra.mxu1 %vm1446_vm6, %v7878_v33  ;;  %7304 = vmatmul.msk.bf16.vlgmr.msra.gmra.mxu0 %vm1446_vm6, %v7879_v34 }
 0x4db   : > { %v2153_v35 = vpop.f32.mrf.mxu2 }
 0x4e3   : > { %v2155_v36 = vpop.f32.mrf.mxu2 }
 0x4f1   : > { %v2167_v8 = vpop.f32.mrf.mxu3  ;;  %v2231_v27 = vpop.f32.mrf.mxu2 }
 0x4f2   : > { %v2232_v26 = vadd.f32 %v2231_v27, %v2167_v8 }
 0x4f3   : > { %v2181_v37 = vpop.f32.mrf.mxu0 }
 0x4f9   : > { %v2169_v38 = vpop.f32.mrf.mxu3  ;;  %v2233_v19 = vpop.f32.mrf.mxu2 }
 0x4fa   : > { %v2234_v27 = vadd.f32 %v2233_v19, %v2169_v38 }
 0x4fb   : > { %v2183_v25 = vpop.f32.mrf.mxu0 }
 0x501   : > { %v2245_v42 = vpop.f32.mrf.mxu3  ;;  %v2312_v44 = vpop.f32.mrf.mxu2 }
 0x502   : > { %v2246_v45 = vadd.f32 %v2245_v42, %v2181_v37 }
 0x503   : > { %v2217_v48 = vpop.f32.mrf.mxu1  ;;  %v2284_v21 = vpop.f32.mrf.mxu0 }
 0x504   : > { %v2218_v46 = vadd.f32 %v2217_v48, %v2153_v35  ;;  %v2319_v37 = vadd.f32 %v2312_v44, %v2246_v45 }
 0x506   : > { %v2317_v17 = vadd.f32 %v2284_v21, %v2218_v46 }
 0x509   : > { %v2247_v47 = vpop.f32.mrf.mxu3  ;;  %v2314_v57 = vpop.f32.mrf.mxu2 }
 0x50a   : > { %v2248_v10 = vadd.f32 %v2247_v47, %v2183_v25 }
 0x50b   : > { %v2219_v18 = vpop.f32.mrf.mxu1  ;;  %v2286_v60 = vpop.f32.mrf.mxu0 }
 0x50c   : > { %v2220_v13 = vadd.f32 %v2219_v18, %v2155_v36 }
 0x50e   : > { %v2320_v30 = vadd.f32 %v2286_v60, %v2220_v13 }
 0x511   : > { %v2357_v22 = vpop.f32.mrf.mxu3  ;;  %v2419_v39 = vpop.f32.mrf.mxu2 }
 0x512   : > { %v2390_v4 = vadd.f32 %v2357_v22, %v2317_v17 }
 0x513   : > { %v2298_v54 = vpop.f32.mrf.mxu1  ;;  %v2371_v1 = vpop.f32.mrf.mxu0 }
 0x514   : > { %v2452_v16 = vadd.f32 %v2419_v39, %v2390_v4  ;;  %v2318_v24 = vadd.f32 %v2298_v54, %v2232_v26 }
 0x516   : > { %v2391_v34 = vadd.f32 %v2371_v1, %v2318_v24 }
 0x519   : > { %v2359_v52 = vpop.f32.mrf.mxu3  ;;  %v2421_v56 = vpop.f32.mrf.mxu2 }
 0x51a   : > { %v2393_v35 = vadd.f32 %v2359_v52, %v2320_v30  ;;  %v2322_v52 = vadd.f32 %v2314_v57, %v2248_v10 }
 0x51b   : > { %v2300_v58 = vpop.f32.mrf.mxu1  ;;  %v2373_v40 = vpop.f32.mrf.mxu0 }
 0x51c   : > { %v2321_v46 = vadd.f32 %v2300_v58, %v2234_v27  ;;  %v2455_v17 = vadd.f32 %v2421_v56, %v2393_v35 }
 0x521   : > { %v2433_v20 = vpop.f32.mrf.mxu3  ;;  %v2511_v53 = vpop.f32.mrf.mxu2 }
 0x522   : > { %v2453_v42 = vadd.f32 %v2433_v20, %v2391_v34 }
 0x523   : > { %v2385_v62 = vpop.f32.mrf.mxu1  ;;  %v2447_v43 = vpop.f32.mrf.mxu0 }
 0x524   : > { %v2392_v22 = vadd.f32 %v2385_v62, %v2319_v37  ;;  %v2531_v18 = vadd.f32 %v2511_v53, %v2453_v42 }
 0x526   : > { %v2454_v4 = vadd.f32 %v2447_v43, %v2392_v22 }
 0x529   : > { %v2435_v2 = vpop.f32.mrf.mxu3  ;;  %v2513_v3 = vpop.f32.mrf.mxu2 }
 0x52b   : > { %v2387_v15 = vpop.f32.mrf.mxu1  ;;  %v2449_v0 = vpop.f32.mrf.mxu0 }
 0x52c   : > { %v2395_v45 = vadd.f32 %v2387_v15, %v2322_v52  ;;  %v2765_v15 = vpop.permute.xlu1 %2764 }
 0x52e   : > { %v2457_v13 = vadd.f32 %v2449_v0, %v2395_v45 }
 0x531   : > { %v2525_v14 = vpop.f32.mrf.mxu3  ;;  %v2598_v41 = vpop.f32.mrf.mxu2 }
 0x532   : > { %v2532_v19 = vadd.f32 %v2525_v14, %v2454_v4 }
 0x533   : > { %v2497_v50 = vpop.f32.mrf.mxu1  ;;  %v2570_v55 = vpop.f32.mrf.mxu0 }
 0x534   : > { %v2530_v6 = vadd.f32 %v2497_v50, %v2452_v16  ;;  %v2394_v50 = vadd.f32 %v2373_v40, %v2321_v46  ;;  %v2605_v53 = vadd.f32 %v2598_v41, %v2532_v19 }
 0x536   : > { %v2603_v8 = vadd.f32 %v2570_v55, %v2530_v6  ;;  %v2760_v55 = vpop.permute.xlu0 %2759  ;;  %v2456_v38 = vadd.f32 %v2435_v2, %v2394_v50 }
 0x538   : > { %v2534_v47 = vadd.f32 %v2513_v3, %v2456_v38 }
 0x539   : > { %v2527_v5 = vpop.f32.mrf.mxu3  ;;  %v2600_v63 = vpop.f32.mrf.mxu2 }
 0x53a   : > { %v2535_v2 = vadd.f32 %v2527_v5, %v2457_v13  ;;  %v2848_v13 = vpop.permute.xlu1 %2847 }
 0x53b   : > { %v2499_v29 = vpop.f32.mrf.mxu1  ;;  %v2572_v31 = vpop.f32.mrf.mxu0 }
 0x53c   : > { %v2533_v26 = vadd.f32 %v2499_v29, %v2455_v17  ;;  %v2608_v0 = vadd.f32 %v2600_v63, %v2535_v2 }
 0x53e   : > { %v2606_v44 = vadd.f32 %v2572_v31, %v2533_v26 }
 0x541   : > { %v2643_v28 = vpop.f32.mrf.mxu3  ;;  %v2716_v21 = vpop.f32.mrf.mxu2 }
 0x542   : > { %v2676_v48 = vadd.f32 %v2643_v28, %v2603_v8 }
 0x543   : > { %v2584_v23 = vpop.f32.mrf.mxu1  ;;  %v2657_v33 = vpop.f32.mrf.mxu0 }
 0x544   : > { %v2749_v39 = vadd.f32 %v2716_v21, %v2676_v48  ;;  %v2604_v1 = vadd.f32 %v2584_v23, %v2531_v18 }
 0x546   : > { %v2767_v20 = vadd.f32 %v2760_v55, %v2749_v39  ;;  %v2677_v58 = vadd.f32 %v2657_v33, %v2604_v1 }
 0x548   : > { %v2773_v16 = vmax.f32 %v2767_v20, 0.0  ;;  %v7382_v20 = vld [vmem:[#allocation2 + $0x38] sm:$0xf] }
 0x549   : > { %v2645_v36 = vpop.f32.mrf.mxu3  ;;  %v2718_v62 = vpop.f32.mrf.mxu2 }
 0x54a   : > { %v2679_v56 = vadd.f32 %v2645_v36, %v2606_v44  ;;  %v2779_v28 = vmul.f32 %v2773_v16, %v8914_v49 }
 0x54b   : > { %v2586_v54 = vpop.f32.mrf.mxu1  ;;  %v2659_v60 = vpop.f32.mrf.mxu0 }
 0x54c   : > { %v2607_v43 = vadd.f32 %v2586_v54, %v2534_v47  ;;  %v2752_v6 = vadd.f32 %v2718_v62, %v2679_v56  ;;  %v7378_v62 = vld [vmem:[#allocation2 + $0x10] sm:$0xf] }
 0x54e   : > { %v2680_v30 = vadd.f32 %v2659_v60, %v2607_v43  ;;  %v2770_v23 = vadd.f32 %v2765_v15, %v2752_v6 }
 0x550   : > { %v2776_v37 = vmax.f32 %v2770_v23, 0.0 }
 0x551   : > { %v2730_v25 = vpop.f32.mrf.mxu3 }
 0x552   : > { %v2750_v29 = vadd.f32 %v2730_v25, %v2677_v58  ;;  %v2782_v36 = vmul.f32 %v2776_v37, %v8914_v49  ;;  %v7889_v58 = vld [vmem:[#allocation2 + $0x48] sm:$0xf0]  ;;  %v7884_v25 = vld [vmem:[#allocation2 + $0x20] sm:$0xf0] }
 0x553   : > { %v2671_v24 = vpop.f32.mrf.mxu1  ;;  %v2744_v40 = vpop.f32.mrf.mxu0  ;;  %v9241_v56 = vor.u32 %v7889_v58, %v7382_v20  ;;  %v9249_v47 = vor.u32 %v7884_v25, %v7378_v62  ;;  %v3596_v37 = vld [vmem:[%s10422_s2] sm:$0xff] }
 0x554   : > { %v2768_v10 = vadd.f32 %v2760_v55, %v2750_v29  ;;  %v2678_v57 = vadd.f32 %v2671_v24, %v2605_v53  ;;  %v9269_v53 = vpop.permute.xlu2 %2934  ;;  %v2856_v29 = vpop.permute.xlu0 %2855 }
 0x556   : > { %v2774_v14 = vmax.f32 %v2768_v10, 0.0  ;;  %v2751_v31 = vadd.f32 %v2744_v40, %v2678_v57  ;;  %v9287_v40 = vpop.permute.xlu1 %3015 }
 0x558   : > { %v2780_v3 = vmul.f32 %v2774_v14, %v8916_v51  ;;  %v2769_v41 = vadd.f32 %v2760_v55, %v2751_v31 }
 0x559   : > { %v2732_v33 = vpop.f32.mrf.mxu3 }
 0x55a   : > { %v2785_v34 = vpack.c.bf16 %v2780_v3, %v2779_v28  ;;  %v2775_v35 = vmax.f32 %v2769_v41, 0.0  ;;  %v2753_v8 = vadd.f32 %v2732_v33, %v2680_v30  ;;  %v7891_v33 = vld [vmem:[#allocation11 + $0x8] sm:$0xff] }
 0x55b   : > { %v2673_v27 = vpop.f32.mrf.mxu1  ;;  %v2746_v21 = vpop.f32.mrf.mxu0 }
 0x55c   : > { %2789 = vst [vmem:[#allocation2 + $0x2c] sm:$0xff] %v2785_v34  ;;  %v2781_v5 = vmul.f32 %v2775_v35, %v8920_v59  ;;  %v2771_v42 = vadd.f32 %v2765_v15, %v2753_v8  ;;  %v2681_v48 = vadd.f32 %v2673_v27, %v2608_v0  ;;  %v9279_v16 = vpop.permute.xlu2 %3094  ;;  %v9281_v24 = vpop.permute.xlu0 %3102 }
 0x55e   : > { %v2786_v46 = vpack.c.bf16 %v2781_v5, %v2781_v5  ;;  %v2777_v17 = vmax.f32 %v2771_v42, 0.0  ;;  %v2754_v22 = vadd.f32 %v2746_v21, %v2681_v48  ;;  %v2927_v10 = vpop.permute.xlu1 %2926 }
 0x560   : > { %2790 = vst [vmem:[#allocation2 + $0x34] sm:$0xf] %v2786_v46  ;;  %v2783_v18 = vmul.f32 %v2777_v17, %v8916_v51  ;;  %v2772_v63 = vadd.f32 %v2765_v15, %v2754_v22  ;;  %v3597_v46 = vld [vmem:[%s10422_s2 + $0x8] sm:$0xff] }
 0x561   : > { %v3649_v22 = vld [vmem:[%s10423_s13 + $0x8] sm:$0xff] }
 0x562   : > { %v2787_v26 = vpack.c.bf16 %v2783_v18, %v2782_v36  ;;  %v2778_v39 = vmax.f32 %v2772_v63, 0.0 }
 0x563   : > { %v7335_v50 = vld [vmem:[#allocation2 + $0x30] sm:$0xf]  ;;  %v7885_v44 = vld [vmem:[#allocation2 + $0x2c] sm:$0xf] }
 0x564   : > { %2791 = vst [vmem:[#allocation2 + $0x40] sm:$0xff] %v2787_v26  ;;  %v2784_v54 = vmul.f32 %v2778_v39, %v8920_v59  ;;  %v2852_v43 = vpop.permute.xlu2 %2851  ;;  %v9291_v6 = vpop.permute.xlu0 %3007 }
 0x566   : > { %v2788_v60 = vpack.c.bf16 %v2784_v54, %v2784_v54  ;;  %v2850_v14 = vpop.permute.xlu1 %2849 }
 0x567   : > { %v7886_v52 = vld [vmem:[#allocation2 + $0x34] sm:$0xf]  ;;  %v2863_v41 = vsel %vm1439_vm5, %v2848_v13, %v2850_v14  ;;  %v2864_v48 = vsel %vm1439_vm5, %v2850_v14, %v2852_v43  ;;  %v3648_v13 = vld [vmem:[%s10423_s13] sm:$0xff] }
 0x568   : > { %2792 = vst [vmem:[#allocation2 + $0x48] sm:$0xf] %v2788_v60 }
 0x56b   : > { %v7888_v4 = vld [vmem:[#allocation2 + $0x40] sm:$0xf0]  ;;  %v7329_v19 = vld [vmem:[#allocation2 + $0x3c] sm:$0xf0] }
 0x56c   : > { %v9217_v1 = vor.u32 %v7888_v4, %v7335_v50  ;;  %v9229_v45 = vor.u32 %v7885_v44, %v7329_v19  ;;  %v2854_v57 = vpop.permute.xlu2 %2853  ;;  %v9303_v2 = vpop.permute.xlu0 %2930  ;;  %v7890_v50 = vld [vmem:[#allocation11] sm:$0xff] }
 0x56d   : > { %v2865_v21 = vsel %vm1439_vm5, %v2852_v43, %v2854_v57 }
 0x56e   : > { %2859 = vrot.lane.b32.xlu0 %v9217_v1, %s8476_s27  ;;  %v2933_v28 = vpop.permute.xlu1 %2932 }
 0x56f   : > { %v7337_v55 = vld [vmem:[#allocation2 + $0x44] sm:$0xf0]  ;;  %v2944_v44 = vsel %vm1317_vm3, %v9303_v2, %v2933_v28 }
 0x570   : > { %v9221_v38 = vor.u32 %v7886_v52, %v7337_v55 }
 0x572   : > { %2940 = vrot.lane.b32.xlu1 %v9221_v38, %s8474_s9  ;;  %2861 = vrot.lane.b32.xlu2 %v9221_v38, %s8476_s27 }
 0x574   : > { %v2929_v15 = vpop.permute.xlu0 %2928 }
 0x575   : > { %v2942_v39 = vsel %vm1317_vm3, %v2927_v10, %v2929_v15  ;;  %v2943_v55 = vsel %vm1317_vm3, %v2929_v15, %v9303_v2  ;;  %v7893_v10 = vld [vmem:[#allocation11 + $0x18] sm:$0xff] }
 0x576   : > { %3021 = vrot.lane.b32.xlu0 %v9221_v38, %s8477_s3  ;;  %v9327_v0 = vpop.permute.xlu1 %3009 }
 0x577   : > { %v3023_v58 = vsel %vm1572_vm7, %v9291_v6, %v9327_v0 }
 0x57a   : > { %3011 = vrot.lane.b32.xlu1 %v9135_v61, %s8477_s3  ;;  %2857 = vrot.lane.b32.xlu2 %v9229_v45, %s8476_s27 }
 0x57c   : > { %v9320_v3 = vpop.permute.xlu0 %3096 }
 0x57e   : > { %2938 = vrot.lane.b32.xlu0 %v9217_v1, %s8474_s9 }
 0x582   : > { %3098 = vrot.lane.b32.xlu1 %v9135_v61, %s8478_s11  ;;  %3013 = vrot.lane.b32.xlu2 %v9143_v7, %s8477_s3 }
 0x586   : > { %3270 = vrot.lane.b32.xlu0 %v9241_v56, %s8470_s5 }
 0x58a   : > { %3104 = vrot.lane.b32.xlu1 %v9229_v45, %s8478_s11  ;;  %3268 = vrot.lane.b32.xlu2 %v9221_v38, %s8470_s5 }
 0x58e   : > { %3262 = vrot.lane.b32.xlu0 %v9249_v47, %s8470_s5 }
 0x592   : > { %3108 = vrot.lane.b32.xlu1 %v9221_v38, %s8478_s11  ;;  %2936 = vrot.lane.b32.xlu2 %v9229_v45, %s8474_s9 }
 0x596   : > { %3106 = vrot.lane.b32.xlu0 %v9217_v1, %s8478_s11 }
 0x59a   : > { %3100 = vrot.lane.b32.xlu1 %v9143_v7, %s8478_s11  ;;  %3017 = vrot.lane.b32.xlu2 %v9229_v45, %s8477_s3 }
 0x59e   : > { %3258 = vrot.lane.b32.xlu0 %v9135_v61, %s8470_s5 }
 0x5a2   : > { %3345 = vrot.lane.b32.xlu1 %v9135_v61, %s8469_s10  ;;  %3260 = vrot.lane.b32.xlu2 %v9143_v7, %s8470_s5 }
 0x5a6   : > { %3343 = vrot.lane.b32.xlu0 %v9141_v32, %s8469_s10 }
 0x5aa   : > { %3256 = vrot.lane.b32.xlu1 %v9141_v32, %s8470_s5  ;;  %3019 = vrot.lane.b32.xlu2 %v9217_v1, %s8477_s3 }
 0x5ae   : > { %3432 = vrot.lane.b32.xlu0 %v9135_v61, %s8471_s29 }
 0x5b2   : > { %3351 = vrot.lane.b32.xlu1 %v9229_v45, %s8469_s10  ;;  %3430 = vrot.lane.b32.xlu2 %v9141_v32, %s8471_s29 }
 0x5b6   : > { %3357 = vrot.lane.b32.xlu0 %v9241_v56, %s8469_s10 }
 0x5ba   : > { %3440 = vrot.lane.b32.xlu1 %v9217_v1, %s8471_s29  ;;  %3355 = vrot.lane.b32.xlu2 %v9221_v38, %s8469_s10 }
 0x5be   : > { %3438 = vrot.lane.b32.xlu0 %v9229_v45, %s8471_s29 }
 0x5c2   : > { %3347 = vrot.lane.b32.xlu1 %v9143_v7, %s8469_s10  ;;  %3266 = vrot.lane.b32.xlu2 %v9217_v1, %s8470_s5 }
 0x5c6   : > { %3442 = vrot.lane.b32.xlu0 %v9221_v38, %s8471_s29 }
 0x5ca   : > { %3527 = vrot.lane.b32.xlu1 %v9217_v1, %s8472_s0  ;;  %3353 = vrot.lane.b32.xlu2 %v9217_v1, %s8469_s10 }
 0x5cc   : > { %v2862_v31 = vpop.permute.xlu2 %2861 }
 0x5ce   : > { %3434 = vrot.lane.b32.xlu0 %v9143_v7, %s8471_s29 }
 0x5d2   : > { %3519 = vrot.lane.b32.xlu1 %v9135_v61, %s8472_s0  ;;  %3264 = vrot.lane.b32.xlu2 %v9229_v45, %s8470_s5 }
 0x5d4   : > { %v2858_v30 = vpop.permute.xlu2 %2857 }
 0x5d5   : > { %v2866_v23 = vsel %vm1439_vm5, %v2856_v29, %v2858_v30 }
 0x5d6   : > { %3525 = vrot.lane.b32.xlu0 %v9229_v45, %s8472_s0  ;;  %2885 = vmatpush.bf16.msra.mxu1 %v2866_v23 }
 0x5da   : > { %3517 = vrot.lane.b32.xlu1 %v9141_v32, %s8472_s0  ;;  %3349 = vrot.lane.b32.xlu2 %v9249_v47, %s8469_s10 }
 0x5db   : > { %2886 = vmatpush.bf16.msra.mxu1 %v2863_v41 }
 0x5dc   : > { %v9329_v34 = vpop.permute.xlu2 %3013 }
 0x5de   : > { %3444 = vrot.lane.b32.xlu0 %v9241_v56, %s8471_s29  ;;  %7341 = vmatmul.msk.bf16.vlgmr.msra.gmra.mxu1 %vm2875_vm14, %v7891_v33 }
 0x5e0   : > { %v2860_v35 = vpop.permute.xlu0 %2859 }
 0x5e1   : > { %v2867_v8 = vsel %vm1439_vm5, %v2858_v30, %v2860_v35  ;;  %v2868_v27 = vsel %vm1439_vm5, %v2860_v35, %v2862_v31 }
 0x5e2   : > { %3523 = vrot.lane.b32.xlu1 %v9249_v47, %s8472_s0  ;;  %3529 = vrot.lane.b32.xlu2 %v9221_v38, %s8472_s0 }
 0x5e3   : > { %2899 = vmatpush.bf16.msra.mxu2 %v2867_v8  ;;  %2913 = vmatpush.bf16.msra.mxu3 %v2868_v27 }
 0x5e4   : > { %v2941_v5 = vpop.permute.xlu1 %2940  ;;  %v9343_v42 = vpop.permute.xlu2 %3268 }
 0x5e6   : > { %3600 = vperm.xlu0 %8165, %v3596_v37  }
 0x5e7   : > { %2900 = vmatpush.bf16.msra.mxu2 %v2864_v48  ;;  %2914 = vmatpush.bf16.msra.mxu3 %v2865_v21 }
 0x5e8   : > { %v3022_v17 = vpop.permute.xlu0 %3021 }
 0x5ea   : > { %7342 = vmatmul.msk.bf16.vlgmr.msra.gmra.mxu2 %vm2875_vm14, %v7891_v33  ;;  %3605 = vperm.xlu1 %8166, %v3597_v46  }
 0x5eb   : > { %3521 = vrot.lane.b32.xlu2 %v9143_v7, %s8472_s0  ;;  %7343 = vmatmul.msk.bf16.vlgmr.msra.gmra.mxu3 %vm2875_vm14, %v7891_v33 }
 0x5ec   : > { %v3012_v36 = vpop.permute.xlu1 %3011  ;;  %v2937_v18 = vpop.permute.xlu2 %2936 }
 0x5ed   : > { %v2945_v63 = vsel %vm1317_vm3, %v9269_v53, %v2937_v18  ;;  %v3024_v2 = vsel %vm1572_vm7, %v9327_v0, %v3012_v36  ;;  %v3025_v31 = vsel %vm1572_vm7, %v3012_v36, %v9329_v34  ;;  %v7894_v0 = vld [vmem:[#allocation11 + $0x20] sm:$0xff]  ;;  %v7896_v36 = vld [vmem:[#allocation11 + $0x30] sm:$0xff] }
 0x5ee   : > { %3657 = vperm.xlu0 %8165, %v3649_v22   ;;  %2963 = vmatpush.bf16.msrb.mxu0 %v2945_v63 }
 0x5f0   : > { %v2939_v26 = vpop.permute.xlu0 %2938 }
 0x5f1   : > { %v2946_v54 = vsel %vm1317_vm3, %v2937_v18, %v2939_v26  ;;  %v2947_v60 = vsel %vm1317_vm3, %v2939_v26, %v2941_v5  ;;  %v7895_v5 = vld [vmem:[#allocation11 + $0x28] sm:$0xff] }
 0x5f2   : > { %2964 = vmatpush.bf16.msrb.mxu0 %v2942_v39  ;;  %2977 = vmatpush.bf16.msrb.mxu1 %v2946_v54 }
 0x5f3   : > { %3531 = vrot.lane.b32.xlu2 %v9241_v56, %s8472_s0  ;;  %2991 = vmatpush.bf16.msrb.mxu2 %v2947_v60  ;;  %v7892_v56 = vld [vmem:[#allocation11 + $0x10] sm:$0xff] }
 0x5f4   : > { %v3099_v4 = vpop.permute.xlu1 %3098  ;;  %v3018_v52 = vpop.permute.xlu2 %3017 }
 0x5f5   : > { %7348 = vmatmul.msk.bf16.vlgmr.msrb.gmra.mxu0 %vm2875_vm14, %v7890_v50  ;;  %v3026_v19 = vsel %vm1572_vm7, %v9287_v40, %v3018_v52  ;;  %v3110_v40 = vsel %vm1646_vm12, %v9279_v16, %v9320_v3  ;;  %v3111_v23 = vsel %vm1646_vm12, %v9320_v3, %v3099_v4 }
 0x5f6   : > { %2978 = vmatpush.bf16.msrb.mxu1 %v2943_v55  ;;  %3044 = vmatpush.bf16.msrb.mxu3 %v3026_v19  ;;  %v7897_v55 = vld [vmem:[#allocation11 + $0x38] sm:$0xff] }
 0x5f7   : > { %2992 = vmatpush.bf16.msrb.mxu2 %v2944_v44 }
 0x5f8   : > { %v3271_v20 = vpop.permute.xlu0 %3270 }
 0x5f9   : > { %7349 = vmatmul.msk.bf16.vlgmr.msrb.gmra.mxu1 %vm2875_vm14, %v7890_v50 }
 0x5fa   : > { %7350 = vmatmul.msk.bf16.vlgmr.msrb.gmra.mxu2 %vm2875_vm14, %v7890_v50  ;;  %3045 = vmatpush.bf16.msrb.mxu3 %v3023_v58 }
 0x5fb   : > { %3436 = vrot.lane.b32.xlu2 %v9249_v47, %s8471_s29 }
 0x5fc   : > { %v3105_v62 = vpop.permute.xlu1 %3104  ;;  %v3261_v25 = vpop.permute.xlu2 %3260 }
 0x5fd   : > { %7355 = vmatmul.msk.bf16.vlgmr.msrb.gmra.mxu3 %vm2875_vm14, %v7892_v56  ;;  %v3113_v53 = vsel %vm1646_vm12, %v9281_v24, %v3105_v62 }
 0x5fe   : > { %3131 = vmatpush.bf16.msra.mxu2 %v3113_v53 }
 0x600   : > { %v3263_v29 = vpop.permute.xlu0 %3262 }
 0x601   : > { %v3274_v30 = vsel %vm1036_vm10, %v3261_v25, %v3263_v29 }
 0x602   : > { %3132 = vmatpush.bf16.msra.mxu2 %v3110_v40  ;;  %v7898_v40 = vld [vmem:[#allocation11 + $0x40] sm:$0xff] }
 0x603   : > { %3652 = vperm.xlu2 %8167, %v3648_v13  }
 0x604   : > { %v3109_v47 = vpop.permute.xlu1 %3108  ;;  %v3020_v43 = vpop.permute.xlu2 %3019 }
 0x605   : > { %v3027_v6 = vsel %vm1572_vm7, %v3018_v52, %v3020_v43  ;;  %v3028_v24 = vsel %vm1572_vm7, %v3020_v43, %v3022_v17 }
 0x606   : > { %3210 = vmatpush.bf16.msrb.mxu2 %v9217_v1  ;;  %3058 = vmatpush.bf16.msra.mxu0 %v3027_v6  ;;  %v3277_v1 = vsel %vm1036_vm10, %v9343_v42, %v3271_v20 }
 0x607   : > { %3072 = vmatpush.bf16.msra.mxu1 %v3028_v24 }
 0x608   : > { %v3107_v57 = vpop.permute.xlu0 %3106 }
 0x609   : > { %v3114_v16 = vsel %vm1646_vm12, %v3105_v62, %v3107_v57  ;;  %v3115_v14 = vsel %vm1646_vm12, %v3107_v57, %v3109_v47 }
 0x60a   : > { %3211 = vmatpush.bf16.msrb.mxu2 %v9135_v61  ;;  %3059 = vmatpush.bf16.msra.mxu0 %v3024_v2 }
 0x60b   : > { %7362 = vmatmul.msk.bf16.vlgmr.msra.gmra.mxu2 %vm2875_vm14, %v7893_v10  ;;  %3073 = vmatpush.bf16.msra.mxu1 %v3025_v31 }
 0x60c   : > { %3145 = vmatpush.bf16.msra.mxu3 %v3114_v16  ;;  %v3101_v61 = vpop.permute.xlu1 %3100  ;;  %v3431_v15 = vpop.permute.xlu2 %3430 }
 0x60d   : > { %7356 = vmatmul.msk.bf16.vlgmr.msra.gmra.mxu0 %vm2875_vm14, %v7892_v56  ;;  %v3112_v28 = vsel %vm1646_vm12, %v3099_v4, %v3101_v61 }
 0x60e   : > { %3321 = vmatpush.bf16.msra.mxu2 %v3277_v1  ;;  %3159 = vmatpush.bf16.msrb.mxu0 %v3115_v14 }
 0x60f   : > { %3196 = vmatpush.bf16.msrb.mxu1 %v9229_v45 }
 0x610   : > { %7357 = vmatmul.msk.bf16.vlgmr.msra.gmra.mxu1 %vm2875_vm14, %v7892_v56  ;;  %3146 = vmatpush.bf16.msra.mxu3 %v3111_v23  ;;  %v3259_v41 = vpop.permute.xlu0 %3258 }
 0x612   : > { %3322 = vmatpush.bf16.msra.mxu2 %v3274_v30  ;;  %3160 = vmatpush.bf16.msrb.mxu0 %v3112_v28 }
 0x613   : > { %3197 = vmatpush.bf16.msrb.mxu1 %v9141_v32  ;;  %7363 = vmatmul.msk.bf16.vlgmr.msra.gmra.mxu3 %vm2875_vm14, %v7893_v10 }
 0x614   : > { %3224 = vmatpush.bf16.msrb.mxu3 %v9221_v38  ;;  %v3346_v45 = vpop.permute.xlu1 %3345  ;;  %v3356_v33 = vpop.permute.xlu2 %3355  ;;  %v3273_v38 = vsel %vm1036_vm10, %v3259_v41, %v3261_v25 }
 0x618   : > { %3225 = vmatpush.bf16.msrb.mxu3 %v9143_v7  ;;  %v3344_v34 = vpop.permute.xlu0 %3343 }
 0x61b   : > { %7370 = vmatmul.msk.bf16.vlgmr.msrb.gmra.mxu2 %vm2875_vm14, %v7894_v0 }
 0x61c   : > { %v3257_v35 = vpop.permute.xlu1 %3256  ;;  %v3267_v8 = vpop.permute.xlu2 %3266 }
 0x61d   : > { %7364 = vmatmul.msk.bf16.vlgmr.msrb.gmra.mxu0 %vm2875_vm14, %v7893_v10  ;;  %v3276_v3 = vsel %vm1036_vm10, %v3267_v8, %v9343_v42  ;;  %v3359_v42 = vsel %vm1053_vm9, %v3344_v34, %v3346_v45  ;;  %v3272_v26 = vsel %vm1036_vm10, %v3257_v35, %v3259_v41 }
 0x61e   : > { %3307 = vmatpush.bf16.msra.mxu1 %v3276_v3 }
 0x620   : > { %7369 = vmatmul.msk.bf16.vlgmr.msrb.gmra.mxu1 %vm2875_vm14, %v7894_v0  ;;  %v3433_v32 = vpop.permute.xlu0 %3432 }
 0x621   : > { %v3446_v4 = vsel %vm1070_vm8, %v3431_v15, %v3433_v32 }
 0x622   : > { %3308 = vmatpush.bf16.msra.mxu1 %v3273_v38 }
 0x623   : > { %7371 = vmatmul.msk.bf16.vlgmr.msrb.gmra.mxu3 %vm2875_vm14, %v7894_v0 }
 0x624   : > { %v3352_v7 = vpop.permute.xlu1 %3351  ;;  %v3354_v27 = vpop.permute.xlu2 %3353 }
 0x625   : > { %v3362_v37 = vsel %vm1053_vm9, %v3352_v7, %v3354_v27  ;;  %v3363_v39 = vsel %vm1053_vm9, %v3354_v27, %v3356_v33 }
 0x626   : > { %3380 = vmatpush.bf16.msra.mxu3 %v3362_v37 }
 0x628   : > { %v3358_v48 = vpop.permute.xlu0 %3357 }
 0x629   : > { %v3364_v21 = vsel %vm1053_vm9, %v3356_v33, %v3358_v48 }
 0x62a   : > { %3381 = vmatpush.bf16.msra.mxu3 %v3359_v42  ;;  %3408 = vmatpush.bf16.msrb.mxu1 %v3364_v21 }
 0x62b   : > { %7386 = vmatmul.msk.bf16.vlgmr.msra.gmra.mxu2 %vm2875_vm14, %v7895_v5 }
 0x62c   : > { %v3441_v46 = vpop.permute.xlu1 %3440  ;;  %v3265_v17 = vpop.permute.xlu2 %3264 }
 0x62d   : > { %v3275_v22 = vsel %vm1036_vm10, %v3265_v17, %v3267_v8 }
 0x62e   : > { %3293 = vmatpush.bf16.msra.mxu0 %v3275_v22 }
 0x630   : > { %7385 = vmatmul.msk.bf16.vlgmr.msra.gmra.mxu1 %vm2875_vm14, %v7895_v5  ;;  %v3439_v18 = vpop.permute.xlu0 %3438 }
 0x631   : > { %v3449_v63 = vsel %vm1070_vm8, %v3439_v18, %v3441_v46 }
 0x632   : > { %3294 = vmatpush.bf16.msra.mxu0 %v3272_v26  ;;  %3467 = vmatpush.bf16.msrb.mxu2 %v3449_v63 }
 0x633   : > { %7391 = vmatmul.msk.bf16.vlgmr.msra.gmra.mxu3 %vm2875_vm14, %v7896_v36 }
 0x634   : > { %v3348_v54 = vpop.permute.xlu1 %3347  ;;  %v3350_v60 = vpop.permute.xlu2 %3349 }
 0x635   : > { %7384 = vmatmul.msk.bf16.vlgmr.msra.gmra.mxu0 %vm2875_vm14, %v7895_v5  ;;  %v3361_v50 = vsel %vm1053_vm9, %v3348_v54, %v3350_v60  ;;  %v3360_v52 = vsel %vm1053_vm9, %v3346_v45, %v3348_v54 }
 0x636   : > { %3394 = vmatpush.bf16.msrb.mxu0 %v3363_v39  ;;  %3409 = vmatpush.bf16.msrb.mxu1 %v3361_v50 }
 0x637   : > { %3468 = vmatpush.bf16.msrb.mxu2 %v3446_v4 }
 0x638   : > { %v3443_v19 = vpop.permute.xlu0 %3442 }
 0x639   : > { %v3450_v44 = vsel %vm1070_vm8, %v3441_v46, %v3443_v19 }
 0x63a   : > { %3395 = vmatpush.bf16.msrb.mxu0 %v3360_v52  ;;  %3481 = vmatpush.bf16.msrb.mxu3 %v3450_v44 }
 0x63b   : > { %7398 = vmatmul.msk.bf16.vlgmr.msrb.gmra.mxu2 %vm2875_vm14, %v7897_v55 }
 0x63c   : > { %v3528_v20 = vpop.permute.xlu1 %3527  ;;  %v3530_v58 = vpop.permute.xlu2 %3529 }
 0x63d   : > { %v3537_v56 = vsel %vm1087_vm11, %v3528_v20, %v3530_v58 }
 0x63e   : > { %3568 = vmatpush.bf16.msra.mxu2 %v3537_v56 }
 0x640   : > { %7393 = vmatmul.msk.bf16.vlgmr.msrb.gmra.mxu1 %vm2875_vm14, %v7896_v36  ;;  %v3435_v62 = vpop.permute.xlu0 %3434 }
 0x641   : > { %v3447_v25 = vsel %vm1070_vm8, %v3433_v32, %v3435_v62 }
 0x642   : > { %3482 = vmatpush.bf16.msrb.mxu3 %v3447_v25 }
 0x644   : > { %v3520_v53 = vpop.permute.xlu1 %3519 }
 0x645   : > { %v3522_v29 = vpop.permute.xlu2 %3521  ;;  %7392 = vmatmul.msk.bf16.vlgmr.msrb.gmra.mxu0 %vm2875_vm14, %v7896_v36  ;;  %7399 = vmatmul.msk.bf16.vlgmr.msrb.gmra.mxu3 %vm2875_vm14, %v7897_v55 }
 0x646   : > { %v3534_v13 = vsel %vm1087_vm11, %v3520_v53, %v3522_v29 }
 0x647   : > { %3569 = vmatpush.bf16.msra.mxu2 %v3534_v13 }
 0x648   : > { %v3526_v47 = vpop.permute.xlu0 %3525 }
 0x649   : > { %v3536_v43 = vsel %vm1087_vm11, %v3526_v47, %v3528_v20 }
 0x64a   : > { %3554 = vmatpush.bf16.msra.mxu1 %v3536_v43 }
 0x64b   : > { %7406 = vmatmul.msk.bf16.vlgmr.msra.gmra.mxu2 %vm2875_vm14, %v7898_v40 }
 0x64c   : > { %v3518_v6 = vpop.permute.xlu1 %3517 }
 0x64d   : > { %v3532_v24 = vpop.permute.xlu2 %3531  ;;  %v3533_v10 = vsel %vm1087_vm11, %v3518_v6, %v3520_v53 }
 0x64e   : > { %v3538_v57 = vsel %vm1087_vm11, %v3530_v58, %v3532_v24  ;;  %3555 = vmatpush.bf16.msra.mxu1 %v3533_v10 }
 0x64f   : > { %3582 = vmatpush.bf16.msra.mxu3 %v3538_v57 }
 0x650   : > { %v3445_v2 = vpop.permute.xlu0 %3444 }
 0x651   : > { %v3451_v16 = vsel %vm1070_vm8, %v3443_v19, %v3445_v2  ;;  %7405 = vmatmul.msk.bf16.vlgmr.msra.gmra.mxu1 %vm2875_vm14, %v7898_v40 }
 0x652   : > { %3495 = vmatpush.bf16.msra.mxu0 %v3451_v16 }
 0x654   : > { %v3524_v14 = vpop.permute.xlu1 %3523 }
 0x655   : > { %v3437_v1 = vpop.permute.xlu2 %3436  ;;  %v3535_v31 = vsel %vm1087_vm11, %v3522_v29, %v3524_v14 }
 0x656   : > { %v3448_v61 = vsel %vm1070_vm8, %v3435_v62, %v3437_v1  ;;  %3583 = vmatpush.bf16.msra.mxu3 %v3535_v31 }
 0x657   : > { %3496 = vmatpush.bf16.msra.mxu0 %v3448_v61 }
 0x659   : > { %7407 = vmatmul.msk.bf16.vlgmr.msra.gmra.mxu3 %vm2875_vm14, %v7898_v40 }
 0x65a   : > { %7400 = vmatmul.msk.bf16.vlgmr.msra.gmra.mxu0 %vm2875_vm14, %v7897_v55 }
 0x65b   : > { %v2888_v15 = vpop.f32.mrf.mxu1 }
 0x663   : > { %v2890_v28 = vpop.f32.mrf.mxu1 }
 0x66d   : > { %v2902_v30 = vpop.f32.mrf.mxu2 }
 0x66e   : > { %v2916_v23 = vpop.f32.mrf.mxu3 }
 0x672   : > { %v2966_v0 = vpop.f32.mrf.mxu0 }
 0x673   : > { %v2967_v53 = vadd.f32 %v2966_v0, %v2888_v15 }
 0x675   : > { %v2904_v41 = vpop.f32.mrf.mxu2 }
 0x676   : > { %v2980_v45 = vpop.f32.mrf.mxu1  ;;  %v9450_v34 = vpop.f32.mrf.mxu3 }
 0x677   : > { %v2981_v33 = vadd.f32 %v2980_v45, %v2902_v30 }
 0x67a   : > { %v2968_v32 = vpop.f32.mrf.mxu0 }
 0x67b   : > { %v2969_v16 = vadd.f32 %v2968_v32, %v2890_v28 }
 0x67d   : > { %v2994_v35 = vpop.f32.mrf.mxu2 }
 0x67e   : > { %v2995_v8 = vadd.f32 %v2994_v35, %v2916_v23  ;;  %v2982_v3 = vpop.f32.mrf.mxu1 }
 0x67f   : > { %v2983_v1 = vadd.f32 %v2982_v3, %v2904_v41 }
 0x680   : > { %v3047_v38 = vpop.f32.mrf.mxu3 }
 0x681   : > { %v3080_v13 = vadd.f32 %v3047_v38, %v2967_v53 }
 0x685   : > { %v9452_v7 = vpop.f32.mrf.mxu2 }
 0x688   : > { %v3049_v21 = vpop.f32.mrf.mxu3 }
 0x689   : > { %v3083_v30 = vadd.f32 %v3049_v21, %v2969_v16 }
 0x68a   : > { %v3061_v37 = vpop.f32.mrf.mxu0 }
 0x68b   : > { %v3081_v40 = vadd.f32 %v3061_v37, %v2981_v33 }
 0x68d   : > { %v3075_v27 = vpop.f32.mrf.mxu1 }
 0x68e   : > { %v9454_v5 = vadd.f32 %v3075_v27, %v2995_v8  ;;  %v3134_v48 = vpop.f32.mrf.mxu2 }
 0x68f   : > { %v3167_v47 = vadd.f32 %v3134_v48, %v3080_v13 }
 0x692   : > { %v3063_v17 = vpop.f32.mrf.mxu0 }
 0x693   : > { %v3084_v23 = vadd.f32 %v3063_v17, %v2983_v1 }
 0x695   : > { %v9456_v42 = vpop.f32.mrf.mxu1 }
 0x696   : > { %v3136_v46 = vpop.f32.mrf.mxu2  ;;  %v3148_v22 = vpop.f32.mrf.mxu3 }
 0x697   : > { %v3168_v43 = vadd.f32 %v3148_v22, %v3081_v40  ;;  %v3170_v15 = vadd.f32 %v3136_v46, %v3083_v30 }
 0x69a   : > { %v3162_v26 = vpop.f32.mrf.mxu0 }
 0x69b   : > { %v3169_v46 = vadd.f32 %v3162_v26, %v9454_v5 }
 0x69d   : > { %v3199_v36 = vpop.f32.mrf.mxu1 }
 0x69e   : > { %v3213_v18 = vpop.f32.mrf.mxu2  ;;  %v3150_v63 = vpop.f32.mrf.mxu3  ;;  %v3232_v6 = vadd.f32 %v3199_v36, %v3167_v47 }
 0x69f   : > { %v3233_v57 = vadd.f32 %v3213_v18, %v3168_v43  ;;  %v3171_v35 = vadd.f32 %v3150_v63, %v3084_v23  ;;  %v3601_v36 = vpop.permute.xlu0 %3600  ;;  %v2997_v43 = vadd.f32 %v9452_v7, %v9450_v34 }
 0x6a2   : > { %v9458_v50 = vpop.f32.mrf.mxu0 }
 0x6a5   : > { %v3201_v39 = vpop.f32.mrf.mxu1 }
 0x6a6   : > { %v3215_v54 = vpop.f32.mrf.mxu2  ;;  %v3227_v60 = vpop.f32.mrf.mxu3  ;;  %v3235_v8 = vadd.f32 %v3201_v39, %v3170_v15 }
 0x6a7   : > { %v3236_v37 = vadd.f32 %v3215_v54, %v3171_v35 }
 0x6ad   : > { %v3310_v4 = vpop.f32.mrf.mxu1 }
 0x6ae   : > { %v3324_v52 = vpop.f32.mrf.mxu2  ;;  %v9460_v55 = vpop.f32.mrf.mxu3  ;;  %v3330_v31 = vadd.f32 %v3310_v4, %v3233_v57 }
 0x6b2   : > { %v3296_v19 = vpop.f32.mrf.mxu0 }
 0x6b3   : > { %v3329_v14 = vadd.f32 %v3296_v19, %v3232_v6 }
 0x6b5   : > { %v3312_v44 = vpop.f32.mrf.mxu1 }
 0x6b6   : > { %v9462_v20 = vpop.f32.mrf.mxu2  ;;  %v3383_v58 = vpop.f32.mrf.mxu3  ;;  %v3333_v41 = vadd.f32 %v3312_v44, %v3236_v37 }
 0x6b7   : > { %v3416_v0 = vadd.f32 %v3383_v58, %v3329_v14  ;;  %v3606_v44 = vpop.permute.xlu1 %3605 }
 0x6ba   : > { %v3298_v56 = vpop.f32.mrf.mxu0 }
 0x6bb   : > { %v3332_v18 = vadd.f32 %v3298_v56, %v3235_v8 }
 0x6bd   : > { %v3411_v62 = vpop.f32.mrf.mxu1 }
 0x6be   : > { %v3470_v25 = vpop.f32.mrf.mxu2  ;;  %v3385_v29 = vpop.f32.mrf.mxu3 }
 0x6bf   : > { %v3503_v38 = vadd.f32 %v3470_v25, %v3416_v0  ;;  %v3419_v63 = vadd.f32 %v3385_v29, %v3332_v18  ;;  %v3234_v25 = vadd.f32 %v3227_v60, %v3169_v46  ;;  %v3085_v29 = vadd.f32 %v9456_v42, %v2997_v43  ;;  %v7416_v46 = vld [vmem:[#allocation2 + $0x18] sm:$0xf0]  ;;  %v7901_v43 = vld [vmem:[#allocation2 + $0x1c] sm:$0xf0] }
 0x6c1   : > { %v3331_v6 = vadd.f32 %v3324_v52, %v3234_v25  ;;  %v3172_v14 = vadd.f32 %v9458_v50, %v3085_v29  ;;  %v3653_v29 = vpop.permute.xlu2 %3652 }
 0x6c2   : > { %v3397_v24 = vpop.f32.mrf.mxu0 }
 0x6c3   : > { %v3417_v45 = vadd.f32 %v3397_v24, %v3330_v31  ;;  %v3418_v60 = vadd.f32 %v3411_v62, %v3331_v6  ;;  %v3237_v30 = vadd.f32 %v9460_v55, %v3172_v14  ;;  %v7422_v6 = vld [vmem:[#allocation2 + $0xc] sm:$0xf] }
 0x6c5   : > { %v9464_v2 = vpop.f32.mrf.mxu1  ;;  %v3334_v23 = vadd.f32 %v9462_v20, %v3237_v30 }
 0x6c6   : > { %v3472_v10 = vpop.f32.mrf.mxu2 }
 0x6c7   : > { %v3506_v53 = vadd.f32 %v3472_v10, %v3419_v63  ;;  %v3421_v15 = vadd.f32 %v9464_v2, %v3334_v23  ;;  %v7414_v63 = vld [vmem:[#allocation2 + $0x4] sm:$0xf]  ;;  %v3658_v23 = vpop.permute.xlu0 %3657 }
 0x6c8   : > { %v3484_v61 = vpop.f32.mrf.mxu3 }
 0x6c9   : > { %v3504_v33 = vadd.f32 %v3484_v61, %v3417_v45 }
 0x6ca   : > { %v3399_v28 = vpop.f32.mrf.mxu0 }
 0x6cb   : > { %v3420_v17 = vadd.f32 %v3399_v28, %v3333_v41  ;;  %v7903_v28 = vld [vmem:[#allocation2 + $0x3c] sm:$0xf0]  ;;  %v7426_v41 = vld [vmem:[#allocation2 + $0x2c] sm:$0xf] }
 0x6ce   : > { %v3571_v27 = vpop.f32.mrf.mxu2  ;;  %v3557_v22 = vpop.f32.mrf.mxu1 }
 0x6cf   : > { %v3591_v48 = vadd.f32 %v3571_v27, %v3504_v33  ;;  %v3590_v32 = vadd.f32 %v3557_v22, %v3503_v38 }
 0x6d0   : > { %v3486_v21 = vpop.f32.mrf.mxu3 }
 0x6d1   : > { %v3609_v3 = vadd.f32 %v3601_v36, %v3591_v48  ;;  %v3608_v4 = vadd.f32 %v3601_v36, %v3590_v32  ;;  %v3507_v39 = vadd.f32 %v3486_v21, %v3420_v17  ;;  %v7428_v32 = vld [vmem:[#allocation2 + $0x40] sm:$0xf0]  ;;  %v7427_v21 = vor.u32 %v7903_v28, %v7426_v41 }
 0x6d3   : > { %v3615_v19 = vmax.f32 %v3609_v3, 0.0  ;;  %v3614_v58 = vmax.f32 %v3608_v4, 0.0  ;;  %v7902_v3 = vld [vmem:[#allocation2 + $0x30] sm:$0xf] }
 0x6d4   : > { %v7431_v17 = vor.u32 %v7902_v3, %v7428_v32 }
 0x6d5   : > { %v3621_v54 = vmul.f32 %v3615_v19, %v8916_v51  ;;  %v3620_v13 = vmul.f32 %v3614_v58, %v8914_v49  ;;  %v7900_v19 = vld [vmem:[#allocation2 + $0x14] sm:$0xf0]  ;;  %v7899_v58 = vld [vmem:[#allocation2 + $0x8] sm:$0xf] }
 0x6d6   : > { %v3573_v56 = vpop.f32.mrf.mxu2  ;;  %v3559_v47 = vpop.f32.mrf.mxu1  ;;  %v7419_v25 = vor.u32 %v7899_v58, %v7416_v46  ;;  %v3768_v46 = vld [vmem:[#allocation2 + $0x20] sm:$0xf] }
 0x6d7   : > { %v3594_v40 = vadd.f32 %v3573_v56, %v3507_v39  ;;  %v3626_v24 = vpack.c.bf16 %v3621_v54, %v3620_v13  ;;  %v3498_v57 = vpop.f32.mrf.mxu0  ;;  %v3593_v5 = vadd.f32 %v3559_v47, %v3506_v53  ;;  %v7415_v39 = vor.u32 %v7900_v19, %v7414_v63  ;;  %v7908_v53 = vld [vmem:[%s10424_s12] sm:$0xff]  ;;  %v7434_v47 = vld [vmem:[#allocation2 + $0x34] sm:$0xf] }
 0x6d8   : > { %v3505_v1 = vadd.f32 %v3498_v57, %v3418_v60  ;;  %v7457_v57 = vld [vmem:[#allocation2] sm:$0xf] }
 0x6d9   : > { %v3612_v26 = vadd.f32 %v3606_v44, %v3594_v40  ;;  %3630 = vst [vmem:[#allocation2 + $0x54] sm:$0xff] %v3626_v24  ;;  %v3611_v10 = vadd.f32 %v3606_v44, %v3593_v5  ;;  %v7904_v40 = vld [vmem:[#allocation2 + $0x44] sm:$0xf0]  ;;  %v7423_v24 = vor.u32 %v7901_v43, %v7422_v6  ;;  %v7911_v5 = vld [vmem:[#allocation2 + $0x10] sm:$0xf0] }
 0x6da   : > { %v7556_v43 = vld [vmem:[#allocation2 + $0x28] sm:$0xf]  ;;  %v7930_v6 = vld [vmem:[#allocation2 + $0x38] sm:$0xf0] }
 0x6db   : > { %v3618_v16 = vmax.f32 %v3612_v26, 0.0  ;;  %v3617_v31 = vmax.f32 %v3611_v10, 0.0  ;;  %v9486_v26 = vor.u32 %v7911_v5, %v7457_v57  ;;  %v3765_v10 = vld [vmem:[#allocation2 + $0x4] sm:$0xff] }
 0x6dc   : > { %v3585_v61 = vpop.f32.mrf.mxu3  ;;  %v4453_v5 = vld [vmem:[%s10349_s15] sm:$0xff] }
 0x6dd   : > { %v3624_v34 = vmul.f32 %v3618_v16, %v8916_v51  ;;  %v3623_v7 = vmul.f32 %v3617_v31, %v8914_v49  ;;  %v3592_v52 = vadd.f32 %v3585_v61, %v3505_v1  ;;  %3825 = vrot.lane.b32.xlu1 %v9486_v26, %s8476_s27  ;;  %v3769_v61 = vunpack.c.l.bf16 %v3765_v10 }
 0x6df   : > { %v3628_v45 = vpack.c.bf16 %v3624_v34, %v3623_v7  ;;  %v3610_v42 = vadd.f32 %v3601_v36, %v3592_v52  ;;  %v3500_v62 = vpop.f32.mrf.mxu0  ;;  %v3770_v34 = vunpack.c.h.bf16 %v3765_v10 }
 0x6e0   : > { %v3508_v35 = vadd.f32 %v3500_v62, %v3421_v15  ;;  %v7438_v27 = vld [vmem:[#allocation2 + $0x54] sm:$0xf]  ;;  %v7905_v48 = vld [vmem:[#allocation2 + $0x58] sm:$0xf] }
 0x6e1   : > { %3632 = vst [vmem:[#allocation2 + $0x68] sm:$0xff] %v3628_v45  ;;  %v3616_v0 = vmax.f32 %v3610_v42, 0.0  ;;  %v3767_v62 = vld [vmem:[#allocation2 + $0x18] sm:$0xff] }
 0x6e3   : > { %v3622_v50 = vmul.f32 %v3616_v0, %v8920_v59 }
 0x6e4   : > { %v3587_v33 = vpop.f32.mrf.mxu3 }
 0x6e5   : > { %v3627_v8 = vpack.c.bf16 %v3622_v50, %v3622_v50  ;;  %v3595_v55 = vadd.f32 %v3587_v33, %v3508_v35  ;;  %v3772_v33 = vunpack.c.l.bf16 %v3767_v62 }
 0x6e7   : > { %3631 = vst [vmem:[#allocation2 + $0x5c] sm:$0xf] %v3627_v8  ;;  %v3613_v38 = vadd.f32 %v3606_v44, %v3595_v55  ;;  %v7435_v44 = vor.u32 %v7904_v40, %v7434_v47  ;;  %v3773_v55 = vunpack.c.h.bf16 %v3767_v62  ;;  %v7508_v40 = vld [vmem:[#allocation2 + $0x10] sm:$0xf]  ;;  %v7913_v47 = vld [vmem:[#allocation2 + $0x20] sm:$0xf0] }
 0x6e8   : > { %v7906_v37 = vld [vmem:[#allocation2 + $0x64] sm:$0xf0]  ;;  %v7440_v22 = vld [vmem:[#allocation2 + $0x68] sm:$0xf0] }
 0x6e9   : > { %v3619_v20 = vmax.f32 %v3613_v38, 0.0  ;;  %v7439_v18 = vor.u32 %v7906_v37, %v7438_v27  ;;  %v7443_v36 = vor.u32 %v7905_v48, %v7440_v22  ;;  %v3766_v22 = vld [vmem:[#allocation2 + $0xc] sm:$0xf] }
 0x6eb   : > { %v3625_v2 = vmul.f32 %v3619_v20, %v8920_v59  ;;  %3722 = vmatpush.bf16.msrb.mxu0 %v7439_v18  ;;  %3736 = vmatpush.bf16.msrb.mxu1 %v7443_v36  ;;  %v3771_v36 = vunpack.c.l.bf16 %v3766_v22 }
 0x6ed   : > { %v3629_v4 = vpack.c.bf16 %v3625_v2, %v3625_v2 }
 0x6ee   : > { %v7446_v54 = vld [vmem:[#allocation2 + $0x5c] sm:$0xf] }
 0x6ef   : > { %3633 = vst [vmem:[#allocation2 + $0x70] sm:$0xf] %v3629_v4  ;;  %3723 = vmatpush.bf16.msrb.mxu0 %v7427_v21  ;;  %3737 = vmatpush.bf16.msrb.mxu1 %v7431_v17 }
 0x6f3   : > { %3724 = vmatpush.bf16.msrb.mxu0 %v7415_v39  ;;  %3738 = vmatpush.bf16.msrb.mxu1 %v7419_v25  ;;  %v3774_v39 = vunpack.c.l.bf16 %v3768_v46 }
 0x6f6   : > { %7448 = vmatmul.msk.bf16.vlgmr.msrb.gmra.mxu0 %vm3713_vm15, %v7908_v53  ;;  %7449 = vmatmul.msk.bf16.vlgmr.msrb.gmra.mxu1 %vm3713_vm15, %v7908_v53  ;;  %v7907_v13 = vld [vmem:[#allocation2 + $0x6c] sm:$0xf0] }
 0x6f7   : > { %v7447_v56 = vor.u32 %v7907_v13, %v7446_v54 }
 0x6f9   : > { %3750 = vmatpush.bf16.msrb.mxu2 %v7447_v56 }
 0x6fd   : > { %3751 = vmatpush.bf16.msrb.mxu2 %v7435_v44  ;;  %v7509_v44 = vor.u32 %v7913_v47, %v7508_v40 }
 0x701   : > { %3752 = vmatpush.bf16.msrb.mxu2 %v7423_v24  ;;  %v7557_v24 = vor.u32 %v7930_v6, %v7556_v43 }
 0x704   : > { %7450 = vmatmul.msk.bf16.vlgmr.msrb.gmra.mxu2 %vm3713_vm15, %v7908_v53 }
 0x74f   : > { %v3826_v57 = vpop.permute.xlu1 %3825 }
 0x773   : > { %v3726_v60 = vpop.f32.mrf.mxu0  ;;  %v3740_v16 = vpop.f32.mrf.mxu1 }
 0x774   : > { %v3727_v14 = vadd.f32 %v3726_v60, %v3653_v29  ;;  %v3741_v1 = vadd.f32 %v3740_v16, %v3653_v29  ;;  %v7925_v60 = vld [vmem:[#allocation2 + $0x10] sm:$0xf0] }
 0x776   : > { %v3759_v31 = vmul.f32 %v3727_v14, %v8914_v49  ;;  %v3760_v30 = vmul.f32 %v3741_v1, %v8916_v51  ;;  %v7915_v14 = vld [vmem:[#allocation12 + $0x8] sm:$0xff] }
 0x778   : > { %v3775_v7 = vadd.f32 %v3769_v61, %v3759_v31  ;;  %v3776_v52 = vadd.f32 %v3770_v34, %v3760_v30 }
 0x77a   : > { %v3781_v45 = vpack.c.bf16 %v3776_v52, %v3775_v7 }
 0x77b   : > { %v3728_v42 = vpop.f32.mrf.mxu0  ;;  %v3742_v15 = vpop.f32.mrf.mxu1 }
 0x77c   : > { %3785 = vst [vmem:[#allocation4 + $0x4] sm:$0xff] %v3781_v45  ;;  %v3729_v0 = vadd.f32 %v3728_v42, %v3658_v23  ;;  %v3743_v50 = vadd.f32 %v3742_v15, %v3658_v23 }
 0x77d   : > { %3789 = vst [vmem:[#allocation2 + $0x4] sm:$0xff] %v3781_v45 }
 0x77e   : > { %v3762_v35 = vmul.f32 %v3729_v0, %v8914_v49  ;;  %v3763_v8 = vmul.f32 %v3743_v50, %v8916_v51 }
 0x780   : > { %v3778_v38 = vadd.f32 %v3772_v33, %v3762_v35  ;;  %v3779_v27 = vadd.f32 %v3773_v55, %v3763_v8  ;;  %v7914_v55 = vld [vmem:[#allocation12] sm:$0xff] }
 0x782   : > { %v3783_v37 = vpack.c.bf16 %v3779_v27, %v3778_v38 }
 0x784   : > { %3787 = vst [vmem:[#allocation4 + $0x18] sm:$0xff] %v3783_v37  ;;  %v7465_v28 = vld [vmem:[#allocation2 + $0x8] sm:$0xf]  ;;  %v7909_v41 = vld [vmem:[#allocation2 + $0x4] sm:$0xf] }
 0x785   : > { %3791 = vst [vmem:[#allocation2 + $0x18] sm:$0xff] %v3783_v37  ;;  %v7923_v30 = vld [vmem:[#allocation2 + $0x4] sm:$0xf]  ;;  %v7548_v34 = vld [vmem:[#allocation2 + $0x8] sm:$0xf] }
 0x787   : > { %v3754_v48 = vpop.f32.mrf.mxu2 }
 0x788   : > { %v3755_v20 = vadd.f32 %v3754_v48, %v3653_v29  ;;  %v7540_v29 = vld [vmem:[#allocation2] sm:$0xf] }
 0x789   : > { %v9568_v1 = vor.u32 %v7925_v60, %v7540_v29 }
 0x78a   : > { %v3761_v18 = vmul.f32 %v3755_v20, %v8920_v59 }
 0x78c   : > { %v3777_v32 = vadd.f32 %v3771_v36, %v3761_v18  ;;  %v7912_v2 = vld [vmem:[#allocation2 + $0x18] sm:$0xf0]  ;;  %v7459_v3 = vld [vmem:[#allocation2 + $0x14] sm:$0xf0] }
 0x78d   : > { %v9495_v4 = vor.u32 %v7912_v2, %v7465_v28  ;;  %v9497_v21 = vor.u32 %v7909_v41, %v7459_v3  ;;  %v7542_v31 = vld [vmem:[#allocation2 + $0x14] sm:$0xf0]  ;;  %v7926_v61 = vld [vmem:[#allocation2 + $0x18] sm:$0xf0] }
 0x78e   : > { %v3782_v17 = vpack.c.bf16 %v3777_v32, %v3777_v32  ;;  %v9573_v7 = vor.u32 %v7923_v30, %v7542_v31  ;;  %v9575_v52 = vor.u32 %v7926_v61, %v7548_v34  ;;  %v7916_v2 = vld [vmem:[#allocation12 + $0x10] sm:$0xff] }
 0x78f   : > { %3829 = vrot.lane.b32.xlu0 %v9495_v4, %s8476_s27  ;;  %3891 = vrot.lane.b32.xlu1 %v9497_v21, %s8474_s9  ;;  %v3756_v19 = vpop.f32.mrf.mxu2 }
 0x790   : > { %3786 = vst [vmem:[#allocation4 + $0xc] sm:$0xf] %v3782_v17  ;;  %3827 = vrot.lane.b32.xlu2 %v9497_v21, %s8476_s27  ;;  %v3757_v63 = vadd.f32 %v3756_v19, %v3658_v23 }
 0x791   : > { %3790 = vst [vmem:[#allocation2 + $0xc] sm:$0xf] %v3782_v17 }
 0x792   : > { %v3764_v58 = vmul.f32 %v3757_v63, %v8920_v59  ;;  %v7917_v63 = vld [vmem:[#allocation12 + $0x18] sm:$0xff] }
 0x794   : > { %v3780_v25 = vadd.f32 %v3774_v39, %v3764_v58 }
 0x796   : > { %v3784_v53 = vpack.c.bf16 %v3780_v25, %v3780_v25 }
 0x798   : > { %3788 = vst [vmem:[#allocation4 + $0x20] sm:$0xf] %v3784_v53  ;;  %3893 = vrot.lane.b32.xlu2 %v9495_v4, %s8474_s9  ;;  %v7910_v54 = vld [vmem:[#allocation2 + $0xc] sm:$0xf] }
 0x799   : > { %3792 = vst [vmem:[#allocation2 + $0x20] sm:$0xf] %v3784_v53  ;;  %v7924_v62 = vld [vmem:[#allocation2 + $0xc] sm:$0xf] }
 0x7a0   : > { %3889 = vrot.lane.b32.xlu2 %v9486_v26, %s8474_s9  ;;  %v7467_v13 = vld [vmem:[#allocation2 + $0x1c] sm:$0xf0] }
 0x7a1   : > { %v9510_v56 = vor.u32 %v7910_v54, %v7467_v13  ;;  %v7550_v45 = vld [vmem:[#allocation2 + $0x1c] sm:$0xf0]  ;;  %v7918_v54 = vld [vmem:[#allocation12 + $0x20] sm:$0xff] }
 0x7a2   : > { %v9588_v50 = vor.u32 %v7924_v62, %v7550_v45 }
 0x7a3   : > { %3831 = vrot.lane.b32.xlu0 %v9510_v56, %s8476_s27  ;;  %3895 = vrot.lane.b32.xlu1 %v9510_v56, %s8474_s9 }
 0x7a8   : > { %3956 = vrot.lane.b32.xlu2 %v9486_v26, %s8477_s3 }
 0x7ab   : > { %3960 = vrot.lane.b32.xlu0 %v9495_v4, %s8477_s3  ;;  %3962 = vrot.lane.b32.xlu1 %v9510_v56, %s8477_s3 }
 0x7b0   : > { %4031 = vrot.lane.b32.xlu2 %v9497_v21, %s8478_s11 }
 0x7b3   : > { %3958 = vrot.lane.b32.xlu0 %v9497_v21, %s8477_s3  ;;  %4029 = vrot.lane.b32.xlu1 %v9486_v26, %s8478_s11  ;;  %v4454_v26 = vld [vmem:[%s10349_s15 + $0x8] sm:$0xff] }
 0x7b8   : > { %4171 = vrot.lane.b32.xlu2 %v9495_v4, %s8470_s5 }
 0x7bb   : > { %4033 = vrot.lane.b32.xlu0 %v9495_v4, %s8478_s11  ;;  %4035 = vrot.lane.b32.xlu1 %v9510_v56, %s8478_s11 }
 0x7c0   : > { %4169 = vrot.lane.b32.xlu2 %v9497_v21, %s8470_s5 }
 0x7c3   : > { %4173 = vrot.lane.b32.xlu0 %v9510_v56, %s8470_s5  ;;  %4175 = vrot.lane.b32.xlu1 %v7509_v44, %s8470_s5 }
 0x7c8   : > { %4242 = vrot.lane.b32.xlu2 %v9497_v21, %s8469_s10 }
 0x7cb   : > { %4246 = vrot.lane.b32.xlu0 %v9510_v56, %s8469_s10  ;;  %4248 = vrot.lane.b32.xlu1 %v7509_v44, %s8469_s10 }
 0x7d0   : > { %4317 = vrot.lane.b32.xlu2 %v9495_v4, %s8471_s29 }
 0x7d3   : > { %4244 = vrot.lane.b32.xlu0 %v9495_v4, %s8469_s10  ;;  %4315 = vrot.lane.b32.xlu1 %v9497_v21, %s8471_s29 }
 0x7d8   : > { %4319 = vrot.lane.b32.xlu2 %v9510_v56, %s8471_s29 }
 0x7db   : > { %4388 = vrot.lane.b32.xlu0 %v9497_v21, %s8472_s0  ;;  %4390 = vrot.lane.b32.xlu1 %v9495_v4, %s8472_s0 }
 0x7e0   : > { %4394 = vrot.lane.b32.xlu2 %v7509_v44, %s8472_s0 }
 0x7e3   : > { %4392 = vrot.lane.b32.xlu0 %v9510_v56, %s8472_s0  ;;  %4321 = vrot.lane.b32.xlu1 %v7509_v44, %s8471_s29 }
 0x7e8   : > { %4553 = vrot.lane.b32.xlu2 %v7557_v24, %s8476_s27 }
 0x7ea   : > { %v3828_v10 = vpop.permute.xlu2 %3827 }
 0x7eb   : > { %4457 = vperm.xlu0 %8165, %v4453_v5   ;;  %4462 = vperm.xlu1 %8166, %v4454_v26   ;;  %v3833_v16 = vsel %vm1439_vm5, %v3826_v57, %v3828_v10  ;;  %v7919_v5 = vld [vmem:[#allocation12 + $0x28] sm:$0xff] }
 0x7ec   : > { %3849 = vmatpush.bf16.msrb.mxu3 %v3833_v16 }
 0x7ef   : > { %7471 = vmatmul.msk.bf16.vlgmr.msrb.gmra.mxu3 %vm1446_vm6, %v7915_v14 }
 0x7f0   : > { %4545 = vrot.lane.b32.xlu2 %v9568_v1, %s8476_s27 }
 0x7f2   : > { %v3894_v23 = vpop.permute.xlu2 %3893 }
 0x7f3   : > { %4547 = vrot.lane.b32.xlu0 %v9573_v7, %s8476_s27  ;;  %4549 = vrot.lane.b32.xlu1 %v9575_v52, %s8476_s27 }
 0x7f8   : > { %4627 = vrot.lane.b32.xlu2 %v9575_v52, %s8474_s9 }
 0x7fa   : > { %v3890_v42 = vpop.permute.xlu2 %3889 }
 0x7fb   : > { %4704 = vrot.lane.b32.xlu0 %v9568_v1, %s8477_s3  ;;  %4625 = vrot.lane.b32.xlu1 %v9573_v7, %s8474_s9 }
 0x800   : > { %4712 = vrot.lane.b32.xlu2 %v7557_v24, %s8477_s3 }
 0x801   : > { %v3830_v15 = vpop.permute.xlu0 %3829  ;;  %v3892_v0 = vpop.permute.xlu1 %3891 }
 0x802   : > { %v3834_v35 = vsel %vm1439_vm5, %v3828_v10, %v3830_v15  ;;  %v3897_v33 = vsel %vm1317_vm3, %v3890_v42, %v3892_v0  ;;  %v3898_v8 = vsel %vm1317_vm3, %v3892_v0, %v3894_v23  ;;  %v3957_v38 = vpop.permute.xlu2 %3956  ;;  %v7921_v0 = vld [vmem:[#allocation12 + $0x38] sm:$0xff] }
 0x803   : > { %4551 = vrot.lane.b32.xlu0 %v9588_v50, %s8476_s27  ;;  %4631 = vrot.lane.b32.xlu1 %v7557_v24, %s8474_s9 }
 0x804   : > { %3863 = vmatpush.bf16.msra.mxu0 %v3834_v35  ;;  %3913 = vmatpush.bf16.msra.mxu2 %v3897_v33 }
 0x805   : > { %3927 = vmatpush.bf16.msra.mxu3 %v3898_v8  ;;  %v7922_v8 = vld [vmem:[#allocation12 + $0x40] sm:$0xff] }
 0x807   : > { %7472 = vmatmul.msk.bf16.vlgmr.msra.gmra.mxu0 %vm1446_vm6, %v7915_v14  ;;  %7478 = vmatmul.msk.bf16.vlgmr.msra.gmra.mxu2 %vm1446_vm6, %v7914_v55 }
 0x808   : > { %7479 = vmatmul.msk.bf16.vlgmr.msra.gmra.mxu3 %vm1446_vm6, %v7914_v55  ;;  %4708 = vrot.lane.b32.xlu2 %v9575_v52, %s8477_s3 }
 0x80a   : > { %v4032_v27 = vpop.permute.xlu2 %4031 }
 0x80b   : > { %4629 = vrot.lane.b32.xlu0 %v9588_v50, %s8474_s9  ;;  %4623 = vrot.lane.b32.xlu1 %v9568_v1, %s8474_s9 }
 0x810   : > { %4793 = vrot.lane.b32.xlu2 %v9573_v7, %s8478_s11 }
 0x812   : > { %v4172_v28 = vpop.permute.xlu2 %4171 }
 0x813   : > { %4710 = vrot.lane.b32.xlu0 %v9588_v50, %s8477_s3  ;;  %4799 = vrot.lane.b32.xlu1 %v7557_v24, %s8478_s11 }
 0x815   : > { %v3832_v37 = vpop.permute.xlu0 %3831  ;;  %v3896_v48 = vpop.permute.xlu1 %3895 }
 0x816   : > { %v3835_v22 = vsel %vm1439_vm5, %v3830_v15, %v3832_v37  ;;  %v3899_v20 = vsel %vm1317_vm3, %v3894_v23, %v3896_v48  ;;  %v7920_v23 = vld [vmem:[#allocation12 + $0x30] sm:$0xff] }
 0x817   : > { %3877 = vmatpush.bf16.msra.mxu1 %v3835_v22  ;;  %3941 = vmatpush.bf16.msrb.mxu0 %v3899_v20 }
 0x81a   : > { %7473 = vmatmul.msk.bf16.vlgmr.msra.gmra.mxu1 %vm1446_vm6, %v7915_v14  ;;  %7480 = vmatmul.msk.bf16.vlgmr.msrb.gmra.mxu0 %vm1446_vm6, %v7914_v55  ;;  %v4170_v58 = vpop.permute.xlu2 %4169 }
 0x81b   : > { %4706 = vrot.lane.b32.xlu1 %v9573_v7, %s8477_s3  ;;  %v4177_v13 = vsel %vm1036_vm10, %v4170_v58, %v4172_v28 }
 0x81d   : > { %v3961_v18 = vpop.permute.xlu0 %3960  ;;  %v3963_v36 = vpop.permute.xlu1 %3962 }
 0x81e   : > { %v3966_v32 = vsel %vm1572_vm7, %v3961_v18, %v3963_v36 }
 0x81f   : > { %4008 = vmatpush.bf16.msrb.mxu3 %v3966_v32 }
 0x822   : > { %7487 = vmatmul.msk.bf16.vlgmr.msrb.gmra.mxu3 %vm1446_vm6, %v7916_v2 }
 0x823   : > { %4115 = vmatpush.bf16.msra.mxu3 %v9497_v21 }
 0x825   : > { %v3959_v41 = vpop.permute.xlu0 %3958  ;;  %v4030_v3 = vpop.permute.xlu1 %4029 }
 0x826   : > { %v4037_v17 = vsel %vm1646_vm12, %v4030_v3, %v4032_v27  ;;  %v3964_v19 = vsel %vm1572_vm7, %v3957_v38, %v3959_v41  ;;  %v3965_v46 = vsel %vm1572_vm7, %v3959_v41, %v3961_v18 }
 0x827   : > { %3980 = vmatpush.bf16.msrb.mxu1 %v3964_v19  ;;  %3994 = vmatpush.bf16.msrb.mxu2 %v3965_v46 }
 0x828   : > { %4053 = vmatpush.bf16.msra.mxu0 %v4037_v17 }
 0x82a   : > { %7485 = vmatmul.msk.bf16.vlgmr.msrb.gmra.mxu1 %vm1446_vm6, %v7916_v2  ;;  %7486 = vmatmul.msk.bf16.vlgmr.msrb.gmra.mxu2 %vm1446_vm6, %v7916_v2 }
 0x82b   : > { %7492 = vmatmul.msk.bf16.vlgmr.msra.gmra.mxu0 %vm1446_vm6, %v7917_v63 }
 0x82c   : > { %4129 = vmatpush.bf16.msrb.mxu0 %v9495_v4  ;;  %v4243_v4 = vpop.permute.xlu2 %4242 }
 0x82d   : > { %v4034_v21 = vpop.permute.xlu0 %4033  ;;  %v4036_v39 = vpop.permute.xlu1 %4035 }
 0x82e   : > { %v4039_v25 = vsel %vm1646_vm12, %v4034_v21, %v4036_v39  ;;  %v4038_v53 = vsel %vm1646_vm12, %v4032_v27, %v4034_v21 }
 0x82f   : > { %4067 = vmatpush.bf16.msra.mxu1 %v4038_v53  ;;  %4081 = vmatpush.bf16.msra.mxu2 %v4039_v25 }
 0x832   : > { %7499 = vmatmul.msk.bf16.vlgmr.msra.gmra.mxu3 %vm1446_vm6, %v7918_v54 }
 0x833   : > { %4143 = vmatpush.bf16.msrb.mxu1 %v9510_v56  ;;  %4193 = vmatpush.bf16.msrb.mxu2 %v4177_v13 }
 0x834   : > { %v4318_v6 = vpop.permute.xlu2 %4317 }
 0x835   : > { %v4174_v40 = vpop.permute.xlu0 %4173  ;;  %v4176_v47 = vpop.permute.xlu1 %4175 }
 0x836   : > { %v4179_v44 = vsel %vm1036_vm10, %v4174_v40, %v4176_v47  ;;  %v4178_v43 = vsel %vm1036_vm10, %v4172_v28, %v4174_v40 }
 0x837   : > { %4207 = vmatpush.bf16.msrb.mxu3 %v4178_v43  ;;  %4221 = vmatpush.bf16.msra.mxu0 %v4179_v44 }
 0x83a   : > { %7493 = vmatmul.msk.bf16.vlgmr.msra.gmra.mxu1 %vm1446_vm6, %v7917_v63  ;;  %7494 = vmatmul.msk.bf16.vlgmr.msra.gmra.mxu2 %vm1446_vm6, %v7917_v63 }
 0x83b   : > { %7500 = vmatmul.msk.bf16.vlgmr.msrb.gmra.mxu0 %vm1446_vm6, %v7918_v54 }
 0x83c   : > { %v4320_v14 = vpop.permute.xlu2 %4319 }
 0x83d   : > { %v4247_v56 = vpop.permute.xlu0 %4246  ;;  %v4249_v24 = vpop.permute.xlu1 %4248  ;;  %v4324_v31 = vsel %vm1070_vm8, %v4318_v6, %v4320_v14 }
 0x83e   : > { %v4252_v57 = vsel %vm1053_vm9, %v4247_v56, %v4249_v24 }
 0x83f   : > { %4294 = vmatpush.bf16.msra.mxu3 %v4252_v57 }
 0x842   : > { %7511 = vmatmul.msk.bf16.vlgmr.msrb.gmra.mxu3 %vm1446_vm6, %v7919_v5 }
 0x844   : > { %v4395_v35 = vpop.permute.xlu2 %4394 }
 0x845   : > { %v4245_v26 = vpop.permute.xlu0 %4244  ;;  %v4316_v29 = vpop.permute.xlu1 %4315 }
 0x846   : > { %v4323_v60 = vsel %vm1070_vm8, %v4316_v29, %v4318_v6  ;;  %v4250_v10 = vsel %vm1053_vm9, %v4243_v4, %v4245_v26  ;;  %v4251_v16 = vsel %vm1053_vm9, %v4245_v26, %v4247_v56 }
 0x847   : > { %4266 = vmatpush.bf16.msra.mxu1 %v4250_v10  ;;  %4280 = vmatpush.bf16.msra.mxu2 %v4251_v16 }
 0x848   : > { %4339 = vmatpush.bf16.msrb.mxu0 %v4323_v60 }
 0x84a   : > { %7501 = vmatmul.msk.bf16.vlgmr.msrb.gmra.mxu1 %vm1446_vm6, %v7918_v54  ;;  %7510 = vmatmul.msk.bf16.vlgmr.msrb.gmra.mxu2 %vm1446_vm6, %v7919_v5 }
 0x84b   : > { %7512 = vmatmul.msk.bf16.vlgmr.msra.gmra.mxu0 %vm1446_vm6, %v7919_v5  ;;  %4353 = vmatpush.bf16.msrb.mxu1 %v4324_v31 }
 0x84d   : > { %v4389_v61 = vpop.permute.xlu0 %4388  ;;  %v4391_v30 = vpop.permute.xlu1 %4390 }
 0x84e   : > { %v4396_v34 = vsel %vm1087_vm11, %v4389_v61, %v4391_v30 }
 0x84f   : > { %4412 = vmatpush.bf16.msrb.mxu3 %v4396_v34 }
 0x852   : > { %7519 = vmatmul.msk.bf16.vlgmr.msra.gmra.mxu3 %vm1446_vm6, %v7920_v23 }
 0x855   : > { %v4393_v45 = vpop.permute.xlu0 %4392  ;;  %v4322_v42 = vpop.permute.xlu1 %4321 }
 0x856   : > { %v4397_v62 = vsel %vm1087_vm11, %v4391_v30, %v4393_v45  ;;  %v4325_v15 = vsel %vm1070_vm8, %v4320_v14, %v4322_v42  ;;  %v4398_v33 = vsel %vm1087_vm11, %v4393_v45, %v4395_v35 }
 0x857   : > { %4367 = vmatpush.bf16.msrb.mxu2 %v4325_v15  ;;  %4426 = vmatpush.bf16.msra.mxu0 %v4397_v62 }
 0x85a   : > { %7517 = vmatmul.msk.bf16.vlgmr.msra.gmra.mxu1 %vm1446_vm6, %v7920_v23  ;;  %7518 = vmatmul.msk.bf16.vlgmr.msra.gmra.mxu2 %vm1446_vm6, %v7920_v23 }
 0x85b   : > { %7524 = vmatmul.msk.bf16.vlgmr.msrb.gmra.mxu0 %vm1446_vm6, %v7921_v0  ;;  %4440 = vmatpush.bf16.msra.mxu1 %v4398_v33 }
 0x862   : > { %7531 = vmatmul.msk.bf16.vlgmr.msrb.gmra.mxu3 %vm1446_vm6, %v7922_v8 }
 0x86a   : > { %7525 = vmatmul.msk.bf16.vlgmr.msrb.gmra.mxu1 %vm1446_vm6, %v7921_v0  ;;  %7526 = vmatmul.msk.bf16.vlgmr.msrb.gmra.mxu2 %vm1446_vm6, %v7921_v0 }
 0x86b   : > { %7532 = vmatmul.msk.bf16.vlgmr.msra.gmra.mxu0 %vm1446_vm6, %v7922_v8 }
 0x872   : > { %v3851_v55 = vpop.f32.mrf.mxu3 }
 0x87a   : > { %7533 = vmatmul.msk.bf16.vlgmr.msra.gmra.mxu1 %vm1446_vm6, %v7922_v8  ;;  %v3853_v38 = vpop.f32.mrf.mxu3 }
 0x884   : > { %v3865_v27 = vpop.f32.mrf.mxu0 }
 0x88a   : > { %v3915_v28 = vpop.f32.mrf.mxu2 }
 0x88b   : > { %v3929_v37 = vpop.f32.mrf.mxu3  ;;  %v3916_v10 = vadd.f32 %v3915_v28, %v3851_v55 }
 0x88c   : > { %v3930_v48 = vadd.f32 %v3929_v37, %v3865_v27  ;;  %v3867_v22 = vpop.f32.mrf.mxu0 }
 0x892   : > { %v3917_v3 = vpop.f32.mrf.mxu2 }
 0x893   : > { %v3931_v32 = vpop.f32.mrf.mxu3  ;;  %v3918_v23 = vadd.f32 %v3917_v3, %v3853_v38  ;;  %v4458_v38 = vpop.permute.xlu0 %4457 }
 0x897   : > { %v3879_v20 = vpop.f32.mrf.mxu1  ;;  %v3943_v18 = vpop.f32.mrf.mxu0 }
 0x898   : > { %v3944_v36 = vadd.f32 %v3943_v18, %v3879_v20  ;;  %v3932_v20 = vadd.f32 %v3931_v32, %v3867_v22 }
 0x89f   : > { %v9658_v2 = vpop.f32.mrf.mxu1  ;;  %v9660_v41 = vpop.f32.mrf.mxu0 }
 0x8a5   : > { %v4010_v17 = vpop.f32.mrf.mxu3 }
 0x8a6   : > { %v4017_v19 = vadd.f32 %v4010_v17, %v3944_v36 }
 0x8a7   : > { %v3982_v46 = vpop.f32.mrf.mxu1 }
 0x8a8   : > { %v4055_v63 = vpop.f32.mrf.mxu0  ;;  %v4015_v31 = vadd.f32 %v3982_v46, %v3916_v10 }
 0x8aa   : > { %v4088_v34 = vadd.f32 %v4055_v63, %v4015_v31 }
 0x8ad   : > { %v3996_v58 = vpop.f32.mrf.mxu2  ;;  %v9662_v21 = vpop.f32.mrf.mxu3 }
 0x8ae   : > { %v4016_v45 = vadd.f32 %v3996_v58, %v3930_v48 }
 0x8af   : > { %v3984_v39 = vpop.f32.mrf.mxu1 }
 0x8b0   : > { %v4057_v25 = vpop.f32.mrf.mxu0  ;;  %v4018_v0 = vadd.f32 %v3984_v39, %v3918_v23 }
 0x8b2   : > { %v4091_v55 = vadd.f32 %v4057_v25, %v4018_v0 }
 0x8b5   : > { %v3998_v53 = vpop.f32.mrf.mxu2  ;;  %v4117_v54 = vpop.f32.mrf.mxu3 }
 0x8b6   : > { %v4150_v42 = vadd.f32 %v4117_v54, %v4088_v34  ;;  %v4019_v36 = vadd.f32 %v3998_v53, %v3932_v20 }
 0x8b7   : > { %v4069_v13 = vpop.f32.mrf.mxu1 }
 0x8b8   : > { %v4131_v4 = vpop.f32.mrf.mxu0  ;;  %v4089_v35 = vadd.f32 %v4069_v13, %v4016_v45  ;;  %v4463_v45 = vpop.permute.xlu1 %4462 }
 0x8ba   : > { %v4151_v18 = vadd.f32 %v4131_v4, %v4089_v35 }
 0x8bd   : > { %v4083_v40 = vpop.f32.mrf.mxu2  ;;  %v4119_v47 = vpop.f32.mrf.mxu3 }
 0x8be   : > { %v4153_v28 = vadd.f32 %v4119_v47, %v4091_v55  ;;  %v4090_v32 = vadd.f32 %v4083_v40, %v4017_v19 }
 0x8bf   : > { %v4071_v44 = vpop.f32.mrf.mxu1 }
 0x8c0   : > { %v4133_v43 = vpop.f32.mrf.mxu0  ;;  %v4092_v48 = vadd.f32 %v4071_v44, %v4019_v36 }
 0x8c2   : > { %v4154_v34 = vadd.f32 %v4133_v43, %v4092_v48 }
 0x8c5   : > { %v9664_v6 = vpop.f32.mrf.mxu2  ;;  %v4209_v56 = vpop.f32.mrf.mxu3 }
 0x8c6   : > { %v4229_v17 = vadd.f32 %v4209_v56, %v4151_v18 }
 0x8c7   : > { %v4145_v24 = vpop.f32.mrf.mxu1 }
 0x8c8   : > { %v9666_v57 = vpop.f32.mrf.mxu0 }
 0x8cd   : > { %v4195_v5 = vpop.f32.mrf.mxu2  ;;  %v4211_v26 = vpop.f32.mrf.mxu3 }
 0x8ce   : > { %v4228_v33 = vadd.f32 %v4195_v5, %v4150_v42  ;;  %v4232_v25 = vadd.f32 %v4211_v26, %v4154_v34  ;;  %v3946_v42 = vadd.f32 %v9660_v41, %v9658_v2 }
 0x8cf   : > { %v9668_v29 = vpop.f32.mrf.mxu1 }
 0x8d0   : > { %v9670_v60 = vpop.f32.mrf.mxu0 }
 0x8d5   : > { %v4197_v16 = vpop.f32.mrf.mxu2  ;;  %v4296_v14 = vpop.f32.mrf.mxu3 }
 0x8d6   : > { %v4231_v3 = vadd.f32 %v4197_v16, %v4153_v28 }
 0x8d7   : > { %v4268_v61 = vpop.f32.mrf.mxu1 }
 0x8d8   : > { %v4341_v30 = vpop.f32.mrf.mxu0  ;;  %v4301_v27 = vadd.f32 %v4268_v61, %v4228_v33  ;;  %v4020_v33 = vadd.f32 %v9662_v21, %v3946_v42  ;;  %v4550_v42 = vpop.permute.xlu1 %4549 }
 0x8da   : > { %v4374_v46 = vadd.f32 %v4341_v30, %v4301_v27  ;;  %v4152_v30 = vadd.f32 %v4145_v24, %v4090_v32 }
 0x8dc   : > { %v4230_v24 = vadd.f32 %v9666_v57, %v4152_v30 }
 0x8dd   : > { %v4282_v62 = vpop.f32.mrf.mxu2  ;;  %v9672_v15 = vpop.f32.mrf.mxu3 }
 0x8de   : > { %v4302_v58 = vadd.f32 %v4282_v62, %v4229_v17  ;;  %v4303_v20 = vadd.f32 %v4296_v14, %v4230_v24 }
 0x8df   : > { %v4270_v8 = vpop.f32.mrf.mxu1 }
 0x8e0   : > { %v4343_v37 = vpop.f32.mrf.mxu0  ;;  %v4304_v13 = vadd.f32 %v4270_v8, %v4231_v3 }
 0x8e2   : > { %v4377_v53 = vadd.f32 %v4343_v37, %v4304_v13  ;;  %v4093_v37 = vadd.f32 %v9664_v6, %v4020_v33 }
 0x8e4   : > { %v4155_v55 = vadd.f32 %v9668_v29, %v4093_v37 }
 0x8e5   : > { %v4414_v63 = vpop.f32.mrf.mxu3  ;;  %v4284_v10 = vpop.f32.mrf.mxu2 }
 0x8e6   : > { %v4447_v54 = vadd.f32 %v4414_v63, %v4374_v46  ;;  %v4305_v23 = vadd.f32 %v4284_v10, %v4232_v25  ;;  %v4233_v57 = vadd.f32 %v9670_v60, %v4155_v55 }
 0x8e7   : > { %v4355_v39 = vpop.f32.mrf.mxu1 }
 0x8e8   : > { %v4465_v5 = vadd.f32 %v4458_v38, %v4447_v54  ;;  %v4375_v31 = vadd.f32 %v4355_v39, %v4302_v58  ;;  %v4428_v61 = vpop.f32.mrf.mxu0  ;;  %v4306_v6 = vadd.f32 %v9672_v15, %v4233_v57 }
 0x8ea   : > { %v4448_v22 = vadd.f32 %v4428_v61, %v4375_v31  ;;  %v4471_v4 = vmax.f32 %v4465_v5, 0.0 }
 0x8ec   : > { %v4466_v47 = vadd.f32 %v4458_v38, %v4448_v22  ;;  %v4477_v0 = vmul.f32 %v4471_v4, %v8914_v49 }
 0x8ed   : > { %v4416_v56 = vpop.f32.mrf.mxu3  ;;  %v4369_v40 = vpop.f32.mrf.mxu2 }
 0x8ee   : > { %v4472_v44 = vmax.f32 %v4466_v47, 0.0  ;;  %v4450_v16 = vadd.f32 %v4416_v56, %v4377_v53  ;;  %v4376_v18 = vadd.f32 %v4369_v40, %v4303_v20  ;;  %v7611_v47 = vld [vmem:[#allocation2 + $0x38] sm:$0xf]  ;;  %v7932_v56 = vld [vmem:[#allocation2 + $0x48] sm:$0xf0] }
 0x8ef   : > { %v4357_v62 = vpop.f32.mrf.mxu1  ;;  %v9708_v30 = vor.u32 %v7932_v56, %v7611_v47 }
 0x8f0   : > { %v4478_v43 = vmul.f32 %v4472_v44, %v8916_v51  ;;  %v4468_v35 = vadd.f32 %v4463_v45, %v4450_v16  ;;  %v4378_v19 = vadd.f32 %v4357_v62, %v4305_v23  ;;  %v4430_v26 = vpop.f32.mrf.mxu0  ;;  %v7927_v23 = vld [vmem:[#allocation2 + $0x20] sm:$0xf0]  ;;  %v4554_v16 = vpop.permute.xlu2 %4553 }
 0x8f2   : > { %v4483_v8 = vpack.c.bf16 %v4478_v43, %v4477_v0  ;;  %v4451_v27 = vadd.f32 %v4430_v26, %v4378_v19  ;;  %v4474_v2 = vmax.f32 %v4468_v35, 0.0  ;;  %v4548_v0 = vpop.permute.xlu0 %4547  ;;  %v9750_v43 = vpop.permute.xlu1 %4625 }
 0x8f3   : > { %v4562_v57 = vsel %vm1439_vm5, %v4548_v0, %v4550_v42 }
 0x8f4   : > { %4487 = vst [vmem:[#allocation2 + $0x2c] sm:$0xff] %v4483_v8  ;;  %v4469_v41 = vadd.f32 %v4463_v45, %v4451_v27  ;;  %v4480_v17 = vmul.f32 %v4474_v2, %v8914_v49 }
 0x8f5   : > { %v4371_v3 = vpop.f32.mrf.mxu2 }
 0x8f6   : > { %v4475_v36 = vmax.f32 %v4469_v41, 0.0  ;;  %v4379_v58 = vadd.f32 %v4371_v3, %v4306_v6 }
 0x8f7   : > { %v4442_v28 = vpop.f32.mrf.mxu1 }
 0x8f8   : > { %v4481_v46 = vmul.f32 %v4475_v36, %v8916_v51  ;;  %v4449_v21 = vadd.f32 %v4442_v28, %v4376_v18 }
 0x8fa   : > { %v4485_v63 = vpack.c.bf16 %v4481_v46, %v4480_v17  ;;  %v4467_v48 = vadd.f32 %v4458_v38, %v4449_v21  ;;  %v9760_v19 = vpop.permute.xlu0 %4704  ;;  %v4632_v40 = vpop.permute.xlu1 %4631  ;;  %v5294_v21 = vld [vmem:[%s10351_s17 + $0x8] sm:$0xff] }
 0x8fb   : > { %v7564_v5 = vld [vmem:[#allocation2 + $0x30] sm:$0xf]  ;;  %v7928_v61 = vld [vmem:[#allocation2 + $0x2c] sm:$0xf] }
 0x8fc   : > { %4489 = vst [vmem:[#allocation2 + $0x40] sm:$0xff] %v4485_v63  ;;  %v4473_v14 = vmax.f32 %v4467_v48, 0.0  ;;  %v7934_v63 = vld [vmem:[#allocation14 + $0x8] sm:$0xff] }
 0x8fe   : > { %v4479_v29 = vmul.f32 %v4473_v14, %v8920_v59 }
 0x8ff   : > { %v4444_v54 = vpop.f32.mrf.mxu1 }
 0x900   : > { %v4484_v10 = vpack.c.bf16 %v4479_v29, %v4479_v29  ;;  %v4452_v39 = vadd.f32 %v4444_v54, %v4379_v58  ;;  %v5495_v54 = vld [vmem:[%s10355_s21] sm:$0xff] }
 0x902   : > { %4488 = vst [vmem:[#allocation2 + $0x34] sm:$0xf] %v4484_v10  ;;  %v4470_v13 = vadd.f32 %v4463_v45, %v4452_v39  ;;  %v4546_v45 = vpop.permute.xlu2 %4545  ;;  %v4552_v33 = vpop.permute.xlu0 %4551  ;;  %v5293_v10 = vld [vmem:[%s10351_s17] sm:$0xff] }
 0x903   : > { %v7931_v31 = vld [vmem:[#allocation2 + $0x40] sm:$0xf0]  ;;  %v7558_v34 = vld [vmem:[#allocation2 + $0x3c] sm:$0xf0]  ;;  %v4624_v24 = vpop.permute.xlu1 %4623  ;;  %v4561_v48 = vsel %vm1439_vm5, %v4546_v45, %v4548_v0  ;;  %v4563_v6 = vsel %vm1439_vm5, %v4550_v42, %v4552_v33  ;;  %v5496_v0 = vld [vmem:[%s10355_s21 + $0x8] sm:$0xff] }
 0x904   : > { %v4476_v60 = vmax.f32 %v4470_v13, 0.0  ;;  %v9687_v22 = vor.u32 %v7931_v31, %v7564_v5  ;;  %v9689_v38 = vor.u32 %v7928_v61, %v7558_v34  ;;  %v4639_v39 = vsel %vm1317_vm3, %v4624_v24, %v9750_v43  ;;  %v7933_v13 = vld [vmem:[#allocation14] sm:$0xff] }
 0x906   : > { %v4482_v15 = vmul.f32 %v4476_v60, %v8920_v59  ;;  %4557 = vrot.lane.b32.xlu1 %v9687_v22, %s8476_s27  ;;  %4555 = vrot.lane.b32.xlu0 %v9689_v38, %s8476_s27 }
 0x908   : > { %v4486_v32 = vpack.c.bf16 %v4482_v15, %v4482_v15  ;;  %v5346_v15 = vld [vmem:[%s10353_s19 + $0x8] sm:$0xff] }
 0x909   : > { %v7929_v25 = vld [vmem:[#allocation2 + $0x34] sm:$0xf] }
 0x90a   : > { %4490 = vst [vmem:[#allocation2 + $0x48] sm:$0xf] %v4486_v32  ;;  %v9748_v62 = vpop.permute.xlu2 %4627  ;;  %v4630_v27 = vpop.permute.xlu0 %4629 }
 0x90b   : > { %v9780_v37 = vpop.permute.xlu1 %4799  ;;  %v4640_v32 = vsel %vm1317_vm3, %v9750_v43, %v9748_v62 }
 0x90e   : > { %4791 = vrot.lane.b32.xlu1 %v9568_v1, %s8478_s11  ;;  %4633 = vrot.lane.b32.xlu0 %v9689_v38, %s8474_s9  ;;  %v7607_v1 = vld [vmem:[#allocation2 + $0x10] sm:$0xf] }
 0x90f   : > { %v9728_v44 = vor.u32 %v7927_v23, %v7607_v1  ;;  %v5345_v1 = vld [vmem:[%s10353_s19] sm:$0xff] }
 0x911   : > { %v7566_v53 = vld [vmem:[#allocation2 + $0x44] sm:$0xf0] }
 0x912   : > { %v9700_v4 = vor.u32 %v7929_v25, %v7566_v53  ;;  %v9758_v35 = vpop.permute.xlu2 %4712  ;;  %v9792_v2 = vpop.permute.xlu0 %4710  ;;  %v4641_v25 = vsel %vm1317_vm3, %v9748_v62, %v4630_v27 }
 0x913   : > { %v9794_v41 = vpop.permute.xlu1 %4706 }
 0x914   : > { %4559 = vrot.lane.b32.xlu2 %v9700_v4, %s8476_s27 }
 0x916   : > { %4635 = vrot.lane.b32.xlu1 %v9687_v22, %s8474_s9  ;;  %4797 = vrot.lane.b32.xlu0 %v9588_v50, %s8478_s11 }
 0x91a   : > { %v9768_v26 = vpop.permute.xlu2 %4708 }
 0x91b   : > { %v4721_v43 = vsel %vm1572_vm7, %v9794_v41, %v9768_v26 }
 0x91c   : > { %4957 = vrot.lane.b32.xlu2 %v9588_v50, %s8470_s5 }
 0x91e   : > { %4795 = vrot.lane.b32.xlu1 %v9575_v52, %s8478_s11  ;;  %4967 = vrot.lane.b32.xlu0 %v9708_v30, %s8470_s5 }
 0x922   : > { %v9778_v8 = vpop.permute.xlu2 %4793 }
 0x924   : > { %4637 = vrot.lane.b32.xlu2 %v9700_v4, %s8474_s9 }
 0x926   : > { %4955 = vrot.lane.b32.xlu1 %v9575_v52, %s8470_s5  ;;  %4714 = vrot.lane.b32.xlu0 %v9689_v38, %s8477_s3 }
 0x92c   : > { %4716 = vrot.lane.b32.xlu2 %v9687_v22, %s8477_s3 }
 0x92e   : > { %4953 = vrot.lane.b32.xlu1 %v9573_v7, %s8470_s5  ;;  %4718 = vrot.lane.b32.xlu0 %v9700_v4, %s8477_s3 }
 0x934   : > { %4801 = vrot.lane.b32.xlu2 %v9689_v38, %s8478_s11 }
 0x936   : > { %5042 = vrot.lane.b32.xlu1 %v9575_v52, %s8469_s10  ;;  %4959 = vrot.lane.b32.xlu0 %v9728_v44, %s8470_s5 }
 0x93c   : > { %5044 = vrot.lane.b32.xlu2 %v9588_v50, %s8469_s10 }
 0x93e   : > { %5127 = vrot.lane.b32.xlu1 %v9573_v7, %s8471_s29  ;;  %4803 = vrot.lane.b32.xlu0 %v9687_v22, %s8478_s11 }
 0x944   : > { %4805 = vrot.lane.b32.xlu2 %v9700_v4, %s8478_s11 }
 0x946   : > { %4963 = vrot.lane.b32.xlu1 %v9687_v22, %s8470_s5  ;;  %5054 = vrot.lane.b32.xlu0 %v9708_v30, %s8469_s10 }
 0x94c   : > { %4965 = vrot.lane.b32.xlu2 %v9700_v4, %s8470_s5 }
 0x94e   : > { %4961 = vrot.lane.b32.xlu1 %v9689_v38, %s8470_s5  ;;  %5040 = vrot.lane.b32.xlu0 %v9573_v7, %s8469_s10 }
 0x954   : > { %5048 = vrot.lane.b32.xlu2 %v9689_v38, %s8469_s10 }
 0x956   : > { %5135 = vrot.lane.b32.xlu1 %v9689_v38, %s8471_s29  ;;  %5046 = vrot.lane.b32.xlu0 %v9728_v44, %s8469_s10 }
 0x95c   : > { %5052 = vrot.lane.b32.xlu2 %v9700_v4, %s8469_s10 }
 0x95e   : > { %5131 = vrot.lane.b32.xlu1 %v9588_v50, %s8471_s29  ;;  %5050 = vrot.lane.b32.xlu0 %v9687_v22, %s8469_s10 }
 0x964   : > { %5137 = vrot.lane.b32.xlu2 %v9687_v22, %s8471_s29 }
 0x966   : > { %5222 = vrot.lane.b32.xlu1 %v9689_v38, %s8472_s0  ;;  %5139 = vrot.lane.b32.xlu0 %v9700_v4, %s8471_s29 }
 0x96c   : > { %5129 = vrot.lane.b32.xlu2 %v9575_v52, %s8471_s29 }
 0x96e   : > { %5218 = vrot.lane.b32.xlu1 %v9588_v50, %s8472_s0  ;;  %5226 = vrot.lane.b32.xlu0 %v9700_v4, %s8472_s0  ;;  %v4560_v20 = vpop.permute.xlu2 %4559 }
 0x974   : > { %5224 = vrot.lane.b32.xlu2 %v9687_v22, %s8472_s0 }
 0x976   : > { %5133 = vrot.lane.b32.xlu1 %v9728_v44, %s8471_s29  ;;  %5216 = vrot.lane.b32.xlu0 %v9575_v52, %s8472_s0  ;;  %v9802_v55 = vpop.permute.xlu2 %4957 }
 0x978   : > { %v4558_v18 = vpop.permute.xlu1 %4557  ;;  %v4556_v36 = vpop.permute.xlu0 %4555 }
 0x979   : > { %v4566_v28 = vsel %vm1439_vm5, %v4558_v18, %v4560_v20  ;;  %v4564_v17 = vsel %vm1439_vm5, %v4554_v16, %v4556_v36  ;;  %v4565_v46 = vsel %vm1439_vm5, %v4556_v36, %v4558_v18 }
 0x97a   : > { %4582 = vmatpush.bf16.msra.mxu2 %v4564_v17  ;;  %4596 = vmatpush.bf16.msra.mxu3 %v4565_v46 }
 0x97b   : > { %4610 = vmatpush.bf16.msrb.mxu0 %v4566_v28 }
 0x97c   : > { %5214 = vrot.lane.b32.xlu2 %v9573_v7, %s8472_s0 }
 0x97e   : > { %5302 = vperm.xlu1 %8166, %v5294_v21   ;;  %4597 = vmatpush.bf16.msra.mxu3 %v4562_v57  ;;  %v4638_v3 = vpop.permute.xlu2 %4637 }
 0x97f   : > { %5228 = vrot.lane.b32.xlu0 %v9708_v30, %s8472_s0  ;;  %4583 = vmatpush.bf16.msra.mxu2 %v4561_v48 }
 0x980   : > { %4611 = vmatpush.bf16.msrb.mxu0 %v4563_v6  ;;  %v4792_v14 = vpop.permute.xlu1 %4791  ;;  %v4634_v58 = vpop.permute.xlu0 %4633 }
 0x981   : > { %v4642_v29 = vsel %vm1317_vm3, %v4632_v40, %v4634_v58  ;;  %7571 = vmatmul.msk.bf16.vlgmr.msra.gmra.mxu3 %vm2875_vm14, %v7934_v63  ;;  %v4807_v23 = vsel %vm1646_vm12, %v4792_v14, %v9778_v8  ;;  %v7938_v14 = vld [vmem:[#allocation14 + $0x28] sm:$0xff] }
 0x982   : > { %7570 = vmatmul.msk.bf16.vlgmr.msra.gmra.mxu2 %vm2875_vm14, %v7934_v63  ;;  %4660 = vmatpush.bf16.msrb.mxu1 %v4642_v29 }
 0x983   : > { %7572 = vmatmul.msk.bf16.vlgmr.msrb.gmra.mxu0 %vm2875_vm14, %v7934_v63 }
 0x984   : > { %5141 = vrot.lane.b32.xlu2 %v9708_v30, %s8471_s29 }
 0x986   : > { %5499 = vperm.xlu1 %8166, %v5495_v54   ;;  %4661 = vmatpush.bf16.msrb.mxu1 %v4639_v39  ;;  %v4717_v5 = vpop.permute.xlu2 %4716 }
 0x987   : > { %5297 = vperm.xlu0 %8165, %v5293_v10  }
 0x988   : > { %v4636_v31 = vpop.permute.xlu1 %4635  ;;  %v9831_v61 = vpop.permute.xlu0 %4797 }
 0x989   : > { %v4643_v34 = vsel %vm1317_vm3, %v4634_v58, %v4636_v31  ;;  %v4644_v60 = vsel %vm1317_vm3, %v4636_v31, %v4638_v3  ;;  %7577 = vmatmul.msk.bf16.vlgmr.msrb.gmra.mxu1 %vm2875_vm14, %v7933_v13 }
 0x98a   : > { %4674 = vmatpush.bf16.msrb.mxu2 %v4643_v34  ;;  %4688 = vmatpush.bf16.msrb.mxu3 %v4644_v60  ;;  %v7940_v34 = vld [vmem:[#allocation14 + $0x38] sm:$0xff] }
 0x98c   : > { %5220 = vrot.lane.b32.xlu2 %v9728_v44, %s8472_s0 }
 0x98e   : > { %4675 = vmatpush.bf16.msrb.mxu2 %v4640_v32  ;;  %4689 = vmatpush.bf16.msrb.mxu3 %v4641_v25  ;;  %v4802_v53 = vpop.permute.xlu2 %4801 }
 0x98f   : > { %5354 = vperm.xlu0 %8165, %v5346_v15   ;;  %v4810_v47 = vsel %vm1646_vm12, %v9780_v37, %v4802_v53 }
 0x990   : > { %v4796_v56 = vpop.permute.xlu1 %4795  ;;  %v4968_v30 = vpop.permute.xlu0 %4967 }
 0x991   : > { %7579 = vmatmul.msk.bf16.vlgmr.msrb.gmra.mxu3 %vm2875_vm14, %v7933_v13  ;;  %v4808_v21 = vsel %vm1646_vm12, %v9778_v8, %v4796_v56 }
 0x992   : > { %4828 = vmatpush.bf16.msra.mxu3 %v4810_v47  ;;  %7578 = vmatmul.msk.bf16.vlgmr.msrb.gmra.mxu2 %vm2875_vm14, %v7933_v13 }
 0x994   : > { %5349 = vperm.xlu2 %8167, %v5345_v1  }
 0x996   : > { %4829 = vmatpush.bf16.msra.mxu3 %v4807_v23  ;;  %v9856_v44 = vpop.permute.xlu2 %5044 }
 0x998   : > { %v9858_v16 = vpop.permute.xlu1 %4955  ;;  %v4715_v45 = vpop.permute.xlu0 %4714 }
 0x999   : > { %v4723_v42 = vsel %vm1572_vm7, %v9758_v35, %v4715_v45  ;;  %v4724_v62 = vsel %vm1572_vm7, %v4715_v45, %v4717_v5  ;;  %v7935_v35 = vld [vmem:[#allocation14 + $0x10] sm:$0xff]  ;;  %v4970_v8 = vsel %vm1036_vm10, %v9858_v16, %v9802_v55 }
 0x99a   : > { %4907 = vmatpush.bf16.msrb.mxu3 %v9687_v22  ;;  %4741 = vmatpush.bf16.msra.mxu0 %v4723_v42  ;;  %v4720_v22 = vsel %vm1572_vm7, %v9760_v19, %v9794_v41  ;;  %v4722_v19 = vsel %vm1572_vm7, %v9768_v26, %v9792_v2  ;;  %v7937_v26 = vld [vmem:[#allocation14 + $0x20] sm:$0xff] }
 0x99b   : > { %4755 = vmatpush.bf16.msra.mxu1 %v4724_v62 }
 0x99c   : > { %5504 = vperm.xlu2 %8167, %v5496_v0  }
 0x99e   : > { %4908 = vmatpush.bf16.msrb.mxu3 %v9575_v52  ;;  %4742 = vmatpush.bf16.msra.mxu0 %v4720_v22  ;;  %v4806_v40 = vpop.permute.xlu2 %4805  ;;  %v7936_v52 = vld [vmem:[#allocation14 + $0x18] sm:$0xff] }
 0x99f   : > { %4756 = vmatpush.bf16.msra.mxu1 %v4721_v43 }
 0x9a0   : > { %v4954_v33 = vpop.permute.xlu1 %4953  ;;  %v4719_v24 = vpop.permute.xlu0 %4718 }
 0x9a1   : > { %v4725_v27 = vsel %vm1572_vm7, %v4717_v5, %v4719_v24  ;;  %7584 = vmatmul.msk.bf16.vlgmr.msra.gmra.mxu0 %vm2875_vm14, %v7935_v35  ;;  %7591 = vmatmul.msk.bf16.vlgmr.msra.gmra.mxu3 %vm2875_vm14, %v7936_v52 }
 0x9a2   : > { %7585 = vmatmul.msk.bf16.vlgmr.msra.gmra.mxu1 %vm2875_vm14, %v7935_v35  ;;  %4769 = vmatpush.bf16.msra.mxu2 %v4725_v27  ;;  %v7941_v27 = vld [vmem:[#allocation14 + $0x40] sm:$0xff] }
 0x9a6   : > { %4770 = vmatpush.bf16.msra.mxu2 %v4722_v19  ;;  %v4966_v37 = vpop.permute.xlu2 %4965 }
 0x9a7   : > { %v4974_v20 = vsel %vm1036_vm10, %v4966_v37, %v4968_v30 }
 0x9a8   : > { %v9882_v41 = vpop.permute.xlu1 %5042  ;;  %v4960_v18 = vpop.permute.xlu0 %4959  ;;  %5018 = vmatpush.bf16.msra.mxu3 %v4974_v20 }
 0x9a9   : > { %7586 = vmatmul.msk.bf16.vlgmr.msra.gmra.mxu2 %vm2875_vm14, %v7935_v35  ;;  %v4971_v36 = vsel %vm1036_vm10, %v9802_v55, %v4960_v18  ;;  %v5057_v47 = vsel %vm1053_vm9, %v9882_v41, %v9856_v44 }
 0x9aa   : > { %4893 = vmatpush.bf16.msrb.mxu2 %v9689_v38 }
 0x9ac   : > { %5019 = vmatpush.bf16.msra.mxu3 %v4971_v36 }
 0x9ae   : > { %4894 = vmatpush.bf16.msrb.mxu2 %v9573_v7  ;;  %v5049_v28 = vpop.permute.xlu2 %5048  ;;  %v4809_v7 = vsel %vm1646_vm12, %v4796_v56, %v9831_v61  ;;  %v7939_v56 = vld [vmem:[#allocation14 + $0x30] sm:$0xff] }
 0x9b0   : > { %v5128_v2 = vpop.permute.xlu1 %5127  ;;  %v4804_v17 = vpop.permute.xlu0 %4803 }
 0x9b1   : > { %v4811_v46 = vsel %vm1646_vm12, %v4802_v53, %v4804_v17  ;;  %v4812_v38 = vsel %vm1646_vm12, %v4804_v17, %v4806_v40  ;;  %7599 = vmatmul.msk.bf16.vlgmr.msrb.gmra.mxu3 %vm2875_vm14, %v7937_v26 }
 0x9b2   : > { %4842 = vmatpush.bf16.msrb.mxu0 %v4811_v46  ;;  %4856 = vmatpush.bf16.msrb.mxu1 %v4812_v38 }
 0x9b6   : > { %4843 = vmatpush.bf16.msrb.mxu0 %v4808_v21  ;;  %4857 = vmatpush.bf16.msrb.mxu1 %v4809_v7  ;;  %v5053_v57 = vpop.permute.xlu2 %5052 }
 0x9b8   : > { %v4964_v63 = vpop.permute.xlu1 %4963  ;;  %v5055_v48 = vpop.permute.xlu0 %5054 }
 0x9b9   : > { %v4973_v3 = vsel %vm1036_vm10, %v4964_v63, %v4966_v37  ;;  %7592 = vmatmul.msk.bf16.vlgmr.msrb.gmra.mxu0 %vm2875_vm14, %v7936_v52  ;;  %7593 = vmatmul.msk.bf16.vlgmr.msrb.gmra.mxu1 %vm2875_vm14, %v7936_v52 }
 0x9ba   : > { %4921 = vmatpush.bf16.msra.mxu0 %v9700_v4  ;;  %7598 = vmatmul.msk.bf16.vlgmr.msrb.gmra.mxu2 %vm2875_vm14, %v7937_v26  ;;  %v5061_v4 = vsel %vm1053_vm9, %v5053_v57, %v5055_v48 }
 0x9bb   : > { %5004 = vmatpush.bf16.msra.mxu2 %v4973_v3 }
 0x9be   : > { %4922 = vmatpush.bf16.msra.mxu0 %v9588_v50  ;;  %v5138_v6 = vpop.permute.xlu2 %5137  ;;  %v4969_v50 = vsel %vm1036_vm10, %v4954_v33, %v9858_v16 }
 0x9bf   : > { %5005 = vmatpush.bf16.msra.mxu2 %v4970_v8 }
 0x9c0   : > { %v4962_v58 = vpop.permute.xlu1 %4961  ;;  %v5041_v29 = vpop.permute.xlu0 %5040 }
 0x9c1   : > { %v4972_v54 = vsel %vm1036_vm10, %v4962_v58, %v4964_v63  ;;  %7615 = vmatmul.msk.bf16.vlgmr.msra.gmra.mxu3 %vm2875_vm14, %v7938_v14  ;;  %v5056_v53 = vsel %vm1053_vm9, %v5041_v29, %v9882_v41 }
 0x9c2   : > { %4990 = vmatpush.bf16.msra.mxu1 %v4972_v54 }
 0x9c3   : > { %5105 = vmatpush.bf16.msrb.mxu2 %v5061_v4 }
 0x9c6   : > { %4991 = vmatpush.bf16.msra.mxu1 %v4969_v50  ;;  %v5130_v10 = vpop.permute.xlu2 %5129 }
 0x9c7   : > { %v5143_v31 = vsel %vm1070_vm8, %v5128_v2, %v5130_v10 }
 0x9c8   : > { %v5136_v39 = vpop.permute.xlu1 %5135  ;;  %v5047_v55 = vpop.permute.xlu0 %5046 }
 0x9c9   : > { %v5146_v13 = vsel %vm1070_vm8, %v5136_v39, %v5138_v6  ;;  %7600 = vmatmul.msk.bf16.vlgmr.msra.gmra.mxu0 %vm2875_vm14, %v7937_v26  ;;  %7613 = vmatmul.msk.bf16.vlgmr.msra.gmra.mxu1 %vm2875_vm14, %v7938_v14  ;;  %v5058_v5 = vsel %vm1053_vm9, %v9856_v44, %v5047_v55 }
 0x9ca   : > { %7614 = vmatmul.msk.bf16.vlgmr.msra.gmra.mxu2 %vm2875_vm14, %v7938_v14  ;;  %5164 = vmatpush.bf16.msrb.mxu3 %v5146_v13 }
 0x9cb   : > { %5106 = vmatpush.bf16.msrb.mxu2 %v5058_v5 }
 0x9ce   : > { %5165 = vmatpush.bf16.msrb.mxu3 %v5143_v31  ;;  %v5225_v61 = vpop.permute.xlu2 %5224 }
 0x9d0   : > { %v5132_v60 = vpop.permute.xlu1 %5131  ;;  %v5051_v15 = vpop.permute.xlu0 %5050 }
 0x9d1   : > { %v5059_v32 = vsel %vm1053_vm9, %v5049_v28, %v5051_v15  ;;  %v5060_v25 = vsel %vm1053_vm9, %v5051_v15, %v5053_v57  ;;  %7627 = vmatmul.msk.bf16.vlgmr.msrb.gmra.mxu3 %vm2875_vm14, %v7940_v34  ;;  %v5144_v44 = vsel %vm1070_vm8, %v5130_v10, %v5132_v60 }
 0x9d2   : > { %5077 = vmatpush.bf16.msrb.mxu0 %v5059_v32  ;;  %5091 = vmatpush.bf16.msrb.mxu1 %v5060_v25 }
 0x9d6   : > { %5078 = vmatpush.bf16.msrb.mxu0 %v5056_v53  ;;  %5092 = vmatpush.bf16.msrb.mxu1 %v5057_v47  ;;  %v5215_v30 = vpop.permute.xlu2 %5214 }
 0x9d8   : > { %v5223_v1 = vpop.permute.xlu1 %5222  ;;  %v5140_v23 = vpop.permute.xlu0 %5139 }
 0x9d9   : > { %v5233_v16 = vsel %vm1087_vm11, %v5223_v1, %v5225_v61  ;;  %v5147_v45 = vsel %vm1070_vm8, %v5138_v6, %v5140_v23  ;;  %7620 = vmatmul.msk.bf16.vlgmr.msrb.gmra.mxu0 %vm2875_vm14, %v7939_v56  ;;  %7621 = vmatmul.msk.bf16.vlgmr.msrb.gmra.mxu1 %vm2875_vm14, %v7939_v56 }
 0x9da   : > { %7622 = vmatmul.msk.bf16.vlgmr.msrb.gmra.mxu2 %vm2875_vm14, %v7939_v56  ;;  %5178 = vmatpush.bf16.msra.mxu0 %v5147_v45 }
 0x9db   : > { %5251 = vmatpush.bf16.msra.mxu2 %v5233_v16 }
 0x9de   : > { %5179 = vmatpush.bf16.msra.mxu0 %v5144_v44  ;;  %v5142_v42 = vpop.permute.xlu2 %5141 }
 0x9df   : > { %v5148_v62 = vsel %vm1070_vm8, %v5140_v23, %v5142_v42 }
 0x9e0   : > { %v5219_v0 = vpop.permute.xlu1 %5218  ;;  %v5227_v22 = vpop.permute.xlu0 %5226  ;;  %5192 = vmatpush.bf16.msra.mxu1 %v5148_v62 }
 0x9e1   : > { %v5234_v43 = vsel %vm1087_vm11, %v5225_v61, %v5227_v22 }
 0x9e2   : > { %5265 = vmatpush.bf16.msra.mxu3 %v5234_v43 }
 0x9e6   : > { %v5221_v20 = vpop.permute.xlu2 %5220 }
 0x9e7   : > { %v5232_v41 = vsel %vm1087_vm11, %v5219_v0, %v5221_v20 }
 0x9e8   : > { %v5134_v35 = vpop.permute.xlu1 %5133  ;;  %v5217_v40 = vpop.permute.xlu0 %5216 }
 0x9e9   : > { %7628 = vmatmul.msk.bf16.vlgmr.msra.gmra.mxu0 %vm2875_vm14, %v7940_v34  ;;  %v5145_v52 = vsel %vm1070_vm8, %v5132_v60, %v5134_v35  ;;  %v5230_v33 = vsel %vm1087_vm11, %v5215_v30, %v5217_v40  ;;  %v5231_v24 = vsel %vm1087_vm11, %v5217_v40, %v5219_v0 }
 0x9ea   : > { %5193 = vmatpush.bf16.msra.mxu1 %v5145_v52  ;;  %5252 = vmatpush.bf16.msra.mxu2 %v5230_v33 }
 0x9eb   : > { %5266 = vmatpush.bf16.msra.mxu3 %v5231_v24 }
 0x9ed   : > { %7629 = vmatmul.msk.bf16.vlgmr.msra.gmra.mxu1 %vm2875_vm14, %v7940_v34  ;;  %7634 = vmatmul.msk.bf16.vlgmr.msra.gmra.mxu2 %vm2875_vm14, %v7941_v27 }
 0x9ee   : > { %7635 = vmatmul.msk.bf16.vlgmr.msra.gmra.mxu3 %vm2875_vm14, %v7941_v27 }
 0x9f1   : > { %v5229_v19 = vpop.permute.xlu0 %5228 }
 0x9f2   : > { %v5235_v37 = vsel %vm1087_vm11, %v5227_v22, %v5229_v19 }
 0x9f3   : > { %5279 = vmatpush.bf16.msrb.mxu0 %v5235_v37 }
 0x9f7   : > { %5280 = vmatpush.bf16.msrb.mxu0 %v5232_v41 }
 0x9fa   : > { %7636 = vmatmul.msk.bf16.vlgmr.msrb.gmra.mxu0 %vm2875_vm14, %v7941_v27 }
 0xa00   : > { %v4613_v2 = vpop.f32.mrf.mxu0 }
 0xa04   : > { %v4599_v18 = vpop.f32.mrf.mxu3 }
 0xa05   : > { %v4585_v36 = vpop.f32.mrf.mxu2 }
 0xa06   : > { %v4663_v17 = vpop.f32.mrf.mxu1 }
 0xa07   : > { %v4664_v42 = vadd.f32 %v4663_v17, %v4585_v36 }
 0xa08   : > { %v4615_v57 = vpop.f32.mrf.mxu0 }
 0xa0c   : > { %v4601_v28 = vpop.f32.mrf.mxu3 }
 0xa0d   : > { %v4587_v26 = vpop.f32.mrf.mxu2 }
 0xa0e   : > { %v4665_v63 = vpop.f32.mrf.mxu1 }
 0xa0f   : > { %v4666_v33 = vadd.f32 %v4665_v63, %v4587_v26 }
 0xa14   : > { %v4691_v46 = vpop.f32.mrf.mxu3 }
 0xa15   : > { %v4677_v38 = vpop.f32.mrf.mxu2  ;;  %v4692_v21 = vadd.f32 %v4691_v46, %v4613_v2 }
 0xa16   : > { %v4678_v7 = vadd.f32 %v4677_v38, %v4599_v18 }
 0xa1c   : > { %v4693_v48 = vpop.f32.mrf.mxu3 }
 0xa1d   : > { %v4679_v3 = vpop.f32.mrf.mxu2 }
 0xa1e   : > { %v4744_v8 = vpop.f32.mrf.mxu0  ;;  %v4680_v37 = vadd.f32 %v4679_v3, %v4601_v28  ;;  %v5298_v3 = vpop.permute.xlu0 %5297 }
 0xa1f   : > { %v4758_v6 = vpop.f32.mrf.mxu1  ;;  %v4777_v62 = vadd.f32 %v4744_v8, %v4664_v42 }
 0xa20   : > { %v4778_v0 = vadd.f32 %v4758_v6, %v4678_v7 }
 0xa24   : > { %v4831_v4 = vpop.f32.mrf.mxu3 }
 0xa25   : > { %v4864_v22 = vadd.f32 %v4831_v4, %v4777_v62 }
 0xa26   : > { %v4746_v58 = vpop.f32.mrf.mxu0 }
 0xa27   : > { %v4760_v29 = vpop.f32.mrf.mxu1  ;;  %v4780_v18 = vadd.f32 %v4746_v58, %v4666_v33 }
 0xa28   : > { %v4781_v46 = vadd.f32 %v4760_v29, %v4680_v37 }
 0xa2c   : > { %v4772_v14 = vpop.f32.mrf.mxu2  ;;  %v4833_v54 = vpop.f32.mrf.mxu3 }
 0xa2d   : > { %v4779_v20 = vadd.f32 %v4772_v14, %v4692_v21  ;;  %v4867_v36 = vadd.f32 %v4833_v54, %v4780_v18 }
 0xa34   : > { %v4774_v50 = vpop.f32.mrf.mxu2  ;;  %v4910_v55 = vpop.f32.mrf.mxu3 }
 0xa36   : > { %v4845_v10 = vpop.f32.mrf.mxu0  ;;  %v4859_v39 = vpop.f32.mrf.mxu1 }
 0xa37   : > { %v4865_v43 = vadd.f32 %v4845_v10, %v4778_v0  ;;  %v4866_v38 = vadd.f32 %v4859_v39, %v4779_v20 }
 0xa39   : > { %v4930_v41 = vadd.f32 %v4910_v55, %v4865_v43 }
 0xa3c   : > { %v4912_v61 = vpop.f32.mrf.mxu3 }
 0xa3d   : > { %v4896_v13 = vpop.f32.mrf.mxu2 }
 0xa3e   : > { %v4847_v5 = vpop.f32.mrf.mxu0  ;;  %v4861_v31 = vpop.f32.mrf.mxu1  ;;  %v4929_v40 = vadd.f32 %v4896_v13, %v4864_v22  ;;  %v4694_v13 = vadd.f32 %v4693_v48, %v4615_v57 }
 0xa3f   : > { %v4868_v17 = vadd.f32 %v4847_v5, %v4781_v46 }
 0xa40   : > { %v4782_v14 = vadd.f32 %v4774_v50, %v4694_v13 }
 0xa41   : > { %v4933_v58 = vadd.f32 %v4912_v61, %v4868_v17 }
 0xa42   : > { %v4869_v5 = vadd.f32 %v4861_v31, %v4782_v14  ;;  %v5303_v31 = vpop.permute.xlu1 %5302 }
 0xa44   : > { %v5021_v32 = vpop.f32.mrf.mxu3 }
 0xa45   : > { %v4898_v34 = vpop.f32.mrf.mxu2 }
 0xa46   : > { %v4924_v60 = vpop.f32.mrf.mxu0  ;;  %v4993_v15 = vpop.f32.mrf.mxu1  ;;  %v4932_v4 = vadd.f32 %v4898_v34, %v4867_v36 }
 0xa47   : > { %v5026_v24 = vadd.f32 %v4993_v15, %v4929_v40  ;;  %v4931_v7 = vadd.f32 %v4924_v60, %v4866_v38 }
 0xa49   : > { %v5028_v29 = vadd.f32 %v5021_v32, %v4931_v7 }
 0xa4c   : > { %v9942_v56 = vpop.f32.mrf.mxu3 }
 0xa4d   : > { %v5007_v25 = vpop.f32.mrf.mxu2 }
 0xa4e   : > { %v4926_v53 = vpop.f32.mrf.mxu0  ;;  %v4995_v47 = vpop.f32.mrf.mxu1  ;;  %v5027_v11 = vadd.f32 %v5007_v25, %v4930_v41 }
 0xa4f   : > { %v5029_v15 = vadd.f32 %v4995_v47, %v4932_v4 }
 0xa54   : > { %v5167_v44 = vpop.f32.mrf.mxu3 }
 0xa55   : > { %v5009_v30 = vpop.f32.mrf.mxu2 }
 0xa56   : > { %v5080_v1 = vpop.f32.mrf.mxu0  ;;  %v5094_v45 = vpop.f32.mrf.mxu1  ;;  %v5030_v60 = vadd.f32 %v5009_v30, %v4933_v58  ;;  %v7943_v58 = vld [vmem:[#allocation2 + $0x14] sm:$0xf0] }
 0xa57   : > { %v5113_v2 = vadd.f32 %v5080_v1, %v5026_v24  ;;  %v5114_v8 = vadd.f32 %v5094_v45, %v5027_v11  ;;  %v4934_v1 = vadd.f32 %v4926_v53, %v4869_v5  ;;  %v7643_v5 = vld [vmem:[#allocation2 + $0x4] sm:$0xf] }
 0xa59   : > { %v5200_v10 = vadd.f32 %v5167_v44, %v5113_v2  ;;  %v5031_v30 = vadd.f32 %v9942_v56, %v4934_v1  ;;  %v7663_v1 = vld [vmem:[#allocation2 + $0x34] sm:$0xf] }
 0xa5c   : > { %v5169_v19 = vpop.f32.mrf.mxu3 }
 0xa5d   : > { %v5108_v23 = vpop.f32.mrf.mxu2 }
 0xa5e   : > { %v5082_v16 = vpop.f32.mrf.mxu0  ;;  %v5096_v27 = vpop.f32.mrf.mxu1  ;;  %v5115_v11 = vadd.f32 %v5108_v23, %v5028_v29 }
 0xa5f   : > { %v5116_v55 = vadd.f32 %v5082_v16, %v5029_v15  ;;  %v5117_v57 = vadd.f32 %v5096_v27, %v5030_v60  ;;  %v7946_v15 = vld [vmem:[#allocation2 + $0x3c] sm:$0xf0]  ;;  %v7942_v60 = vld [vmem:[#allocation2 + $0x8] sm:$0xf] }
 0xa61   : > { %v5203_v47 = vadd.f32 %v5169_v19, %v5116_v55  ;;  %v7645_v55 = vld [vmem:[#allocation2 + $0x18] sm:$0xf0] }
 0xa65   : > { %v5110_v52 = vpop.f32.mrf.mxu2 }
 0xa66   : > { %v5181_v35 = vpop.f32.mrf.mxu0  ;;  %v5118_v33 = vadd.f32 %v5110_v52, %v5031_v30 }
 0xa67   : > { %v5201_v26 = vadd.f32 %v5181_v35, %v5114_v8 }
 0xa6a   : > { %v5195_v42 = vpop.f32.mrf.mxu1 }
 0xa6b   : > { %v5202_v48 = vadd.f32 %v5195_v42, %v5115_v11  ;;  %v7657_v42 = vld [vmem:[#allocation2 + $0x40] sm:$0xf0]  ;;  %v7947_v11 = vld [vmem:[#allocation2 + $0x44] sm:$0xf0] }
 0xa6e   : > { %v5183_v6 = vpop.f32.mrf.mxu0 }
 0xa6f   : > { %v5204_v0 = vadd.f32 %v5183_v6, %v5117_v57  ;;  %v7951_v57 = vld [vmem:[%s10352_s18] sm:$0xff] }
 0xa70   : > { %v5254_v63 = vpop.f32.mrf.mxu2 }
 0xa71   : > { %v5287_v28 = vadd.f32 %v5254_v63, %v5200_v10  ;;  %v5268_v21 = vpop.f32.mrf.mxu3 }
 0xa72   : > { %v5288_v39 = vadd.f32 %v5268_v21, %v5201_v26  ;;  %v5197_v35 = vpop.f32.mrf.mxu1  ;;  %v7945_v21 = vld [vmem:[#allocation2 + $0x30] sm:$0xf] }
 0xa73   : > { %v5305_v54 = vadd.f32 %v5298_v3, %v5287_v28  ;;  %v5205_v37 = vadd.f32 %v5197_v35, %v5118_v33  ;;  %v7655_v28 = vld [vmem:[#allocation2 + $0x2c] sm:$0xf]  ;;  %v7660_v14 = vor.u32 %v7945_v21, %v7657_v42 }
 0xa74   : > { %v5306_v25 = vadd.f32 %v5298_v3, %v5288_v39 }
 0xa75   : > { %v5311_v34 = vmax.f32 %v5305_v54, 0.0 }
 0xa76   : > { %v5312_v45 = vmax.f32 %v5306_v25, 0.0  ;;  %v7644_v25 = vor.u32 %v7943_v58, %v7643_v5  ;;  %v7686_v5 = vld [vmem:[#allocation4 + $0x4] sm:$0xf] }
 0xa77   : > { %v5317_v44 = vmul.f32 %v5311_v34, %v8914_v49  ;;  %v5282_v62 = vpop.f32.mrf.mxu0  ;;  %v7648_v34 = vor.u32 %v7942_v60, %v7645_v55  ;;  %v7953_v55 = vld [vmem:[#allocation4 + $0x14] sm:$0xf0]  ;;  %v7952_v60 = vld [vmem:[#allocation4 + $0x8] sm:$0xf] }
 0xa78   : > { %v5318_v50 = vmul.f32 %v5312_v45, %v8916_v51  ;;  %v5289_v61 = vadd.f32 %v5282_v62, %v5202_v48  ;;  %v5256_v32 = vpop.f32.mrf.mxu2  ;;  %v7664_v48 = vor.u32 %v7947_v11, %v7663_v1  ;;  %v7944_v45 = vld [vmem:[#allocation2 + $0x1c] sm:$0xf0]  ;;  %v7687_v11 = vor.u32 %v7953_v55, %v7686_v5 }
 0xa79   : > { %v5290_v16 = vadd.f32 %v5256_v32, %v5203_v47  ;;  %v5270_v22 = vpop.f32.mrf.mxu3  ;;  %v7651_v47 = vld [vmem:[#allocation2 + $0xc] sm:$0xf]  ;;  %v7965_v5 = vld [vmem:[#allocation15 + $0x8] sm:$0xff] }
 0xa7a   : > { %v5323_v23 = vpack.c.bf16 %v5318_v50, %v5317_v44  ;;  %v5307_v43 = vadd.f32 %v5298_v3, %v5289_v61  ;;  %v5291_v53 = vadd.f32 %v5270_v22, %v5204_v0  ;;  %v7656_v3 = vor.u32 %v7946_v15, %v7655_v28  ;;  %v5350_v0 = vpop.permute.xlu2 %5349  ;;  %v5461_v61 = vld [vmem:[#allocation2 + $0x4] sm:$0xff] }
 0xa7b   : > { %v5308_v40 = vadd.f32 %v5303_v31, %v5290_v16  ;;  %v7652_v44 = vor.u32 %v7944_v45, %v7651_v47  ;;  %v5465_v30 = vunpack.c.l.bf16 %v5461_v61  ;;  %v7954_v45 = vld [vmem:[#allocation4 + $0x1c] sm:$0xf0]  ;;  %v7694_v47 = vld [vmem:[#allocation4 + $0xc] sm:$0xf] }
 0xa7c   : > { %5327 = vst [vmem:[#allocation2 + $0x54] sm:$0xff] %v5323_v23  ;;  %v5313_v24 = vmax.f32 %v5307_v43, 0.0  ;;  %v5309_v27 = vadd.f32 %v5303_v31, %v5291_v53  ;;  %v5466_v43 = vunpack.c.h.bf16 %v5461_v61  ;;  %v5355_v53 = vpop.permute.xlu0 %5354  ;;  %v5500_v61 = vpop.permute.xlu1 %5499 }
 0xa7d   : > { %v5314_v19 = vmax.f32 %v5308_v40, 0.0 }
 0xa7e   : > { %v5319_v20 = vmul.f32 %v5313_v24, %v8920_v59  ;;  %v5315_v41 = vmax.f32 %v5309_v27, 0.0  ;;  %v5462_v27 = vld [vmem:[#allocation2 + $0xc] sm:$0xf] }
 0xa7f   : > { %v5320_v18 = vmul.f32 %v5314_v19, %v8914_v49  ;;  %v5284_v2 = vpop.f32.mrf.mxu0 }
 0xa80   : > { %v5324_v46 = vpack.c.bf16 %v5319_v20, %v5319_v20  ;;  %v5321_v56 = vmul.f32 %v5315_v41, %v8916_v51  ;;  %v5292_v38 = vadd.f32 %v5284_v2, %v5205_v37  ;;  %v5463_v20 = vld [vmem:[#allocation2 + $0x18] sm:$0xff] }
 0xa82   : > { %5328 = vst [vmem:[#allocation2 + $0x5c] sm:$0xf] %v5324_v46  ;;  %v5325_v36 = vpack.c.bf16 %v5321_v56, %v5320_v18  ;;  %v5310_v17 = vadd.f32 %v5303_v31, %v5292_v38  ;;  %v5467_v46 = vunpack.c.l.bf16 %v5462_v27  ;;  %v5468_v38 = vunpack.c.l.bf16 %v5463_v20 }
 0xa83   : > { %v7667_v6 = vld [vmem:[#allocation2 + $0x54] sm:$0xf]  ;;  %v7948_v10 = vld [vmem:[#allocation2 + $0x58] sm:$0xf] }
 0xa84   : > { %5329 = vst [vmem:[#allocation2 + $0x68] sm:$0xff] %v5325_v36  ;;  %v5316_v52 = vmax.f32 %v5310_v17, 0.0 }
 0xa86   : > { %v5322_v7 = vmul.f32 %v5316_v52, %v8920_v59  ;;  %v5469_v52 = vunpack.c.h.bf16 %v5463_v20 }
 0xa88   : > { %v5326_v8 = vpack.c.bf16 %v5322_v7, %v5322_v7 }
 0xa89   : > { %v7675_v29 = vld [vmem:[#allocation2 + $0x5c] sm:$0xf] }
 0xa8a   : > { %5330 = vst [vmem:[#allocation2 + $0x70] sm:$0xf] %v5326_v8 }
 0xa8b   : > { %v7949_v4 = vld [vmem:[#allocation2 + $0x64] sm:$0xf0]  ;;  %v7669_v13 = vld [vmem:[#allocation2 + $0x68] sm:$0xf0] }
 0xa8c   : > { %v7668_v26 = vor.u32 %v7949_v4, %v7667_v6  ;;  %v7672_v63 = vor.u32 %v7948_v10, %v7669_v13  ;;  %v5464_v10 = vld [vmem:[#allocation2 + $0x20] sm:$0xf] }
 0xa8d   : > { %v5470_v15 = vunpack.c.l.bf16 %v5464_v10 }
 0xa8e   : > { %5418 = vmatpush.bf16.msrb.mxu1 %v7668_v26  ;;  %5432 = vmatpush.bf16.msrb.mxu2 %v7672_v63 }
 0xa91   : > { %v7950_v39 = vld [vmem:[#allocation2 + $0x6c] sm:$0xf0] }
 0xa92   : > { %5419 = vmatpush.bf16.msrb.mxu1 %v7656_v3  ;;  %5433 = vmatpush.bf16.msrb.mxu2 %v7660_v14  ;;  %v7676_v54 = vor.u32 %v7950_v39, %v7675_v29 }
 0xa94   : > { %5446 = vmatpush.bf16.msrb.mxu3 %v7676_v54  ;;  %v7688_v54 = vld [vmem:[#allocation4 + $0x18] sm:$0xf0] }
 0xa96   : > { %5420 = vmatpush.bf16.msrb.mxu1 %v7644_v25  ;;  %5434 = vmatpush.bf16.msrb.mxu2 %v7648_v34  ;;  %v7691_v25 = vor.u32 %v7952_v60, %v7688_v54 }
 0xa98   : > { %5447 = vmatpush.bf16.msrb.mxu3 %v7664_v48 }
 0xa99   : > { %7677 = vmatmul.msk.bf16.vlgmr.msrb.gmra.mxu1 %vm3713_vm15, %v7951_v57  ;;  %7678 = vmatmul.msk.bf16.vlgmr.msrb.gmra.mxu2 %vm3713_vm15, %v7951_v57 }
 0xa9c   : > { %5448 = vmatpush.bf16.msrb.mxu3 %v7652_v44  ;;  %v7695_v44 = vor.u32 %v7954_v45, %v7694_v47  ;;  %v7964_v45 = vld [vmem:[#allocation15] sm:$0xff] }
 0xa9f   : > { %7679 = vmatmul.msk.bf16.vlgmr.msrb.gmra.mxu3 %vm3713_vm15, %v7951_v57  ;;  %v7958_v57 = vld [vmem:[%s10354_s20] sm:$0xff] }
 0xb16   : > { %v5422_v62 = vpop.f32.mrf.mxu1 }
 0xb17   : > { %v5423_v50 = vadd.f32 %v5422_v62, %v5350_v0  ;;  %v7717_v62 = vld [vmem:[#allocation2] sm:$0xf] }
 0xb19   : > { %v5455_v16 = vmul.f32 %v5423_v50, %v8914_v49 }
 0xb1b   : > { %v5471_v35 = vadd.f32 %v5465_v30, %v5455_v16 }
 0xb1c   : > { %v5436_v32 = vpop.f32.mrf.mxu2 }
 0xb1d   : > { %v5437_v22 = vadd.f32 %v5436_v32, %v5350_v0 }
 0xb1e   : > { %v5424_v31 = vpop.f32.mrf.mxu1 }
 0xb1f   : > { %v5456_v23 = vmul.f32 %v5437_v22, %v8916_v51  ;;  %v5425_v33 = vadd.f32 %v5424_v31, %v5355_v53 }
 0xb21   : > { %v5472_v40 = vadd.f32 %v5466_v43, %v5456_v23  ;;  %v5458_v18 = vmul.f32 %v5425_v33, %v8914_v49 }
 0xb22   : > { %v5450_v24 = vpop.f32.mrf.mxu3 }
 0xb23   : > { %v5477_v19 = vpack.c.bf16 %v5472_v40, %v5471_v35  ;;  %v5451_v37 = vadd.f32 %v5450_v24, %v5350_v0  ;;  %v5474_v7 = vadd.f32 %v5468_v38, %v5458_v18  ;;  %v7961_v0 = vld [vmem:[#allocation2 + $0x10] sm:$0xf0] }
 0xb24   : > { %v5438_v41 = vpop.f32.mrf.mxu2  ;;  %v7718_v50 = vor.u32 %v7961_v0, %v7717_v62 }
 0xb25   : > { %5481 = vst [vmem:[#allocation4 + $0x2c] sm:$0xff] %v5477_v19  ;;  %v5457_v2 = vmul.f32 %v5451_v37, %v8920_v59  ;;  %v5439_v56 = vadd.f32 %v5438_v41, %v5355_v53 }
 0xb26   : > { %5635 = vrot.lane.b32.xlu0 %v7718_v50, %s8476_s27 }
 0xb27   : > { %v5473_v36 = vadd.f32 %v5467_v46, %v5457_v2  ;;  %v5459_v17 = vmul.f32 %v5439_v56, %v8916_v51 }
 0xb29   : > { %v5478_v8 = vpack.c.bf16 %v5473_v36, %v5473_v36  ;;  %v5475_v6 = vadd.f32 %v5469_v52, %v5459_v17 }
 0xb2a   : > { %v5452_v4 = vpop.f32.mrf.mxu3 }
 0xb2b   : > { %5482 = vst [vmem:[#allocation4 + $0x34] sm:$0xf] %v5478_v8  ;;  %v5479_v13 = vpack.c.bf16 %v5475_v6, %v5474_v7  ;;  %v5453_v26 = vadd.f32 %v5452_v4, %v5355_v53  ;;  %v5505_v53 = vpop.permute.xlu2 %5504 }
 0xb2c   : > { %v7698_v21 = vld [vmem:[#allocation4 + $0x2c] sm:$0xf]  ;;  %v7955_v14 = vld [vmem:[#allocation4 + $0x30] sm:$0xf] }
 0xb2d   : > { %5483 = vst [vmem:[#allocation4 + $0x40] sm:$0xff] %v5479_v13  ;;  %v5460_v63 = vmul.f32 %v5453_v26, %v8920_v59 }
 0xb2f   : > { %v5476_v42 = vadd.f32 %v5470_v15, %v5460_v63  ;;  %v7768_v63 = vld [vmem:[#allocation2 + $0x10] sm:$0xf]  ;;  %v7963_v15 = vld [vmem:[#allocation2 + $0x20] sm:$0xf0] }
 0xb31   : > { %v5480_v28 = vpack.c.bf16 %v5476_v42, %v5476_v42  ;;  %v7769_v42 = vor.u32 %v7963_v15, %v7768_v63 }
 0xb32   : > { %v7706_v34 = vld [vmem:[#allocation4 + $0x34] sm:$0xf] }
 0xb33   : > { %5484 = vst [vmem:[#allocation4 + $0x48] sm:$0xf] %v5480_v28  ;;  %v6263_v28 = vld [vmem:[%s10357_s23] sm:$0xff] }
 0xb34   : > { %v7956_v3 = vld [vmem:[#allocation4 + $0x3c] sm:$0xf0]  ;;  %v7700_v58 = vld [vmem:[#allocation4 + $0x40] sm:$0xf0] }
 0xb35   : > { %v7699_v29 = vor.u32 %v7956_v3, %v7698_v21  ;;  %v7703_v39 = vor.u32 %v7955_v14, %v7700_v58  ;;  %v6264_v21 = vld [vmem:[%s10357_s23 + $0x8] sm:$0xff] }
 0xb37   : > { %5553 = vmatpush.bf16.msra.mxu0 %v7699_v29  ;;  %5567 = vmatpush.bf16.msra.mxu1 %v7703_v39 }
 0xb3a   : > { %v7957_v1 = vld [vmem:[#allocation4 + $0x44] sm:$0xf0] }
 0xb3b   : > { %5554 = vmatpush.bf16.msra.mxu0 %v7687_v11  ;;  %5568 = vmatpush.bf16.msra.mxu1 %v7691_v25  ;;  %v7707_v48 = vor.u32 %v7957_v1, %v7706_v34 }
 0xb3d   : > { %5581 = vmatpush.bf16.msra.mxu2 %v7707_v48 }
 0xb3e   : > { %7708 = vmatmul.msk.bf16.vlgmr.msra.gmra.mxu0 %vm2875_vm14, %v7958_v57  ;;  %7709 = vmatmul.msk.bf16.vlgmr.msra.gmra.mxu1 %vm2875_vm14, %v7958_v57 }
 0xb41   : > { %5582 = vmatpush.bf16.msra.mxu2 %v7695_v44 }
 0xb44   : > { %7710 = vmatmul.msk.bf16.vlgmr.msra.gmra.mxu2 %vm2875_vm14, %v7958_v57 }
 0xb98   : > { %v5636_v58 = vpop.permute.xlu0 %5635 }
 0xbbb   : > { %v5556_v32 = vpop.f32.mrf.mxu0  ;;  %v5570_v16 = vpop.f32.mrf.mxu1 }
 0xbbc   : > { %v5557_v22 = vadd.f32 %v5556_v32, %v5500_v61  ;;  %v5571_v31 = vadd.f32 %v5570_v16, %v5500_v61 }
 0xbbe   : > { %v5589_v30 = vmul.f32 %v5557_v22, %v8914_v49  ;;  %v5590_v23 = vmul.f32 %v5571_v31, %v8916_v51  ;;  %v7966_v22 = vld [vmem:[#allocation15 + $0x10] sm:$0xff] }
 0xbc0   : > { %v5595_v43 = vpack.c.bf16 %v5590_v23, %v5589_v30 }
 0xbc2   : > { %5599 = vst [vmem:[#allocation2 + $0x4] sm:$0xff] %v5595_v43 }
 0xbc3   : > { %v5558_v35 = vpop.f32.mrf.mxu0  ;;  %v5572_v40 = vpop.f32.mrf.mxu1 }
 0xbc4   : > { %v5559_v33 = vadd.f32 %v5558_v35, %v5505_v53  ;;  %v5573_v24 = vadd.f32 %v5572_v40, %v5505_v53  ;;  %v7967_v35 = vld [vmem:[#allocation15 + $0x18] sm:$0xff] }
 0xbc6   : > { %v5592_v27 = vmul.f32 %v5559_v33, %v8914_v49  ;;  %v5593_v19 = vmul.f32 %v5573_v24, %v8916_v51 }
 0xbc7   : > { %v5584_v37 = vpop.f32.mrf.mxu2 }
 0xbc8   : > { %v5597_v20 = vpack.c.bf16 %v5593_v19, %v5592_v27  ;;  %v5585_v41 = vadd.f32 %v5584_v37, %v5500_v61 }
 0xbc9   : > { %v7725_v38 = vld [vmem:[#allocation2 + $0x8] sm:$0xf]  ;;  %v7959_v17 = vld [vmem:[#allocation2 + $0x4] sm:$0xf] }
 0xbca   : > { %5601 = vst [vmem:[#allocation2 + $0x18] sm:$0xff] %v5597_v20  ;;  %v5591_v18 = vmul.f32 %v5585_v41, %v8920_v59  ;;  %v7968_v41 = vld [vmem:[#allocation15 + $0x20] sm:$0xff] }
 0xbcc   : > { %v5596_v2 = vpack.c.bf16 %v5591_v18, %v5591_v18 }
 0xbce   : > { %5600 = vst [vmem:[#allocation2 + $0xc] sm:$0xf] %v5596_v2 }
 0xbcf   : > { %v5586_v46 = vpop.f32.mrf.mxu2 }
 0xbd0   : > { %v5587_v56 = vadd.f32 %v5586_v46, %v5505_v53 }
 0xbd1   : > { %v7962_v36 = vld [vmem:[#allocation2 + $0x18] sm:$0xf0]  ;;  %v7719_v52 = vld [vmem:[#allocation2 + $0x14] sm:$0xf0] }
 0xbd2   : > { %v5594_v7 = vmul.f32 %v5587_v56, %v8920_v59  ;;  %v9976_v8 = vor.u32 %v7962_v36, %v7725_v38  ;;  %v9978_v6 = vor.u32 %v7959_v17, %v7719_v52 }
 0xbd4   : > { %v5598_v4 = vpack.c.bf16 %v5594_v7, %v5594_v7  ;;  %5639 = vrot.lane.b32.xlu2 %v9976_v8, %s8476_s27  ;;  %5637 = vrot.lane.b32.xlu1 %v9978_v6, %s8476_s27 }
 0xbd5   : > { %v7960_v10 = vld [vmem:[#allocation2 + $0xc] sm:$0xf] }
 0xbd6   : > { %5602 = vst [vmem:[#allocation2 + $0x20] sm:$0xf] %v5598_v4  ;;  %v7969_v4 = vld [vmem:[#allocation15 + $0x28] sm:$0xff] }
 0xbdc   : > { %5703 = vrot.lane.b32.xlu2 %v9976_v8, %s8474_s9  ;;  %5701 = vrot.lane.b32.xlu1 %v9978_v6, %s8474_s9 }
 0xbdd   : > { %v7727_v13 = vld [vmem:[#allocation2 + $0x1c] sm:$0xf0] }
 0xbde   : > { %v9988_v26 = vor.u32 %v7960_v10, %v7727_v13 }
 0xbe0   : > { %5641 = vrot.lane.b32.xlu0 %v9988_v26, %s8476_s27 }
 0xbe4   : > { %5766 = vrot.lane.b32.xlu2 %v7718_v50, %s8477_s3  ;;  %5705 = vrot.lane.b32.xlu1 %v9988_v26, %s8474_s9 }
 0xbe8   : > { %5699 = vrot.lane.b32.xlu0 %v7718_v50, %s8474_s9 }
 0xbec   : > { %5772 = vrot.lane.b32.xlu2 %v9988_v26, %s8477_s3  ;;  %5770 = vrot.lane.b32.xlu1 %v9976_v8, %s8477_s3 }
 0xbf0   : > { %5768 = vrot.lane.b32.xlu0 %v9978_v6, %s8477_s3 }
 0xbf4   : > { %5843 = vrot.lane.b32.xlu2 %v9976_v8, %s8478_s11  ;;  %5841 = vrot.lane.b32.xlu1 %v9978_v6, %s8478_s11 }
 0xbf8   : > { %5839 = vrot.lane.b32.xlu0 %v7718_v50, %s8478_s11 }
 0xbfc   : > { %5983 = vrot.lane.b32.xlu2 %v9988_v26, %s8470_s5  ;;  %5981 = vrot.lane.b32.xlu1 %v9976_v8, %s8470_s5 }
 0xc00   : > { %5845 = vrot.lane.b32.xlu0 %v9988_v26, %s8478_s11 }
 0xc04   : > { %6052 = vrot.lane.b32.xlu2 %v9978_v6, %s8469_s10  ;;  %5985 = vrot.lane.b32.xlu1 %v7769_v42, %s8470_s5 }
 0xc08   : > { %5979 = vrot.lane.b32.xlu0 %v9978_v6, %s8470_s5 }
 0xc0c   : > { %6058 = vrot.lane.b32.xlu2 %v7769_v42, %s8469_s10  ;;  %6056 = vrot.lane.b32.xlu1 %v9988_v26, %s8469_s10 }
 0xc10   : > { %6054 = vrot.lane.b32.xlu0 %v9976_v8, %s8469_s10 }
 0xc14   : > { %6129 = vrot.lane.b32.xlu2 %v9988_v26, %s8471_s29  ;;  %6127 = vrot.lane.b32.xlu1 %v9976_v8, %s8471_s29 }
 0xc18   : > { %6125 = vrot.lane.b32.xlu0 %v9978_v6, %s8471_s29 }
 0xc1c   : > { %6131 = vrot.lane.b32.xlu2 %v7769_v42, %s8471_s29  ;;  %6200 = vrot.lane.b32.xlu1 %v9976_v8, %s8472_s0 }
 0xc20   : > { %6198 = vrot.lane.b32.xlu0 %v9978_v6, %s8472_s0 }
 0xc24   : > { %6267 = vperm.xlu2 %8167, %v6263_v28   ;;  %6204 = vrot.lane.b32.xlu1 %v7769_v42, %s8472_s0 }
 0xc28   : > { %6202 = vrot.lane.b32.xlu0 %v9988_v26, %s8472_s0 }
 0xc2e   : > { %v5640_v3 = vpop.permute.xlu2 %5639 }
 0xc30   : > { %6272 = vperm.xlu0 %8165, %v6264_v21   ;;  %v7970_v21 = vld [vmem:[#allocation15 + $0x30] sm:$0xff] }
 0xc36   : > { %v5704_v14 = vpop.permute.xlu2 %5703 }
 0xc3e   : > { %v5767_v29 = vpop.permute.xlu2 %5766 }
 0xc46   : > { %v5638_v39 = vpop.permute.xlu1 %5637  ;;  %v5773_v25 = vpop.permute.xlu2 %5772 }
 0xc47   : > { %v5643_v55 = vsel %vm1439_vm5, %v5636_v58, %v5638_v39  ;;  %v5644_v54 = vsel %vm1439_vm5, %v5638_v39, %v5640_v3  ;;  %v7971_v39 = vld [vmem:[#allocation15 + $0x38] sm:$0xff] }
 0xc48   : > { %5659 = vmatpush.bf16.msra.mxu3 %v5643_v55  ;;  %5673 = vmatpush.bf16.msrb.mxu0 %v5644_v54  ;;  %v7972_v55 = vld [vmem:[#allocation15 + $0x40] sm:$0xff] }
 0xc4b   : > { %7731 = vmatmul.msk.bf16.vlgmr.msra.gmra.mxu3 %vm1446_vm6, %v7965_v5  ;;  %7732 = vmatmul.msk.bf16.vlgmr.msrb.gmra.mxu0 %vm1446_vm6, %v7965_v5 }
 0xc4e   : > { %v5702_v60 = vpop.permute.xlu1 %5701  ;;  %v5844_v47 = vpop.permute.xlu2 %5843 }
 0xc4f   : > { %v5708_v11 = vsel %vm1317_vm3, %v5702_v60, %v5704_v14 }
 0xc50   : > { %5737 = vmatpush.bf16.msrb.mxu3 %v5708_v11 }
 0xc52   : > { %v5642_v34 = vpop.permute.xlu0 %5641 }
 0xc53   : > { %v5645_v1 = vsel %vm1439_vm5, %v5640_v3, %v5642_v34 }
 0xc54   : > { %5687 = vmatpush.bf16.msrb.mxu1 %v5645_v1 }
 0xc56   : > { %v5706_v57 = vpop.permute.xlu1 %5705  ;;  %v5984_v31 = vpop.permute.xlu2 %5983 }
 0xc57   : > { %v5709_v48 = vsel %vm1317_vm3, %v5704_v14, %v5706_v57  ;;  %7733 = vmatmul.msk.bf16.vlgmr.msrb.gmra.mxu1 %vm1446_vm6, %v7965_v5 }
 0xc58   : > { %5751 = vmatpush.bf16.msra.mxu0 %v5709_v48 }
 0xc5a   : > { %v5700_v44 = vpop.permute.xlu0 %5699 }
 0xc5b   : > { %v5707_v62 = vsel %vm1317_vm3, %v5700_v44, %v5702_v60  ;;  %7739 = vmatmul.msk.bf16.vlgmr.msrb.gmra.mxu3 %vm1446_vm6, %v7964_v45  ;;  %7740 = vmatmul.msk.bf16.vlgmr.msra.gmra.mxu0 %vm1446_vm6, %v7964_v45 }
 0xc5c   : > { %5723 = vmatpush.bf16.msrb.mxu2 %v5707_v62 }
 0xc5e   : > { %v5771_v0 = vpop.permute.xlu1 %5770  ;;  %v6053_v40 = vpop.permute.xlu2 %6052 }
 0xc5f   : > { %v5776_v50 = vsel %vm1572_vm7, %v5771_v0, %v5773_v25  ;;  %7738 = vmatmul.msk.bf16.vlgmr.msrb.gmra.mxu2 %vm1446_vm6, %v7964_v45 }
 0xc60   : > { %5818 = vmatpush.bf16.msra.mxu3 %v5776_v50 }
 0xc62   : > { %v5769_v61 = vpop.permute.xlu0 %5768 }
 0xc63   : > { %v5774_v32 = vsel %vm1572_vm7, %v5767_v29, %v5769_v61  ;;  %v5775_v16 = vsel %vm1572_vm7, %v5769_v61, %v5771_v0 }
 0xc64   : > { %5925 = vmatpush.bf16.msrb.mxu3 %v9978_v6  ;;  %5790 = vmatpush.bf16.msra.mxu1 %v5774_v32 }
 0xc65   : > { %5804 = vmatpush.bf16.msra.mxu2 %v5775_v16 }
 0xc66   : > { %v5842_v30 = vpop.permute.xlu1 %5841  ;;  %v6059_v18 = vpop.permute.xlu2 %6058 }
 0xc67   : > { %v5848_v23 = vsel %vm1646_vm12, %v5842_v30, %v5844_v47  ;;  %7745 = vmatmul.msk.bf16.vlgmr.msra.gmra.mxu1 %vm1446_vm6, %v7966_v22 }
 0xc68   : > { %5877 = vmatpush.bf16.msrb.mxu1 %v5848_v23 }
 0xc6a   : > { %v5840_v43 = vpop.permute.xlu0 %5839 }
 0xc6b   : > { %v5847_v53 = vsel %vm1646_vm12, %v5840_v43, %v5842_v30  ;;  %7747 = vmatmul.msk.bf16.vlgmr.msra.gmra.mxu3 %vm1446_vm6, %v7966_v22 }
 0xc6c   : > { %5953 = vmatpush.bf16.msra.mxu1 %v9988_v26  ;;  %5863 = vmatpush.bf16.msrb.mxu0 %v5847_v53 }
 0xc6e   : > { %v5982_v33 = vpop.permute.xlu1 %5981  ;;  %v6130_v36 = vpop.permute.xlu2 %6129 }
 0xc6f   : > { %v5988_v24 = vsel %vm1036_vm10, %v5982_v33, %v5984_v31  ;;  %7746 = vmatmul.msk.bf16.vlgmr.msra.gmra.mxu2 %vm1446_vm6, %v7966_v22  ;;  %7752 = vmatmul.msk.bf16.vlgmr.msrb.gmra.mxu0 %vm1446_vm6, %v7967_v35 }
 0xc70   : > { %5939 = vmatpush.bf16.msra.mxu0 %v9976_v8  ;;  %6017 = vmatpush.bf16.msra.mxu3 %v5988_v24 }
 0xc72   : > { %v5846_v27 = vpop.permute.xlu0 %5845 }
 0xc73   : > { %v5849_v19 = vsel %vm1646_vm12, %v5844_v47, %v5846_v27 }
 0xc74   : > { %5891 = vmatpush.bf16.msrb.mxu2 %v5849_v19 }
 0xc76   : > { %v5986_v37 = vpop.permute.xlu1 %5985  ;;  %v6132_v26 = vpop.permute.xlu2 %6131 }
 0xc77   : > { %v5989_v20 = vsel %vm1036_vm10, %v5984_v31, %v5986_v37  ;;  %7753 = vmatmul.msk.bf16.vlgmr.msrb.gmra.mxu1 %vm1446_vm6, %v7967_v35  ;;  %v6135_v63 = vsel %vm1070_vm8, %v6130_v36, %v6132_v26 }
 0xc78   : > { %6031 = vmatpush.bf16.msrb.mxu0 %v5989_v20 }
 0xc7a   : > { %v5980_v2 = vpop.permute.xlu0 %5979 }
 0xc7b   : > { %v5987_v46 = vsel %vm1036_vm10, %v5980_v2, %v5982_v33  ;;  %7759 = vmatmul.msk.bf16.vlgmr.msrb.gmra.mxu3 %vm1446_vm6, %v7968_v41 }
 0xc7c   : > { %6003 = vmatpush.bf16.msra.mxu2 %v5987_v46 }
 0xc7e   : > { %v6057_v56 = vpop.permute.xlu1 %6056 }
 0xc7f   : > { %v6062_v38 = vsel %vm1053_vm9, %v6057_v56, %v6059_v18  ;;  %7754 = vmatmul.msk.bf16.vlgmr.msrb.gmra.mxu2 %vm1446_vm6, %v7967_v35  ;;  %7760 = vmatmul.msk.bf16.vlgmr.msra.gmra.mxu0 %vm1446_vm6, %v7968_v41 }
 0xc80   : > { %6104 = vmatpush.bf16.msrb.mxu3 %v6062_v38 }
 0xc82   : > { %v6055_v17 = vpop.permute.xlu0 %6054 }
 0xc83   : > { %v6060_v52 = vsel %vm1053_vm9, %v6053_v40, %v6055_v17  ;;  %v6061_v7 = vsel %vm1053_vm9, %v6055_v17, %v6057_v56 }
 0xc84   : > { %6076 = vmatpush.bf16.msrb.mxu1 %v6060_v52  ;;  %6090 = vmatpush.bf16.msrb.mxu2 %v6061_v7 }
 0xc86   : > { %v6128_v8 = vpop.permute.xlu1 %6127 }
 0xc87   : > { %v6134_v6 = vsel %vm1070_vm8, %v6128_v8, %v6130_v36  ;;  %7761 = vmatmul.msk.bf16.vlgmr.msra.gmra.mxu1 %vm1446_vm6, %v7968_v41 }
 0xc88   : > { %6163 = vmatpush.bf16.msra.mxu1 %v6134_v6 }
 0xc8a   : > { %v6126_v10 = vpop.permute.xlu0 %6125 }
 0xc8b   : > { %v6133_v13 = vsel %vm1070_vm8, %v6126_v10, %v6128_v8  ;;  %7771 = vmatmul.msk.bf16.vlgmr.msra.gmra.mxu3 %vm1446_vm6, %v7969_v4 }
 0xc8c   : > { %6149 = vmatpush.bf16.msra.mxu0 %v6133_v13 }
 0xc8e   : > { %v6201_v15 = vpop.permute.xlu1 %6200 }
 0xc8f   : > { %7770 = vmatmul.msk.bf16.vlgmr.msra.gmra.mxu2 %vm1446_vm6, %v7969_v4  ;;  %7772 = vmatmul.msk.bf16.vlgmr.msrb.gmra.mxu0 %vm1446_vm6, %v7969_v4 }
 0xc90   : > { %6177 = vmatpush.bf16.msra.mxu2 %v6135_v63 }
 0xc92   : > { %v6199_v42 = vpop.permute.xlu0 %6198 }
 0xc93   : > { %v6206_v28 = vsel %vm1087_vm11, %v6199_v42, %v6201_v15 }
 0xc94   : > { %6222 = vmatpush.bf16.msra.mxu3 %v6206_v28 }
 0xc96   : > { %v6205_v3 = vpop.permute.xlu1 %6204 }
 0xc97   : > { %7777 = vmatmul.msk.bf16.vlgmr.msrb.gmra.mxu1 %vm1446_vm6, %v7970_v21 }
 0xc9a   : > { %v6203_v14 = vpop.permute.xlu0 %6202 }
 0xc9b   : > { %v6207_v58 = vsel %vm1087_vm11, %v6201_v15, %v6203_v14  ;;  %v6208_v29 = vsel %vm1087_vm11, %v6203_v14, %v6205_v3  ;;  %7779 = vmatmul.msk.bf16.vlgmr.msrb.gmra.mxu3 %vm1446_vm6, %v7970_v21 }
 0xc9c   : > { %6236 = vmatpush.bf16.msrb.mxu0 %v6207_v58  ;;  %6250 = vmatpush.bf16.msrb.mxu1 %v6208_v29 }
 0xc9f   : > { %7778 = vmatmul.msk.bf16.vlgmr.msrb.gmra.mxu2 %vm1446_vm6, %v7970_v21  ;;  %7784 = vmatmul.msk.bf16.vlgmr.msra.gmra.mxu0 %vm1446_vm6, %v7971_v39 }
 0xca7   : > { %7785 = vmatmul.msk.bf16.vlgmr.msra.gmra.mxu1 %vm1446_vm6, %v7971_v39 }
 0xcab   : > { %7791 = vmatmul.msk.bf16.vlgmr.msra.gmra.mxu3 %vm1446_vm6, %v7972_v55 }
 0xcaf   : > { %7786 = vmatmul.msk.bf16.vlgmr.msra.gmra.mxu2 %vm1446_vm6, %v7971_v39  ;;  %7792 = vmatmul.msk.bf16.vlgmr.msrb.gmra.mxu0 %vm1446_vm6, %v7972_v55 }
 0xcb7   : > { %7793 = vmatmul.msk.bf16.vlgmr.msrb.gmra.mxu1 %vm1446_vm6, %v7972_v55 }
 0xcc8   : > { %v5675_v54 = vpop.f32.mrf.mxu0 }
 0xcce   : > { %v5661_v5 = vpop.f32.mrf.mxu3 }
 0xcd0   : > { %v5677_v60 = vpop.f32.mrf.mxu0 }
 0xcd4   : > { %v5689_v11 = vpop.f32.mrf.mxu1 }
 0xcd6   : > { %v5663_v25 = vpop.f32.mrf.mxu3 }
 0xcd8   : > { %v5753_v34 = vpop.f32.mrf.mxu0 }
 0xcd9   : > { %v5754_v1 = vadd.f32 %v5753_v34, %v5689_v11  ;;  %v7797_v11 = vld [vmem:[#allocation2] sm:$0xf] }
 0xcdc   : > { %v10097_v57 = vpop.f32.mrf.mxu1 }
 0xcde   : > { %v5739_v48 = vpop.f32.mrf.mxu3 }
 0xcdf   : > { %v5740_v45 = vadd.f32 %v5739_v48, %v5675_v54 }
 0xce0   : > { %v5755_v44 = vpop.f32.mrf.mxu0 }
 0xce2   : > { %v5725_v47 = vpop.f32.mrf.mxu2 }
 0xce3   : > { %v5726_v7 = vadd.f32 %v5725_v47, %v5661_v5  ;;  %v7975_v5 = vld [vmem:[#allocation2 + $0x10] sm:$0xf0] }
 0xce4   : > { %v5792_v62 = vpop.f32.mrf.mxu1  ;;  %v10103_v48 = vor.u32 %v7975_v5, %v7797_v11 }
 0xce5   : > { %v5825_v4 = vadd.f32 %v5792_v62, %v5726_v7 }
 0xce6   : > { %v5741_v0 = vpop.f32.mrf.mxu3  ;;  %6336 = vrot.lane.b32.xlu0 %v10103_v48, %s8476_s27 }
 0xce7   : > { %v5742_v26 = vadd.f32 %v5741_v0, %v5677_v60 }
 0xcea   : > { %v5727_v50 = vpop.f32.mrf.mxu2 }
 0xceb   : > { %v5728_v42 = vadd.f32 %v5727_v50, %v5663_v25 }
 0xcec   : > { %v5794_v61 = vpop.f32.mrf.mxu1  ;;  %v5865_v32 = vpop.f32.mrf.mxu0 }
 0xced   : > { %v5898_v63 = vadd.f32 %v5865_v32, %v5825_v4  ;;  %v5828_v34 = vadd.f32 %v5794_v61, %v5728_v42  ;;  %v5756_v32 = vadd.f32 %v5755_v44, %v10097_v57 }
 0xcee   : > { %v5820_v16 = vpop.f32.mrf.mxu3 }
 0xcef   : > { %v5827_v39 = vadd.f32 %v5820_v16, %v5754_v1 }
 0xcf2   : > { %v5806_v22 = vpop.f32.mrf.mxu2 }
 0xcf3   : > { %v5826_v8 = vadd.f32 %v5806_v22, %v5740_v45 }
 0xcf4   : > { %v5867_v31 = vpop.f32.mrf.mxu0  ;;  %v5879_v30 = vpop.f32.mrf.mxu1 }
 0xcf5   : > { %v5899_v10 = vadd.f32 %v5879_v30, %v5826_v8  ;;  %v5901_v60 = vadd.f32 %v5867_v31, %v5828_v34  ;;  %v6287_v8 = vld [vmem:[#allocation3 + $0x4] sm:$0xff] }
 0xcf6   : > { %v5822_v23 = vpop.f32.mrf.mxu3 }
 0xcfa   : > { %v5808_v43 = vpop.f32.mrf.mxu2 }
 0xcfb   : > { %v5829_v3 = vadd.f32 %v5808_v43, %v5742_v26 }
 0xcfc   : > { %v5881_v53 = vpop.f32.mrf.mxu1  ;;  %v5941_v35 = vpop.f32.mrf.mxu0 }
 0xcfd   : > { %v5961_v15 = vadd.f32 %v5941_v35, %v5899_v10  ;;  %v5902_v45 = vadd.f32 %v5881_v53, %v5829_v3  ;;  %v5830_v53 = vadd.f32 %v5822_v23, %v5756_v32  ;;  %v6292_v10 = vunpack.c.h.bf16 %v6287_v8  ;;  %v6273_v3 = vpop.permute.xlu0 %6272 }
 0xcfe   : > { %v5927_v40 = vpop.f32.mrf.mxu3 }
 0xcff   : > { %v5960_v14 = vadd.f32 %v5927_v40, %v5898_v63  ;;  %v6268_v40 = vpop.permute.xlu2 %6267 }
 0xd02   : > { %v5893_v33 = vpop.f32.mrf.mxu2 }
 0xd03   : > { %v5900_v47 = vadd.f32 %v5893_v33, %v5827_v39 }
 0xd04   : > { %v5943_v24 = vpop.f32.mrf.mxu0  ;;  %v5955_v27 = vpop.f32.mrf.mxu1 }
 0xd05   : > { %v5964_v25 = vadd.f32 %v5943_v24, %v5902_v45  ;;  %v5962_v30 = vadd.f32 %v5955_v27, %v5900_v47 }
 0xd06   : > { %v5929_v19 = vpop.f32.mrf.mxu3 }
 0xd07   : > { %v5963_v1 = vadd.f32 %v5929_v19, %v5901_v60 }
 0xd0a   : > { %v5895_v37 = vpop.f32.mrf.mxu2 }
 0xd0c   : > { %v10099_v20 = vpop.f32.mrf.mxu1  ;;  %v6033_v41 = vpop.f32.mrf.mxu0 }
 0xd0e   : > { %v6019_v18 = vpop.f32.mrf.mxu3 }
 0xd0f   : > { %v6039_v58 = vadd.f32 %v6019_v18, %v5961_v15  ;;  %v6040_v18 = vadd.f32 %v6033_v41, %v5962_v30  ;;  %v6290_v30 = vld [vmem:[#allocation3 + $0x20] sm:$0xf] }
 0xd12   : > { %v6005_v2 = vpop.f32.mrf.mxu2 }
 0xd13   : > { %v6038_v55 = vadd.f32 %v6005_v2, %v5960_v14 }
 0xd14   : > { %v10101_v46 = vpop.f32.mrf.mxu0  ;;  %v6078_v56 = vpop.f32.mrf.mxu1 }
 0xd15   : > { %v6111_v0 = vadd.f32 %v6078_v56, %v6038_v55  ;;  %v5903_v56 = vadd.f32 %v5895_v37, %v5830_v53  ;;  %v6289_v55 = vld [vmem:[#allocation3 + $0x18] sm:$0xff] }
 0xd16   : > { %v6021_v38 = vpop.f32.mrf.mxu3  ;;  %v6295_v47 = vunpack.c.h.bf16 %v6289_v55 }
 0xd17   : > { %v6042_v43 = vadd.f32 %v6021_v38, %v5964_v25 }
 0xd1a   : > { %v6007_v36 = vpop.f32.mrf.mxu2 }
 0xd1b   : > { %v6041_v33 = vadd.f32 %v6007_v36, %v5963_v1  ;;  %v5965_v36 = vadd.f32 %v10099_v20, %v5903_v56 }
 0xd1c   : > { %v6080_v17 = vpop.f32.mrf.mxu1  ;;  %v6151_v52 = vpop.f32.mrf.mxu0 }
 0xd1d   : > { %v6184_v61 = vadd.f32 %v6151_v52, %v6111_v0  ;;  %v6114_v19 = vadd.f32 %v6080_v17, %v6041_v33  ;;  %v6043_v17 = vadd.f32 %v10101_v46, %v5965_v36  ;;  %v6294_v46 = vunpack.c.l.bf16 %v6289_v55 }
 0xd1e   : > { %v6106_v6 = vpop.f32.mrf.mxu3 }
 0xd1f   : > { %v6113_v4 = vadd.f32 %v6106_v6, %v6040_v18 }
 0xd22   : > { %v6092_v13 = vpop.f32.mrf.mxu2 }
 0xd23   : > { %v6112_v54 = vadd.f32 %v6092_v13, %v6039_v58  ;;  %v6291_v13 = vunpack.c.l.bf16 %v6287_v8 }
 0xd24   : > { %v6153_v28 = vpop.f32.mrf.mxu0  ;;  %v6165_v21 = vpop.f32.mrf.mxu1 }
 0xd25   : > { %v6185_v50 = vadd.f32 %v6165_v21, %v6112_v54  ;;  %v6187_v41 = vadd.f32 %v6153_v28, %v6114_v19  ;;  %v6288_v21 = vld [vmem:[#allocation3 + $0xc] sm:$0xf] }
 0xd26   : > { %v6108_v29 = vpop.f32.mrf.mxu3  ;;  %v6293_v5 = vunpack.c.l.bf16 %v6288_v21 }
 0xd27   : > { %v6116_v34 = vadd.f32 %v6108_v29, %v6043_v17 }
 0xd2a   : > { %v6094_v62 = vpop.f32.mrf.mxu2 }
 0xd2b   : > { %v6115_v2 = vadd.f32 %v6094_v62, %v6042_v43 }
 0xd2c   : > { %v6167_v16 = vpop.f32.mrf.mxu1  ;;  %v6238_v22 = vpop.f32.mrf.mxu0 }
 0xd2d   : > { %v6258_v35 = vadd.f32 %v6238_v22, %v6185_v50  ;;  %v6188_v38 = vadd.f32 %v6167_v16, %v6115_v2 }
 0xd2e   : > { %v6224_v31 = vpop.f32.mrf.mxu3 }
 0xd2f   : > { %v6276_v7 = vadd.f32 %v6268_v40, %v6258_v35  ;;  %v6257_v24 = vadd.f32 %v6224_v31, %v6184_v61  ;;  %v6296_v35 = vunpack.c.l.bf16 %v6290_v30 }
 0xd31   : > { %v6282_v57 = vmul.f32 %v6276_v7, %v8916_v51  ;;  %v6275_v44 = vadd.f32 %v6268_v40, %v6257_v24 }
 0xd32   : > { %v6179_v27 = vpop.f32.mrf.mxu2 }
 0xd33   : > { %v6281_v52 = vmul.f32 %v6275_v44, %v8914_v49  ;;  %v6186_v23 = vadd.f32 %v6179_v27, %v6113_v4  ;;  %v6298_v15 = vadd.f32 %v6292_v10, %v6282_v57  ;;  %v7832_v57 = vld [vmem:[#allocation2 + $0x10] sm:$0xf]  ;;  %v7977_v44 = vld [vmem:[#allocation2 + $0x20] sm:$0xf0] }
 0xd34   : > { %v6240_v26 = vpop.f32.mrf.mxu0  ;;  %v6252_v63 = vpop.f32.mrf.mxu1  ;;  %v7833_v19 = vor.u32 %v7977_v44, %v7832_v57 }
 0xd35   : > { %v6297_v42 = vadd.f32 %v6291_v13, %v6281_v52  ;;  %v6261_v37 = vadd.f32 %v6240_v26, %v6188_v38  ;;  %v6259_v6 = vadd.f32 %v6252_v63, %v6186_v23 }
 0xd36   : > { %v6226_v14 = vpop.f32.mrf.mxu3 }
 0xd37   : > { %v6303_v58 = vpack.c.bf16 %v6298_v15, %v6297_v42  ;;  %v6279_v39 = vadd.f32 %v6273_v3, %v6261_v37  ;;  %v6277_v54 = vadd.f32 %v6268_v40, %v6259_v6  ;;  %v6260_v11 = vadd.f32 %v6226_v14, %v6187_v41  ;;  %v7794_v41 = vld [vmem:[%s10358_s24 + $0x1] sm:$0x1] }
 0xd39   : > { %6307 = vst [vmem:[#allocation2 + $0x4] sm:$0xff] %v6303_v58  ;;  %v6285_v20 = vmul.f32 %v6279_v39, %v8916_v51  ;;  %v6283_v28 = vmul.f32 %v6277_v54, %v8920_v59  ;;  %v6278_v45 = vadd.f32 %v6273_v3, %v6260_v11  ;;  %v6317_v58 = vld [vmem:[%s10358_s24] sm:$0x1] }
 0xd3a   : > { %v6181_v60 = vpop.f32.mrf.mxu2 }
 0xd3b   : > { %v6299_v62 = vadd.f32 %v6293_v5, %v6283_v28  ;;  %v6284_v25 = vmul.f32 %v6278_v45, %v8914_v49  ;;  %v6189_v0 = vadd.f32 %v6181_v60, %v6116_v34  ;;  %v6301_v32 = vadd.f32 %v6295_v47, %v6285_v20  ;;  %v7817_v34 = vld [vmem:[%s10358_s24 + $0x2] sm:$0x1] }
 0xd3c   : > { %v6254_v50 = vpop.f32.mrf.mxu1 }
 0xd3d   : > { %v6304_v1 = vpack.c.bf16 %v6299_v62, %v6299_v62  ;;  %v6300_v16 = vadd.f32 %v6294_v46, %v6284_v25  ;;  %v6262_v22 = vadd.f32 %v6254_v50, %v6189_v0  ;;  %v7821_v25 = vld [vmem:[%s10358_s24 + $0x3] sm:$0x1] }
 0xd3f   : > { %6308 = vst [vmem:[#allocation2 + $0xc] sm:$0xf] %v6304_v1  ;;  %v6305_v29 = vpack.c.bf16 %v6301_v32, %v6300_v16  ;;  %v6280_v43 = vadd.f32 %v6273_v3, %v6262_v22 }
 0xd40   : > { %v7805_v33 = vld [vmem:[#allocation2 + $0x8] sm:$0xf]  ;;  %v7973_v18 = vld [vmem:[#allocation2 + $0x4] sm:$0xf] }
 0xd41   : > { %6309 = vst [vmem:[#allocation2 + $0x18] sm:$0xff] %v6305_v29  ;;  %v6286_v61 = vmul.f32 %v6280_v43, %v8920_v59  ;;  %v7825_v43 = vld [vmem:[%s10358_s24 + $0x4] sm:$0x1] }
 0xd43   : > { %v6302_v40 = vadd.f32 %v6296_v35, %v6286_v61 }
 0xd45   : > { %v6306_v53 = vpack.c.bf16 %v6302_v40, %v6302_v40 }
 0xd46   : > { %v7974_v24 = vld [vmem:[#allocation2 + $0xc] sm:$0xf] }
 0xd47   : > { %6310 = vst [vmem:[#allocation2 + $0x20] sm:$0xf] %v6306_v53 }
 0xd48   : > { %v7976_v31 = vld [vmem:[#allocation2 + $0x18] sm:$0xf0]  ;;  %v7799_v2 = vld [vmem:[#allocation2 + $0x14] sm:$0xf0] }
 0xd49   : > { %v10116_v7 = vor.u32 %v7976_v31, %v7805_v33  ;;  %v10118_v8 = vor.u32 %v7973_v18, %v7799_v2 }
 0xd4b   : > { %6340 = vrot.lane.b32.xlu2 %v10116_v7, %s8476_s27  ;;  %6338 = vrot.lane.b32.xlu1 %v10118_v8, %s8476_s27 }
 0xd4e   : > { %v7807_v56 = vld [vmem:[#allocation2 + $0x1c] sm:$0xf0] }
 0xd4f   : > { %v10124_v4 = vor.u32 %v7974_v24, %v7807_v56  ;;  %v7829_v56 = vld [vmem:[%s10358_s24 + $0x5] sm:$0x1] }
 0xd51   : > { %6398 = vrot.lane.b32.xlu0 %v10124_v4, %s8474_s9 }
 0xd53   : > { %6396 = vrot.lane.b32.xlu2 %v10116_v7, %s8474_s9  ;;  %6342 = vrot.lane.b32.xlu1 %v10124_v4, %s8476_s27  ;;  %s10429_s27 = sld [smem:[#allocation50_spill]] }
 0xd58   : > { %v6337_v52 = vpop.permute.xlu0 %6336 }
 0xd59   : > { %6450 = vrot.lane.b32.xlu0 %v10103_v48, %s8477_s3 }
 0xd5b   : > { %6392 = vrot.lane.b32.xlu2 %v10103_v48, %s8474_s9  ;;  %6394 = vrot.lane.b32.xlu1 %v10118_v8, %s8474_s9 }
 0xd61   : > { %6513 = vrot.lane.b32.xlu0 %v10118_v8, %s8478_s11 }
 0xd63   : > { %6511 = vrot.lane.b32.xlu2 %v10103_v48, %s8478_s11  ;;  %6452 = vrot.lane.b32.xlu1 %v10118_v8, %s8477_s3  ;;  %v6869_v48 = vld [vmem:[#allocation5] sm:$0x1] }
 0xd69   : > { %6515 = vrot.lane.b32.xlu0 %v10116_v7, %s8478_s11 }
 0xd6b   : > { %6456 = vrot.lane.b32.xlu2 %v10124_v4, %s8477_s3  ;;  %6454 = vrot.lane.b32.xlu1 %v10116_v7, %s8477_s3  ;;  %s10425_s3 = sld [smem:[#allocation27_spill]] }
 0xd71   : > { %6633 = vrot.lane.b32.xlu0 %v7833_v19, %s8470_s5 }
 0xd73   : > { %6631 = vrot.lane.b32.xlu2 %v10124_v4, %s8470_s5  ;;  %6517 = vrot.lane.b32.xlu1 %v10124_v4, %s8478_s11  ;;  %s10262_s11 = sand.u32 1, %s10425_s3   ;;  %s10282_s3 = scalar_lea.hbm %s10429_s27, %s7980_s8 }
 0xd74   : > { %s7978_s1 = smul.u32 3, %s10262_s11 }
 0xd76   : > { %s941_s25 = scalar_lea.vmem [#allocation17], %s7978_s1  ;;  %s948_s30 = scalar_lea.vmem [#allocation18], %s7978_s1 }
 0xd77   : > { %s6937_s26 = sshll.u32 %s948_s30, 4  ;;  %s6938_s26 = int_to_ptr.vmem [resolvable:$true] %s6937_s26 }
 0xd79   : > { %6688 = vrot.lane.b32.xlu0 %v10118_v8, %s8469_s10 }
 0xd7b   : > { %6627 = vrot.lane.b32.xlu2 %v10118_v8, %s8470_s5  ;;  %6629 = vrot.lane.b32.xlu1 %v10116_v7, %s8470_s5 }
 0xd81   : > { %6751 = vrot.lane.b32.xlu0 %v10116_v7, %s8471_s29 }
 0xd83   : > { %6749 = vrot.lane.b32.xlu2 %v10118_v8, %s8471_s29  ;;  %6690 = vrot.lane.b32.xlu1 %v10116_v7, %s8469_s10 }
 0xd89   : > { %6753 = vrot.lane.b32.xlu0 %v10124_v4, %s8471_s29 }
 0xd8b   : > { %6694 = vrot.lane.b32.xlu2 %v7833_v19, %s8469_s10  ;;  %6692 = vrot.lane.b32.xlu1 %v10124_v4, %s8469_s10  ;;  %s10426_s10 = sld [smem:[#allocation49_spill]] }
 0xd91   : > { %6810 = vrot.lane.b32.xlu0 %v10118_v8, %s8472_s0  ;;  %s6921_s5 = scalar_lea.hbm %s10426_s10, %s7980_s8  ;;  %s6906_s8 = scalar_lea.sflag [#allocation8], %s10262_s11 }
 0xd92   : > { %s8368_s12 = scalar_lea.hbm %s10426_s10, 6 }
 0xd93   : > { %6814 = vrot.lane.b32.xlu2 %v10124_v4, %s8472_s0  ;;  %6812 = vrot.lane.b32.xlu1 %v10116_v7, %s8472_s0 }
 0xd99   : > { %6872 = vperm.xlu0 %8165, %v6869_v48  }
 0xd9b   : > { %6816 = vrot.lane.b32.xlu2 %v7833_v19, %s8472_s0  ;;  %6755 = vrot.lane.b32.xlu1 %v7833_v19, %s8471_s29  ;;  %s6923_s29 = sshll.u32 %s941_s25, 4  ;;  %s6925_s0 = sshll.u32 %s6921_s5, 4  ;;  %s6924_s29 = int_to_ptr.vmem [resolvable:$true] %s6923_s29  ;;  %s6926_s0 = int_to_ptr.hbm [resolvable:$true] %s6925_s0 }
 0xd9c   : > { %s6939_s5 = sshll.u32 %s10282_s3, 4  ;;  %s8362_s9 = sshra.s32 %s6926_s0, 4  ;;  %s8363_s9 = int_to_ptr.hbm [resolvable:$true] %s8362_s9  ;;  %s6940_s5 = int_to_ptr.hbm [resolvable:$true] %s6939_s5 }
 0xd9d   : > { %p8369_p3 = scmp.lt.s32.totalorder %s8363_s9, %s10426_s10 }
 0xda5   : > { %v6341_v10 = vpop.permute.xlu2 %6340 }
 0xdad   : > { %v6397_v27 = vpop.permute.xlu2 %6396 }
 0xdb5   : > { %v6393_v38 = vpop.permute.xlu2 %6392 }
 0xdbd   : > { %v6339_v13 = vpop.permute.xlu1 %6338  ;;  %v6512_v26 = vpop.permute.xlu2 %6511 }
 0xdbe   : > { %v6344_v23 = vsel %vm1439_vm5, %v6337_v52, %v6339_v13  ;;  %v6345_v36 = vsel %vm1439_vm5, %v6339_v13, %v6341_v10  ;;  %v7841_v13 = vld [vmem:[%s10358_s24 + $0x7] sm:$0x1] }
 0xdbf   : > { %6360 = vmatpush.bf16.msrb.mxu2 %v6344_v23  ;;  %6373 = vmatpush.bf16.msrb.mxu3 %v6345_v36  ;;  %v7845_v23 = vld [vmem:[%s10358_s24 + $0x8] sm:$0x1] }
 0xdc2   : > { %7811 = vmatmul.msk.bf16.vlgmr.msrb.gmra.mxu2 %vm1446_vm6, %v7794_v41  ;;  %7812 = vmatmul.msk.bf16.vlgmr.msrb.gmra.mxu3 %vm1446_vm6, %v7794_v41 }
 0xdc3   : > { %v6399_v63 = vpop.permute.xlu0 %6398 }
 0xdc4   : > { %v6402_v15 = vsel %vm1317_vm3, %v6397_v27, %v6399_v63 }
 0xdc5   : > { %6442 = vmatpush.bf16.msra.mxu3 %v6402_v15  ;;  %v6343_v42 = vpop.permute.xlu1 %6342  ;;  %v6457_v6 = vpop.permute.xlu2 %6456 }
 0xdc6   : > { %v6346_v37 = vsel %vm1439_vm5, %v6341_v10, %v6343_v42  ;;  %v7837_v10 = vld [vmem:[%s10358_s24 + $0x6] sm:$0x1] }
 0xdc7   : > { %6386 = vmatpush.bf16.msra.mxu0 %v6346_v37 }
 0xdca   : > { %7813 = vmatmul.msk.bf16.vlgmr.msra.gmra.mxu0 %vm1446_vm6, %v7794_v41 }
 0xdcb   : > { %v6451_v21 = vpop.permute.xlu0 %6450 }
 0xdcd   : > { %v6395_v3 = vpop.permute.xlu1 %6394  ;;  %v6632_v54 = vpop.permute.xlu2 %6631 }
 0xdce   : > { %v6400_v17 = vsel %vm1317_vm3, %v6393_v38, %v6395_v3  ;;  %v6401_v14 = vsel %vm1317_vm3, %v6395_v3, %v6397_v27 }
 0xdcf   : > { %6416 = vmatpush.bf16.msra.mxu1 %v6400_v17  ;;  %6429 = vmatpush.bf16.msra.mxu2 %v6401_v14 }
 0xdd2   : > { %7814 = vmatmul.msk.bf16.vlgmr.msra.gmra.mxu1 %vm1446_vm6, %v6317_v58  ;;  %7815 = vmatmul.msk.bf16.vlgmr.msra.gmra.mxu2 %vm1446_vm6, %v6317_v58 }
 0xdd3   : > { %7816 = vmatmul.msk.bf16.vlgmr.msra.gmra.mxu3 %vm1446_vm6, %v6317_v58  ;;  %v6514_v39 = vpop.permute.xlu0 %6513 }
 0xdd4   : > { %v6519_v55 = vsel %vm1646_vm12, %v6512_v26, %v6514_v39 }
 0xdd5   : > { %6535 = vmatpush.bf16.msrb.mxu3 %v6519_v55  ;;  %v6453_v11 = vpop.permute.xlu1 %6452  ;;  %v6628_v62 = vpop.permute.xlu2 %6627 }
 0xdd6   : > { %v6458_v5 = vsel %vm1572_vm7, %v6451_v21, %v6453_v11 }
 0xdd7   : > { %6474 = vmatpush.bf16.msrb.mxu0 %v6458_v5 }
 0xdd9   : > { %6598 = vmatpush.bf16.msra.mxu3 %v10116_v7 }
 0xdda   : > { %7818 = vmatmul.msk.bf16.vlgmr.msrb.gmra.mxu0 %vm1446_vm6, %v7817_v34 }
 0xddb   : > { %v6516_v20 = vpop.permute.xlu0 %6515 }
 0xddc   : > { %v6520_v28 = vsel %vm1646_vm12, %v6514_v39, %v6516_v20 }
 0xddd   : > { %6548 = vmatpush.bf16.msra.mxu0 %v6520_v28  ;;  %v6455_v45 = vpop.permute.xlu1 %6454  ;;  %v6750_v1 = vpop.permute.xlu2 %6749 }
 0xdde   : > { %v6459_v47 = vsel %vm1572_vm7, %v6453_v11, %v6455_v45  ;;  %v6460_v60 = vsel %vm1572_vm7, %v6455_v45, %v6457_v6 }
 0xddf   : > { %6487 = vmatpush.bf16.msrb.mxu1 %v6459_v47  ;;  %6500 = vmatpush.bf16.msrb.mxu2 %v6460_v60 }
 0xde1   : > { %6611 = vmatpush.bf16.msrb.mxu0 %v10124_v4 }
 0xde2   : > { %7819 = vmatmul.msk.bf16.vlgmr.msrb.gmra.mxu1 %vm1446_vm6, %v7817_v34  ;;  %7820 = vmatmul.msk.bf16.vlgmr.msrb.gmra.mxu2 %vm1446_vm6, %v7817_v34 }
 0xde3   : > { %6585 = vmatpush.bf16.msra.mxu2 %v10118_v8  ;;  %7822 = vmatmul.msk.bf16.vlgmr.msrb.gmra.mxu3 %vm1446_vm6, %v7821_v25  ;;  %v6634_v46 = vpop.permute.xlu0 %6633 }
 0xde4   : > { %v6637_v0 = vsel %vm1036_vm10, %v6632_v54, %v6634_v46 }
 0xde5   : > { %6677 = vmatpush.bf16.msrb.mxu3 %v6637_v0  ;;  %v6518_v50 = vpop.permute.xlu1 %6517  ;;  %v6695_v61 = vpop.permute.xlu2 %6694 }
 0xde6   : > { %v6521_v32 = vsel %vm1646_vm12, %v6516_v20, %v6518_v50 }
 0xde7   : > { %6561 = vmatpush.bf16.msra.mxu1 %v6521_v32 }
 0xdea   : > { %7823 = vmatmul.msk.bf16.vlgmr.msra.gmra.mxu0 %vm1446_vm6, %v7821_v25 }
 0xdeb   : > { %v6689_v16 = vpop.permute.xlu0 %6688 }
 0xded   : > { %v6630_v22 = vpop.permute.xlu1 %6629  ;;  %v6815_v2 = vpop.permute.xlu2 %6814 }
 0xdee   : > { %v6635_v30 = vsel %vm1036_vm10, %v6628_v62, %v6630_v22  ;;  %v6636_v29 = vsel %vm1036_vm10, %v6630_v22, %v6632_v54 }
 0xdef   : > { %6651 = vmatpush.bf16.msrb.mxu1 %v6635_v30  ;;  %6664 = vmatpush.bf16.msrb.mxu2 %v6636_v29 }
 0xdf2   : > { %7824 = vmatmul.msk.bf16.vlgmr.msra.gmra.mxu1 %vm1446_vm6, %v7821_v25  ;;  %7826 = vmatmul.msk.bf16.vlgmr.msra.gmra.mxu2 %vm1446_vm6, %v7825_v43 }
 0xdf3   : > { %7827 = vmatmul.msk.bf16.vlgmr.msra.gmra.mxu3 %vm1446_vm6, %v7825_v43  ;;  %v6752_v35 = vpop.permute.xlu0 %6751 }
 0xdf4   : > { %v6757_v40 = vsel %vm1070_vm8, %v6750_v1, %v6752_v35 }
 0xdf5   : > { %6773 = vmatpush.bf16.msra.mxu3 %v6757_v40  ;;  %v6691_v53 = vpop.permute.xlu1 %6690  ;;  %v6817_v48 = vpop.permute.xlu2 %6816 }
 0xdf6   : > { %v6696_v33 = vsel %vm1053_vm9, %v6689_v16, %v6691_v53  ;;  %v6820_v27 = vsel %vm1087_vm11, %v6815_v2, %v6817_v48 }
 0xdf7   : > { %6712 = vmatpush.bf16.msra.mxu0 %v6696_v33 }
 0xdfa   : > { %7828 = vmatmul.msk.bf16.vlgmr.msrb.gmra.mxu0 %vm1446_vm6, %v7825_v43 }
 0xdfb   : > { %v6754_v31 = vpop.permute.xlu0 %6753 }
 0xdfc   : > { %v6758_v18 = vsel %vm1070_vm8, %v6752_v35, %v6754_v31 }
 0xdfd   : > { %6786 = vmatpush.bf16.msrb.mxu0 %v6758_v18  ;;  %v6693_v7 = vpop.permute.xlu1 %6692 }
 0xdfe   : > { %v6697_v8 = vsel %vm1053_vm9, %v6691_v53, %v6693_v7  ;;  %v6698_v24 = vsel %vm1053_vm9, %v6693_v7, %v6695_v61 }
 0xdff   : > { %6725 = vmatpush.bf16.msra.mxu1 %v6697_v8  ;;  %6738 = vmatpush.bf16.msra.mxu2 %v6698_v24 }
 0xe02   : > { %7834 = vmatmul.msk.bf16.vlgmr.msrb.gmra.mxu1 %vm1446_vm6, %v7829_v56  ;;  %7835 = vmatmul.msk.bf16.vlgmr.msrb.gmra.mxu2 %vm1446_vm6, %v7829_v56 }
 0xe03   : > { %7836 = vmatmul.msk.bf16.vlgmr.msrb.gmra.mxu3 %vm1446_vm6, %v7829_v56  ;;  %v6811_v4 = vpop.permute.xlu0 %6810 }
 0xe05   : > { %v6813_v57 = vpop.permute.xlu1 %6812 }
 0xe06   : > { %v6818_v44 = vsel %vm1087_vm11, %v6811_v4, %v6813_v57  ;;  %v6819_v19 = vsel %vm1087_vm11, %v6813_v57, %v6815_v2 }
 0xe07   : > { %6834 = vmatpush.bf16.msrb.mxu2 %v6818_v44  ;;  %6847 = vmatpush.bf16.msrb.mxu3 %v6819_v19 }
 0xe0a   : > { %7838 = vmatmul.msk.bf16.vlgmr.msra.gmra.mxu0 %vm1446_vm6, %v7837_v10 }
 0xe0b   : > { %6860 = vmatpush.bf16.msra.mxu0 %v6820_v27 }
 0xe0d   : > { %v6756_v38 = vpop.permute.xlu1 %6755 }
 0xe0e   : > { %v6759_v52 = vsel %vm1070_vm8, %v6754_v31, %v6756_v38 }
 0xe0f   : > { %6799 = vmatpush.bf16.msrb.mxu1 %v6759_v52 }
 0xe12   : > { %7839 = vmatmul.msk.bf16.vlgmr.msra.gmra.mxu1 %vm1446_vm6, %v7837_v10  ;;  %7840 = vmatmul.msk.bf16.vlgmr.msra.gmra.mxu2 %vm1446_vm6, %v7837_v10 }
 0xe13   : > { %7842 = vmatmul.msk.bf16.vlgmr.msra.gmra.mxu3 %vm1446_vm6, %v7841_v13 }
 0xe1a   : > { %7843 = vmatmul.msk.bf16.vlgmr.msrb.gmra.mxu0 %vm1446_vm6, %v7841_v13 }
 0xe22   : > { %7844 = vmatmul.msk.bf16.vlgmr.msrb.gmra.mxu1 %vm1446_vm6, %v7841_v13  ;;  %7846 = vmatmul.msk.bf16.vlgmr.msrb.gmra.mxu2 %vm1446_vm6, %v7845_v23 }
 0xe23   : > { %7847 = vmatmul.msk.bf16.vlgmr.msrb.gmra.mxu3 %vm1446_vm6, %v7845_v23 }
 0xe2a   : > { %7848 = vmatmul.msk.bf16.vlgmr.msra.gmra.mxu0 %vm1446_vm6, %v7845_v23 }
 0xe45   : > { %v6362_v36 = vpop.f32.mrf.mxu2  ;;  %v6375_v41 = vpop.f32.mrf.mxu3 }
 0xe47   : > { %v6388_v26 = vpop.f32.mrf.mxu0 }
 0xe4d   : > { %v6364_v63 = vpop.f32.mrf.mxu2  ;;  %v6377_v15 = vpop.f32.mrf.mxu3 }
 0xe4e   : > { %v6873_v15 = vpop.permute.xlu0 %6872 }
 0xe4f   : > { %v6390_v42 = vpop.f32.mrf.mxu0  ;;  %v6418_v37 = vpop.f32.mrf.mxu1 }
 0xe50   : > { %v6419_v6 = vadd.f32 %v6418_v37, %v6362_v36 }
 0xe55   : > { %v6431_v21 = vpop.f32.mrf.mxu2 }
 0xe56   : > { %v6432_v3 = vadd.f32 %v6431_v21, %v6375_v41  ;;  %v6444_v17 = vpop.f32.mrf.mxu3 }
 0xe57   : > { %v6445_v14 = vadd.f32 %v6444_v17, %v6388_v26  ;;  %v6420_v58 = vpop.f32.mrf.mxu1  ;;  %v6476_v39 = vpop.f32.mrf.mxu0  ;;  %v6875_v17 = vperm.slane %v6873_v15, 0 }
 0xe58   : > { %v6506_v55 = vadd.f32 %v6476_v39, %v6419_v6 }
 0xe5d   : > { %v6433_v54 = vpop.f32.mrf.mxu2 }
 0xe5e   : > { %v6446_v11 = vpop.f32.mrf.mxu3 }
 0xe5f   : > { %v6478_v5 = vpop.f32.mrf.mxu0  ;;  %v6489_v34 = vpop.f32.mrf.mxu1 }
 0xe60   : > { %v6507_v56 = vadd.f32 %v6489_v34, %v6432_v3 }
 0xe65   : > { %v6502_v20 = vpop.f32.mrf.mxu2 }
 0xe66   : > { %v6537_v28 = vpop.f32.mrf.mxu3  ;;  %v6508_v4 = vadd.f32 %v6502_v20, %v6445_v14 }
 0xe67   : > { %v6491_v45 = vpop.f32.mrf.mxu1  ;;  %v6550_v47 = vpop.f32.mrf.mxu0  ;;  %v6567_v57 = vadd.f32 %v6537_v28, %v6506_v55 }
 0xe68   : > { %v6568_v44 = vadd.f32 %v6550_v47, %v6507_v56 }
 0xe6d   : > { %v6504_v60 = vpop.f32.mrf.mxu2 }
 0xe6e   : > { %v6539_v62 = vpop.f32.mrf.mxu3 }
 0xe6f   : > { %v6552_v25 = vpop.f32.mrf.mxu0  ;;  %v6563_v46 = vpop.f32.mrf.mxu1  ;;  %v6893_v62 = vlaneseq }
 0xe70   : > { %v6569_v48 = vadd.f32 %v6563_v46, %v6508_v4  ;;  %v6899_v25 = vld [vmem:[%s8762_s6] sm:$0x7]  ;;  %v10427_v46 = vperm.slane %v8770_v9, 1  ;;  %s8364_s6 = scalar_lea.hbm %s8363_s9, 3 }
 0xe71   : > { %vm10284_vm8 = vcmp.lt.s32.totalorder %v6893_v62, 384  ;;  %p8365_p0 = scmp.ne.s32.totalorder %s8363_s9, %s8364_s6  ;;  %p8370_p4 = scmp.lt.s32.totalorder %s8368_s12, %s8364_s6 }
 0xe73   : > { %p8366_p1 = pnand %p8365_p0, %p8660_p5  ;;  %p8371_p7 = por %p8370_p4, %p8369_p3 }
 0xe75   : > { %v6587_v0 = vpop.f32.mrf.mxu2  ;;  %p8367_p2 = pneg %p8366_p1 }
 0xe76   : > { %v6600_v50 = vpop.f32.mrf.mxu3  ;;  %v6617_v10 = vadd.f32 %v6587_v0, %v6567_v57 }
 0xe77   : > { %v6565_v32 = vpop.f32.mrf.mxu1  ;;  %v6613_v1 = vpop.f32.mrf.mxu0  ;;  %v6618_v38 = vadd.f32 %v6600_v50, %v6568_v44  ;;  %p8372_p8 = pnand %p8371_p7, %p8367_p2 }
 0xe78   : > { %v6619_v23 = vadd.f32 %v6613_v1, %v6569_v48 }
 0xe7d   : > { %v6589_v16 = vpop.f32.mrf.mxu2 }
 0xe7e   : > { %v6602_v22 = vpop.f32.mrf.mxu3  ;;  %v6898_v16 = vld [vmem:[%s8757_s4] sm:$0x7] }
 0xe7f   : > { %v6615_v30 = vpop.f32.mrf.mxu0  ;;  %v6653_v29 = vpop.f32.mrf.mxu1 }
 0xe80   : > { %v6683_v36 = vadd.f32 %v6653_v29, %v6617_v10 }
 0xe85   : > { %v6666_v43 = vpop.f32.mrf.mxu2 }
 0xe86   : > { %v6679_v61 = vpop.f32.mrf.mxu3  ;;  %v6684_v41 = vadd.f32 %v6666_v43, %v6618_v38 }
 0xe87   : > { %v6655_v35 = vpop.f32.mrf.mxu1  ;;  %v6714_v40 = vpop.f32.mrf.mxu0  ;;  %v6685_v26 = vadd.f32 %v6679_v61, %v6619_v23 }
 0xe88   : > { %v6744_v63 = vadd.f32 %v6714_v40, %v6683_v36 }
 0xe8d   : > { %v6668_v53 = vpop.f32.mrf.mxu2 }
 0xe8e   : > { %v6681_v33 = vpop.f32.mrf.mxu3 }
 0xe8f   : > { %v6716_v31 = vpop.f32.mrf.mxu0  ;;  %v6727_v18 = vpop.f32.mrf.mxu1 }
 0xe90   : > { %v6745_v42 = vadd.f32 %v6727_v18, %v6684_v41 }
 0xe95   : > { %v6740_v2 = vpop.f32.mrf.mxu2 }
 0xe96   : > { %v6775_v7 = vpop.f32.mrf.mxu3  ;;  %v6746_v37 = vadd.f32 %v6740_v2, %v6685_v26 }
 0xe97   : > { %v6729_v8 = vpop.f32.mrf.mxu1  ;;  %v6788_v24 = vpop.f32.mrf.mxu0  ;;  %v6805_v6 = vadd.f32 %v6775_v7, %v6744_v63 }
 0xe98   : > { %v6806_v21 = vadd.f32 %v6788_v24, %v6745_v42 }
 0xe9d   : > { %v6742_v19 = vpop.f32.mrf.mxu2 }
 0xe9e   : > { %v6777_v27 = vpop.f32.mrf.mxu3 }
 0xe9f   : > { %v6790_v52 = vpop.f32.mrf.mxu0  ;;  %v6801_v13 = vpop.f32.mrf.mxu1 }
 0xea0   : > { %v6807_v14 = vadd.f32 %v6801_v13, %v6746_v37 }
 0xea5   : > { %v6836_v3 = vpop.f32.mrf.mxu2 }
 0xea6   : > { %v6866_v58 = vadd.f32 %v6836_v3, %v6805_v6  ;;  %v6849_v39 = vpop.f32.mrf.mxu3 }
 0xea7   : > { %v6867_v55 = vadd.f32 %v6849_v39, %v6806_v21  ;;  %v6862_v54 = vpop.f32.mrf.mxu0  ;;  %v6803_v11 = vpop.f32.mrf.mxu1 }
 0xea8   : > { %v6876_v5 = vadd.f32 %v6875_v17, %v6866_v58  ;;  %v6868_v34 = vadd.f32 %v6862_v54, %v6807_v14 }
 0xea9   : > { %v6877_v20 = vadd.f32 %v6875_v17, %v6867_v55 }
 0xeaa   : > { %v6878_v28 = vadd.f32 %v6875_v17, %v6868_v34  ;;  %v6879_v45 = vmul.f32 %v6876_v5, %v8914_v49  ;;  %v10428_v49 = vperm.slane %v8770_v9, 0  ;;  %v6902_v9 = vmul.f32 %v6899_v25, %v6898_v16 }
 0xeab   : > { %v6880_v47 = vmul.f32 %v6877_v20, %v8916_v51 }
 0xeac   : > { %v6881_v60 = vmul.f32 %v6878_v28, %v8920_v59  ;;  %v6882_v51 = vadd.f32 %v6879_v45, %v10428_v49  ;;  %v6900_v59 = vsub.f32 1.0, %v6899_v25 }
 0xead   : > { %v6883_v0 = vadd.f32 %v6880_v47, %v10427_v46  ;;  %v6838_v50 = vpop.f32.mrf.mxu2 }
 0xeae   : > { %v6884_v32 = vadd.f32 %v6881_v60, %v8775_v12  ;;  %v6851_v1 = vpop.f32.mrf.mxu3 }
 0xeaf   : > { %v6888_v22 = vrot.slane %v6883_v0, 7  ;;  %v6864_v30 = vpop.f32.mrf.mxu0 }
 0xeb0   : > { %v6889_v29 = vrot.slane %v6884_v32, 6 }
 0xeb1   : > { %v6890_v43 = vsel %vm995_vm0, %v6882_v51, %v6888_v22 }
 0xeb2   : > { %v6891_v61 = vsel %vm1252_vm13, %v6890_v43, %v6889_v29 }
 0xeb3   : > { %6897 = vst.msk [vmem:[%s941_s25] sm:$0x7] %vm10284_vm8, %v6891_v61  ;;  %v6901_v35 = vmul.f32 %v6900_v59, %v6891_v61 }
 0xeb4   : > { %8375 = shalt.err (!%p8372_p8)
}
 0xeb5   : > { %8006 = dma.vmem_to_hbm [thread:$0]  (%p8660_p5), %s6924_s29, 48, %s6926_s0, %s6906_s8   ;;  %v6903_v40 = vadd.f32 %v6902_v9, %v6901_v35 }
 0xeb6   : > { %s6911_s7 = scalar_lea.sflag [#allocation19], %s10262_s11  ;;  %s8390_s2 = sshra.s32 %s6940_s5, 4  ;;  %s8391_s2 = int_to_ptr.hbm [resolvable:$true] %s8390_s2 }
 0xeb7   : > { %6904 = vst.msk [vmem:[%s948_s30] sm:$0x7] %vm10284_vm8, %v6903_v40  ;;  %s8392_s13 = scalar_lea.hbm %s8391_s2, 3  ;;  %s8396_s3 = scalar_lea.hbm %s10429_s27, 6 }
 0xeb8   : > { %p8393_p9 = scmp.ne.s32.totalorder %s8391_s2, %s8392_s13  ;;  %p8397_p12 = scmp.lt.s32.totalorder %s8391_s2, %s10429_s27 }
 0xeb9   : > { %p8398_p13 = scmp.lt.s32.totalorder %s8396_s3, %s8392_s13 }
 0xeba   : > { %p8394_p10 = pnand %p8393_p9, %p8660_p5 }
 0xebb   : > { %p8399_p0 = por %p8398_p13, %p8397_p12 }
 0xebc   : > { %p8395_p11 = pneg %p8394_p10 }
 0xebe   : > { %p8400_p1 = pnand %p8399_p0, %p8395_p11 }
 0xec0   : > { %8403 = shalt.err (!%p8400_p1)
}
 0xec1   : > { %8007 = dma.vmem_to_hbm [thread:$0]  (%p8660_p5), %s6938_s26, 48, %s6940_s5, %s6911_s7  }
 0xec2 PF: > { %s10433_s11 = sld [smem:[#allocation29_spill]] }
 0xec3   : > { %s10434_s0 = sld [smem:[#allocation26_spill]] }
 0xec8   : > { %p8048_p2 = scmp.ge.s32.totalorder %s10433_s11, 2 }
 0xec9   : > { %s6951_s8 = sand.u32 1, %s10434_s0  }
 0xeca   : > { %p8030_p3 = pnand %p8048_p2, %p8664_p6  ;;  %s6952_s6 = scalar_lea.sflag [#allocation8], %s6951_s8 }
 0xecc   : > { %p8031_p4 = pneg %p8030_p3 }
 0xece   : > { %8437 = dma.done.wait (%p8031_p4), %s6952_s6, 48  }
 0xecf   : > { %8439 = vsyncadd (%p8031_p4), %s6952_s6, 4294967248  ;;  %s6962_s1 = scalar_lea.sflag [#allocation19], %s6951_s8 }
 0xed0   : > { %8441 = dma.done.wait (%p8031_p4), %s6962_s1, 48  }
 0xed1   : > { %8443 = vsyncadd (%p8031_p4), %s6962_s1, 4294967248  ;;  %s10436_s5 = sld [smem:[#allocation30_spill]] }
 0xed2   : > { %s10437_s8 = sld [smem:[#allocation27_spill]] }
 0xed3   : > { %s10438_s30 = sld [smem:[#allocation28_spill]] }
 0xed4   : > { %s10439_s9 = sld [smem:[#allocation31_spill]] }
 0xed7   : > { %p47_p5 = scmp.ge.s32.totalorder %s10436_s5, 4  }
 0xed9   :  { %49 = sbr.rel (!%p47_p5) target bundleno = 27 (0x1b), region = 263 }
 0xede   :  { %6968 = vsyncpa [#allocation7], 1 }
 0xedf   :  { %6970 = vsyncpa [#allocation7 + $0x1], 1 }
 0xee0   :  { %6971 = vsyncpa [#allocation10], 1 }
 0xee1   :  { %6972 = vsyncpa [#allocation13], 1 }
 0xee2   :  { %6973 = vsyncpa [#allocation16], 1 }
 0xee3   :  { %6974 = vsyncpa [#allocation8], 1 }
 0xee4   :  { %6976 = vsyncpa [#allocation8 + $0x1], 1 }
 0xee5   :  { %6977 = vsyncpa [#allocation19], 1 }
 0xee6   :  { %6979 = vsyncpa [#allocation19 + $0x1], 1 }

</bundles_post_ra>
